<compile_context>
chip_gen: v7x
topology: tpu7x:2x2x1
jax: 0.10.0
libtpu: 0.0.40
codegen_flags: <defaults>
</compile_context>

<pallas_src>
import numpy as np

import jax
import jax.numpy as jnp
from jax.experimental import pallas as pl
from jax.experimental.pallas import tpu as pltpu


N_BATCH = 2          # images per forward pass (all processed in one program)
IMG = 32
C_IN = 3

# name, cin, cout, k, stride, pad, relu+bn, spatial size of this layer's input
_LAYER_DEFS = [
    ('conv1',       3, 8, 3, 1, 1, True,  32),
    ('conv2',       8, 8, 3, 1, 1, True,  32),
    ('conv3',       8, 8, 1, 1, 1, False, 32),
    ('pool1',       8, 8, 3, 2, 0, True,  34),
    ('downsample1', 3, 8, 3, 2, 1, True,  32),
    ('conv4',       8, 8, 3, 1, 1, True,  16),
    ('conv5',       8, 8, 3, 1, 1, True,  16),
    ('conv6',       8, 8, 3, 1, 1, True,  16),
    ('conv7',       8, 8, 1, 1, 1, False, 16),
    ('pool2',       8, 8, 3, 2, 0, True,  18),
    ('downsample2', 8, 8, 3, 2, 1, True,  16),
    ('conv8',       8, 8, 3, 1, 1, True,   8),
    ('conv9',       8, 8, 3, 1, 1, True,   8),
    ('conv10',      8, 8, 3, 1, 1, True,   8),
]


# ----------------------------------------------------------------------------
# Raw parameters (deterministic synthetic init, PyTorch layouts)
# ----------------------------------------------------------------------------
def make_raw_params(key):
    raw = {}
    for (name, cin, cout, k, _stride, _pad, has_bn, _hin) in _LAYER_DEFS:
        key, k1, k2, k3, k4, k5 = jax.random.split(key, 6)
        w = jax.random.normal(k1, (cout, cin, k, k), jnp.float32)
        w = w * (1.0 / (cin * k * k) ** 0.5)
        if has_bn:
            gamma = 1.0 + 0.1 * jax.random.normal(k2, (cout,), jnp.float32)
            beta = 0.1 * jax.random.normal(k3, (cout,), jnp.float32)
            mean = 0.1 * jax.random.normal(k4, (cout,), jnp.float32)
            var = 1.0 + 0.1 * jnp.abs(jax.random.normal(k5, (cout,), jnp.float32))
            scale = gamma / jnp.sqrt(var + 1e-5)
            bias = beta - mean * scale
        else:
            scale = jnp.ones((cout,), jnp.float32)
            bias = jnp.zeros((cout,), jnp.float32)
        raw[name] = {'w': w, 'scale': scale, 'bias': bias}
    key, km = jax.random.split(key)
    raw['mixer_w'] = jax.random.normal(km, (10, 8, 1, 1), jnp.float32) * (1.0 / 8 ** 0.5)
    return raw


# ----------------------------------------------------------------------------
# Host-side weight pre-transformation (stacked row-selection + banded matrices)
# ----------------------------------------------------------------------------
def _out_size(h_in, k, stride, pad):
    return (h_in + 2 * pad - k) // stride + 1


def _build_row_select_stacked(h_in, k, stride, pad, nb):
    """(k*nb*Ho, nb*H_in) 0/1 matrix: vertical tap shift + padding + stride,
    block-diagonal over the nb batch images, with all k taps stacked on rows
    so one matmul produces every tap for every image."""
    ho = _out_size(h_in, k, stride, pad)
    s = np.zeros((k * nb * ho, nb * h_in), np.float32)
    for ki in range(k):
        for b in range(nb):
            for io in range(ho):
                h = stride * io + ki - pad
                if 0 <= h < h_in:
                    s[(ki * nb + b) * ho + io, b * h_in + h] = 1.0
    return s


def _build_banded_weights(w_oihw, w_in, k, stride, pad):
    """(k, W_in*Cin, Wo*Cout) banded matrices: horizontal taps + channel mix."""
    w4 = np.transpose(np.asarray(w_oihw), (2, 3, 1, 0))   # (ki, kj, cin, cout)
    cin, cout = w4.shape[2], w4.shape[3]
    wo = _out_size(w_in, k, stride, pad)
    b = np.zeros((k, w_in * cin, wo * cout), np.float32)
    for ki in range(k):
        for jo in range(wo):
            for kj in range(k):
                w = stride * jo + kj - pad
                if 0 <= w < w_in:
                    b[ki, w * cin:(w + 1) * cin, jo * cout:(jo + 1) * cout] = w4[ki, kj]
    return b


def prepare_params(raw, nb):
    """Flatten everything the kernel needs into a list of f32 operands."""
    arrays, plan_layers = [], {}

    def add(a):
        arrays.append(jnp.asarray(np.asarray(a, np.float32)))
        return len(arrays) - 1

    s_cache = {}
    for (name, _cin, cout, k, stride, pad, has_bn, h_in) in _LAYER_DEFS:
        ho = _out_size(h_in, k, stride, pad)
        skey = (h_in, k, stride, pad)
        if skey not in s_cache:                       # dedupe shared S matrices
            s_cache[skey] = add(_build_row_select_stacked(h_in, k, stride, pad, nb))
        b_idx = add(_build_banded_weights(raw[name]['w'], h_in, k, stride, pad))
        if has_bn:
            sb = np.stack([np.tile(np.asarray(raw[name]['scale']), ho),
                           np.tile(np.asarray(raw[name]['bias']), ho)])
            sb_idx = add(sb)                          # (2, Wo*Cout)
        else:
            sb_idx = None
        # rows = nb*Ho = per-tap row count of the stacked-S product.
        plan_layers[name] = (s_cache[skey], b_idx, sb_idx, k, nb * ho, has_bn)

    # Head: fused GAP(8x8) + 1x1 mixer.
    #   g (nb, 64)      = G (nb, nb*8) @ x (nb*8, 64)   -- per-image row sums
    #   logits (nb, 10) = g @ R (64, 10)                -- w-sum + channel mix,
    #                                                       1/64 average folded in
    g_idx = add(np.kron(np.eye(nb, dtype=np.float32), np.ones((1, 8), np.float32)))
    wmix = np.asarray(raw['mixer_w']).reshape(10, 8).T          # (8, 10)
    r_idx = add(np.tile(wmix / 64.0, (8, 1)))                    # (64, 10)
    return arrays, {'layers': plan_layers, 'head_g': g_idx, 'head_r': r_idx}


# ----------------------------------------------------------------------------
# The fused Pallas kernel (one program = the whole batch)
# ----------------------------------------------------------------------------
def _make_kernel(plan):
    layers = plan['layers']
    head_g = plan['head_g']
    head_r = plan['head_r']

    def conv_layer(params, x, name):
        s_idx, b_idx, sb_idx, k, rows, relu_bn = layers[name]
        # One stacked row-selection matmul covering all k vertical taps and
        # every image in the batch.
        t = jnp.dot(params[s_idx][...], x, preferred_element_type=jnp.float32)
        y = None
        for ki in range(k):
            # Static, multiple-of-8 sublane slice: just selects whole vregs.
            tk = t[ki * rows:(ki + 1) * rows, :]
            p = jnp.dot(tk, params[b_idx][ki], preferred_element_type=jnp.float32)
            y = p if y is None else y + p
        if relu_bn:                                   # Conv -> ReLU -> BN(eval)
            y = jnp.maximum(y, 0.0)
            sb = params[sb_idx][...]
            y = y * sb[0:1, :] + sb[1:2, :]
        return y

    def kernel(x0_ref, *rest):
        params, out_ref = rest[:-1], rest[-1]
        x0 = x0_ref[...]                              # (N*32, 96)

        x = conv_layer(params, x0, 'conv1')
        x = conv_layer(params, x, 'conv2')
        x = conv_layer(params, x, 'conv3')
        x = conv_layer(params, x, 'pool1')
        x = x + conv_layer(params, x0, 'downsample1')   # residual stays in VMEM
        i2 = x
        x = conv_layer(params, x, 'conv4')
        x = conv_layer(params, x, 'conv5')
        x = conv_layer(params, x, 'conv6')
        x = conv_layer(params, x, 'conv7')
        x = conv_layer(params, x, 'pool2')
        x = x + conv_layer(params, i2, 'downsample2')
        i3 = x
        x = conv_layer(params, x, 'conv8')
        x = conv_layer(params, x, 'conv9')
        x = conv_layer(params, x, 'conv10')
        x = x + i3                                    # (N*8, 64)

        # Fused head: GAP(8) + 1x1 mixer + log_softmax (two tiny matmuls).
        g = jnp.dot(params[head_g][...], x, preferred_element_type=jnp.float32)
        logits = jnp.dot(g, params[head_r][...],
                         preferred_element_type=jnp.float32)          # (N, 10)
        z = logits - jnp.max(logits, axis=-1, keepdims=True)
        lse = jnp.log(jnp.sum(jnp.exp(z), axis=-1, keepdims=True))
        out_ref[...] = (z - lse).astype(out_ref.dtype)

    return kernel


def build_forward(arrays, plan):
    kernel = _make_kernel(plan)

    def _const_map(nd):
        return lambda n: (0,) * nd

    in_specs = [pl.BlockSpec((N_BATCH * IMG, IMG * C_IN), lambda n: (0, 0))]
    in_specs += [pl.BlockSpec(a.shape, _const_map(a.ndim)) for a in arrays]

    pallas_fn = pl.pallas_call(
        kernel,
        out_shape=jax.ShapeDtypeStruct((N_BATCH, 10), jnp.float32),
        grid=(1,),
        in_specs=in_specs,
        out_specs=pl.BlockSpec((N_BATCH, 10), lambda n: (0, 0)),
        compiler_params=pltpu.CompilerParams(
            dimension_semantics=("arbitrary",),
            vmem_limit_bytes=32 * 1024 * 1024),
    )

    @jax.jit
    def forward(x_nchw, *arrs):
        # NCHW -> NHWC -> batch-stacked (N*H, W*C) slab (images stacked on rows).
        x0 = jnp.transpose(x_nchw, (0, 2, 3, 1)).astype(jnp.float32)
        x0 = x0.reshape(N_BATCH * IMG, IMG * C_IN)
        return pallas_fn(x0, *arrs)

    return lambda x: forward(x, *arrays)


# ----------------------------------------------------------------------------
# Plain-JAX reference of the original module (for the correctness check)
# ----------------------------------------------------------------------------
def reference_forward(raw, x_nchw):
    x = jnp.transpose(x_nchw, (0, 2, 3, 1)).astype(jnp.float32)
    meta = {d[0]: d for d in _LAYER_DEFS}

    def block(x, name):
        _, _cin, _cout, _k, stride, pad, has_bn, _hin = meta[name]
        w = jnp.transpose(raw[name]['w'], (2, 3, 1, 0))       # HWIO
        y = jax.lax.conv_general_dilated(
            x, w, window_strides=(stride, stride),
            padding=[(pad, pad), (pad, pad)],
            dimension_numbers=('NHWC', 'HWIO', 'NHWC'),
            precision=jax.lax.Precision.HIGHEST)
        if has_bn:
            y = jnp.maximum(y, 0.0)
            y = y * raw[name]['scale'] + raw[name]['bias']
        return y

    i1 = x
    x = block(x, 'conv1'); x = block(x, 'conv2'); x = block(x, 'conv3')
    x = block(x, 'pool1')
    x = x + block(i1, 'downsample1')
    i2 = x
    x = block(x, 'conv4'); x = block(x, 'conv5'); x = block(x, 'conv6')
    x = block(x, 'conv7'); x = block(x, 'pool2')
    x = x + block(i2, 'downsample2')
    i3 = x
    x = block(x, 'conv8'); x = block(x, 'conv9'); x = block(x, 'conv10')
    x = x + i3
    g = jnp.mean(x, axis=(1, 2))                               # (N, 8)
    wmix = raw['mixer_w'].reshape(10, 8).T                     # (8, 10)
    logits = jnp.dot(g, wmix, precision=jax.lax.Precision.HIGHEST)
    return jax.nn.log_softmax(logits, axis=-1)


if __name__ == "__main__":
    key = jax.random.PRNGKey(0)
    kp, kx = jax.random.split(key)
    raw = make_raw_params(kp)
    arrays, plan = prepare_params(raw, N_BATCH)
    fwd = build_forward(arrays, plan)

    # CIFAR-10-shaped input (32x32 is required so the residual shapes and the
    # AvgPool2d(8) head line up); small batch = 2.
    x = jax.random.normal(kx, (N_BATCH, 3, IMG, IMG), jnp.float32)

    out = jax.block_until_ready(fwd(x))

    assert out.shape == (N_BATCH, 10)
    assert bool(jnp.all(jnp.isfinite(out)))
    assert bool(jnp.allclose(jnp.sum(jnp.exp(out), axis=1), 1.0, atol=1e-4))

    # Check the fused kernel against a plain-JAX/XLA reference of the module.
    ref = jax.block_until_ready(jax.jit(reference_forward)(raw, x))
    err = float(jnp.max(jnp.abs(out - ref)))
    assert err < 5e-2, f"kernel vs reference mismatch: {err}"

    print("KERNEL_OK")
</pallas_src>

<mosaic_0001>
module attributes {stable_mosaic.version = 11 : i64} {
  func.func @kernel(%arg0: i32, %arg1: memref<64x96xf32, #tpu.memory_space<vmem>>, %arg2: memref<192x64xf32, #tpu.memory_space<vmem>>, %arg3: memref<3x96x256xf32, #tpu.memory_space<vmem>>, %arg4: memref<2x256xf32, #tpu.memory_space<vmem>>, %arg5: memref<3x256x256xf32, #tpu.memory_space<vmem>>, %arg6: memref<2x256xf32, #tpu.memory_space<vmem>>, %arg7: memref<68x64xf32, #tpu.memory_space<vmem>>, %arg8: memref<1x256x272xf32, #tpu.memory_space<vmem>>, %arg9: memref<96x68xf32, #tpu.memory_space<vmem>>, %arg10: memref<3x272x128xf32, #tpu.memory_space<vmem>>, %arg11: memref<2x128xf32, #tpu.memory_space<vmem>>, %arg12: memref<96x64xf32, #tpu.memory_space<vmem>>, %arg13: memref<3x96x128xf32, #tpu.memory_space<vmem>>, %arg14: memref<2x128xf32, #tpu.memory_space<vmem>>, %arg15: memref<96x32xf32, #tpu.memory_space<vmem>>, %arg16: memref<3x128x128xf32, #tpu.memory_space<vmem>>, %arg17: memref<2x128xf32, #tpu.memory_space<vmem>>, %arg18: memref<3x128x128xf32, #tpu.memory_space<vmem>>, %arg19: memref<2x128xf32, #tpu.memory_space<vmem>>, %arg20: memref<3x128x128xf32, #tpu.memory_space<vmem>>, %arg21: memref<2x128xf32, #tpu.memory_space<vmem>>, %arg22: memref<36x32xf32, #tpu.memory_space<vmem>>, %arg23: memref<1x128x144xf32, #tpu.memory_space<vmem>>, %arg24: memref<48x36xf32, #tpu.memory_space<vmem>>, %arg25: memref<3x144x64xf32, #tpu.memory_space<vmem>>, %arg26: memref<2x64xf32, #tpu.memory_space<vmem>>, %arg27: memref<48x32xf32, #tpu.memory_space<vmem>>, %arg28: memref<3x128x64xf32, #tpu.memory_space<vmem>>, %arg29: memref<2x64xf32, #tpu.memory_space<vmem>>, %arg30: memref<48x16xf32, #tpu.memory_space<vmem>>, %arg31: memref<3x64x64xf32, #tpu.memory_space<vmem>>, %arg32: memref<2x64xf32, #tpu.memory_space<vmem>>, %arg33: memref<3x64x64xf32, #tpu.memory_space<vmem>>, %arg34: memref<2x64xf32, #tpu.memory_space<vmem>>, %arg35: memref<3x64x64xf32, #tpu.memory_space<vmem>>, %arg36: memref<2x64xf32, #tpu.memory_space<vmem>>, %arg37: memref<2x16xf32, #tpu.memory_space<vmem>>, %arg38: memref<64x10xf32, #tpu.memory_space<vmem>>, %arg39: memref<2x10xf32, #tpu.memory_space<vmem>>) attributes {dimension_semantics = [#tpu.dimension_semantics<arbitrary>], iteration_bounds = array<i64: 1>, scalar_prefetch = 0 : i64, scratch_operands = 0 : i64, tpu.core_type = #tpu.core_type<tc>, window_params = [{pipeline_mode = #tpu.pipeline_mode<synchronous>, transform_indices = @transform_0, window_bounds = array<i64: 64, 96>}, {pipeline_mode = #tpu.pipeline_mode<synchronous>, transform_indices = @transform_1, window_bounds = array<i64: 192, 64>}, {pipeline_mode = #tpu.pipeline_mode<synchronous>, transform_indices = @transform_2, window_bounds = array<i64: 3, 96, 256>}, {pipeline_mode = #tpu.pipeline_mode<synchronous>, transform_indices = @transform_3, window_bounds = array<i64: 2, 256>}, {pipeline_mode = #tpu.pipeline_mode<synchronous>, transform_indices = @transform_4, window_bounds = array<i64: 3, 256, 256>}, {pipeline_mode = #tpu.pipeline_mode<synchronous>, transform_indices = @transform_5, window_bounds = array<i64: 2, 256>}, {pipeline_mode = #tpu.pipeline_mode<synchronous>, transform_indices = @transform_6, window_bounds = array<i64: 68, 64>}, {pipeline_mode = #tpu.pipeline_mode<synchronous>, transform_indices = @transform_7, window_bounds = array<i64: 1, 256, 272>}, {pipeline_mode = #tpu.pipeline_mode<synchronous>, transform_indices = @transform_8, window_bounds = array<i64: 96, 68>}, {pipeline_mode = #tpu.pipeline_mode<synchronous>, transform_indices = @transform_9, window_bounds = array<i64: 3, 272, 128>}, {pipeline_mode = #tpu.pipeline_mode<synchronous>, transform_indices = @transform_10, window_bounds = array<i64: 2, 128>}, {pipeline_mode = #tpu.pipeline_mode<synchronous>, transform_indices = @transform_11, window_bounds = array<i64: 96, 64>}, {pipeline_mode = #tpu.pipeline_mode<synchronous>, transform_indices = @transform_12, window_bounds = array<i64: 3, 96, 128>}, {pipeline_mode = #tpu.pipeline_mode<synchronous>, transform_indices = @transform_13, window_bounds = array<i64: 2, 128>}, {pipeline_mode = #tpu.pipeline_mode<synchronous>, transform_indices = @transform_14, window_bounds = array<i64: 96, 32>}, {pipeline_mode = #tpu.pipeline_mode<synchronous>, transform_indices = @transform_15, window_bounds = array<i64: 3, 128, 128>}, {pipeline_mode = #tpu.pipeline_mode<synchronous>, transform_indices = @transform_16, window_bounds = array<i64: 2, 128>}, {pipeline_mode = #tpu.pipeline_mode<synchronous>, transform_indices = @transform_17, window_bounds = array<i64: 3, 128, 128>}, {pipeline_mode = #tpu.pipeline_mode<synchronous>, transform_indices = @transform_18, window_bounds = array<i64: 2, 128>}, {pipeline_mode = #tpu.pipeline_mode<synchronous>, transform_indices = @transform_19, window_bounds = array<i64: 3, 128, 128>}, {pipeline_mode = #tpu.pipeline_mode<synchronous>, transform_indices = @transform_20, window_bounds = array<i64: 2, 128>}, {pipeline_mode = #tpu.pipeline_mode<synchronous>, transform_indices = @transform_21, window_bounds = array<i64: 36, 32>}, {pipeline_mode = #tpu.pipeline_mode<synchronous>, transform_indices = @transform_22, window_bounds = array<i64: 1, 128, 144>}, {pipeline_mode = #tpu.pipeline_mode<synchronous>, transform_indices = @transform_23, window_bounds = array<i64: 48, 36>}, {pipeline_mode = #tpu.pipeline_mode<synchronous>, transform_indices = @transform_24, window_bounds = array<i64: 3, 144, 64>}, {pipeline_mode = #tpu.pipeline_mode<synchronous>, transform_indices = @transform_25, window_bounds = array<i64: 2, 64>}, {pipeline_mode = #tpu.pipeline_mode<synchronous>, transform_indices = @transform_26, window_bounds = array<i64: 48, 32>}, {pipeline_mode = #tpu.pipeline_mode<synchronous>, transform_indices = @transform_27, window_bounds = array<i64: 3, 128, 64>}, {pipeline_mode = #tpu.pipeline_mode<synchronous>, transform_indices = @transform_28, window_bounds = array<i64: 2, 64>}, {pipeline_mode = #tpu.pipeline_mode<synchronous>, transform_indices = @transform_29, window_bounds = array<i64: 48, 16>}, {pipeline_mode = #tpu.pipeline_mode<synchronous>, transform_indices = @transform_30, window_bounds = array<i64: 3, 64, 64>}, {pipeline_mode = #tpu.pipeline_mode<synchronous>, transform_indices = @transform_31, window_bounds = array<i64: 2, 64>}, {pipeline_mode = #tpu.pipeline_mode<synchronous>, transform_indices = @transform_32, window_bounds = array<i64: 3, 64, 64>}, {pipeline_mode = #tpu.pipeline_mode<synchronous>, transform_indices = @transform_33, window_bounds = array<i64: 2, 64>}, {pipeline_mode = #tpu.pipeline_mode<synchronous>, transform_indices = @transform_34, window_bounds = array<i64: 3, 64, 64>}, {pipeline_mode = #tpu.pipeline_mode<synchronous>, transform_indices = @transform_35, window_bounds = array<i64: 2, 64>}, {pipeline_mode = #tpu.pipeline_mode<synchronous>, transform_indices = @transform_36, window_bounds = array<i64: 2, 16>}, {pipeline_mode = #tpu.pipeline_mode<synchronous>, transform_indices = @transform_37, window_bounds = array<i64: 64, 10>}, {pipeline_mode = #tpu.pipeline_mode<synchronous>, transform_indices = @transform_38, window_bounds = array<i64: 2, 10>}]} {
    %c0 = arith.constant 0 : index
    %c0_0 = arith.constant 0 : index
    %0 = vector.load %arg1[%c0, %c0_0] : memref<64x96xf32, #tpu.memory_space<vmem>>, vector<64x96xf32>
    %c0_1 = arith.constant 0 : index
    %c0_2 = arith.constant 0 : index
    %1 = vector.load %arg2[%c0_1, %c0_2] : memref<192x64xf32, #tpu.memory_space<vmem>>, vector<192x64xf32>
    %cst = arith.constant dense<0.000000e+00> : vector<192x96xf32>
    %2 = tpu.matmul %1, %0, %cst {dimension_numbers = #tpu.dot_dimension_numbers<[1], [0], [0], [1], [0, 0, 1, 1], [], []>} : vector<192x64xf32>, vector<64x96xf32>, vector<192x96xf32> -> vector<192x96xf32>
    %3 = vector.extract_strided_slice %2 {offsets = [0, 0], sizes = [64, 96], strides = [1, 1]} : vector<192x96xf32> to vector<64x96xf32>
    %c0_3 = arith.constant 0 : index
    %c0_4 = arith.constant 0 : index
    %c0_5 = arith.constant 0 : index
    %4 = vector.load %arg3[%c0_3, %c0_4, %c0_5] : memref<3x96x256xf32, #tpu.memory_space<vmem>>, vector<1x96x256xf32>
    %5 = vector.shape_cast %4 : vector<1x96x256xf32> to vector<96x256xf32>
    %cst_6 = arith.constant dense<0.000000e+00> : vector<64x256xf32>
    %6 = tpu.matmul %3, %5, %cst_6 {dimension_numbers = #tpu.dot_dimension_numbers<[1], [0], [0], [1], [0, 0, 1, 1], [], []>} : vector<64x96xf32>, vector<96x256xf32>, vector<64x256xf32> -> vector<64x256xf32>
    %7 = vector.extract_strided_slice %2 {offsets = [64, 0], sizes = [64, 96], strides = [1, 1]} : vector<192x96xf32> to vector<64x96xf32>
    %c1 = arith.constant 1 : index
    %c0_7 = arith.constant 0 : index
    %c0_8 = arith.constant 0 : index
    %8 = vector.load %arg3[%c1, %c0_7, %c0_8] : memref<3x96x256xf32, #tpu.memory_space<vmem>>, vector<1x96x256xf32>
    %9 = vector.shape_cast %8 : vector<1x96x256xf32> to vector<96x256xf32>
    %cst_9 = arith.constant dense<0.000000e+00> : vector<64x256xf32>
    %10 = tpu.matmul %7, %9, %cst_9 {dimension_numbers = #tpu.dot_dimension_numbers<[1], [0], [0], [1], [0, 0, 1, 1], [], []>} : vector<64x96xf32>, vector<96x256xf32>, vector<64x256xf32> -> vector<64x256xf32>
    %11 = arith.addf %6, %10 : vector<64x256xf32>
    %12 = vector.extract_strided_slice %2 {offsets = [128, 0], sizes = [64, 96], strides = [1, 1]} : vector<192x96xf32> to vector<64x96xf32>
    %c2 = arith.constant 2 : index
    %c0_10 = arith.constant 0 : index
    %c0_11 = arith.constant 0 : index
    %13 = vector.load %arg3[%c2, %c0_10, %c0_11] : memref<3x96x256xf32, #tpu.memory_space<vmem>>, vector<1x96x256xf32>
    %14 = vector.shape_cast %13 : vector<1x96x256xf32> to vector<96x256xf32>
    %cst_12 = arith.constant dense<0.000000e+00> : vector<64x256xf32>
    %15 = tpu.matmul %12, %14, %cst_12 {dimension_numbers = #tpu.dot_dimension_numbers<[1], [0], [0], [1], [0, 0, 1, 1], [], []>} : vector<64x96xf32>, vector<96x256xf32>, vector<64x256xf32> -> vector<64x256xf32>
    %16 = arith.addf %11, %15 : vector<64x256xf32>
    %cst_13 = arith.constant 0.000000e+00 : f32
    %17 = vector.broadcast %cst_13 : f32 to vector<64x256xf32>
    %18 = arith.maximumf %16, %17 : vector<64x256xf32>
    %c0_14 = arith.constant 0 : index
    %c0_15 = arith.constant 0 : index
    %19 = vector.load %arg4[%c0_14, %c0_15] : memref<2x256xf32, #tpu.memory_space<vmem>>, vector<2x256xf32>
    %20 = vector.extract_strided_slice %19 {offsets = [0, 0], sizes = [1, 256], strides = [1, 1]} : vector<2x256xf32> to vector<1x256xf32>
    %21 = vector.broadcast %20 : vector<1x256xf32> to vector<64x256xf32>
    %22 = arith.mulf %18, %21 : vector<64x256xf32>
    %23 = vector.extract_strided_slice %19 {offsets = [1, 0], sizes = [1, 256], strides = [1, 1]} : vector<2x256xf32> to vector<1x256xf32>
    %24 = vector.broadcast %23 : vector<1x256xf32> to vector<64x256xf32>
    %25 = arith.addf %22, %24 : vector<64x256xf32>
    %c0_16 = arith.constant 0 : index
    %c0_17 = arith.constant 0 : index
    %26 = vector.load %arg2[%c0_16, %c0_17] : memref<192x64xf32, #tpu.memory_space<vmem>>, vector<192x64xf32>
    %cst_18 = arith.constant dense<0.000000e+00> : vector<192x256xf32>
    %27 = tpu.matmul %26, %25, %cst_18 {dimension_numbers = #tpu.dot_dimension_numbers<[1], [0], [0], [1], [0, 0, 1, 1], [], []>} : vector<192x64xf32>, vector<64x256xf32>, vector<192x256xf32> -> vector<192x256xf32>
    %28 = vector.extract_strided_slice %27 {offsets = [0, 0], sizes = [64, 256], strides = [1, 1]} : vector<192x256xf32> to vector<64x256xf32>
    %c0_19 = arith.constant 0 : index
    %c0_20 = arith.constant 0 : index
    %c0_21 = arith.constant 0 : index
    %29 = vector.load %arg5[%c0_19, %c0_20, %c0_21] : memref<3x256x256xf32, #tpu.memory_space<vmem>>, vector<1x256x256xf32>
    %30 = vector.shape_cast %29 : vector<1x256x256xf32> to vector<256x256xf32>
    %cst_22 = arith.constant dense<0.000000e+00> : vector<64x256xf32>
    %31 = tpu.matmul %28, %30, %cst_22 {dimension_numbers = #tpu.dot_dimension_numbers<[1], [0], [0], [1], [0, 0, 1, 1], [], []>} : vector<64x256xf32>, vector<256x256xf32>, vector<64x256xf32> -> vector<64x256xf32>
    %32 = vector.extract_strided_slice %27 {offsets = [64, 0], sizes = [64, 256], strides = [1, 1]} : vector<192x256xf32> to vector<64x256xf32>
    %c1_23 = arith.constant 1 : index
    %c0_24 = arith.constant 0 : index
    %c0_25 = arith.constant 0 : index
    %33 = vector.load %arg5[%c1_23, %c0_24, %c0_25] : memref<3x256x256xf32, #tpu.memory_space<vmem>>, vector<1x256x256xf32>
    %34 = vector.shape_cast %33 : vector<1x256x256xf32> to vector<256x256xf32>
    %cst_26 = arith.constant dense<0.000000e+00> : vector<64x256xf32>
    %35 = tpu.matmul %32, %34, %cst_26 {dimension_numbers = #tpu.dot_dimension_numbers<[1], [0], [0], [1], [0, 0, 1, 1], [], []>} : vector<64x256xf32>, vector<256x256xf32>, vector<64x256xf32> -> vector<64x256xf32>
    %36 = arith.addf %31, %35 : vector<64x256xf32>
    %37 = vector.extract_strided_slice %27 {offsets = [128, 0], sizes = [64, 256], strides = [1, 1]} : vector<192x256xf32> to vector<64x256xf32>
    %c2_27 = arith.constant 2 : index
    %c0_28 = arith.constant 0 : index
    %c0_29 = arith.constant 0 : index
    %38 = vector.load %arg5[%c2_27, %c0_28, %c0_29] : memref<3x256x256xf32, #tpu.memory_space<vmem>>, vector<1x256x256xf32>
    %39 = vector.shape_cast %38 : vector<1x256x256xf32> to vector<256x256xf32>
    %cst_30 = arith.constant dense<0.000000e+00> : vector<64x256xf32>
    %40 = tpu.matmul %37, %39, %cst_30 {dimension_numbers = #tpu.dot_dimension_numbers<[1], [0], [0], [1], [0, 0, 1, 1], [], []>} : vector<64x256xf32>, vector<256x256xf32>, vector<64x256xf32> -> vector<64x256xf32>
    %41 = arith.addf %36, %40 : vector<64x256xf32>
    %cst_31 = arith.constant 0.000000e+00 : f32
    %42 = vector.broadcast %cst_31 : f32 to vector<64x256xf32>
    %43 = arith.maximumf %41, %42 : vector<64x256xf32>
    %c0_32 = arith.constant 0 : index
    %c0_33 = arith.constant 0 : index
    %44 = vector.load %arg6[%c0_32, %c0_33] : memref<2x256xf32, #tpu.memory_space<vmem>>, vector<2x256xf32>
    %45 = vector.extract_strided_slice %44 {offsets = [0, 0], sizes = [1, 256], strides = [1, 1]} : vector<2x256xf32> to vector<1x256xf32>
    %46 = vector.broadcast %45 : vector<1x256xf32> to vector<64x256xf32>
    %47 = arith.mulf %43, %46 : vector<64x256xf32>
    %48 = vector.extract_strided_slice %44 {offsets = [1, 0], sizes = [1, 256], strides = [1, 1]} : vector<2x256xf32> to vector<1x256xf32>
    %49 = vector.broadcast %48 : vector<1x256xf32> to vector<64x256xf32>
    %50 = arith.addf %47, %49 : vector<64x256xf32>
    %c0_34 = arith.constant 0 : index
    %c0_35 = arith.constant 0 : index
    %51 = vector.load %arg7[%c0_34, %c0_35] : memref<68x64xf32, #tpu.memory_space<vmem>>, vector<68x64xf32>
    %cst_36 = arith.constant dense<0.000000e+00> : vector<68x256xf32>
    %52 = tpu.matmul %51, %50, %cst_36 {dimension_numbers = #tpu.dot_dimension_numbers<[1], [0], [0], [1], [0, 0, 1, 1], [], []>} : vector<68x64xf32>, vector<64x256xf32>, vector<68x256xf32> -> vector<68x256xf32>
    %c0_37 = arith.constant 0 : index
    %c0_38 = arith.constant 0 : index
    %c0_39 = arith.constant 0 : index
    %53 = vector.load %arg8[%c0_37, %c0_38, %c0_39] : memref<1x256x272xf32, #tpu.memory_space<vmem>>, vector<1x256x272xf32>
    %54 = vector.shape_cast %53 : vector<1x256x272xf32> to vector<256x272xf32>
    %cst_40 = arith.constant dense<0.000000e+00> : vector<68x272xf32>
    %55 = tpu.matmul %52, %54, %cst_40 {dimension_numbers = #tpu.dot_dimension_numbers<[1], [0], [0], [1], [0, 0, 1, 1], [], []>} : vector<68x256xf32>, vector<256x272xf32>, vector<68x272xf32> -> vector<68x272xf32>
    %c0_41 = arith.constant 0 : index
    %c0_42 = arith.constant 0 : index
    %56 = vector.load %arg9[%c0_41, %c0_42] : memref<96x68xf32, #tpu.memory_space<vmem>>, vector<96x68xf32>
    %cst_43 = arith.constant dense<0.000000e+00> : vector<96x272xf32>
    %57 = tpu.matmul %56, %55, %cst_43 {dimension_numbers = #tpu.dot_dimension_numbers<[1], [0], [0], [1], [0, 0, 1, 1], [], []>} : vector<96x68xf32>, vector<68x272xf32>, vector<96x272xf32> -> vector<96x272xf32>
    %58 = vector.extract_strided_slice %57 {offsets = [0, 0], sizes = [32, 272], strides = [1, 1]} : vector<96x272xf32> to vector<32x272xf32>
    %c0_44 = arith.constant 0 : index
    %c0_45 = arith.constant 0 : index
    %c0_46 = arith.constant 0 : index
    %59 = vector.load %arg10[%c0_44, %c0_45, %c0_46] : memref<3x272x128xf32, #tpu.memory_space<vmem>>, vector<1x272x128xf32>
    %60 = vector.shape_cast %59 : vector<1x272x128xf32> to vector<272x128xf32>
    %cst_47 = arith.constant dense<0.000000e+00> : vector<32x128xf32>
    %61 = tpu.matmul %58, %60, %cst_47 {dimension_numbers = #tpu.dot_dimension_numbers<[1], [0], [0], [1], [0, 0, 1, 1], [], []>} : vector<32x272xf32>, vector<272x128xf32>, vector<32x128xf32> -> vector<32x128xf32>
    %62 = vector.extract_strided_slice %57 {offsets = [32, 0], sizes = [32, 272], strides = [1, 1]} : vector<96x272xf32> to vector<32x272xf32>
    %c1_48 = arith.constant 1 : index
    %c0_49 = arith.constant 0 : index
    %c0_50 = arith.constant 0 : index
    %63 = vector.load %arg10[%c1_48, %c0_49, %c0_50] : memref<3x272x128xf32, #tpu.memory_space<vmem>>, vector<1x272x128xf32>
    %64 = vector.shape_cast %63 : vector<1x272x128xf32> to vector<272x128xf32>
    %cst_51 = arith.constant dense<0.000000e+00> : vector<32x128xf32>
    %65 = tpu.matmul %62, %64, %cst_51 {dimension_numbers = #tpu.dot_dimension_numbers<[1], [0], [0], [1], [0, 0, 1, 1], [], []>} : vector<32x272xf32>, vector<272x128xf32>, vector<32x128xf32> -> vector<32x128xf32>
    %66 = arith.addf %61, %65 : vector<32x128xf32>
    %67 = vector.extract_strided_slice %57 {offsets = [64, 0], sizes = [32, 272], strides = [1, 1]} : vector<96x272xf32> to vector<32x272xf32>
    %c2_52 = arith.constant 2 : index
    %c0_53 = arith.constant 0 : index
    %c0_54 = arith.constant 0 : index
    %68 = vector.load %arg10[%c2_52, %c0_53, %c0_54] : memref<3x272x128xf32, #tpu.memory_space<vmem>>, vector<1x272x128xf32>
    %69 = vector.shape_cast %68 : vector<1x272x128xf32> to vector<272x128xf32>
    %cst_55 = arith.constant dense<0.000000e+00> : vector<32x128xf32>
    %70 = tpu.matmul %67, %69, %cst_55 {dimension_numbers = #tpu.dot_dimension_numbers<[1], [0], [0], [1], [0, 0, 1, 1], [], []>} : vector<32x272xf32>, vector<272x128xf32>, vector<32x128xf32> -> vector<32x128xf32>
    %71 = arith.addf %66, %70 : vector<32x128xf32>
    %cst_56 = arith.constant 0.000000e+00 : f32
    %72 = vector.broadcast %cst_56 : f32 to vector<32x128xf32>
    %73 = arith.maximumf %71, %72 : vector<32x128xf32>
    %c0_57 = arith.constant 0 : index
    %c0_58 = arith.constant 0 : index
    %74 = vector.load %arg11[%c0_57, %c0_58] : memref<2x128xf32, #tpu.memory_space<vmem>>, vector<2x128xf32>
    %75 = vector.extract_strided_slice %74 {offsets = [0, 0], sizes = [1, 128], strides = [1, 1]} : vector<2x128xf32> to vector<1x128xf32>
    %76 = vector.broadcast %75 : vector<1x128xf32> to vector<32x128xf32>
    %77 = arith.mulf %73, %76 : vector<32x128xf32>
    %78 = vector.extract_strided_slice %74 {offsets = [1, 0], sizes = [1, 128], strides = [1, 1]} : vector<2x128xf32> to vector<1x128xf32>
    %79 = vector.broadcast %78 : vector<1x128xf32> to vector<32x128xf32>
    %80 = arith.addf %77, %79 : vector<32x128xf32>
    %c0_59 = arith.constant 0 : index
    %c0_60 = arith.constant 0 : index
    %81 = vector.load %arg12[%c0_59, %c0_60] : memref<96x64xf32, #tpu.memory_space<vmem>>, vector<96x64xf32>
    %cst_61 = arith.constant dense<0.000000e+00> : vector<96x96xf32>
    %82 = tpu.matmul %81, %0, %cst_61 {dimension_numbers = #tpu.dot_dimension_numbers<[1], [0], [0], [1], [0, 0, 1, 1], [], []>} : vector<96x64xf32>, vector<64x96xf32>, vector<96x96xf32> -> vector<96x96xf32>
    %83 = vector.extract_strided_slice %82 {offsets = [0, 0], sizes = [32, 96], strides = [1, 1]} : vector<96x96xf32> to vector<32x96xf32>
    %c0_62 = arith.constant 0 : index
    %c0_63 = arith.constant 0 : index
    %c0_64 = arith.constant 0 : index
    %84 = vector.load %arg13[%c0_62, %c0_63, %c0_64] : memref<3x96x128xf32, #tpu.memory_space<vmem>>, vector<1x96x128xf32>
    %85 = vector.shape_cast %84 : vector<1x96x128xf32> to vector<96x128xf32>
    %cst_65 = arith.constant dense<0.000000e+00> : vector<32x128xf32>
    %86 = tpu.matmul %83, %85, %cst_65 {dimension_numbers = #tpu.dot_dimension_numbers<[1], [0], [0], [1], [0, 0, 1, 1], [], []>} : vector<32x96xf32>, vector<96x128xf32>, vector<32x128xf32> -> vector<32x128xf32>
    %87 = vector.extract_strided_slice %82 {offsets = [32, 0], sizes = [32, 96], strides = [1, 1]} : vector<96x96xf32> to vector<32x96xf32>
    %c1_66 = arith.constant 1 : index
    %c0_67 = arith.constant 0 : index
    %c0_68 = arith.constant 0 : index
    %88 = vector.load %arg13[%c1_66, %c0_67, %c0_68] : memref<3x96x128xf32, #tpu.memory_space<vmem>>, vector<1x96x128xf32>
    %89 = vector.shape_cast %88 : vector<1x96x128xf32> to vector<96x128xf32>
    %cst_69 = arith.constant dense<0.000000e+00> : vector<32x128xf32>
    %90 = tpu.matmul %87, %89, %cst_69 {dimension_numbers = #tpu.dot_dimension_numbers<[1], [0], [0], [1], [0, 0, 1, 1], [], []>} : vector<32x96xf32>, vector<96x128xf32>, vector<32x128xf32> -> vector<32x128xf32>
    %91 = arith.addf %86, %90 : vector<32x128xf32>
    %92 = vector.extract_strided_slice %82 {offsets = [64, 0], sizes = [32, 96], strides = [1, 1]} : vector<96x96xf32> to vector<32x96xf32>
    %c2_70 = arith.constant 2 : index
    %c0_71 = arith.constant 0 : index
    %c0_72 = arith.constant 0 : index
    %93 = vector.load %arg13[%c2_70, %c0_71, %c0_72] : memref<3x96x128xf32, #tpu.memory_space<vmem>>, vector<1x96x128xf32>
    %94 = vector.shape_cast %93 : vector<1x96x128xf32> to vector<96x128xf32>
    %cst_73 = arith.constant dense<0.000000e+00> : vector<32x128xf32>
    %95 = tpu.matmul %92, %94, %cst_73 {dimension_numbers = #tpu.dot_dimension_numbers<[1], [0], [0], [1], [0, 0, 1, 1], [], []>} : vector<32x96xf32>, vector<96x128xf32>, vector<32x128xf32> -> vector<32x128xf32>
    %96 = arith.addf %91, %95 : vector<32x128xf32>
    %cst_74 = arith.constant 0.000000e+00 : f32
    %97 = vector.broadcast %cst_74 : f32 to vector<32x128xf32>
    %98 = arith.maximumf %96, %97 : vector<32x128xf32>
    %c0_75 = arith.constant 0 : index
    %c0_76 = arith.constant 0 : index
    %99 = vector.load %arg14[%c0_75, %c0_76] : memref<2x128xf32, #tpu.memory_space<vmem>>, vector<2x128xf32>
    %100 = vector.extract_strided_slice %99 {offsets = [0, 0], sizes = [1, 128], strides = [1, 1]} : vector<2x128xf32> to vector<1x128xf32>
    %101 = vector.broadcast %100 : vector<1x128xf32> to vector<32x128xf32>
    %102 = arith.mulf %98, %101 : vector<32x128xf32>
    %103 = vector.extract_strided_slice %99 {offsets = [1, 0], sizes = [1, 128], strides = [1, 1]} : vector<2x128xf32> to vector<1x128xf32>
    %104 = vector.broadcast %103 : vector<1x128xf32> to vector<32x128xf32>
    %105 = arith.addf %102, %104 : vector<32x128xf32>
    %106 = arith.addf %80, %105 : vector<32x128xf32>
    %c0_77 = arith.constant 0 : index
    %c0_78 = arith.constant 0 : index
    %107 = vector.load %arg15[%c0_77, %c0_78] : memref<96x32xf32, #tpu.memory_space<vmem>>, vector<96x32xf32>
    %cst_79 = arith.constant dense<0.000000e+00> : vector<96x128xf32>
    %108 = tpu.matmul %107, %106, %cst_79 {dimension_numbers = #tpu.dot_dimension_numbers<[1], [0], [0], [1], [0, 0, 1, 1], [], []>} : vector<96x32xf32>, vector<32x128xf32>, vector<96x128xf32> -> vector<96x128xf32>
    %109 = vector.extract_strided_slice %108 {offsets = [0, 0], sizes = [32, 128], strides = [1, 1]} : vector<96x128xf32> to vector<32x128xf32>
    %c0_80 = arith.constant 0 : index
    %c0_81 = arith.constant 0 : index
    %c0_82 = arith.constant 0 : index
    %110 = vector.load %arg16[%c0_80, %c0_81, %c0_82] : memref<3x128x128xf32, #tpu.memory_space<vmem>>, vector<1x128x128xf32>
    %111 = vector.shape_cast %110 : vector<1x128x128xf32> to vector<128x128xf32>
    %cst_83 = arith.constant dense<0.000000e+00> : vector<32x128xf32>
    %112 = tpu.matmul %109, %111, %cst_83 {dimension_numbers = #tpu.dot_dimension_numbers<[1], [0], [0], [1], [0, 0, 1, 1], [], []>} : vector<32x128xf32>, vector<128x128xf32>, vector<32x128xf32> -> vector<32x128xf32>
    %113 = vector.extract_strided_slice %108 {offsets = [32, 0], sizes = [32, 128], strides = [1, 1]} : vector<96x128xf32> to vector<32x128xf32>
    %c1_84 = arith.constant 1 : index
    %c0_85 = arith.constant 0 : index
    %c0_86 = arith.constant 0 : index
    %114 = vector.load %arg16[%c1_84, %c0_85, %c0_86] : memref<3x128x128xf32, #tpu.memory_space<vmem>>, vector<1x128x128xf32>
    %115 = vector.shape_cast %114 : vector<1x128x128xf32> to vector<128x128xf32>
    %cst_87 = arith.constant dense<0.000000e+00> : vector<32x128xf32>
    %116 = tpu.matmul %113, %115, %cst_87 {dimension_numbers = #tpu.dot_dimension_numbers<[1], [0], [0], [1], [0, 0, 1, 1], [], []>} : vector<32x128xf32>, vector<128x128xf32>, vector<32x128xf32> -> vector<32x128xf32>
    %117 = arith.addf %112, %116 : vector<32x128xf32>
    %118 = vector.extract_strided_slice %108 {offsets = [64, 0], sizes = [32, 128], strides = [1, 1]} : vector<96x128xf32> to vector<32x128xf32>
    %c2_88 = arith.constant 2 : index
    %c0_89 = arith.constant 0 : index
    %c0_90 = arith.constant 0 : index
    %119 = vector.load %arg16[%c2_88, %c0_89, %c0_90] : memref<3x128x128xf32, #tpu.memory_space<vmem>>, vector<1x128x128xf32>
    %120 = vector.shape_cast %119 : vector<1x128x128xf32> to vector<128x128xf32>
    %cst_91 = arith.constant dense<0.000000e+00> : vector<32x128xf32>
    %121 = tpu.matmul %118, %120, %cst_91 {dimension_numbers = #tpu.dot_dimension_numbers<[1], [0], [0], [1], [0, 0, 1, 1], [], []>} : vector<32x128xf32>, vector<128x128xf32>, vector<32x128xf32> -> vector<32x128xf32>
    %122 = arith.addf %117, %121 : vector<32x128xf32>
    %cst_92 = arith.constant 0.000000e+00 : f32
    %123 = vector.broadcast %cst_92 : f32 to vector<32x128xf32>
    %124 = arith.maximumf %122, %123 : vector<32x128xf32>
    %c0_93 = arith.constant 0 : index
    %c0_94 = arith.constant 0 : index
    %125 = vector.load %arg17[%c0_93, %c0_94] : memref<2x128xf32, #tpu.memory_space<vmem>>, vector<2x128xf32>
    %126 = vector.extract_strided_slice %125 {offsets = [0, 0], sizes = [1, 128], strides = [1, 1]} : vector<2x128xf32> to vector<1x128xf32>
    %127 = vector.broadcast %126 : vector<1x128xf32> to vector<32x128xf32>
    %128 = arith.mulf %124, %127 : vector<32x128xf32>
    %129 = vector.extract_strided_slice %125 {offsets = [1, 0], sizes = [1, 128], strides = [1, 1]} : vector<2x128xf32> to vector<1x128xf32>
    %130 = vector.broadcast %129 : vector<1x128xf32> to vector<32x128xf32>
    %131 = arith.addf %128, %130 : vector<32x128xf32>
    %c0_95 = arith.constant 0 : index
    %c0_96 = arith.constant 0 : index
    %132 = vector.load %arg15[%c0_95, %c0_96] : memref<96x32xf32, #tpu.memory_space<vmem>>, vector<96x32xf32>
    %cst_97 = arith.constant dense<0.000000e+00> : vector<96x128xf32>
    %133 = tpu.matmul %132, %131, %cst_97 {dimension_numbers = #tpu.dot_dimension_numbers<[1], [0], [0], [1], [0, 0, 1, 1], [], []>} : vector<96x32xf32>, vector<32x128xf32>, vector<96x128xf32> -> vector<96x128xf32>
    %134 = vector.extract_strided_slice %133 {offsets = [0, 0], sizes = [32, 128], strides = [1, 1]} : vector<96x128xf32> to vector<32x128xf32>
    %c0_98 = arith.constant 0 : index
    %c0_99 = arith.constant 0 : index
    %c0_100 = arith.constant 0 : index
    %135 = vector.load %arg18[%c0_98, %c0_99, %c0_100] : memref<3x128x128xf32, #tpu.memory_space<vmem>>, vector<1x128x128xf32>
    %136 = vector.shape_cast %135 : vector<1x128x128xf32> to vector<128x128xf32>
    %cst_101 = arith.constant dense<0.000000e+00> : vector<32x128xf32>
    %137 = tpu.matmul %134, %136, %cst_101 {dimension_numbers = #tpu.dot_dimension_numbers<[1], [0], [0], [1], [0, 0, 1, 1], [], []>} : vector<32x128xf32>, vector<128x128xf32>, vector<32x128xf32> -> vector<32x128xf32>
    %138 = vector.extract_strided_slice %133 {offsets = [32, 0], sizes = [32, 128], strides = [1, 1]} : vector<96x128xf32> to vector<32x128xf32>
    %c1_102 = arith.constant 1 : index
    %c0_103 = arith.constant 0 : index
    %c0_104 = arith.constant 0 : index
    %139 = vector.load %arg18[%c1_102, %c0_103, %c0_104] : memref<3x128x128xf32, #tpu.memory_space<vmem>>, vector<1x128x128xf32>
    %140 = vector.shape_cast %139 : vector<1x128x128xf32> to vector<128x128xf32>
    %cst_105 = arith.constant dense<0.000000e+00> : vector<32x128xf32>
    %141 = tpu.matmul %138, %140, %cst_105 {dimension_numbers = #tpu.dot_dimension_numbers<[1], [0], [0], [1], [0, 0, 1, 1], [], []>} : vector<32x128xf32>, vector<128x128xf32>, vector<32x128xf32> -> vector<32x128xf32>
    %142 = arith.addf %137, %141 : vector<32x128xf32>
    %143 = vector.extract_strided_slice %133 {offsets = [64, 0], sizes = [32, 128], strides = [1, 1]} : vector<96x128xf32> to vector<32x128xf32>
    %c2_106 = arith.constant 2 : index
    %c0_107 = arith.constant 0 : index
    %c0_108 = arith.constant 0 : index
    %144 = vector.load %arg18[%c2_106, %c0_107, %c0_108] : memref<3x128x128xf32, #tpu.memory_space<vmem>>, vector<1x128x128xf32>
    %145 = vector.shape_cast %144 : vector<1x128x128xf32> to vector<128x128xf32>
    %cst_109 = arith.constant dense<0.000000e+00> : vector<32x128xf32>
    %146 = tpu.matmul %143, %145, %cst_109 {dimension_numbers = #tpu.dot_dimension_numbers<[1], [0], [0], [1], [0, 0, 1, 1], [], []>} : vector<32x128xf32>, vector<128x128xf32>, vector<32x128xf32> -> vector<32x128xf32>
    %147 = arith.addf %142, %146 : vector<32x128xf32>
    %cst_110 = arith.constant 0.000000e+00 : f32
    %148 = vector.broadcast %cst_110 : f32 to vector<32x128xf32>
    %149 = arith.maximumf %147, %148 : vector<32x128xf32>
    %c0_111 = arith.constant 0 : index
    %c0_112 = arith.constant 0 : index
    %150 = vector.load %arg19[%c0_111, %c0_112] : memref<2x128xf32, #tpu.memory_space<vmem>>, vector<2x128xf32>
    %151 = vector.extract_strided_slice %150 {offsets = [0, 0], sizes = [1, 128], strides = [1, 1]} : vector<2x128xf32> to vector<1x128xf32>
    %152 = vector.broadcast %151 : vector<1x128xf32> to vector<32x128xf32>
    %153 = arith.mulf %149, %152 : vector<32x128xf32>
    %154 = vector.extract_strided_slice %150 {offsets = [1, 0], sizes = [1, 128], strides = [1, 1]} : vector<2x128xf32> to vector<1x128xf32>
    %155 = vector.broadcast %154 : vector<1x128xf32> to vector<32x128xf32>
    %156 = arith.addf %153, %155 : vector<32x128xf32>
    %c0_113 = arith.constant 0 : index
    %c0_114 = arith.constant 0 : index
    %157 = vector.load %arg15[%c0_113, %c0_114] : memref<96x32xf32, #tpu.memory_space<vmem>>, vector<96x32xf32>
    %cst_115 = arith.constant dense<0.000000e+00> : vector<96x128xf32>
    %158 = tpu.matmul %157, %156, %cst_115 {dimension_numbers = #tpu.dot_dimension_numbers<[1], [0], [0], [1], [0, 0, 1, 1], [], []>} : vector<96x32xf32>, vector<32x128xf32>, vector<96x128xf32> -> vector<96x128xf32>
    %159 = vector.extract_strided_slice %158 {offsets = [0, 0], sizes = [32, 128], strides = [1, 1]} : vector<96x128xf32> to vector<32x128xf32>
    %c0_116 = arith.constant 0 : index
    %c0_117 = arith.constant 0 : index
    %c0_118 = arith.constant 0 : index
    %160 = vector.load %arg20[%c0_116, %c0_117, %c0_118] : memref<3x128x128xf32, #tpu.memory_space<vmem>>, vector<1x128x128xf32>
    %161 = vector.shape_cast %160 : vector<1x128x128xf32> to vector<128x128xf32>
    %cst_119 = arith.constant dense<0.000000e+00> : vector<32x128xf32>
    %162 = tpu.matmul %159, %161, %cst_119 {dimension_numbers = #tpu.dot_dimension_numbers<[1], [0], [0], [1], [0, 0, 1, 1], [], []>} : vector<32x128xf32>, vector<128x128xf32>, vector<32x128xf32> -> vector<32x128xf32>
    %163 = vector.extract_strided_slice %158 {offsets = [32, 0], sizes = [32, 128], strides = [1, 1]} : vector<96x128xf32> to vector<32x128xf32>
    %c1_120 = arith.constant 1 : index
    %c0_121 = arith.constant 0 : index
    %c0_122 = arith.constant 0 : index
    %164 = vector.load %arg20[%c1_120, %c0_121, %c0_122] : memref<3x128x128xf32, #tpu.memory_space<vmem>>, vector<1x128x128xf32>
    %165 = vector.shape_cast %164 : vector<1x128x128xf32> to vector<128x128xf32>
    %cst_123 = arith.constant dense<0.000000e+00> : vector<32x128xf32>
    %166 = tpu.matmul %163, %165, %cst_123 {dimension_numbers = #tpu.dot_dimension_numbers<[1], [0], [0], [1], [0, 0, 1, 1], [], []>} : vector<32x128xf32>, vector<128x128xf32>, vector<32x128xf32> -> vector<32x128xf32>
    %167 = arith.addf %162, %166 : vector<32x128xf32>
    %168 = vector.extract_strided_slice %158 {offsets = [64, 0], sizes = [32, 128], strides = [1, 1]} : vector<96x128xf32> to vector<32x128xf32>
    %c2_124 = arith.constant 2 : index
    %c0_125 = arith.constant 0 : index
    %c0_126 = arith.constant 0 : index
    %169 = vector.load %arg20[%c2_124, %c0_125, %c0_126] : memref<3x128x128xf32, #tpu.memory_space<vmem>>, vector<1x128x128xf32>
    %170 = vector.shape_cast %169 : vector<1x128x128xf32> to vector<128x128xf32>
    %cst_127 = arith.constant dense<0.000000e+00> : vector<32x128xf32>
    %171 = tpu.matmul %168, %170, %cst_127 {dimension_numbers = #tpu.dot_dimension_numbers<[1], [0], [0], [1], [0, 0, 1, 1], [], []>} : vector<32x128xf32>, vector<128x128xf32>, vector<32x128xf32> -> vector<32x128xf32>
    %172 = arith.addf %167, %171 : vector<32x128xf32>
    %cst_128 = arith.constant 0.000000e+00 : f32
    %173 = vector.broadcast %cst_128 : f32 to vector<32x128xf32>
    %174 = arith.maximumf %172, %173 : vector<32x128xf32>
    %c0_129 = arith.constant 0 : index
    %c0_130 = arith.constant 0 : index
    %175 = vector.load %arg21[%c0_129, %c0_130] : memref<2x128xf32, #tpu.memory_space<vmem>>, vector<2x128xf32>
    %176 = vector.extract_strided_slice %175 {offsets = [0, 0], sizes = [1, 128], strides = [1, 1]} : vector<2x128xf32> to vector<1x128xf32>
    %177 = vector.broadcast %176 : vector<1x128xf32> to vector<32x128xf32>
    %178 = arith.mulf %174, %177 : vector<32x128xf32>
    %179 = vector.extract_strided_slice %175 {offsets = [1, 0], sizes = [1, 128], strides = [1, 1]} : vector<2x128xf32> to vector<1x128xf32>
    %180 = vector.broadcast %179 : vector<1x128xf32> to vector<32x128xf32>
    %181 = arith.addf %178, %180 : vector<32x128xf32>
    %c0_131 = arith.constant 0 : index
    %c0_132 = arith.constant 0 : index
    %182 = vector.load %arg22[%c0_131, %c0_132] : memref<36x32xf32, #tpu.memory_space<vmem>>, vector<36x32xf32>
    %cst_133 = arith.constant dense<0.000000e+00> : vector<36x128xf32>
    %183 = tpu.matmul %182, %181, %cst_133 {dimension_numbers = #tpu.dot_dimension_numbers<[1], [0], [0], [1], [0, 0, 1, 1], [], []>} : vector<36x32xf32>, vector<32x128xf32>, vector<36x128xf32> -> vector<36x128xf32>
    %c0_134 = arith.constant 0 : index
    %c0_135 = arith.constant 0 : index
    %c0_136 = arith.constant 0 : index
    %184 = vector.load %arg23[%c0_134, %c0_135, %c0_136] : memref<1x128x144xf32, #tpu.memory_space<vmem>>, vector<1x128x144xf32>
    %185 = vector.shape_cast %184 : vector<1x128x144xf32> to vector<128x144xf32>
    %cst_137 = arith.constant dense<0.000000e+00> : vector<36x144xf32>
    %186 = tpu.matmul %183, %185, %cst_137 {dimension_numbers = #tpu.dot_dimension_numbers<[1], [0], [0], [1], [0, 0, 1, 1], [], []>} : vector<36x128xf32>, vector<128x144xf32>, vector<36x144xf32> -> vector<36x144xf32>
    %c0_138 = arith.constant 0 : index
    %c0_139 = arith.constant 0 : index
    %187 = vector.load %arg24[%c0_138, %c0_139] : memref<48x36xf32, #tpu.memory_space<vmem>>, vector<48x36xf32>
    %cst_140 = arith.constant dense<0.000000e+00> : vector<48x144xf32>
    %188 = tpu.matmul %187, %186, %cst_140 {dimension_numbers = #tpu.dot_dimension_numbers<[1], [0], [0], [1], [0, 0, 1, 1], [], []>} : vector<48x36xf32>, vector<36x144xf32>, vector<48x144xf32> -> vector<48x144xf32>
    %189 = vector.extract_strided_slice %188 {offsets = [0, 0], sizes = [16, 144], strides = [1, 1]} : vector<48x144xf32> to vector<16x144xf32>
    %c0_141 = arith.constant 0 : index
    %c0_142 = arith.constant 0 : index
    %c0_143 = arith.constant 0 : index
    %190 = vector.load %arg25[%c0_141, %c0_142, %c0_143] : memref<3x144x64xf32, #tpu.memory_space<vmem>>, vector<1x144x64xf32>
    %191 = vector.shape_cast %190 : vector<1x144x64xf32> to vector<144x64xf32>
    %cst_144 = arith.constant dense<0.000000e+00> : vector<16x64xf32>
    %192 = tpu.matmul %189, %191, %cst_144 {dimension_numbers = #tpu.dot_dimension_numbers<[1], [0], [0], [1], [0, 0, 1, 1], [], []>} : vector<16x144xf32>, vector<144x64xf32>, vector<16x64xf32> -> vector<16x64xf32>
    %193 = vector.extract_strided_slice %188 {offsets = [16, 0], sizes = [16, 144], strides = [1, 1]} : vector<48x144xf32> to vector<16x144xf32>
    %c1_145 = arith.constant 1 : index
    %c0_146 = arith.constant 0 : index
    %c0_147 = arith.constant 0 : index
    %194 = vector.load %arg25[%c1_145, %c0_146, %c0_147] : memref<3x144x64xf32, #tpu.memory_space<vmem>>, vector<1x144x64xf32>
    %195 = vector.shape_cast %194 : vector<1x144x64xf32> to vector<144x64xf32>
    %cst_148 = arith.constant dense<0.000000e+00> : vector<16x64xf32>
    %196 = tpu.matmul %193, %195, %cst_148 {dimension_numbers = #tpu.dot_dimension_numbers<[1], [0], [0], [1], [0, 0, 1, 1], [], []>} : vector<16x144xf32>, vector<144x64xf32>, vector<16x64xf32> -> vector<16x64xf32>
    %197 = arith.addf %192, %196 : vector<16x64xf32>
    %198 = vector.extract_strided_slice %188 {offsets = [32, 0], sizes = [16, 144], strides = [1, 1]} : vector<48x144xf32> to vector<16x144xf32>
    %c2_149 = arith.constant 2 : index
    %c0_150 = arith.constant 0 : index
    %c0_151 = arith.constant 0 : index
    %199 = vector.load %arg25[%c2_149, %c0_150, %c0_151] : memref<3x144x64xf32, #tpu.memory_space<vmem>>, vector<1x144x64xf32>
    %200 = vector.shape_cast %199 : vector<1x144x64xf32> to vector<144x64xf32>
    %cst_152 = arith.constant dense<0.000000e+00> : vector<16x64xf32>
    %201 = tpu.matmul %198, %200, %cst_152 {dimension_numbers = #tpu.dot_dimension_numbers<[1], [0], [0], [1], [0, 0, 1, 1], [], []>} : vector<16x144xf32>, vector<144x64xf32>, vector<16x64xf32> -> vector<16x64xf32>
    %202 = arith.addf %197, %201 : vector<16x64xf32>
    %cst_153 = arith.constant 0.000000e+00 : f32
    %203 = vector.broadcast %cst_153 : f32 to vector<16x64xf32>
    %204 = arith.maximumf %202, %203 : vector<16x64xf32>
    %c0_154 = arith.constant 0 : index
    %c0_155 = arith.constant 0 : index
    %205 = vector.load %arg26[%c0_154, %c0_155] : memref<2x64xf32, #tpu.memory_space<vmem>>, vector<2x64xf32>
    %206 = vector.extract_strided_slice %205 {offsets = [0, 0], sizes = [1, 64], strides = [1, 1]} : vector<2x64xf32> to vector<1x64xf32>
    %207 = vector.broadcast %206 : vector<1x64xf32> to vector<16x64xf32>
    %208 = arith.mulf %204, %207 : vector<16x64xf32>
    %209 = vector.extract_strided_slice %205 {offsets = [1, 0], sizes = [1, 64], strides = [1, 1]} : vector<2x64xf32> to vector<1x64xf32>
    %210 = vector.broadcast %209 : vector<1x64xf32> to vector<16x64xf32>
    %211 = arith.addf %208, %210 : vector<16x64xf32>
    %c0_156 = arith.constant 0 : index
    %c0_157 = arith.constant 0 : index
    %212 = vector.load %arg27[%c0_156, %c0_157] : memref<48x32xf32, #tpu.memory_space<vmem>>, vector<48x32xf32>
    %cst_158 = arith.constant dense<0.000000e+00> : vector<48x128xf32>
    %213 = tpu.matmul %212, %106, %cst_158 {dimension_numbers = #tpu.dot_dimension_numbers<[1], [0], [0], [1], [0, 0, 1, 1], [], []>} : vector<48x32xf32>, vector<32x128xf32>, vector<48x128xf32> -> vector<48x128xf32>
    %214 = vector.extract_strided_slice %213 {offsets = [0, 0], sizes = [16, 128], strides = [1, 1]} : vector<48x128xf32> to vector<16x128xf32>
    %c0_159 = arith.constant 0 : index
    %c0_160 = arith.constant 0 : index
    %c0_161 = arith.constant 0 : index
    %215 = vector.load %arg28[%c0_159, %c0_160, %c0_161] : memref<3x128x64xf32, #tpu.memory_space<vmem>>, vector<1x128x64xf32>
    %216 = vector.shape_cast %215 : vector<1x128x64xf32> to vector<128x64xf32>
    %cst_162 = arith.constant dense<0.000000e+00> : vector<16x64xf32>
    %217 = tpu.matmul %214, %216, %cst_162 {dimension_numbers = #tpu.dot_dimension_numbers<[1], [0], [0], [1], [0, 0, 1, 1], [], []>} : vector<16x128xf32>, vector<128x64xf32>, vector<16x64xf32> -> vector<16x64xf32>
    %218 = vector.extract_strided_slice %213 {offsets = [16, 0], sizes = [16, 128], strides = [1, 1]} : vector<48x128xf32> to vector<16x128xf32>
    %c1_163 = arith.constant 1 : index
    %c0_164 = arith.constant 0 : index
    %c0_165 = arith.constant 0 : index
    %219 = vector.load %arg28[%c1_163, %c0_164, %c0_165] : memref<3x128x64xf32, #tpu.memory_space<vmem>>, vector<1x128x64xf32>
    %220 = vector.shape_cast %219 : vector<1x128x64xf32> to vector<128x64xf32>
    %cst_166 = arith.constant dense<0.000000e+00> : vector<16x64xf32>
    %221 = tpu.matmul %218, %220, %cst_166 {dimension_numbers = #tpu.dot_dimension_numbers<[1], [0], [0], [1], [0, 0, 1, 1], [], []>} : vector<16x128xf32>, vector<128x64xf32>, vector<16x64xf32> -> vector<16x64xf32>
    %222 = arith.addf %217, %221 : vector<16x64xf32>
    %223 = vector.extract_strided_slice %213 {offsets = [32, 0], sizes = [16, 128], strides = [1, 1]} : vector<48x128xf32> to vector<16x128xf32>
    %c2_167 = arith.constant 2 : index
    %c0_168 = arith.constant 0 : index
    %c0_169 = arith.constant 0 : index
    %224 = vector.load %arg28[%c2_167, %c0_168, %c0_169] : memref<3x128x64xf32, #tpu.memory_space<vmem>>, vector<1x128x64xf32>
    %225 = vector.shape_cast %224 : vector<1x128x64xf32> to vector<128x64xf32>
    %cst_170 = arith.constant dense<0.000000e+00> : vector<16x64xf32>
    %226 = tpu.matmul %223, %225, %cst_170 {dimension_numbers = #tpu.dot_dimension_numbers<[1], [0], [0], [1], [0, 0, 1, 1], [], []>} : vector<16x128xf32>, vector<128x64xf32>, vector<16x64xf32> -> vector<16x64xf32>
    %227 = arith.addf %222, %226 : vector<16x64xf32>
    %cst_171 = arith.constant 0.000000e+00 : f32
    %228 = vector.broadcast %cst_171 : f32 to vector<16x64xf32>
    %229 = arith.maximumf %227, %228 : vector<16x64xf32>
    %c0_172 = arith.constant 0 : index
    %c0_173 = arith.constant 0 : index
    %230 = vector.load %arg29[%c0_172, %c0_173] : memref<2x64xf32, #tpu.memory_space<vmem>>, vector<2x64xf32>
    %231 = vector.extract_strided_slice %230 {offsets = [0, 0], sizes = [1, 64], strides = [1, 1]} : vector<2x64xf32> to vector<1x64xf32>
    %232 = vector.broadcast %231 : vector<1x64xf32> to vector<16x64xf32>
    %233 = arith.mulf %229, %232 : vector<16x64xf32>
    %234 = vector.extract_strided_slice %230 {offsets = [1, 0], sizes = [1, 64], strides = [1, 1]} : vector<2x64xf32> to vector<1x64xf32>
    %235 = vector.broadcast %234 : vector<1x64xf32> to vector<16x64xf32>
    %236 = arith.addf %233, %235 : vector<16x64xf32>
    %237 = arith.addf %211, %236 : vector<16x64xf32>
    %c0_174 = arith.constant 0 : index
    %c0_175 = arith.constant 0 : index
    %238 = vector.load %arg30[%c0_174, %c0_175] : memref<48x16xf32, #tpu.memory_space<vmem>>, vector<48x16xf32>
    %cst_176 = arith.constant dense<0.000000e+00> : vector<48x64xf32>
    %239 = tpu.matmul %238, %237, %cst_176 {dimension_numbers = #tpu.dot_dimension_numbers<[1], [0], [0], [1], [0, 0, 1, 1], [], []>} : vector<48x16xf32>, vector<16x64xf32>, vector<48x64xf32> -> vector<48x64xf32>
    %240 = vector.extract_strided_slice %239 {offsets = [0, 0], sizes = [16, 64], strides = [1, 1]} : vector<48x64xf32> to vector<16x64xf32>
    %c0_177 = arith.constant 0 : index
    %c0_178 = arith.constant 0 : index
    %c0_179 = arith.constant 0 : index
    %241 = vector.load %arg31[%c0_177, %c0_178, %c0_179] : memref<3x64x64xf32, #tpu.memory_space<vmem>>, vector<1x64x64xf32>
    %242 = vector.shape_cast %241 : vector<1x64x64xf32> to vector<64x64xf32>
    %cst_180 = arith.constant dense<0.000000e+00> : vector<16x64xf32>
    %243 = tpu.matmul %240, %242, %cst_180 {dimension_numbers = #tpu.dot_dimension_numbers<[1], [0], [0], [1], [0, 0, 1, 1], [], []>} : vector<16x64xf32>, vector<64x64xf32>, vector<16x64xf32> -> vector<16x64xf32>
    %244 = vector.extract_strided_slice %239 {offsets = [16, 0], sizes = [16, 64], strides = [1, 1]} : vector<48x64xf32> to vector<16x64xf32>
    %c1_181 = arith.constant 1 : index
    %c0_182 = arith.constant 0 : index
    %c0_183 = arith.constant 0 : index
    %245 = vector.load %arg31[%c1_181, %c0_182, %c0_183] : memref<3x64x64xf32, #tpu.memory_space<vmem>>, vector<1x64x64xf32>
    %246 = vector.shape_cast %245 : vector<1x64x64xf32> to vector<64x64xf32>
    %cst_184 = arith.constant dense<0.000000e+00> : vector<16x64xf32>
    %247 = tpu.matmul %244, %246, %cst_184 {dimension_numbers = #tpu.dot_dimension_numbers<[1], [0], [0], [1], [0, 0, 1, 1], [], []>} : vector<16x64xf32>, vector<64x64xf32>, vector<16x64xf32> -> vector<16x64xf32>
    %248 = arith.addf %243, %247 : vector<16x64xf32>
    %249 = vector.extract_strided_slice %239 {offsets = [32, 0], sizes = [16, 64], strides = [1, 1]} : vector<48x64xf32> to vector<16x64xf32>
    %c2_185 = arith.constant 2 : index
    %c0_186 = arith.constant 0 : index
    %c0_187 = arith.constant 0 : index
    %250 = vector.load %arg31[%c2_185, %c0_186, %c0_187] : memref<3x64x64xf32, #tpu.memory_space<vmem>>, vector<1x64x64xf32>
    %251 = vector.shape_cast %250 : vector<1x64x64xf32> to vector<64x64xf32>
    %cst_188 = arith.constant dense<0.000000e+00> : vector<16x64xf32>
    %252 = tpu.matmul %249, %251, %cst_188 {dimension_numbers = #tpu.dot_dimension_numbers<[1], [0], [0], [1], [0, 0, 1, 1], [], []>} : vector<16x64xf32>, vector<64x64xf32>, vector<16x64xf32> -> vector<16x64xf32>
    %253 = arith.addf %248, %252 : vector<16x64xf32>
    %cst_189 = arith.constant 0.000000e+00 : f32
    %254 = vector.broadcast %cst_189 : f32 to vector<16x64xf32>
    %255 = arith.maximumf %253, %254 : vector<16x64xf32>
    %c0_190 = arith.constant 0 : index
    %c0_191 = arith.constant 0 : index
    %256 = vector.load %arg32[%c0_190, %c0_191] : memref<2x64xf32, #tpu.memory_space<vmem>>, vector<2x64xf32>
    %257 = vector.extract_strided_slice %256 {offsets = [0, 0], sizes = [1, 64], strides = [1, 1]} : vector<2x64xf32> to vector<1x64xf32>
    %258 = vector.broadcast %257 : vector<1x64xf32> to vector<16x64xf32>
    %259 = arith.mulf %255, %258 : vector<16x64xf32>
    %260 = vector.extract_strided_slice %256 {offsets = [1, 0], sizes = [1, 64], strides = [1, 1]} : vector<2x64xf32> to vector<1x64xf32>
    %261 = vector.broadcast %260 : vector<1x64xf32> to vector<16x64xf32>
    %262 = arith.addf %259, %261 : vector<16x64xf32>
    %c0_192 = arith.constant 0 : index
    %c0_193 = arith.constant 0 : index
    %263 = vector.load %arg30[%c0_192, %c0_193] : memref<48x16xf32, #tpu.memory_space<vmem>>, vector<48x16xf32>
    %cst_194 = arith.constant dense<0.000000e+00> : vector<48x64xf32>
    %264 = tpu.matmul %263, %262, %cst_194 {dimension_numbers = #tpu.dot_dimension_numbers<[1], [0], [0], [1], [0, 0, 1, 1], [], []>} : vector<48x16xf32>, vector<16x64xf32>, vector<48x64xf32> -> vector<48x64xf32>
    %265 = vector.extract_strided_slice %264 {offsets = [0, 0], sizes = [16, 64], strides = [1, 1]} : vector<48x64xf32> to vector<16x64xf32>
    %c0_195 = arith.constant 0 : index
    %c0_196 = arith.constant 0 : index
    %c0_197 = arith.constant 0 : index
    %266 = vector.load %arg33[%c0_195, %c0_196, %c0_197] : memref<3x64x64xf32, #tpu.memory_space<vmem>>, vector<1x64x64xf32>
    %267 = vector.shape_cast %266 : vector<1x64x64xf32> to vector<64x64xf32>
    %cst_198 = arith.constant dense<0.000000e+00> : vector<16x64xf32>
    %268 = tpu.matmul %265, %267, %cst_198 {dimension_numbers = #tpu.dot_dimension_numbers<[1], [0], [0], [1], [0, 0, 1, 1], [], []>} : vector<16x64xf32>, vector<64x64xf32>, vector<16x64xf32> -> vector<16x64xf32>
    %269 = vector.extract_strided_slice %264 {offsets = [16, 0], sizes = [16, 64], strides = [1, 1]} : vector<48x64xf32> to vector<16x64xf32>
    %c1_199 = arith.constant 1 : index
    %c0_200 = arith.constant 0 : index
    %c0_201 = arith.constant 0 : index
    %270 = vector.load %arg33[%c1_199, %c0_200, %c0_201] : memref<3x64x64xf32, #tpu.memory_space<vmem>>, vector<1x64x64xf32>
    %271 = vector.shape_cast %270 : vector<1x64x64xf32> to vector<64x64xf32>
    %cst_202 = arith.constant dense<0.000000e+00> : vector<16x64xf32>
    %272 = tpu.matmul %269, %271, %cst_202 {dimension_numbers = #tpu.dot_dimension_numbers<[1], [0], [0], [1], [0, 0, 1, 1], [], []>} : vector<16x64xf32>, vector<64x64xf32>, vector<16x64xf32> -> vector<16x64xf32>
    %273 = arith.addf %268, %272 : vector<16x64xf32>
    %274 = vector.extract_strided_slice %264 {offsets = [32, 0], sizes = [16, 64], strides = [1, 1]} : vector<48x64xf32> to vector<16x64xf32>
    %c2_203 = arith.constant 2 : index
    %c0_204 = arith.constant 0 : index
    %c0_205 = arith.constant 0 : index
    %275 = vector.load %arg33[%c2_203, %c0_204, %c0_205] : memref<3x64x64xf32, #tpu.memory_space<vmem>>, vector<1x64x64xf32>
    %276 = vector.shape_cast %275 : vector<1x64x64xf32> to vector<64x64xf32>
    %cst_206 = arith.constant dense<0.000000e+00> : vector<16x64xf32>
    %277 = tpu.matmul %274, %276, %cst_206 {dimension_numbers = #tpu.dot_dimension_numbers<[1], [0], [0], [1], [0, 0, 1, 1], [], []>} : vector<16x64xf32>, vector<64x64xf32>, vector<16x64xf32> -> vector<16x64xf32>
    %278 = arith.addf %273, %277 : vector<16x64xf32>
    %cst_207 = arith.constant 0.000000e+00 : f32
    %279 = vector.broadcast %cst_207 : f32 to vector<16x64xf32>
    %280 = arith.maximumf %278, %279 : vector<16x64xf32>
    %c0_208 = arith.constant 0 : index
    %c0_209 = arith.constant 0 : index
    %281 = vector.load %arg34[%c0_208, %c0_209] : memref<2x64xf32, #tpu.memory_space<vmem>>, vector<2x64xf32>
    %282 = vector.extract_strided_slice %281 {offsets = [0, 0], sizes = [1, 64], strides = [1, 1]} : vector<2x64xf32> to vector<1x64xf32>
    %283 = vector.broadcast %282 : vector<1x64xf32> to vector<16x64xf32>
    %284 = arith.mulf %280, %283 : vector<16x64xf32>
    %285 = vector.extract_strided_slice %281 {offsets = [1, 0], sizes = [1, 64], strides = [1, 1]} : vector<2x64xf32> to vector<1x64xf32>
    %286 = vector.broadcast %285 : vector<1x64xf32> to vector<16x64xf32>
    %287 = arith.addf %284, %286 : vector<16x64xf32>
    %c0_210 = arith.constant 0 : index
    %c0_211 = arith.constant 0 : index
    %288 = vector.load %arg30[%c0_210, %c0_211] : memref<48x16xf32, #tpu.memory_space<vmem>>, vector<48x16xf32>
    %cst_212 = arith.constant dense<0.000000e+00> : vector<48x64xf32>
    %289 = tpu.matmul %288, %287, %cst_212 {dimension_numbers = #tpu.dot_dimension_numbers<[1], [0], [0], [1], [0, 0, 1, 1], [], []>} : vector<48x16xf32>, vector<16x64xf32>, vector<48x64xf32> -> vector<48x64xf32>
    %290 = vector.extract_strided_slice %289 {offsets = [0, 0], sizes = [16, 64], strides = [1, 1]} : vector<48x64xf32> to vector<16x64xf32>
    %c0_213 = arith.constant 0 : index
    %c0_214 = arith.constant 0 : index
    %c0_215 = arith.constant 0 : index
    %291 = vector.load %arg35[%c0_213, %c0_214, %c0_215] : memref<3x64x64xf32, #tpu.memory_space<vmem>>, vector<1x64x64xf32>
    %292 = vector.shape_cast %291 : vector<1x64x64xf32> to vector<64x64xf32>
    %cst_216 = arith.constant dense<0.000000e+00> : vector<16x64xf32>
    %293 = tpu.matmul %290, %292, %cst_216 {dimension_numbers = #tpu.dot_dimension_numbers<[1], [0], [0], [1], [0, 0, 1, 1], [], []>} : vector<16x64xf32>, vector<64x64xf32>, vector<16x64xf32> -> vector<16x64xf32>
    %294 = vector.extract_strided_slice %289 {offsets = [16, 0], sizes = [16, 64], strides = [1, 1]} : vector<48x64xf32> to vector<16x64xf32>
    %c1_217 = arith.constant 1 : index
    %c0_218 = arith.constant 0 : index
    %c0_219 = arith.constant 0 : index
    %295 = vector.load %arg35[%c1_217, %c0_218, %c0_219] : memref<3x64x64xf32, #tpu.memory_space<vmem>>, vector<1x64x64xf32>
    %296 = vector.shape_cast %295 : vector<1x64x64xf32> to vector<64x64xf32>
    %cst_220 = arith.constant dense<0.000000e+00> : vector<16x64xf32>
    %297 = tpu.matmul %294, %296, %cst_220 {dimension_numbers = #tpu.dot_dimension_numbers<[1], [0], [0], [1], [0, 0, 1, 1], [], []>} : vector<16x64xf32>, vector<64x64xf32>, vector<16x64xf32> -> vector<16x64xf32>
    %298 = arith.addf %293, %297 : vector<16x64xf32>
    %299 = vector.extract_strided_slice %289 {offsets = [32, 0], sizes = [16, 64], strides = [1, 1]} : vector<48x64xf32> to vector<16x64xf32>
    %c2_221 = arith.constant 2 : index
    %c0_222 = arith.constant 0 : index
    %c0_223 = arith.constant 0 : index
    %300 = vector.load %arg35[%c2_221, %c0_222, %c0_223] : memref<3x64x64xf32, #tpu.memory_space<vmem>>, vector<1x64x64xf32>
    %301 = vector.shape_cast %300 : vector<1x64x64xf32> to vector<64x64xf32>
    %cst_224 = arith.constant dense<0.000000e+00> : vector<16x64xf32>
    %302 = tpu.matmul %299, %301, %cst_224 {dimension_numbers = #tpu.dot_dimension_numbers<[1], [0], [0], [1], [0, 0, 1, 1], [], []>} : vector<16x64xf32>, vector<64x64xf32>, vector<16x64xf32> -> vector<16x64xf32>
    %303 = arith.addf %298, %302 : vector<16x64xf32>
    %cst_225 = arith.constant 0.000000e+00 : f32
    %304 = vector.broadcast %cst_225 : f32 to vector<16x64xf32>
    %305 = arith.maximumf %303, %304 : vector<16x64xf32>
    %c0_226 = arith.constant 0 : index
    %c0_227 = arith.constant 0 : index
    %306 = vector.load %arg36[%c0_226, %c0_227] : memref<2x64xf32, #tpu.memory_space<vmem>>, vector<2x64xf32>
    %307 = vector.extract_strided_slice %306 {offsets = [0, 0], sizes = [1, 64], strides = [1, 1]} : vector<2x64xf32> to vector<1x64xf32>
    %308 = vector.broadcast %307 : vector<1x64xf32> to vector<16x64xf32>
    %309 = arith.mulf %305, %308 : vector<16x64xf32>
    %310 = vector.extract_strided_slice %306 {offsets = [1, 0], sizes = [1, 64], strides = [1, 1]} : vector<2x64xf32> to vector<1x64xf32>
    %311 = vector.broadcast %310 : vector<1x64xf32> to vector<16x64xf32>
    %312 = arith.addf %309, %311 : vector<16x64xf32>
    %313 = arith.addf %312, %237 : vector<16x64xf32>
    %c0_228 = arith.constant 0 : index
    %c0_229 = arith.constant 0 : index
    %314 = vector.load %arg37[%c0_228, %c0_229] : memref<2x16xf32, #tpu.memory_space<vmem>>, vector<2x16xf32>
    %cst_230 = arith.constant dense<0.000000e+00> : vector<2x64xf32>
    %315 = tpu.matmul %314, %313, %cst_230 {dimension_numbers = #tpu.dot_dimension_numbers<[1], [0], [0], [1], [0, 0, 1, 1], [], []>} : vector<2x16xf32>, vector<16x64xf32>, vector<2x64xf32> -> vector<2x64xf32>
    %c0_231 = arith.constant 0 : index
    %c0_232 = arith.constant 0 : index
    %316 = vector.load %arg38[%c0_231, %c0_232] : memref<64x10xf32, #tpu.memory_space<vmem>>, vector<64x10xf32>
    %cst_233 = arith.constant dense<0.000000e+00> : vector<2x10xf32>
    %317 = tpu.matmul %315, %316, %cst_233 {dimension_numbers = #tpu.dot_dimension_numbers<[1], [0], [0], [1], [0, 0, 1, 1], [], []>} : vector<2x64xf32>, vector<64x10xf32>, vector<2x10xf32> -> vector<2x10xf32>
    %cst_234 = arith.constant dense<0xFF800000> : vector<2xf32>
    %318 = vector.multi_reduction <maximumf>, %317, %cst_234 [1] : vector<2x10xf32> to vector<2xf32>
    %319 = vector.shape_cast %318 : vector<2xf32> to vector<2x1xf32>
    %320 = vector.broadcast %319 : vector<2x1xf32> to vector<2x10xf32>
    %321 = arith.subf %317, %320 : vector<2x10xf32>
    %322 = math.exp %321 : vector<2x10xf32>
    %cst_235 = arith.constant dense<0.000000e+00> : vector<2xf32>
    %323 = vector.multi_reduction <add>, %322, %cst_235 [1] : vector<2x10xf32> to vector<2xf32>
    %324 = vector.shape_cast %323 : vector<2xf32> to vector<2x1xf32>
    %325 = math.log %324 : vector<2x1xf32>
    %326 = vector.broadcast %325 : vector<2x1xf32> to vector<2x10xf32>
    %327 = arith.subf %321, %326 : vector<2x10xf32>
    %c0_236 = arith.constant 0 : index
    %c0_237 = arith.constant 0 : index
    %328 = vector.load %arg39[%c0_236, %c0_237] : memref<2x10xf32, #tpu.memory_space<vmem>>, vector<2x10xf32>
    tpu.vector_store %arg39[%c0_236, %c0_237], %327 {strides = array<i32>} : memref<2x10xf32, #tpu.memory_space<vmem>>, vector<2x10xf32>,
    return
  }
  func.func @transform_0(%arg0: i32) -> (i32, i32) {
    %c0_i32 = arith.constant 0 : i32
    %c0_i32_0 = arith.constant 0 : i32
    %c0_i32_1 = arith.constant 0 : i32
    return %c0_i32, %c0_i32_0 : i32, i32
  }
  func.func @transform_1(%arg0: i32) -> (i32, i32) {
    %c0_i32 = arith.constant 0 : i32
    %c0_i32_0 = arith.constant 0 : i32
    %c0_i32_1 = arith.constant 0 : i32
    return %c0_i32, %c0_i32_0 : i32, i32
  }
  func.func @transform_2(%arg0: i32) -> (i32, i32, i32) {
    %c0_i32 = arith.constant 0 : i32
    %c0_i32_0 = arith.constant 0 : i32
    %c0_i32_1 = arith.constant 0 : i32
    %c0_i32_2 = arith.constant 0 : i32
    return %c0_i32, %c0_i32_0, %c0_i32_1 : i32, i32, i32
  }
  func.func @transform_3(%arg0: i32) -> (i32, i32) {
    %c0_i32 = arith.constant 0 : i32
    %c0_i32_0 = arith.constant 0 : i32
    %c0_i32_1 = arith.constant 0 : i32
    return %c0_i32, %c0_i32_0 : i32, i32
  }
  func.func @transform_4(%arg0: i32) -> (i32, i32, i32) {
    %c0_i32 = arith.constant 0 : i32
    %c0_i32_0 = arith.constant 0 : i32
    %c0_i32_1 = arith.constant 0 : i32
    %c0_i32_2 = arith.constant 0 : i32
    return %c0_i32, %c0_i32_0, %c0_i32_1 : i32, i32, i32
  }
  func.func @transform_5(%arg0: i32) -> (i32, i32) {
    %c0_i32 = arith.constant 0 : i32
    %c0_i32_0 = arith.constant 0 : i32
    %c0_i32_1 = arith.constant 0 : i32
    return %c0_i32, %c0_i32_0 : i32, i32
  }
  func.func @transform_6(%arg0: i32) -> (i32, i32) {
    %c0_i32 = arith.constant 0 : i32
    %c0_i32_0 = arith.constant 0 : i32
    %c0_i32_1 = arith.constant 0 : i32
    return %c0_i32, %c0_i32_0 : i32, i32
  }
  func.func @transform_7(%arg0: i32) -> (i32, i32, i32) {
    %c0_i32 = arith.constant 0 : i32
    %c0_i32_0 = arith.constant 0 : i32
    %c0_i32_1 = arith.constant 0 : i32
    %c0_i32_2 = arith.constant 0 : i32
    return %c0_i32, %c0_i32_0, %c0_i32_1 : i32, i32, i32
  }
  func.func @transform_8(%arg0: i32) -> (i32, i32) {
    %c0_i32 = arith.constant 0 : i32
    %c0_i32_0 = arith.constant 0 : i32
    %c0_i32_1 = arith.constant 0 : i32
    return %c0_i32, %c0_i32_0 : i32, i32
  }
  func.func @transform_9(%arg0: i32) -> (i32, i32, i32) {
    %c0_i32 = arith.constant 0 : i32
    %c0_i32_0 = arith.constant 0 : i32
    %c0_i32_1 = arith.constant 0 : i32
    %c0_i32_2 = arith.constant 0 : i32
    return %c0_i32, %c0_i32_0, %c0_i32_1 : i32, i32, i32
  }
  func.func @transform_10(%arg0: i32) -> (i32, i32) {
    %c0_i32 = arith.constant 0 : i32
    %c0_i32_0 = arith.constant 0 : i32
    %c0_i32_1 = arith.constant 0 : i32
    return %c0_i32, %c0_i32_0 : i32, i32
  }
  func.func @transform_11(%arg0: i32) -> (i32, i32) {
    %c0_i32 = arith.constant 0 : i32
    %c0_i32_0 = arith.constant 0 : i32
    %c0_i32_1 = arith.constant 0 : i32
    return %c0_i32, %c0_i32_0 : i32, i32
  }
  func.func @transform_12(%arg0: i32) -> (i32, i32, i32) {
    %c0_i32 = arith.constant 0 : i32
    %c0_i32_0 = arith.constant 0 : i32
    %c0_i32_1 = arith.constant 0 : i32
    %c0_i32_2 = arith.constant 0 : i32
    return %c0_i32, %c0_i32_0, %c0_i32_1 : i32, i32, i32
  }
  func.func @transform_13(%arg0: i32) -> (i32, i32) {
    %c0_i32 = arith.constant 0 : i32
    %c0_i32_0 = arith.constant 0 : i32
    %c0_i32_1 = arith.constant 0 : i32
    return %c0_i32, %c0_i32_0 : i32, i32
  }
  func.func @transform_14(%arg0: i32) -> (i32, i32) {
    %c0_i32 = arith.constant 0 : i32
    %c0_i32_0 = arith.constant 0 : i32
    %c0_i32_1 = arith.constant 0 : i32
    return %c0_i32, %c0_i32_0 : i32, i32
  }
  func.func @transform_15(%arg0: i32) -> (i32, i32, i32) {
    %c0_i32 = arith.constant 0 : i32
    %c0_i32_0 = arith.constant 0 : i32
    %c0_i32_1 = arith.constant 0 : i32
    %c0_i32_2 = arith.constant 0 : i32
    return %c0_i32, %c0_i32_0, %c0_i32_1 : i32, i32, i32
  }
  func.func @transform_16(%arg0: i32) -> (i32, i32) {
    %c0_i32 = arith.constant 0 : i32
    %c0_i32_0 = arith.constant 0 : i32
    %c0_i32_1 = arith.constant 0 : i32
    return %c0_i32, %c0_i32_0 : i32, i32
  }
  func.func @transform_17(%arg0: i32) -> (i32, i32, i32) {
    %c0_i32 = arith.constant 0 : i32
    %c0_i32_0 = arith.constant 0 : i32
    %c0_i32_1 = arith.constant 0 : i32
    %c0_i32_2 = arith.constant 0 : i32
    return %c0_i32, %c0_i32_0, %c0_i32_1 : i32, i32, i32
  }
  func.func @transform_18(%arg0: i32) -> (i32, i32) {
    %c0_i32 = arith.constant 0 : i32
    %c0_i32_0 = arith.constant 0 : i32
    %c0_i32_1 = arith.constant 0 : i32
    return %c0_i32, %c0_i32_0 : i32, i32
  }
  func.func @transform_19(%arg0: i32) -> (i32, i32, i32) {
    %c0_i32 = arith.constant 0 : i32
    %c0_i32_0 = arith.constant 0 : i32
    %c0_i32_1 = arith.constant 0 : i32
    %c0_i32_2 = arith.constant 0 : i32
    return %c0_i32, %c0_i32_0, %c0_i32_1 : i32, i32, i32
  }
  func.func @transform_20(%arg0: i32) -> (i32, i32) {
    %c0_i32 = arith.constant 0 : i32
    %c0_i32_0 = arith.constant 0 : i32
    %c0_i32_1 = arith.constant 0 : i32
    return %c0_i32, %c0_i32_0 : i32, i32
  }
  func.func @transform_21(%arg0: i32) -> (i32, i32) {
    %c0_i32 = arith.constant 0 : i32
    %c0_i32_0 = arith.constant 0 : i32
    %c0_i32_1 = arith.constant 0 : i32
    return %c0_i32, %c0_i32_0 : i32, i32
  }
  func.func @transform_22(%arg0: i32) -> (i32, i32, i32) {
    %c0_i32 = arith.constant 0 : i32
    %c0_i32_0 = arith.constant 0 : i32
    %c0_i32_1 = arith.constant 0 : i32
    %c0_i32_2 = arith.constant 0 : i32
    return %c0_i32, %c0_i32_0, %c0_i32_1 : i32, i32, i32
  }
  func.func @transform_23(%arg0: i32) -> (i32, i32) {
    %c0_i32 = arith.constant 0 : i32
    %c0_i32_0 = arith.constant 0 : i32
    %c0_i32_1 = arith.constant 0 : i32
    return %c0_i32, %c0_i32_0 : i32, i32
  }
  func.func @transform_24(%arg0: i32) -> (i32, i32, i32) {
    %c0_i32 = arith.constant 0 : i32
    %c0_i32_0 = arith.constant 0 : i32
    %c0_i32_1 = arith.constant 0 : i32
    %c0_i32_2 = arith.constant 0 : i32
    return %c0_i32, %c0_i32_0, %c0_i32_1 : i32, i32, i32
  }
  func.func @transform_25(%arg0: i32) -> (i32, i32) {
    %c0_i32 = arith.constant 0 : i32
    %c0_i32_0 = arith.constant 0 : i32
    %c0_i32_1 = arith.constant 0 : i32
    return %c0_i32, %c0_i32_0 : i32, i32
  }
  func.func @transform_26(%arg0: i32) -> (i32, i32) {
    %c0_i32 = arith.constant 0 : i32
    %c0_i32_0 = arith.constant 0 : i32
    %c0_i32_1 = arith.constant 0 : i32
    return %c0_i32, %c0_i32_0 : i32, i32
  }
  func.func @transform_27(%arg0: i32) -> (i32, i32, i32) {
    %c0_i32 = arith.constant 0 : i32
    %c0_i32_0 = arith.constant 0 : i32
    %c0_i32_1 = arith.constant 0 : i32
    %c0_i32_2 = arith.constant 0 : i32
    return %c0_i32, %c0_i32_0, %c0_i32_1 : i32, i32, i32
  }
  func.func @transform_28(%arg0: i32) -> (i32, i32) {
    %c0_i32 = arith.constant 0 : i32
    %c0_i32_0 = arith.constant 0 : i32
    %c0_i32_1 = arith.constant 0 : i32
    return %c0_i32, %c0_i32_0 : i32, i32
  }
  func.func @transform_29(%arg0: i32) -> (i32, i32) {
    %c0_i32 = arith.constant 0 : i32
    %c0_i32_0 = arith.constant 0 : i32
    %c0_i32_1 = arith.constant 0 : i32
    return %c0_i32, %c0_i32_0 : i32, i32
  }
  func.func @transform_30(%arg0: i32) -> (i32, i32, i32) {
    %c0_i32 = arith.constant 0 : i32
    %c0_i32_0 = arith.constant 0 : i32
    %c0_i32_1 = arith.constant 0 : i32
    %c0_i32_2 = arith.constant 0 : i32
    return %c0_i32, %c0_i32_0, %c0_i32_1 : i32, i32, i32
  }
  func.func @transform_31(%arg0: i32) -> (i32, i32) {
    %c0_i32 = arith.constant 0 : i32
    %c0_i32_0 = arith.constant 0 : i32
    %c0_i32_1 = arith.constant 0 : i32
    return %c0_i32, %c0_i32_0 : i32, i32
  }
  func.func @transform_32(%arg0: i32) -> (i32, i32, i32) {
    %c0_i32 = arith.constant 0 : i32
    %c0_i32_0 = arith.constant 0 : i32
    %c0_i32_1 = arith.constant 0 : i32
    %c0_i32_2 = arith.constant 0 : i32
    return %c0_i32, %c0_i32_0, %c0_i32_1 : i32, i32, i32
  }
  func.func @transform_33(%arg0: i32) -> (i32, i32) {
    %c0_i32 = arith.constant 0 : i32
    %c0_i32_0 = arith.constant 0 : i32
    %c0_i32_1 = arith.constant 0 : i32
    return %c0_i32, %c0_i32_0 : i32, i32
  }
  func.func @transform_34(%arg0: i32) -> (i32, i32, i32) {
    %c0_i32 = arith.constant 0 : i32
    %c0_i32_0 = arith.constant 0 : i32
    %c0_i32_1 = arith.constant 0 : i32
    %c0_i32_2 = arith.constant 0 : i32
    return %c0_i32, %c0_i32_0, %c0_i32_1 : i32, i32, i32
  }
  func.func @transform_35(%arg0: i32) -> (i32, i32) {
    %c0_i32 = arith.constant 0 : i32
    %c0_i32_0 = arith.constant 0 : i32
    %c0_i32_1 = arith.constant 0 : i32
    return %c0_i32, %c0_i32_0 : i32, i32
  }
  func.func @transform_36(%arg0: i32) -> (i32, i32) {
    %c0_i32 = arith.constant 0 : i32
    %c0_i32_0 = arith.constant 0 : i32
    %c0_i32_1 = arith.constant 0 : i32
    return %c0_i32, %c0_i32_0 : i32, i32
  }
  func.func @transform_37(%arg0: i32) -> (i32, i32) {
    %c0_i32 = arith.constant 0 : i32
    %c0_i32_0 = arith.constant 0 : i32
    %c0_i32_1 = arith.constant 0 : i32
    return %c0_i32, %c0_i32_0 : i32, i32
  }
  func.func @transform_38(%arg0: i32) -> (i32, i32) {
    %c0_i32 = arith.constant 0 : i32
    %c0_i32_0 = arith.constant 0 : i32
    %c0_i32_1 = arith.constant 0 : i32
    return %c0_i32, %c0_i32_0 : i32, i32
  }
}

</mosaic_0001>

<bundles_post_ra>
// kernel: forward.1
= control target key start
LH: loop header
LB: loop body
LE: loop exit
PB: predicated region body
PF: predicated region fallthrough
CT: control target
= control target key end

     0   :  { %s12282_s6 = smov 1   ;;  %s12283_s10 = smov 2   ;;  %s14549_s0 = inlined_call_operand.smem [shape: u32[39], index: -1, kind: input, shape index: {}] }
   0x1   :  { %s12347_s5 = sld [smem:[%s14549_s0]]   ;;  %s12284_s14 = smov 3  }
   0x2   :  { %s12352_s9 = sld [smem:[%s14549_s0 + %s12282_s6]]   ;;  %s12285_s18 = smov 4  }
   0x3   :  { %s12357_s13 = sld [smem:[%s14549_s0 + %s12283_s10]]   ;;  %s12286_s22 = smov 5  }
   0x4   :  { %s12362_s17 = sld [smem:[%s14549_s0 + %s12284_s14]]   ;;  %s12287_s26 = smov 6  }
   0x5   :  { %s12367_s21 = sld [smem:[%s14549_s0 + %s12285_s18]]   ;;  %s12288_s30 = smov 7  }
   0x6   :  { %s12372_s25 = sld [smem:[%s14549_s0 + %s12286_s22]]   ;;  %s12289_s4 = smov 8  }
   0x7   :  { %s12377_s29 = sld [smem:[%s14549_s0 + %s12287_s26]]   ;;  %s12290_s10 = smov 9  }
   0x8   :  { %14569 = sst [smem:[#allocation32_spill]] %s12352_s9  ;;  %s12291_s15 = smov 10  }
   0x9   :  { %14570 = sst [smem:[#allocation33_spill]] %s12357_s13  ;;  %s12292_s20 = smov 11  }
   0xa   :  { %s12382_s3 = sld [smem:[%s14549_s0 + %s12288_s30]]   ;;  %s12293_s26 = smov 12  }
   0xb   :  { %14571 = sst [smem:[#allocation34_spill]] %s12367_s21  ;;  %s12294_s1 = smov 13  }
   0xc   :  { %s12387_s8 = sld [smem:[%s14549_s0 + %s12289_s4]]   ;;  %s12295_s7 = smov 14  }
   0xd   :  { %14572 = sst [smem:[#allocation35_spill]] %s12377_s29  ;;  %s12297_s22 = smov 16  }
   0xe   :  { %s12392_s14 = sld [smem:[%s14549_s0 + %s12290_s10]]   ;;  %s12298_s28 = smov 17  }
   0xf   :  { %s12397_s19 = sld [smem:[%s14549_s0 + %s12291_s15]]   ;;  %s12296_s15 = smov 15  }
  0x10   :  { %14573 = sst [smem:[#allocation36_spill]] %s12382_s3 }
  0x11   :  { %s12402_s24 = sld [smem:[%s14549_s0 + %s12292_s20]]  }
  0x12   :  { %14574 = sst [smem:[#allocation37_spill]] %s12387_s8 }
  0x13   :  { %s12407_s30 = sld [smem:[%s14549_s0 + %s12293_s26]]  }
  0x14   :  { %14575 = sst [smem:[#allocation38_spill]] %s12392_s14 }
  0x15   :  { %s12412_s6 = sld [smem:[%s14549_s0 + %s12294_s1]]  }
  0x16   :  { %s12417_s12 = sld [smem:[%s14549_s0 + %s12295_s7]]   ;;  %s12299_s7 = smov 18  }
  0x17   :  { %14576 = sst [smem:[#allocation39_spill]] %s12402_s24 }
  0x18   :  { %s12422_s20 = sld [smem:[%s14549_s0 + %s12296_s15]]   ;;  %s12300_s15 = smov 19  }
  0x19   :  { %s12427_s27 = sld [smem:[%s14549_s0 + %s12297_s22]]   ;;  %s12301_s22 = smov 20  }
  0x1a   :  { %s12432_s4 = sld [smem:[%s14549_s0 + %s12298_s28]]   ;;  %s12302_s28 = smov 21  }
  0x1b   :  { %s12447_s24 = sld [smem:[%s14549_s0 + %s12301_s22]]   ;;  %s12305_s22 = smov 24  }
  0x1c   :  { %14577 = sst [smem:[#allocation40_spill]] %s12417_s12 }
  0x1d   :  { %s12437_s12 = sld [smem:[%s14549_s0 + %s12299_s7]]   ;;  %s12303_s7 = smov 22  }
  0x1e   :  { %14578 = sst [smem:[#allocation41_spill]] %s12422_s20 }
  0x1f   :  { %s12442_s20 = sld [smem:[%s14549_s0 + %s12300_s15]]   ;;  %s12304_s15 = smov 23  }
  0x20   :  { %14579 = sst [smem:[#allocation42_spill]] %s12432_s4 }
  0x21   :  { %s12452_s4 = sld [smem:[%s14549_s0 + %s12302_s28]]   ;;  %s12306_s28 = smov 25  }
  0x22   :  { %s12457_s14 = sld [smem:[%s14549_s0 + %s12303_s7]]   ;;  %s12307_s7 = smov 26  }
  0x23   :  { %s12467_s8 = sld [smem:[%s14549_s0 + %s12305_s22]]   ;;  %s12309_s22 = smov 28  }
  0x25   :  { %14580 = sst [smem:[#allocation43_spill]] %s12442_s20 }
  0x26   :  { %s12462_s20 = sld [smem:[%s14549_s0 + %s12304_s15]]   ;;  %s12308_s15 = smov 27  }
  0x27   :  { %14581 = sst [smem:[#allocation44_spill]] %s12452_s4 }
  0x28   :  { %14582 = sst [smem:[#allocation45_spill]] %s12457_s14 }
  0x29   :  { %14584 = sst [smem:[#allocation47_spill]] %s12467_s8 }
  0x2a   :  { %s12472_s4 = sld [smem:[%s14549_s0 + %s12306_s28]]   ;;  %s12310_s28 = smov 29  }
  0x2b   :  { %s12477_s14 = sld [smem:[%s14549_s0 + %s12307_s7]]   ;;  %s12311_s7 = smov 30  }
  0x2c   :  { %14583 = sst [smem:[#allocation46_spill]] %s12462_s20 }
  0x2d   :  { %s12482_s20 = sld [smem:[%s14549_s0 + %s12308_s15]]   ;;  %s12312_s15 = smov 31  }
  0x2e   :  { %s12487_s8 = sld [smem:[%s14549_s0 + %s12309_s22]]   ;;  %s12313_s22 = smov 32  }
  0x2f   :  { %s12492_s29 = sld [smem:[%s14549_s0 + %s12310_s28]]   ;;  %s12314_s28 = smov 33  }
  0x30   :  { %s12507_s3 = sld [smem:[%s14549_s0 + %s12313_s22]]   ;;  %s12317_s22 = smov 36  }
  0x31   :  { %14585 = sst [smem:[#allocation48_spill]] %s12477_s14 }
  0x32   :  { %s12497_s14 = sld [smem:[%s14549_s0 + %s12311_s7]]   ;;  %s12315_s7 = smov 34  }
  0x33   :  { %14586 = sst [smem:[#allocation49_spill]] %s12482_s20 }
  0x34   :  { %s12502_s20 = sld [smem:[%s14549_s0 + %s12312_s15]]   ;;  %s12316_s15 = smov 35  }
  0x35   :  { %14587 = sst [smem:[#allocation50_spill]] %s12492_s29 }
  0x36   :  { %s12512_s29 = sld [smem:[%s14549_s0 + %s12314_s28]]   ;;  %s12318_s28 = smov 37  }
  0x37   :  { %s12517_s21 = sld [smem:[%s14549_s0 + %s12315_s7]]   ;;  %s12319_s7 = smov 38  }
  0x38   :  { %s12527_s13 = sld [smem:[%s14549_s0 + %s12317_s22]]  }
  0x39   :  { %s12537_s9 = sld [smem:[%s14549_s0 + %s12319_s7]]  }
  0x3a   :  { %14588 = sst [smem:[#allocation51_spill]] %s12502_s20 }
  0x3b   :  { %s12522_s20 = sld [smem:[%s14549_s0 + %s12316_s15]]  }
  0x3c   :  { %14589 = sst [smem:[#allocation52_spill]] %s12512_s29 }
  0x3d   :  { %s12532_s29 = sld [smem:[%s14549_s0 + %s12318_s28]]  }
  0x3e   :  { %82 = vsyncpa [#allocation3], 0 }
  0x3f   :  { %83 = vsyncpa [#allocation6], 0 }
  0x40   :  { %84 = vsyncpa [#allocation9], 0 }
  0x41   :  { %85 = vsyncpa [#allocation12], 0 }
  0x42   :  { %86 = vsyncpa [#allocation15], 0 }
  0x43   :  { %87 = vsyncpa [#allocation18], 0 }
  0x44   :  { %88 = vsyncpa [#allocation21], 0 }
  0x45   :  { %89 = vsyncpa [#allocation4], 0  ;;  %s12320_s15 = smov [#allocation5]   ;;  %s12321_s18 = smov [#allocation8]  }
  0x46   :  { %s114_s16 = sshll.u32 %s12320_s15, 4  ;;  %s143_s22 = sshll.u32 %s12321_s18, 4  ;;  %s115_s16 = int_to_ptr.vmem [resolvable:$true] %s114_s16  ;;  %s12539_s22 = int_to_ptr.vmem [resolvable:$true] %s143_s22 }
  0x47   :  { %s11958_s0 = scalar_lea.hbm %s12372_s25, 64 }
  0x48   :  { %p11959_p0 = scmp.ne.s32.totalorder %s12372_s25, %s11958_s0  ;;  %p11962_p1 = scmp.lt.u32.totalorder %s11958_s0, %s12372_s25 }
  0x4a   :  { %p11964_p2 = pnand %p11962_p1, %p11959_p0 }
  0x4c   :  { %11967 = shalt.err (!%p11964_p2)
}
  0x4d   :  { %s11968_s23 = scalar_lea.vmem %s115_s16, 64  ;;  %p11973_p4 = scmp.lt.s32.totalorder %s115_s16, %s115_s16 }
  0x4e   :  { %p11969_p3 = scmp.ne.s32.totalorder %s115_s16, %s11968_s23  ;;  %p11974_p5 = scmp.lt.s32.totalorder %s11968_s23, %s11968_s23 }
  0x50   :  { %p11975_p6 = por %p11974_p5, %p11973_p4 }
  0x52   :  { %p11976_p7 = pnand %p11975_p6, %p11969_p3 }
  0x54   :  { %11979 = shalt.err (!%p11976_p7)
}
  0x55   :  { %117 = dma.hbm_to_vmem [thread:$0]  %s12372_s25, 64, %s115_s16, [#allocation6]  }
  0x56   :  { %s11980_s26 = scalar_lea.hbm %s12407_s30, 4608 }
  0x57   :  { %p11981_p8 = scmp.ne.s32.totalorder %s12407_s30, %s11980_s26  ;;  %p11984_p9 = scmp.lt.u32.totalorder %s11980_s26, %s12407_s30 }
  0x59   :  { %p11986_p10 = pnand %p11984_p9, %p11981_p8 }
  0x5b   :  { %11989 = shalt.err (!%p11986_p10)
}
  0x5c   :  { %s11990_s28 = scalar_lea.vmem %s12539_s22, 4608  ;;  %p11995_p12 = scmp.lt.s32.totalorder %s12539_s22, %s12539_s22 }
  0x5d   :  { %p11991_p11 = scmp.ne.s32.totalorder %s12539_s22, %s11990_s28  ;;  %p11996_p13 = scmp.lt.s32.totalorder %s11990_s28, %s11990_s28 }
  0x5f   :  { %p11997_p0 = por %p11996_p13, %p11995_p12 }
  0x61   :  { %p11998_p1 = pnand %p11997_p0, %p11991_p11 }
  0x63   :  { %12001 = shalt.err (!%p11998_p1)
}
  0x64   :  { %s12322_s1 = smov 128   ;;  %s12323_s25 = smov 8  }
  0x65   :  { %149 = dma.hbm_to_vmem [thread:$0]  %s12407_s30, 4608, %s12539_s22, [#allocation9], %s12322_s1, %s12322_s1, %s12323_s25  }
  0x66   :  { %s12324_s2 = smov [#allocation11]   ;;  %s12325_s10 = smov [#allocation14]  }
  0x67   :  { %s170_s7 = sshll.u32 %s12324_s2, 4  ;;  %s194_s11 = sshll.u32 %s12325_s10, 4  ;;  %s171_s7 = int_to_ptr.vmem [resolvable:$true] %s170_s7  ;;  %s195_s11 = int_to_ptr.vmem [resolvable:$true] %s194_s11 }
  0x68   :  { %s12002_s15 = scalar_lea.hbm %s12427_s27, 32 }
  0x69   :  { %p12003_p2 = scmp.ne.s32.totalorder %s12427_s27, %s12002_s15  ;;  %p12006_p3 = scmp.lt.u32.totalorder %s12002_s15, %s12427_s27 }
  0x6b   :  { %p12008_p4 = pnand %p12006_p3, %p12003_p2 }
  0x6d   :  { %12011 = shalt.err (!%p12008_p4)
}
  0x6e   :  { %s12012_s16 = scalar_lea.vmem %s171_s7, 32  ;;  %p12017_p6 = scmp.lt.s32.totalorder %s171_s7, %s171_s7 }
  0x6f   :  { %p12013_p5 = scmp.ne.s32.totalorder %s171_s7, %s12012_s16  ;;  %p12018_p7 = scmp.lt.s32.totalorder %s12012_s16, %s12012_s16 }
  0x71   :  { %p12019_p8 = por %p12018_p7, %p12017_p6 }
  0x73   :  { %p12020_p9 = pnand %p12019_p8, %p12013_p5 }
  0x75   :  { %12023 = shalt.err (!%p12020_p9)
}
  0x76   :  { %173 = dma.hbm_to_vmem [thread:$0]  %s12427_s27, 32, %s171_s7, [#allocation12]  }
  0x77   :  { %s12024_s30 = scalar_lea.hbm %s12447_s24, 32 }
  0x78   :  { %p12025_p10 = scmp.ne.s32.totalorder %s12447_s24, %s12024_s30  ;;  %p12028_p11 = scmp.lt.u32.totalorder %s12024_s30, %s12447_s24 }
  0x7a   :  { %p12030_p12 = pnand %p12028_p11, %p12025_p10 }
  0x7c   :  { %12033 = shalt.err (!%p12030_p12)
}
  0x7d   :  { %s12034_s18 = scalar_lea.vmem %s195_s11, 32  ;;  %p12039_p0 = scmp.lt.s32.totalorder %s195_s11, %s195_s11 }
  0x7e   :  { %p12035_p13 = scmp.ne.s32.totalorder %s195_s11, %s12034_s18  ;;  %p12040_p1 = scmp.lt.s32.totalorder %s12034_s18, %s12034_s18 }
  0x80   :  { %p12041_p2 = por %p12040_p1, %p12039_p0 }
  0x82   :  { %p12042_p3 = pnand %p12041_p2, %p12035_p13 }
  0x84   :  { %12045 = shalt.err (!%p12042_p3)
}
  0x85   :  { %197 = dma.hbm_to_vmem [thread:$0]  %s12447_s24, 32, %s195_s11, [#allocation15]  }
  0x86   :  { %s12326_s22 = smov [#allocation17]   ;;  %s12327_s27 = smov [#allocation20]  }
  0x87   :  { %s226_s0 = sshll.u32 %s12326_s22, 4  ;;  %s251_s23 = sshll.u32 %s12327_s27, 4  ;;  %s227_s0 = int_to_ptr.vmem [resolvable:$true] %s226_s0  ;;  %s12565_s23 = int_to_ptr.vmem [resolvable:$true] %s251_s23 }
  0x88   :  { %s12046_s26 = scalar_lea.hbm %s12487_s8, 32 }
  0x89   :  { %p12047_p4 = scmp.ne.s32.totalorder %s12487_s8, %s12046_s26  ;;  %p12050_p5 = scmp.lt.u32.totalorder %s12046_s26, %s12487_s8 }
  0x8b   :  { %p12052_p6 = pnand %p12050_p5, %p12047_p4 }
  0x8d   :  { %12055 = shalt.err (!%p12052_p6)
}
  0x8e   :  { %s12056_s28 = scalar_lea.vmem %s227_s0, 32  ;;  %p12061_p8 = scmp.lt.s32.totalorder %s227_s0, %s227_s0 }
  0x8f   :  { %p12057_p7 = scmp.ne.s32.totalorder %s227_s0, %s12056_s28  ;;  %p12062_p9 = scmp.lt.s32.totalorder %s12056_s28, %s12056_s28 }
  0x91   :  { %p12063_p10 = por %p12062_p9, %p12061_p8 }
  0x93   :  { %p12064_p11 = pnand %p12063_p10, %p12057_p7 }
  0x95   :  { %12067 = shalt.err (!%p12064_p11)
}
  0x96   :  { %229 = dma.hbm_to_vmem [thread:$0]  %s12487_s8, 32, %s227_s0, [#allocation18]  }
  0x97   :  { %s12068_s24 = scalar_lea.hbm %s12507_s3, 3072 }
  0x98   :  { %p12069_p12 = scmp.ne.s32.totalorder %s12507_s3, %s12068_s24  ;;  %p12072_p13 = scmp.lt.u32.totalorder %s12068_s24, %s12507_s3 }
  0x9a   :  { %p12074_p0 = pnand %p12072_p13, %p12069_p12 }
  0x9c   :  { %12077 = shalt.err (!%p12074_p0)
}
  0x9d   :  { %s12078_s2 = scalar_lea.vmem %s12565_s23, 3072  ;;  %p12083_p2 = scmp.lt.s32.totalorder %s12565_s23, %s12565_s23 }
  0x9e   :  { %p12079_p1 = scmp.ne.s32.totalorder %s12565_s23, %s12078_s2  ;;  %p12084_p3 = scmp.lt.s32.totalorder %s12078_s2, %s12078_s2 }
  0xa0   :  { %p12085_p4 = por %p12084_p3, %p12083_p2 }
  0xa2   :  { %p12086_p5 = pnand %p12085_p4, %p12079_p1 }
  0xa4   :  { %12089 = shalt.err (!%p12086_p5)
}
  0xa5   :  { %257 = dma.hbm_to_vmem [thread:$0]  %s12507_s3, 3072, %s12565_s23, [#allocation21], %s12322_s1, %s12322_s1, %s12323_s25  }
  0xa6   :  { %s12328_s8 = smov [#allocation2]   ;;  %s12329_s10 = smov [#allocation7]  }
  0xa7   :  { %s102_s7 = sshll.u32 %s12328_s8, 4  ;;  %s132_s11 = sshll.u32 %s12329_s10, 4  ;;  %s103_s7 = int_to_ptr.vmem [resolvable:$true] %s102_s7  ;;  %s133_s11 = int_to_ptr.vmem [resolvable:$true] %s132_s11 }
  0xa8   :  { %s12090_s15 = scalar_lea.hbm %s12362_s17, 64 }
  0xa9   :  { %p12091_p6 = scmp.ne.s32.totalorder %s12362_s17, %s12090_s15  ;;  %p12094_p7 = scmp.lt.u32.totalorder %s12090_s15, %s12362_s17 }
  0xab   :  { %p12096_p8 = pnand %p12094_p7, %p12091_p6 }
  0xad   :  { %12099 = shalt.err (!%p12096_p8)
}
  0xae   :  { %s12100_s16 = scalar_lea.vmem %s103_s7, 64  ;;  %p12105_p10 = scmp.lt.s32.totalorder %s103_s7, %s103_s7 }
  0xaf   :  { %p12101_p9 = scmp.ne.s32.totalorder %s103_s7, %s12100_s16  ;;  %p12106_p11 = scmp.lt.s32.totalorder %s12100_s16, %s12100_s16 }
  0xb1   :  { %p12107_p12 = por %p12106_p11, %p12105_p10 }
  0xb3   :  { %p12108_p13 = pnand %p12107_p12, %p12101_p9 }
  0xb5   :  { %12111 = shalt.err (!%p12108_p13)
}
  0xb6   :  { %105 = dma.hbm_to_vmem [thread:$0]  %s12362_s17, 64, %s103_s7, [#allocation3]  }
  0xb7   :  { %s12112_s3 = scalar_lea.hbm %s12397_s19, 32 }
  0xb8   :  { %p12113_p0 = scmp.ne.s32.totalorder %s12397_s19, %s12112_s3  ;;  %p12116_p1 = scmp.lt.u32.totalorder %s12112_s3, %s12397_s19 }
  0xba   :  { %p12118_p2 = pnand %p12116_p1, %p12113_p0 }
  0xbc   :  { %12121 = shalt.err (!%p12118_p2)
}
  0xbd   :  { %s12122_s30 = scalar_lea.vmem %s133_s11, 32  ;;  %p12127_p4 = scmp.lt.s32.totalorder %s133_s11, %s133_s11 }
  0xbe   :  { %p12123_p3 = scmp.ne.s32.totalorder %s133_s11, %s12122_s30  ;;  %p12128_p5 = scmp.lt.s32.totalorder %s12122_s30, %s12122_s30 }
  0xc0   :  { %p12129_p6 = por %p12128_p5, %p12127_p4 }
  0xc2   :  { %p12130_p7 = pnand %p12129_p6, %p12123_p3 }
  0xc4   :  { %12133 = shalt.err (!%p12130_p7)
}
  0xc5   :  { %135 = dma.hbm_to_vmem [thread:$0]  %s12397_s19, 32, %s133_s11, [#allocation6]  }
  0xc6   :  { %s12330_s18 = smov [#allocation10]   ;;  %s12331_s17 = smov [#allocation13]  }
  0xc7   :  { %s156_s22 = sshll.u32 %s12330_s18, 4  ;;  %s182_s0 = sshll.u32 %s12331_s17, 4  ;;  %s157_s22 = int_to_ptr.vmem [resolvable:$true] %s156_s22  ;;  %s183_s0 = int_to_ptr.vmem [resolvable:$true] %s182_s0 }
  0xc8   :  { %s12134_s27 = scalar_lea.hbm %s12412_s6, 32 }
  0xc9   :  { %p12135_p8 = scmp.ne.s32.totalorder %s12412_s6, %s12134_s27  ;;  %p12138_p9 = scmp.lt.u32.totalorder %s12134_s27, %s12412_s6 }
  0xcb   :  { %p12140_p10 = pnand %p12138_p9, %p12135_p8 }
  0xcd   :  { %12143 = shalt.err (!%p12140_p10)
}
  0xce   :  { %s12144_s23 = scalar_lea.vmem %s157_s22, 32  ;;  %p12149_p12 = scmp.lt.s32.totalorder %s157_s22, %s157_s22 }
  0xcf   :  { %p12145_p11 = scmp.ne.s32.totalorder %s157_s22, %s12144_s23  ;;  %p12150_p13 = scmp.lt.s32.totalorder %s12144_s23, %s12144_s23 }
  0xd1   :  { %p12151_p0 = por %p12150_p13, %p12149_p12 }
  0xd3   :  { %p12152_p1 = pnand %p12151_p0, %p12145_p11 }
  0xd5   :  { %12155 = shalt.err (!%p12152_p1)
}
  0xd6   :  { %159 = dma.hbm_to_vmem [thread:$0]  %s12412_s6, 32, %s157_s22, [#allocation9]  }
  0xd7   :  { %s12156_s19 = scalar_lea.hbm %s12437_s12, 32 }
  0xd8   :  { %p12157_p2 = scmp.ne.s32.totalorder %s12437_s12, %s12156_s19  ;;  %p12160_p3 = scmp.lt.u32.totalorder %s12156_s19, %s12437_s12 }
  0xda   :  { %p12162_p4 = pnand %p12160_p3, %p12157_p2 }
  0xdc   :  { %12165 = shalt.err (!%p12162_p4)
}
  0xdd   :  { %s12166_s26 = scalar_lea.vmem %s183_s0, 32  ;;  %p12171_p6 = scmp.lt.s32.totalorder %s183_s0, %s183_s0 }
  0xde   :  { %p12167_p5 = scmp.ne.s32.totalorder %s183_s0, %s12166_s26  ;;  %p12172_p7 = scmp.lt.s32.totalorder %s12166_s26, %s12166_s26 }
  0xe0   :  { %p12173_p8 = por %p12172_p7, %p12171_p6 }
  0xe2   :  { %p12174_p9 = pnand %p12173_p8, %p12167_p5 }
  0xe4   :  { %12177 = shalt.err (!%p12174_p9)
}
  0xe5   :  { %185 = dma.hbm_to_vmem [thread:$0]  %s12437_s12, 32, %s183_s0, [#allocation12]  }
  0xe6   :  { %s12332_s28 = smov [#allocation16]   ;;  %s12333_s6 = smov [#allocation19]  }
  0xe7   :  { %s212_s24 = sshll.u32 %s12332_s28, 4  ;;  %s237_s2 = sshll.u32 %s12333_s6, 4  ;;  %s213_s24 = int_to_ptr.vmem [resolvable:$true] %s212_s24  ;;  %s12599_s2 = int_to_ptr.vmem [resolvable:$true] %s237_s2 }
  0xe8   :  { %s12178_s8 = scalar_lea.hbm %s12472_s4, 32 }
  0xe9   :  { %p12179_p10 = scmp.ne.s32.totalorder %s12472_s4, %s12178_s8  ;;  %p12182_p11 = scmp.lt.u32.totalorder %s12178_s8, %s12472_s4 }
  0xeb   :  { %p12184_p12 = pnand %p12182_p11, %p12179_p10 }
  0xed   :  { %12187 = shalt.err (!%p12184_p12)
}
  0xee   :  { %s12188_s7 = scalar_lea.vmem %s213_s24, 32  ;;  %p12193_p0 = scmp.lt.s32.totalorder %s213_s24, %s213_s24 }
  0xef   :  { %p12189_p13 = scmp.ne.s32.totalorder %s213_s24, %s12188_s7  ;;  %p12194_p1 = scmp.lt.s32.totalorder %s12188_s7, %s12188_s7 }
  0xf1   :  { %p12195_p2 = por %p12194_p1, %p12193_p0 }
  0xf3   :  { %p12196_p3 = pnand %p12195_p2, %p12189_p13 }
  0xf5   :  { %12199 = shalt.err (!%p12196_p3)
}
  0xf6   :  { %215 = dma.hbm_to_vmem [thread:$0]  %s12472_s4, 32, %s213_s24, [#allocation15]  }
  0xf7   :  { %s12200_s12 = scalar_lea.hbm %s12497_s14, 3072 }
  0xf8   :  { %p12201_p4 = scmp.ne.s32.totalorder %s12497_s14, %s12200_s12  ;;  %p12204_p5 = scmp.lt.u32.totalorder %s12200_s12, %s12497_s14 }
  0xfa   :  { %p12206_p6 = pnand %p12204_p5, %p12201_p4 }
  0xfc   :  { %12209 = shalt.err (!%p12206_p6)
}
  0xfd   :  { %s12210_s10 = scalar_lea.vmem %s12599_s2, 3072  ;;  %p12215_p8 = scmp.lt.s32.totalorder %s12599_s2, %s12599_s2 }
  0xfe   :  { %p12211_p7 = scmp.ne.s32.totalorder %s12599_s2, %s12210_s10  ;;  %p12216_p9 = scmp.lt.s32.totalorder %s12210_s10, %s12210_s10 }
 0x100   :  { %p12217_p10 = por %p12216_p9, %p12215_p8 }
 0x102   :  { %p12218_p11 = pnand %p12217_p10, %p12211_p7 }
 0x104   :  { %12221 = shalt.err (!%p12218_p11)
}
 0x105   :  { %243 = dma.hbm_to_vmem [thread:$0]  %s12497_s14, 3072, %s12599_s2, [#allocation18], %s12322_s1, %s12322_s1, %s12323_s25  }
 0x106   :  { %s12334_s4 = smov [#allocation22]   ;;  %s12222_s15 = scalar_lea.hbm %s12517_s21, 3072 }
 0x107   :  { %s265_s11 = sshll.u32 %s12334_s4, 4  ;;  %p12223_p12 = scmp.ne.s32.totalorder %s12517_s21, %s12222_s15  ;;  %s266_s11 = int_to_ptr.vmem [resolvable:$true] %s265_s11 }
 0x108   :  { %p12226_p13 = scmp.lt.u32.totalorder %s12222_s15, %s12517_s21 }
 0x10a   :  { %p12228_p0 = pnand %p12226_p13, %p12223_p12 }
 0x10c   :  { %12231 = shalt.err (!%p12228_p0)
}
 0x10d   :  { %s12232_s16 = scalar_lea.vmem %s266_s11, 3072  ;;  %p12237_p2 = scmp.lt.s32.totalorder %s266_s11, %s266_s11 }
 0x10e   :  { %p12233_p1 = scmp.ne.s32.totalorder %s266_s11, %s12232_s16  ;;  %p12238_p3 = scmp.lt.s32.totalorder %s12232_s16, %s12232_s16 }
 0x110   :  { %p12239_p4 = por %p12238_p3, %p12237_p2 }
 0x112   :  { %p12240_p5 = pnand %p12239_p4, %p12233_p1 }
 0x114   :  { %12243 = shalt.err (!%p12240_p5)
}
 0x115   :  { %271 = dma.hbm_to_vmem [thread:$0]  %s12517_s21, 3072, %s266_s11, [#allocation21], %s12322_s1, %s12322_s1, %s12323_s25  }
 0x116   :  { %12266 = dma.done.wait [#allocation3], 64  }
 0x117   :  { %12267 = vsyncadd [#allocation3], 4294967232 }
 0x118   :  { %12268 = dma.done.wait [#allocation6], 96  }
 0x119   :  { %12269 = vsyncadd [#allocation6], 4294967200 }
 0x11a   :  { %12270 = dma.done.wait [#allocation9], 4640  }
 0x11b   :  { %12271 = vsyncadd [#allocation9], 4294962656 }
 0x11c   :  { %12272 = dma.done.wait [#allocation12], 64  }
 0x11d   :  { %12273 = vsyncadd [#allocation12], 4294967232 }
 0x11e   :  { %12274 = dma.done.wait [#allocation15], 64  }
 0x11f   :  { %12275 = vsyncadd [#allocation15], 4294967232 }
 0x120   :  { %12276 = dma.done.wait [#allocation18], 3104  }
 0x121   :  { %12277 = vsyncadd [#allocation18], 4294964192 }
 0x122   :  { %12278 = dma.done.wait [#allocation21], 6144  }
 0x123   :  { %12279 = vsyncadd [#allocation21], 4294961152  ;;  %s14590_s21 = sld [smem:[#allocation32_spill]]  ;;  %v317_v0 = vld [vmem:[%s12347_s5] sm:$0xff]  ;;  %v318_v1 = vld [vmem:[%s12347_s5 + $0x8] sm:$0xff]  ;;  %vm349_vm0 = vcmask 523264  }
 0x124   :  { %v319_v2 = vld [vmem:[%s12347_s5 + $0x10] sm:$0xff]  ;;  %v12627_v3 = vpack.c.bf16 %v318_v1, %v317_v0  ;;  %s14591_s14 = sld [smem:[#allocation33_spill]]  ;;  %v320_v4 = vld [vmem:[%s12347_s5 + $0x18] sm:$0xff]  ;;  %v321_v6 = vld [vmem:[%s12347_s5 + $0x20] sm:$0xff]  ;;  %vm656_vm1 = vcmask 785408   ;;  %s14593_s1 = sld [smem:[#allocation36_spill]] }
 0x125   :  { %v12630_v5 = vpack.c.bf16 %v320_v4, %v319_v2  ;;  %v322_v7 = vld [vmem:[%s12347_s5 + $0x28] sm:$0xff]  ;;  %v323_v10 = vld [vmem:[%s12347_s5 + $0x30] sm:$0xff]  ;;  %v324_v11 = vld [vmem:[%s12347_s5 + $0x38] sm:$0xff]  ;;  %s14592_s5 = sld [smem:[#allocation34_spill]]  ;;  %s14594_s25 = sld [smem:[#allocation35_spill]]  ;;  %vm2531_vm2 = vcmask 556032  }
 0x126   :  { %10408 = vmatprep.subr.bf16.mxu0 %v12627_v3  ;;  %v12642_v9 = vpack.c.bf16 %v322_v7, %v321_v6  ;;  %v12648_v12 = vpack.c.bf16 %v324_v11, %v323_v10  ;;  %s14595_s3 = sld [smem:[#allocation37_spill]]  ;;  %s14596_s30 = sld [smem:[#allocation38_spill]]  ;;  %vm2568_vm3 = vcmask 1043456   ;;  %vm2909_vm4 = vcmask 130048  }
 0x127   :  { %10410 = vmatpush3.bf16.msra.mxu0 %v12627_v3  ;;  %s14597_s18 = sld [smem:[#allocation39_spill]]  ;;  %s14598_s22 = sld [smem:[#allocation40_spill]]  ;;  %vm4059_vm5 = vcmask 261120   ;;  %vm12337_vm6 = vmmov 0   ;;  %vm5704_vm7 = vcmask 293888   ;;  %vm7883_vm8 = vcmask 74752  }
 0x128   :  { %10412 = vmatprep.subr.bf16.mxu0 %v12630_v5  ;;  %s14599_s17 = sld [smem:[#allocation41_spill]]  ;;  %s14600_s0 = sld [smem:[#allocation42_spill]] }
 0x129   :  { %v12635_v8 = vld [vmem:[%s14590_s21] sm:$0xff]  ;;  %v12662_v25 = vld [vmem:[%s14590_s21 + $0x8] sm:$0xff]  ;;  %v12665_v26 = vld [vmem:[%s14590_s21 + $0x10] sm:$0xff]  ;;  %s14601_s27 = sld [smem:[#allocation43_spill]]  ;;  %s14602_s23 = sld [smem:[#allocation45_spill]] }
 0x12a   :  { %9380 = vmatprep.mubr.msk.f32.mxu0 %vm349_vm0, %v12635_v8  ;;  %v7981_v13 = vld [vmem:[%s14591_s14 + $0xc8] sm:$0xff]  ;;  %v7983_v14 = vld [vmem:[%s14591_s14 + $0xd8] sm:$0xff]  ;;  %v7980_v15 = vld [vmem:[%s14591_s14 + $0xc0] sm:$0xff]  ;;  %s14603_s19 = sld [smem:[#allocation44_spill]]  ;;  %s14604_s26 = sld [smem:[#allocation47_spill]] }
 0x12b   :  { %10414 = vmatpush3.bf16.msra.mxu0 %v12630_v5  ;;  %v7982_v16 = vld [vmem:[%s14591_s14 + $0xd0] sm:$0xff]  ;;  %v10423_v17 = vpack.c.bf16 %v7983_v14, %v7981_v13  ;;  %v7985_v19 = vld [vmem:[%s14591_s14 + $0xe8] sm:$0xff]  ;;  %v7987_v20 = vld [vmem:[%s14591_s14 + $0xf8] sm:$0xff]  ;;  %v12335_v13 = vmov 0.0   ;;  %s14605_s28 = sld [smem:[#allocation46_spill]]  ;;  %s14606_s24 = sld [smem:[#allocation49_spill]] }
 0x12c   :  { %10416 = vmatprep.subr.bf16.mxu0 %v12642_v9  ;;  %v10425_v18 = vpack.c.bf16 %v7982_v16, %v7980_v15  ;;  %v7984_v21 = vld [vmem:[%s14591_s14 + $0xe0] sm:$0xff]  ;;  %v10427_v22 = vpack.c.bf16 %v7987_v20, %v7985_v19  ;;  %v7986_v23 = vld [vmem:[%s14591_s14 + $0xf0] sm:$0xff]  ;;  %v12672_v27 = vld [vmem:[%s14590_s21 + $0x18] sm:$0xff]  ;;  %745 = vmatprep.mubr.f32.mxu1 %v12335_v13  ;;  %s14607_s6 = sld [smem:[#allocation48_spill]]  ;;  %s14608_s2 = sld [smem:[#allocation50_spill]] }
 0x12d   :  { %10424 = vmatprep.subr.bf16.mxu1 %v10423_v17  ;;  %v10429_v24 = vpack.c.bf16 %v7986_v23, %v7984_v21  ;;  %v12675_v28 = vld [vmem:[%s14590_s21 + $0x20] sm:$0xff]  ;;  %v12682_v29 = vld [vmem:[%s14590_s21 + $0x28] sm:$0xff]  ;;  %v12685_v30 = vld [vmem:[%s14590_s21 + $0x30] sm:$0xff]  ;;  %s14609_s8 = sld [smem:[#allocation51_spill]]  ;;  %s14610_s7 = sld [smem:[#allocation52_spill]] }
 0x12e   :  { %10426 = vmatpush1.bf16.msra.mxu1 %v10425_v18  ;;  %v12692_v31 = vld [vmem:[%s14590_s21 + $0x38] sm:$0xff]  ;;  %v12695_v32 = vld [vmem:[%s14590_s21 + $0x40] sm:$0xff]  ;;  %v12702_v33 = vld [vmem:[%s14590_s21 + $0x48] sm:$0xff] }
 0x12f   :  { %10418 = vmatpush3.bf16.msra.mxu0 %v12642_v9  ;;  %10428 = vmatprep.subr.bf16.mxu1 %v10427_v22  ;;  %v12705_v34 = vld [vmem:[%s14590_s21 + $0x50] sm:$0xff]  ;;  %v12712_v35 = vld [vmem:[%s14590_s21 + $0x58] sm:$0xff]  ;;  %v12715_v36 = vld [vmem:[%s14590_s21 + $0x60] sm:$0xff] }
 0x130   :  { %10420 = vmatprep.subr.bf16.mxu0 %v12648_v12  ;;  %v12722_v37 = vld [vmem:[%s14590_s21 + $0x68] sm:$0xff]  ;;  %v12725_v38 = vld [vmem:[%s14590_s21 + $0x70] sm:$0xff]  ;;  %v12732_v39 = vld [vmem:[%s14590_s21 + $0x78] sm:$0xff] }
 0x131   :  { %v12735_v40 = vld [vmem:[%s14590_s21 + $0x80] sm:$0xff]  ;;  %v12742_v41 = vld [vmem:[%s14590_s21 + $0x88] sm:$0xff]  ;;  %v12745_v42 = vld [vmem:[%s14590_s21 + $0x90] sm:$0xff] }
 0x132   :  { %10430 = vmatpush1.bf16.msra.mxu1 %v10429_v24  ;;  %v12752_v43 = vld [vmem:[%s14590_s21 + $0x98] sm:$0xff]  ;;  %v12755_v44 = vld [vmem:[%s14590_s21 + $0xa0] sm:$0xff]  ;;  %v12762_v45 = vld [vmem:[%s14590_s21 + $0xa8] sm:$0xff] }
 0x133   :  { %10422 = vmatpush3.bf16.msra.mxu0 %v12648_v12  ;;  %v12765_v46 = vld [vmem:[%s14590_s21 + $0xb0] sm:$0xff]  ;;  %v12772_v47 = vld [vmem:[%s14590_s21 + $0xb8] sm:$0xff]  ;;  %v7989_v48 = vld [vmem:[%s14591_s14 + $0x108] sm:$0xff] }
 0x134   :  { %v7991_v49 = vld [vmem:[%s14591_s14 + $0x118] sm:$0xff]  ;;  %v7988_v51 = vld [vmem:[%s14591_s14 + $0x100] sm:$0xff]  ;;  %v7990_v52 = vld [vmem:[%s14591_s14 + $0x110] sm:$0xff] }
 0x135   :  { %v10431_v50 = vpack.c.bf16 %v7991_v49, %v7989_v48  ;;  %v10433_v53 = vpack.c.bf16 %v7990_v52, %v7988_v51  ;;  %v7993_v54 = vld [vmem:[%s14591_s14 + $0x128] sm:$0xff]  ;;  %v7995_v55 = vld [vmem:[%s14591_s14 + $0x138] sm:$0xff]  ;;  %v7992_v57 = vld [vmem:[%s14591_s14 + $0x120] sm:$0xff] }
 0x136   :  { %9381 = vmatmul.mubr.msk.f32.vlgmr.msra.gmra.mrb[0].mxu0 %vm349_vm0, %v12662_v25  ;;  %v10435_v56 = vpack.c.bf16 %v7995_v55, %v7993_v54  ;;  %v7994_v58 = vld [vmem:[%s14591_s14 + $0x130] sm:$0xff]  ;;  %v7997_v60 = vld [vmem:[%s14591_s14 + $0x148] sm:$0xff]  ;;  %v7999_v61 = vld [vmem:[%s14591_s14 + $0x158] sm:$0xff] }
 0x137   :  { %9383 = vmatprep.mubr.msk.f32.mxu0 %vm349_vm0, %v12665_v26  ;;  %10432 = vmatprep.subr.bf16.mxu1 %v10431_v50  ;;  %v10437_v59 = vpack.c.bf16 %v7994_v58, %v7992_v57  ;;  %v10439_v62 = vpack.c.bf16 %v7999_v61, %v7997_v60  ;;  %v7996_v63 = vld [vmem:[%s14591_s14 + $0x140] sm:$0xff]  ;;  %v7998_v0 = vld [vmem:[%s14591_s14 + $0x150] sm:$0xff]  ;;  %v8001_v2 = vld [vmem:[%s14591_s14 + $0x168] sm:$0xff] }
 0x138   :  { %10434 = vmatpush1.bf16.msra.mxu1 %v10433_v53  ;;  %v10441_v1 = vpack.c.bf16 %v7998_v0, %v7996_v63  ;;  %v8003_v4 = vld [vmem:[%s14591_s14 + $0x178] sm:$0xff]  ;;  %v8000_v7 = vld [vmem:[%s14591_s14 + $0x160] sm:$0xff]  ;;  %v8002_v10 = vld [vmem:[%s14591_s14 + $0x170] sm:$0xff] }
 0x139   :  { %10436 = vmatprep.subr.bf16.mxu1 %v10435_v56  ;;  %v10443_v6 = vpack.c.bf16 %v8003_v4, %v8001_v2  ;;  %v10445_v11 = vpack.c.bf16 %v8002_v10, %v8000_v7  ;;  %v608_v14 = vld [vmem:[%s14591_s14 + $0x8] sm:$0xff]  ;;  %v610_v15 = vld [vmem:[%s14591_s14 + $0x18] sm:$0xff]  ;;  %v607_v24 = vld [vmem:[%s14591_s14] sm:$0xff] }
 0x13a   :  { %9384 = vmatmul.mubr.msk.f32.gmra.mrb[2].mxu0 %vm349_vm0, %v12672_v27  ;;  %v10447_v16 = vpack.c.bf16 %v610_v15, %v608_v14  ;;  %v609_v48 = vld [vmem:[%s14591_s14 + $0x10] sm:$0xff]  ;;  %v612_v50 = vld [vmem:[%s14591_s14 + $0x28] sm:$0xff]  ;;  %v614_v51 = vld [vmem:[%s14591_s14 + $0x38] sm:$0xff] }
 0x13b   :  { %9386 = vmatprep.mubr.msk.f32.mxu0 %vm349_vm0, %v12675_v28  ;;  %v10449_v52 = vpack.c.bf16 %v609_v48, %v607_v24  ;;  %v10451_v54 = vpack.c.bf16 %v614_v51, %v612_v50  ;;  %v611_v55 = vld [vmem:[%s14591_s14 + $0x20] sm:$0xff]  ;;  %v613_v56 = vld [vmem:[%s14591_s14 + $0x30] sm:$0xff]  ;;  %v616_v58 = vld [vmem:[%s14591_s14 + $0x48] sm:$0xff] }
 0x13c   :  { %10438 = vmatpush1.bf16.msra.mxu1 %v10437_v59  ;;  %v618_v59 = vld [vmem:[%s14591_s14 + $0x58] sm:$0xff]  ;;  %v10453_v60 = vpack.c.bf16 %v613_v56, %v611_v55  ;;  %v615_v63 = vld [vmem:[%s14591_s14 + $0x40] sm:$0xff]  ;;  %v617_v0 = vld [vmem:[%s14591_s14 + $0x50] sm:$0xff] }
 0x13d   :  { %10440 = vmatprep.subr.bf16.mxu1 %v10439_v62  ;;  %v10455_v62 = vpack.c.bf16 %v618_v59, %v616_v58  ;;  %v620_v2 = vld [vmem:[%s14591_s14 + $0x68] sm:$0xff]  ;;  %v622_v4 = vld [vmem:[%s14591_s14 + $0x78] sm:$0xff]  ;;  %v621_v14 = vld [vmem:[%s14591_s14 + $0x70] sm:$0xff] }
 0x13e   :  { %9387 = vmatmul.mubr.msk.f32.gmra.mrb[4].mxu0 %vm349_vm0, %v12682_v29  ;;  %v10459_v10 = vpack.c.bf16 %v622_v4, %v620_v2  ;;  %v626_v24 = vld [vmem:[%s14591_s14 + $0x98] sm:$0xff]  ;;  %v628_v55 = vld [vmem:[%s14591_s14 + $0xa8] sm:$0xff]  ;;  %v627_v59 = vld [vmem:[%s14591_s14 + $0xa0] sm:$0xff] }
 0x13f   :  { %9389 = vmatprep.mubr.msk.f32.mxu0 %vm349_vm0, %v12685_v30  ;;  %v630_v56 = vld [vmem:[%s14591_s14 + $0xb8] sm:$0xff] }
 0x140   :  { %10442 = vmatpush1.bf16.msra.mxu1 %v10441_v1  ;;  %v10467_v58 = vpack.c.bf16 %v630_v56, %v628_v55  ;;  %v8029_v55 = vld [vmem:[%s14591_s14 + $0x1c8] sm:$0xff]  ;;  %v8031_v56 = vld [vmem:[%s14591_s14 + $0x1d8] sm:$0xff] }
 0x141   :  { %10444 = vmatprep.subr.bf16.mxu1 %v10443_v6  ;;  %v10457_v6 = vpack.c.bf16 %v617_v0, %v615_v63  ;;  %v8021_v63 = vld [vmem:[%s14591_s14 + $0x188] sm:$0xff]  ;;  %v8023_v0 = vld [vmem:[%s14591_s14 + $0x198] sm:$0xff] }
 0x142   :  { %9390 = vmatmul.mubr.msk.f32.gmra.mrb[6].mxu0 %vm349_vm0, %v12692_v31  ;;  %v10471_v2 = vpack.c.bf16 %v8023_v0, %v8021_v63  ;;  %v8035_v63 = vld [vmem:[%s14591_s14 + $0x1f8] sm:$0xff] }
 0x143   :  { %9392 = vmatprep.mubr.msk.f32.mxu0 %vm349_vm0, %v12695_v32 }
 0x144   :  { %10446 = vmatpush1.bf16.msra.mxu1 %v10445_v11  ;;  %v619_v11 = vld [vmem:[%s14591_s14 + $0x60] sm:$0xff] }
 0x145   :  { %10448 = vmatprep.subr.bf16.mxu1 %v10447_v16  ;;  %v624_v16 = vld [vmem:[%s14591_s14 + $0x88] sm:$0xff]  ;;  %v10461_v48 = vpack.c.bf16 %v621_v14, %v619_v11  ;;  %v8020_v14 = vld [vmem:[%s14591_s14 + $0x180] sm:$0xff] }
 0x146   :  { %9393 = vmatmul.mubr.msk.f32.gmra.mrb[8].mxu0 %vm349_vm0, %v12702_v33  ;;  %v10463_v51 = vpack.c.bf16 %v626_v24, %v624_v16  ;;  %v8027_v24 = vld [vmem:[%s14591_s14 + $0x1b8] sm:$0xff] }
 0x147   :  { %9395 = vmatprep.mubr.msk.f32.mxu0 %vm349_vm0, %v12705_v34 }
 0x14a   :  { %9396 = vmatmul.mubr.msk.f32.gmra.mrb[10].mxu0 %vm349_vm0, %v12712_v35 }
 0x14b   :  { %9398 = vmatprep.mubr.msk.f32.mxu0 %vm349_vm0, %v12715_v36 }
 0x14e   :  { %9399 = vmatmul.mubr.msk.f32.gmra.mrb[12].mxu0 %vm349_vm0, %v12722_v37 }
 0x14f   :  { %9401 = vmatprep.mubr.msk.f32.mxu0 %vm349_vm0, %v12725_v38 }
 0x152   :  { %9402 = vmatmul.mubr.msk.f32.gmra.mrb[14].mxu0 %vm349_vm0, %v12732_v39 }
 0x153   :  { %9404 = vmatprep.mubr.msk.f32.mxu0 %vm349_vm0, %v12735_v40 }
 0x156   :  { %9405 = vmatmul.mubr.msk.f32.gmra.mrb[16].mxu0 %vm349_vm0, %v12742_v41 }
 0x157   :  { %9407 = vmatprep.mubr.msk.f32.mxu0 %vm349_vm0, %v12745_v42 }
 0x15a   :  { %9408 = vmatmul.mubr.msk.f32.gmra.mrb[18].mxu0 %vm349_vm0, %v12752_v43 }
 0x15b   :  { %9410 = vmatprep.mubr.msk.f32.mxu0 %vm349_vm0, %v12755_v44 }
 0x15e   :  { %9411 = vmatmul.mubr.msk.f32.gmra.mrb[20].mxu0 %vm349_vm0, %v12762_v45 }
 0x15f   :  { %9413 = vmatprep.mubr.msk.f32.mxu0 %vm349_vm0, %v12765_v46 }
 0x162   :  { %9414 = vmatmul.mubr.msk.f32.gmra.mrb[22].mxu0 %vm349_vm0, %v12772_v47 }
 0x163   :  { %1259 = vmatprep.mubr.f32.mxu0 %v12335_v13 }
 0x209   :  { %v12796_v17 = vpop.f32.mrb[0].mxu0 }
 0x20a   :  { %v12798_v18 = vpop.f32.mrb[1].mxu0 }
 0x20d   :  { %v12800_v19 = vpop.f32.mrb[2].mxu0 }
 0x20e   :  { %v12802_v20 = vpop.f32.mrb[3].mxu0 }
 0x211   :  { %v12804_v21 = vpop.f32.mrb[4].mxu0 }
 0x212   :  { %v12806_v22 = vpop.f32.mrb[5].mxu0 }
 0x215   :  { %v12808_v23 = vpop.f32.mrb[6].mxu0 }
 0x216   :  { %v12812_v49 = vpop.f32.mrb[7].mxu0 }
 0x219   :  { %v9394_v53 = vpop.f32.mrb[8].mxu0 }
 0x21a   :  { %v528_v57 = vpop.f32.mrb[9].mxu0 }
 0x21b   :  { %8004 = vmatmul.mubr.msk.f32.vlgmr.msra.gmra.mrb[0].mxu1 %vm656_vm1, %v528_v57 }
 0x21c   :  { %751 = vmatprep.mubr.f32.mxu1 %v12335_v13  ;;  %10450 = vmatpush1.bf16.msra.mxu1 %v10449_v52  ;;  %v623_v52 = vld [vmem:[%s14591_s14 + $0x80] sm:$0xff] }
 0x21d   :  { %v9397_v61 = vpop.f32.mrb[10].mxu0  ;;  %10452 = vmatprep.subr.bf16.mxu1 %v10451_v54 }
 0x21e   :  { %v538_v1 = vpop.f32.mrb[11].mxu0 }
 0x21f   :  { %8005 = vmatmul.mubr.msk.f32.gmra.mrb[2].mxu1 %vm656_vm1, %v9394_v53  ;;  %v625_v53 = vld [vmem:[%s14591_s14 + $0x90] sm:$0xff] }
 0x220   :  { %757 = vmatprep.mubr.f32.mxu1 %v12335_v13  ;;  %10454 = vmatpush1.bf16.msra.mxu1 %v10453_v60  ;;  %v10465_v57 = vpack.c.bf16 %v625_v53, %v623_v52  ;;  %v629_v60 = vld [vmem:[%s14591_s14 + $0xb0] sm:$0xff]  ;;  %v8024_v53 = vld [vmem:[%s14591_s14 + $0x1a0] sm:$0xff] }
 0x221   :  { %v9400_v7 = vpop.f32.mrb[12].mxu0  ;;  %10456 = vmatprep.subr.bf16.mxu1 %v10455_v62 }
 0x222   :  { %v548_v15 = vpop.f32.mrb[13].mxu0 }
 0x223   :  { %8006 = vmatmul.mubr.msk.f32.gmra.mrb[4].mxu1 %vm656_vm1, %v538_v1 }
 0x224   :  { %763 = vmatprep.mubr.f32.mxu1 %v12335_v13  ;;  %10458 = vmatpush1.bf16.msra.mxu1 %v10457_v6 }
 0x225   :  { %10460 = vmatprep.subr.bf16.mxu1 %v10459_v10  ;;  %v9403_v50 = vpop.f32.mrb[14].mxu0 }
 0x226   :  { %v558_v54 = vpop.f32.mrb[15].mxu0 }
 0x227   :  { %8007 = vmatmul.mubr.msk.f32.gmra.mrb[6].mxu1 %vm656_vm1, %v9397_v61  ;;  %v10469_v61 = vpack.c.bf16 %v629_v60, %v627_v59  ;;  %v8030_v59 = vld [vmem:[%s14591_s14 + $0x1d0] sm:$0xff]  ;;  %v8033_v60 = vld [vmem:[%s14591_s14 + $0x1e8] sm:$0xff] }
 0x228   :  { %769 = vmatprep.mubr.f32.mxu1 %v12335_v13  ;;  %10462 = vmatpush1.bf16.msra.mxu1 %v10461_v48  ;;  %v10483_v0 = vpack.c.bf16 %v8035_v63, %v8033_v60 }
 0x229   :  { %10464 = vmatprep.subr.bf16.mxu1 %v10463_v51  ;;  %v12842_v62 = vpop.f32.mrb[16].mxu0 }
 0x22a   :  { %v12846_v1 = vpop.f32.mrb[17].mxu0 }
 0x22b   :  { %8008 = vmatmul.mubr.msk.f32.gmra.mrb[8].mxu1 %vm656_vm1, %v548_v15  ;;  %v8022_v15 = vld [vmem:[%s14591_s14 + $0x190] sm:$0xff] }
 0x22c   :  { %775 = vmatprep.mubr.f32.mxu1 %v12335_v13  ;;  %10466 = vmatpush1.bf16.msra.mxu1 %v10465_v57  ;;  %v10473_v51 = vpack.c.bf16 %v8022_v15, %v8020_v14  ;;  %v10479_v57 = vpack.c.bf16 %v8031_v56, %v8029_v55  ;;  %v8037_v14 = vld [vmem:[%s14591_s14 + $0x208] sm:$0xff]  ;;  %v8039_v15 = vld [vmem:[%s14591_s14 + $0x218] sm:$0xff]  ;;  %v8040_v55 = vld [vmem:[%s14591_s14 + $0x220] sm:$0xff] }
 0x22d   :  { %10468 = vmatprep.subr.bf16.mxu1 %v10467_v58  ;;  %v12850_v4 = vpop.f32.mrb[18].mxu0  ;;  %v8028_v58 = vld [vmem:[%s14591_s14 + $0x1c0] sm:$0xff]  ;;  %v8042_v56 = vld [vmem:[%s14591_s14 + $0x230] sm:$0xff] }
 0x22e   :  { %v12852_v6 = vpop.f32.mrb[19].mxu0 }
 0x22f   :  { %8009 = vmatmul.mubr.msk.f32.gmra.mrb[10].mxu1 %vm656_vm1, %v9400_v7  ;;  %v8025_v7 = vld [vmem:[%s14591_s14 + $0x1a8] sm:$0xff] }
 0x230   :  { %781 = vmatprep.mubr.f32.mxu1 %v12335_v13  ;;  %10470 = vmatpush1.bf16.msra.mxu1 %v10469_v61  ;;  %v10475_v52 = vpack.c.bf16 %v8027_v24, %v8025_v7  ;;  %v8032_v61 = vld [vmem:[%s14591_s14 + $0x1e0] sm:$0xff]  ;;  %v10487_v7 = vpack.c.bf16 %v8039_v15, %v8037_v14  ;;  %v8081_v15 = vld [vmem:[%s14592_s5 + $0x228] sm:$0xff] }
 0x231   :  { %10472 = vmatprep.subr.bf16.mxu1 %v10471_v2  ;;  %v12856_v10 = vpop.f32.mrb[20].mxu0  ;;  %v8034_v2 = vld [vmem:[%s14591_s14 + $0x1f0] sm:$0xff]  ;;  %v8036_v24 = vld [vmem:[%s14591_s14 + $0x200] sm:$0xff] }
 0x232   :  { %v12858_v11 = vpop.f32.mrb[21].mxu0 }
 0x233   :  { %8010 = vmatmul.mubr.msk.f32.gmra.mrb[12].mxu1 %vm656_vm1, %v558_v54  ;;  %v8026_v54 = vld [vmem:[%s14591_s14 + $0x1b0] sm:$0xff] }
 0x234   :  { %787 = vmatprep.mubr.f32.mxu1 %v12335_v13 }
 0x235   :  { %v12864_v16 = vpop.f32.mrb[22].mxu0 }
 0x236   :  { %v12868_v48 = vpop.f32.mrb[23].mxu0 }
 0x237   :  { %8011 = vmatmul.mubr.msk.f32.gmra.mrb[14].mxu1 %vm656_vm1, %v9403_v50  ;;  %v10477_v50 = vpack.c.bf16 %v8026_v54, %v8024_v53  ;;  %v8043_v53 = vld [vmem:[%s14591_s14 + $0x238] sm:$0xff] }
 0x238   :  { %882 = vmatprep.mubr.f32.mxu1 %v12335_v13 }
 0x23b   :  { %8012 = vmatmul.mubr.msk.f32.vlgmr.msra.gmra.mrb[0].mxu1 %vm656_vm1, %v12798_v18  ;;  %v10481_v18 = vpack.c.bf16 %v8030_v59, %v8028_v58 }
 0x23c   :  { %888 = vmatprep.mubr.f32.mxu1 %v12335_v13  ;;  %10474 = vmatpush1.bf16.msra.mxu1 %v10473_v51  ;;  %v8038_v51 = vld [vmem:[%s14591_s14 + $0x210] sm:$0xff] }
 0x23d   :  { %10476 = vmatprep.subr.bf16.mxu1 %v10475_v52  ;;  %v8041_v52 = vld [vmem:[%s14591_s14 + $0x228] sm:$0xff]  ;;  %v10489_v54 = vpack.c.bf16 %v8038_v51, %v8036_v24  ;;  %v8080_v24 = vld [vmem:[%s14592_s5 + $0x220] sm:$0xff]  ;;  %v8082_v51 = vld [vmem:[%s14592_s5 + $0x230] sm:$0xff] }
 0x23f   :  { %8013 = vmatmul.mubr.msk.f32.gmra.mrb[2].mxu1 %vm656_vm1, %v12796_v17  ;;  %v10485_v17 = vpack.c.bf16 %v8034_v2, %v8032_v61 }
 0x240   :  { %894 = vmatprep.mubr.f32.mxu1 %v12335_v13  ;;  %10478 = vmatpush1.bf16.msra.mxu1 %v10477_v50  ;;  %v10493_v50 = vpack.c.bf16 %v8042_v56, %v8040_v55 }
 0x241   :  { %10480 = vmatprep.subr.bf16.mxu1 %v10479_v57  ;;  %v8078_v57 = vld [vmem:[%s14592_s5 + $0x210] sm:$0xff] }
 0x243   :  { %8014 = vmatmul.mubr.msk.f32.gmra.mrb[4].mxu1 %vm656_vm1, %v12802_v20  ;;  %v10491_v20 = vpack.c.bf16 %v8043_v53, %v8041_v52  ;;  %v10517_v53 = vpack.c.bf16 %v8082_v51, %v8080_v24 }
 0x244   :  { %900 = vmatprep.mubr.f32.mxu1 %v12335_v13  ;;  %10482 = vmatpush1.bf16.msra.mxu1 %v10481_v18 }
 0x245   :  { %10484 = vmatprep.subr.bf16.mxu1 %v10483_v0 }
 0x247   :  { %8015 = vmatmul.mubr.msk.f32.gmra.mrb[6].mxu1 %vm656_vm1, %v12800_v19  ;;  %v1127_v19 = vlaneseq }
 0x248   :  { %906 = vmatprep.mubr.f32.mxu1 %v12335_v13  ;;  %10486 = vmatpush1.bf16.msra.mxu1 %v10485_v17  ;;  %v8083_v17 = vld [vmem:[%s14592_s5 + $0x238] sm:$0xff] }
 0x249   :  { %10488 = vmatprep.subr.bf16.mxu1 %v10487_v7  ;;  %v10515_v7 = vpack.c.bf16 %v8083_v17, %v8081_v15  ;;  %v8093_v15 = vld [vmem:[%s14592_s5 + $0x288] sm:$0xff] }
 0x24b   :  { %8016 = vmatmul.mubr.msk.f32.gmra.mrb[8].mxu1 %vm656_vm1, %v12806_v22 }
 0x24c   :  { %912 = vmatprep.mubr.f32.mxu1 %v12335_v13  ;;  %10490 = vmatpush1.bf16.msra.mxu1 %v10489_v54 }
 0x24d   :  { %10492 = vmatprep.subr.bf16.mxu1 %v10491_v20 }
 0x24f   :  { %8017 = vmatmul.mubr.msk.f32.gmra.mrb[10].mxu1 %vm656_vm1, %v12804_v21  ;;  %v12937_v21 = vshrl.u32 %v1127_v19, 7 }
 0x250   :  { %918 = vmatprep.mubr.f32.mxu1 %v12335_v13  ;;  %10494 = vmatpush1.bf16.msra.mxu1 %v10493_v50 }
 0x251   :  { %v12940_v22 = vsub.s32 0, %v12937_v21 }
 0x253   :  { %8018 = vmatmul.mubr.msk.f32.gmra.mrb[12].mxu1 %vm656_vm1, %v12812_v49  ;;  %v1133_v49 = vsub.s32 2, %v12937_v21 }
 0x254   :  { %924 = vmatprep.mubr.f32.mxu1 %v12335_v13 }
 0x257   :  { %8019 = vmatmul.mubr.msk.f32.gmra.mrb[14].mxu1 %vm656_vm1, %v12808_v23  ;;  %v1125_v23 = vld [vmem:[#allocation2] sm:$0xf] }
 0x258   :  { %1044 = vmatprep.mubr.f32.mxu1 %v12335_v13 }
 0x25b   :  { %8044 = vmatmul.mubr.msk.f32.vlgmr.msra.gmra.mrb[0].mxu1 %vm656_vm1, %v12846_v1  ;;  %v12945_v1 = vsub.s32 1, %v12937_v21 }
 0x25c   :  { %1050 = vmatprep.mubr.f32.mxu1 %v12335_v13 }
 0x25d   :  { %v1164_v18 = vrot.slane %v1125_v23, %v12945_v1 }
 0x25f   :  { %8045 = vmatmul.mubr.msk.f32.gmra.mrb[2].mxu1 %vm656_vm1, %v12842_v62  ;;  %v1130_v62 = vrot.slane %v1125_v23, %v12940_v22  ;;  %v12969_v20 = vrot.slane %v1164_v18, %v12945_v1 }
 0x260   :  { %1056 = vmatprep.mubr.f32.mxu1 %v12335_v13 }
 0x261   :  { %v12955_v63 = vrot.slane %v1130_v62, %v12940_v22  ;;  %v8085_v62 = vld [vmem:[%s14592_s5 + $0x248] sm:$0xff] }
 0x263   :  { %8046 = vmatmul.mubr.msk.f32.gmra.mrb[4].mxu1 %vm656_vm1, %v12852_v6  ;;  %v1167_v6 = vsub.s32 3, %v12937_v21 }
 0x264   :  { %1062 = vmatprep.mubr.f32.mxu1 %v12335_v13 }
 0x265   :  { %v1168_v14 = vrot.slane %v1125_v23, %v1167_v6 }
 0x267   :  { %8047 = vmatmul.mubr.msk.f32.gmra.mrb[6].mxu1 %vm656_vm1, %v12850_v4  ;;  %v1134_v4 = vrot.slane %v1125_v23, %v1133_v49  ;;  %v12973_v19 = vrot.slane %v1168_v14, %v12945_v1  ;;  %v8090_v14 = vld [vmem:[%s14592_s5 + $0x270] sm:$0xff] }
 0x268   :  { %1068 = vmatprep.mubr.f32.mxu1 %v12335_v13 }
 0x269   :  { %v12959_v2 = vrot.slane %v1134_v4, %v12940_v22  ;;  %v8087_v4 = vld [vmem:[%s14592_s5 + $0x258] sm:$0xff] }
 0x26b   :  { %8048 = vmatmul.mubr.msk.f32.gmra.mrb[8].mxu1 %vm656_vm1, %v12858_v11  ;;  %v8079_v11 = vld [vmem:[%s14592_s5 + $0x218] sm:$0xff] }
 0x26c   :  { %1074 = vmatprep.mubr.f32.mxu1 %v12335_v13 }
 0x26f   :  { %8049 = vmatmul.mubr.msk.f32.gmra.mrb[10].mxu1 %vm656_vm1, %v12856_v10  ;;  %v8077_v10 = vld [vmem:[%s14592_s5 + $0x208] sm:$0xff] }
 0x270   :  { %1080 = vmatprep.mubr.f32.mxu1 %v12335_v13 }
 0x273   :  { %8050 = vmatmul.mubr.msk.f32.gmra.mrb[12].mxu1 %vm656_vm1, %v12868_v48  ;;  %v8076_v48 = vld [vmem:[%s14592_s5 + $0x200] sm:$0xff] }
 0x274   :  { %1086 = vmatprep.mubr.f32.mxu1 %v12335_v13  ;;  %v10513_v59 = vpack.c.bf16 %v8078_v57, %v8076_v48  ;;  %v8086_v48 = vld [vmem:[%s14592_s5 + $0x250] sm:$0xff]  ;;  %v8089_v57 = vld [vmem:[%s14592_s5 + $0x268] sm:$0xff] }
 0x277   :  { %8051 = vmatmul.mubr.msk.f32.gmra.mrb[14].mxu1 %vm656_vm1, %v12864_v16  ;;  %v10511_v16 = vpack.c.bf16 %v8079_v11, %v8077_v10  ;;  %v8084_v10 = vld [vmem:[%s14592_s5 + $0x240] sm:$0xff] }
 0x278   :  { %v10521_v18 = vpack.c.bf16 %v8086_v48, %v8084_v10  ;;  %v8092_v10 = vld [vmem:[%s14592_s5 + $0x280] sm:$0xff] }
 0x279   :  { %10512 = vmatprep.subr.bf16.mxu1 %v10511_v16  ;;  %v10519_v16 = vpack.c.bf16 %v8087_v4, %v8085_v62 }
 0x27a   :  { %10514 = vmatpush1.bf16.msra.mxu1 %v10513_v59 }
 0x27b   :  { %10516 = vmatprep.subr.bf16.mxu1 %v10515_v7 }
 0x27e   :  { %10518 = vmatpush1.bf16.msra.mxu1 %v10517_v53 }
 0x27f   :  { %10520 = vmatprep.subr.bf16.mxu1 %v10519_v16 }
 0x282   :  { %10522 = vmatpush1.bf16.msra.mxu1 %v10521_v18 }
 0x32e   :  { %v1046_v58 = vpop.f32.mrb[0].mxu1 }
 0x32f   :  { %v1109_v60 = vmax.f32 %v1046_v58, 0.0  ;;  %v1048_v0 = vpop.f32.mrb[1].mxu1  ;;  %v8091_v58 = vld [vmem:[%s14592_s5 + $0x278] sm:$0xff] }
 0x330   :  { %v1110_v61 = vmax.f32 %v1048_v0, 0.0  ;;  %v10523_v0 = vpack.c.bf16 %v8091_v58, %v8089_v57  ;;  %v8097_v57 = vld [vmem:[%s14592_s5 + $0x2a8] sm:$0xff]  ;;  %v8099_v58 = vld [vmem:[%s14592_s5 + $0x2b8] sm:$0xff] }
 0x331   :  { %v1145_v54 = vmul.f32 %v12955_v63, %v1109_v60 }
 0x332   :  { %v1052_v52 = vpop.f32.mrb[2].mxu1  ;;  %v1146_v50 = vmul.f32 %v12959_v2, %v1110_v61  ;;  %v8088_v61 = vld [vmem:[%s14592_s5 + $0x260] sm:$0xff]  ;;  %10524 = vmatprep.subr.bf16.mxu1 %v10523_v0 }
 0x333   :  { %v1111_v55 = vmax.f32 %v1052_v52, 0.0  ;;  %v1054_v56 = vpop.f32.mrb[3].mxu1  ;;  %v1179_v17 = vadd.f32 %v12969_v20, %v1145_v54  ;;  %v8095_v52 = vld [vmem:[%s14592_s5 + $0x298] sm:$0xff]  ;;  %v8094_v54 = vld [vmem:[%s14592_s5 + $0x290] sm:$0xff] }
 0x334   :  { %v1112_v23 = vmax.f32 %v1054_v56, 0.0  ;;  %v1180_v53 = vadd.f32 %v12973_v19, %v1146_v50  ;;  %v10527_v4 = vpack.c.bf16 %v8095_v52, %v8093_v15  ;;  %v10529_v0 = vpack.c.bf16 %v8094_v54, %v8092_v10  ;;  %v8096_v15 = vld [vmem:[%s14592_s5 + $0x2a0] sm:$0xff]  ;;  %v8103_v52 = vld [vmem:[%s14592_s5 + $0x2d8] sm:$0xff] }
 0x335   :  { %v1147_v11 = vmul.f32 %v12955_v63, %v1111_v55 }
 0x336   :  { %v1148_v59 = vmul.f32 %v12959_v2, %v1112_v23  ;;  %v1058_v60 = vpop.f32.mrb[4].mxu1  ;;  %v10525_v23 = vpack.c.bf16 %v8090_v14, %v8088_v61  ;;  %v10531_v14 = vpack.c.bf16 %v8099_v58, %v8097_v57  ;;  %v8100_v57 = vld [vmem:[%s14592_s5 + $0x2c0] sm:$0xff]  ;;  %v8102_v58 = vld [vmem:[%s14592_s5 + $0x2d0] sm:$0xff] }
 0x337   :  { %v1181_v7 = vadd.f32 %v12969_v20, %v1147_v11  ;;  %v1113_v24 = vmax.f32 %v1058_v60, 0.0  ;;  %v1060_v51 = vpop.f32.mrb[5].mxu1 }
 0x338   :  { %v1182_v55 = vadd.f32 %v12973_v19, %v1148_v59  ;;  %v1114_v56 = vmax.f32 %v1060_v51, 0.0  ;;  %10526 = vmatpush1.bf16.msra.mxu1 %v10525_v23  ;;  %v8101_v51 = vld [vmem:[%s14592_s5 + $0x2c8] sm:$0xff] }
 0x339   :  { %v10497_v62 = vpack.c.bf16 %v1181_v7, %v1179_v17  ;;  %v1149_v16 = vmul.f32 %v12955_v63, %v1113_v24  ;;  %10528 = vmatprep.subr.bf16.mxu1 %v10527_v4  ;;  %v8098_v17 = vld [vmem:[%s14592_s5 + $0x2b0] sm:$0xff] }
 0x33a   :  { %v1064_v48 = vpop.f32.mrb[6].mxu1  ;;  %v10495_v11 = vpack.c.bf16 %v1182_v55, %v1180_v53  ;;  %v1150_v60 = vmul.f32 %v12959_v2, %v1114_v56  ;;  %v10533_v54 = vpack.c.bf16 %v8098_v17, %v8096_v15  ;;  %v8104_v17 = vld [vmem:[%s14592_s5 + $0x2e0] sm:$0xff] }
 0x33b   :  { %v1115_v50 = vmax.f32 %v1064_v48, 0.0  ;;  %v1066_v59 = vpop.f32.mrb[7].mxu1  ;;  %v1183_v53 = vadd.f32 %v12969_v20, %v1149_v16 }
 0x33c   :  { %v1116_v18 = vmax.f32 %v1066_v59, 0.0  ;;  %10496 = vmatprep.subr.bf16.mxu0 %v10495_v11  ;;  %10530 = vmatpush1.bf16.msra.mxu1 %v10529_v0  ;;  %v10535_v11 = vpack.c.bf16 %v8103_v52, %v8101_v51  ;;  %v8105_v59 = vld [vmem:[%s14592_s5 + $0x2e8] sm:$0xff]  ;;  %v10537_v0 = vpack.c.bf16 %v8102_v58, %v8100_v57  ;;  %v8106_v51 = vld [vmem:[%s14592_s5 + $0x2f0] sm:$0xff] }
 0x33d   :  { %v1151_v61 = vmul.f32 %v12955_v63, %v1115_v50  ;;  %10498 = vmatpush1.bf16.msra.mxu0 %v10497_v62  ;;  %v1184_v62 = vadd.f32 %v12973_v19, %v1150_v60  ;;  %10532 = vmatprep.subr.bf16.mxu1 %v10531_v14 }
 0x33e   :  { %v1152_v7 = vmul.f32 %v12959_v2, %v1116_v18  ;;  %v1070_v24 = vpop.f32.mrb[8].mxu1  ;;  %v8107_v18 = vld [vmem:[%s14592_s5 + $0x2f8] sm:$0xff] }
 0x33f   :  { %v1185_v55 = vadd.f32 %v12969_v20, %v1151_v61  ;;  %v1117_v56 = vmax.f32 %v1070_v24, 0.0  ;;  %v1072_v23 = vpop.f32.mrb[9].mxu1  ;;  %v10539_v15 = vpack.c.bf16 %v8107_v18, %v8105_v59 }
 0x340   :  { %v1186_v4 = vadd.f32 %v12973_v19, %v1152_v7  ;;  %v1118_v10 = vmax.f32 %v1072_v23, 0.0  ;;  %10534 = vmatpush1.bf16.msra.mxu1 %v10533_v54 }
 0x341   :  { %v10501_v48 = vpack.c.bf16 %v1185_v55, %v1183_v53  ;;  %v1153_v61 = vmul.f32 %v12955_v63, %v1117_v56  ;;  %10536 = vmatprep.subr.bf16.mxu1 %v10535_v11 }
 0x342   :  { %v1076_v50 = vpop.f32.mrb[10].mxu1  ;;  %v10499_v16 = vpack.c.bf16 %v1186_v4, %v1184_v62  ;;  %v1154_v7 = vmul.f32 %v12959_v2, %v1118_v10 }
 0x343   :  { %v1119_v24 = vmax.f32 %v1076_v50, 0.0  ;;  %v1078_v60 = vpop.f32.mrb[11].mxu1  ;;  %v1187_v55 = vadd.f32 %v12969_v20, %v1153_v61 }
 0x344   :  { %v1120_v23 = vmax.f32 %v1078_v60, 0.0  ;;  %10500 = vmatprep.subr.bf16.mxu0 %v10499_v16  ;;  %v1188_v10 = vadd.f32 %v12973_v19, %v1154_v7  ;;  %10538 = vmatpush1.bf16.msra.mxu1 %v10537_v0 }
 0x345   :  { %v1155_v14 = vmul.f32 %v12955_v63, %v1119_v24  ;;  %10502 = vmatpush1.bf16.msra.mxu0 %v10501_v48  ;;  %v10541_v48 = vpack.c.bf16 %v8106_v51, %v8104_v17  ;;  %10540 = vmatprep.subr.bf16.mxu1 %v10539_v15 }
 0x346   :  { %v1156_v52 = vmul.f32 %v12959_v2, %v1120_v23  ;;  %v1082_v53 = vpop.f32.mrb[12].mxu1 }
 0x347   :  { %v1189_v56 = vadd.f32 %v12969_v20, %v1155_v14  ;;  %v1121_v62 = vmax.f32 %v1082_v53, 0.0  ;;  %v1084_v4 = vpop.f32.mrb[13].mxu1 }
 0x348   :  { %v1190_v54 = vadd.f32 %v12973_v19, %v1156_v52  ;;  %v1122_v57 = vmax.f32 %v1084_v4, 0.0  ;;  %10542 = vmatpush1.bf16.msra.mxu1 %v10541_v48  ;;  %v8126_v52 = vld [vmem:[%s14592_s5 + $0x390] sm:$0xff]  ;;  %v8128_v4 = vld [vmem:[%s14592_s5 + $0x3a0] sm:$0xff]  ;;  %v8135_v48 = vld [vmem:[%s14592_s5 + $0x3d8] sm:$0xff] }
 0x349   :  { %v10505_v11 = vpack.c.bf16 %v1189_v56, %v1187_v55  ;;  %v1157_v16 = vmul.f32 %v12955_v63, %v1121_v62  ;;  %v8129_v55 = vld [vmem:[%s14592_s5 + $0x3a8] sm:$0xff]  ;;  %v8131_v56 = vld [vmem:[%s14592_s5 + $0x3b8] sm:$0xff] }
 0x34a   :  { %v1088_v58 = vpop.f32.mrb[14].mxu1  ;;  %v10503_v50 = vpack.c.bf16 %v1190_v54, %v1188_v10  ;;  %v1158_v61 = vmul.f32 %v12959_v2, %v1122_v57  ;;  %v10563_v62 = vpack.c.bf16 %v8131_v56, %v8129_v55  ;;  %v8130_v10 = vld [vmem:[%s14592_s5 + $0x3b0] sm:$0xff]  ;;  %v8133_v57 = vld [vmem:[%s14592_s5 + $0x3c8] sm:$0xff] }
 0x34b   :  { %v1123_v59 = vmax.f32 %v1088_v58, 0.0  ;;  %v1090_v18 = vpop.f32.mrb[15].mxu1  ;;  %v1191_v23 = vadd.f32 %v12969_v20, %v1157_v16  ;;  %v10565_v54 = vpack.c.bf16 %v8130_v10, %v8128_v4  ;;  %v8132_v58 = vld [vmem:[%s14592_s5 + $0x3c0] sm:$0xff]  ;;  %v1414_v55 = vld [vmem:[%s14592_s5 + $0x50] sm:$0xff]  ;;  %v1417_v56 = vld [vmem:[%s14592_s5 + $0x68] sm:$0xff] }
 0x34c   :  { %v1124_v24 = vmax.f32 %v1090_v18, 0.0  ;;  %10504 = vmatprep.subr.bf16.mxu0 %v10503_v50  ;;  %v1192_v14 = vadd.f32 %v12973_v19, %v1158_v61  ;;  %v8134_v50 = vld [vmem:[%s14592_s5 + $0x3d0] sm:$0xff]  ;;  %v8139_v18 = vld [vmem:[%s14592_s5 + $0x3f8] sm:$0xff] }
 0x34d   :  { %v1159_v60 = vmul.f32 %v12955_v63, %v1123_v59  ;;  %10506 = vmatpush1.bf16.msra.mxu0 %v10505_v11  ;;  %v10567_v11 = vpack.c.bf16 %v8135_v48, %v8133_v57  ;;  %v10569_v16 = vpack.c.bf16 %v8134_v50, %v8132_v58  ;;  %v8137_v59 = vld [vmem:[%s14592_s5 + $0x3e8] sm:$0xff]  ;;  %v1416_v48 = vld [vmem:[%s14592_s5 + $0x60] sm:$0xff]  ;;  %v1423_v50 = vld [vmem:[%s14592_s5 + $0x98] sm:$0xff] }
 0x34e   :  { %v1160_v7 = vmul.f32 %v12959_v2, %v1124_v24  ;;  %v8127_v2 = vld [vmem:[%s14592_s5 + $0x398] sm:$0xff]  ;;  %v10571_v61 = vpack.c.bf16 %v8139_v18, %v8137_v59  ;;  %v8136_v24 = vld [vmem:[%s14592_s5 + $0x3e0] sm:$0xff]  ;;  %v1421_v58 = vld [vmem:[%s14592_s5 + $0x88] sm:$0xff] }
 0x34f   :  { %v1193_v0 = vadd.f32 %v12969_v20, %v1159_v60  ;;  %v8138_v60 = vld [vmem:[%s14592_s5 + $0x3f0] sm:$0xff] }
 0x350   :  { %v1194_v15 = vadd.f32 %v12973_v19, %v1160_v7  ;;  %v8124_v19 = vld [vmem:[%s14592_s5 + $0x380] sm:$0xff]  ;;  %v10573_v7 = vpack.c.bf16 %v8138_v60, %v8136_v24  ;;  %v1422_v60 = vld [vmem:[%s14592_s5 + $0x90] sm:$0xff] }
 0x351   :  { %v10509_v17 = vpack.c.bf16 %v1193_v0, %v1191_v23  ;;  %v10561_v53 = vpack.c.bf16 %v8126_v52, %v8124_v19  ;;  %v1405_v23 = vld [vmem:[%s14592_s5 + $0x8] sm:$0xff]  ;;  %v1407_v0 = vld [vmem:[%s14592_s5 + $0x18] sm:$0xff]  ;;  %v1420_v24 = vld [vmem:[%s14592_s5 + $0x80] sm:$0xff] }
 0x352   :  { %v10507_v51 = vpack.c.bf16 %v1194_v15, %v1192_v14  ;;  %v10575_v14 = vpack.c.bf16 %v1407_v0, %v1405_v23  ;;  %v1427_v23 = vld [vmem:[%s14592_s5 + $0xb8] sm:$0xff] }
 0x354   :  { %10508 = vmatprep.subr.bf16.mxu0 %v10507_v51 }
 0x355   :  { %10510 = vmatpush1.bf16.msra.mxu0 %v10509_v17 }
 0x358   :  { %8052 = vmatmul.mubr.msk.f32.vlgmr.msra.gmra.mrb[24].mxu0 %vm349_vm0, %v12635_v8  ;;  %v8109_v8 = vld [vmem:[%s14592_s5 + $0x308] sm:$0xff] }
 0x359   :  { %1265 = vmatprep.mubr.f32.mxu0 %v12335_v13 }
 0x35c   :  { %8053 = vmatmul.mubr.msk.f32.gmra.mrb[26].mxu0 %vm349_vm0, %v12662_v25  ;;  %v8111_v25 = vld [vmem:[%s14592_s5 + $0x318] sm:$0xff] }
 0x35d   :  { %1271 = vmatprep.mubr.f32.mxu0 %v12335_v13 }
 0x360   :  { %8054 = vmatmul.mubr.msk.f32.gmra.mrb[28].mxu0 %vm349_vm0, %v12665_v26  ;;  %v10543_v26 = vpack.c.bf16 %v8111_v25, %v8109_v8 }
 0x361   :  { %1277 = vmatprep.mubr.f32.mxu0 %v12335_v13 }
 0x362   :  { %10544 = vmatprep.subr.bf16.mxu1 %v10543_v26 }
 0x364   :  { %8055 = vmatmul.mubr.msk.f32.gmra.mrb[30].mxu0 %vm349_vm0, %v12672_v27  ;;  %v8108_v27 = vld [vmem:[%s14592_s5 + $0x300] sm:$0xff] }
 0x365   :  { %1283 = vmatprep.mubr.f32.mxu0 %v12335_v13 }
 0x368   :  { %8056 = vmatmul.mubr.msk.f32.gmra.mrb[32].mxu0 %vm349_vm0, %v12675_v28  ;;  %v8110_v28 = vld [vmem:[%s14592_s5 + $0x310] sm:$0xff] }
 0x369   :  { %1289 = vmatprep.mubr.f32.mxu0 %v12335_v13 }
 0x36c   :  { %8057 = vmatmul.mubr.msk.f32.gmra.mrb[34].mxu0 %vm349_vm0, %v12682_v29  ;;  %v10545_v29 = vpack.c.bf16 %v8110_v28, %v8108_v27 }
 0x36d   :  { %1295 = vmatprep.mubr.f32.mxu0 %v12335_v13 }
 0x36e   :  { %10546 = vmatpush1.bf16.msra.mxu1 %v10545_v29 }
 0x370   :  { %8058 = vmatmul.mubr.msk.f32.gmra.mrb[36].mxu0 %vm349_vm0, %v12685_v30  ;;  %v8113_v30 = vld [vmem:[%s14592_s5 + $0x328] sm:$0xff] }
 0x371   :  { %1301 = vmatprep.mubr.f32.mxu0 %v12335_v13 }
 0x374   :  { %8059 = vmatmul.mubr.msk.f32.gmra.mrb[38].mxu0 %vm349_vm0, %v12692_v31  ;;  %v8115_v31 = vld [vmem:[%s14592_s5 + $0x338] sm:$0xff] }
 0x375   :  { %1307 = vmatprep.mubr.f32.mxu0 %v12335_v13 }
 0x378   :  { %8060 = vmatmul.mubr.msk.f32.gmra.mrb[40].mxu0 %vm349_vm0, %v12695_v32  ;;  %v10547_v32 = vpack.c.bf16 %v8115_v31, %v8113_v30 }
 0x379   :  { %1313 = vmatprep.mubr.f32.mxu0 %v12335_v13 }
 0x37a   :  { %10548 = vmatprep.subr.bf16.mxu1 %v10547_v32 }
 0x37c   :  { %8061 = vmatmul.mubr.msk.f32.gmra.mrb[42].mxu0 %vm349_vm0, %v12702_v33  ;;  %v8112_v33 = vld [vmem:[%s14592_s5 + $0x320] sm:$0xff] }
 0x37d   :  { %1319 = vmatprep.mubr.f32.mxu0 %v12335_v13 }
 0x380   :  { %8062 = vmatmul.mubr.msk.f32.gmra.mrb[44].mxu0 %vm349_vm0, %v12705_v34  ;;  %v8114_v34 = vld [vmem:[%s14592_s5 + $0x330] sm:$0xff] }
 0x381   :  { %1325 = vmatprep.mubr.f32.mxu0 %v12335_v13 }
 0x384   :  { %8063 = vmatmul.mubr.msk.f32.gmra.mrb[46].mxu0 %vm349_vm0, %v12712_v35  ;;  %v10549_v35 = vpack.c.bf16 %v8114_v34, %v8112_v33 }
 0x385   :  { %1331 = vmatprep.mubr.f32.mxu0 %v12335_v13 }
 0x386   :  { %10550 = vmatpush1.bf16.msra.mxu1 %v10549_v35 }
 0x388   :  { %8064 = vmatmul.mubr.msk.f32.gmra.mrb[48].mxu0 %vm349_vm0, %v12715_v36  ;;  %v8117_v36 = vld [vmem:[%s14592_s5 + $0x348] sm:$0xff] }
 0x389   :  { %1337 = vmatprep.mubr.f32.mxu0 %v12335_v13 }
 0x38c   :  { %8065 = vmatmul.mubr.msk.f32.gmra.mrb[50].mxu0 %vm349_vm0, %v12722_v37  ;;  %v8119_v37 = vld [vmem:[%s14592_s5 + $0x358] sm:$0xff] }
 0x38d   :  { %1343 = vmatprep.mubr.f32.mxu0 %v12335_v13 }
 0x390   :  { %8066 = vmatmul.mubr.msk.f32.gmra.mrb[52].mxu0 %vm349_vm0, %v12725_v38  ;;  %v10551_v38 = vpack.c.bf16 %v8119_v37, %v8117_v36  ;;  %v1404_v37 = vld [vmem:[%s14592_s5] sm:$0xff] }
 0x391   :  { %1349 = vmatprep.mubr.f32.mxu0 %v12335_v13 }
 0x392   :  { %10552 = vmatprep.subr.bf16.mxu1 %v10551_v38  ;;  %v1406_v38 = vld [vmem:[%s14592_s5 + $0x10] sm:$0xff] }
 0x394   :  { %8067 = vmatmul.mubr.msk.f32.gmra.mrb[54].mxu0 %vm349_vm0, %v12732_v39  ;;  %v8116_v39 = vld [vmem:[%s14592_s5 + $0x340] sm:$0xff] }
 0x395   :  { %1355 = vmatprep.mubr.f32.mxu0 %v12335_v13 }
 0x398   :  { %8068 = vmatmul.mubr.msk.f32.gmra.mrb[56].mxu0 %vm349_vm0, %v12735_v40  ;;  %v8118_v40 = vld [vmem:[%s14592_s5 + $0x350] sm:$0xff] }
 0x399   :  { %1361 = vmatprep.mubr.f32.mxu0 %v12335_v13 }
 0x39c   :  { %8069 = vmatmul.mubr.msk.f32.gmra.mrb[58].mxu0 %vm349_vm0, %v12742_v41  ;;  %v10553_v41 = vpack.c.bf16 %v8118_v40, %v8116_v39  ;;  %v1409_v39 = vld [vmem:[%s14592_s5 + $0x28] sm:$0xff]  ;;  %v1411_v40 = vld [vmem:[%s14592_s5 + $0x38] sm:$0xff] }
 0x39d   :  { %1367 = vmatprep.mubr.f32.mxu0 %v12335_v13 }
 0x39e   :  { %10554 = vmatpush1.bf16.msra.mxu1 %v10553_v41 }
 0x3a0   :  { %8070 = vmatmul.mubr.msk.f32.gmra.mrb[60].mxu0 %vm349_vm0, %v12745_v42  ;;  %v8121_v42 = vld [vmem:[%s14592_s5 + $0x368] sm:$0xff] }
 0x3a1   :  { %1373 = vmatprep.mubr.f32.mxu0 %v12335_v13 }
 0x3a4   :  { %8071 = vmatmul.mubr.msk.f32.gmra.mrb[62].mxu0 %vm349_vm0, %v12752_v43  ;;  %v8123_v43 = vld [vmem:[%s14592_s5 + $0x378] sm:$0xff] }
 0x3a5   :  { %1379 = vmatprep.mubr.f32.mxu0 %v12335_v13 }
 0x3a8   :  { %8072 = vmatmul.mubr.msk.f32.gmra.mrb[64].mxu0 %vm349_vm0, %v12755_v44  ;;  %v10555_v44 = vpack.c.bf16 %v8123_v43, %v8121_v42  ;;  %v10577_v42 = vpack.c.bf16 %v1406_v38, %v1404_v37 }
 0x3a9   :  { %1385 = vmatprep.mubr.f32.mxu0 %v12335_v13 }
 0x3aa   :  { %10556 = vmatprep.subr.bf16.mxu1 %v10555_v44  ;;  %v10579_v44 = vpack.c.bf16 %v1411_v40, %v1409_v39  ;;  %v1424_v39 = vld [vmem:[%s14592_s5 + $0xa0] sm:$0xff]  ;;  %v1426_v40 = vld [vmem:[%s14592_s5 + $0xb0] sm:$0xff] }
 0x3ac   :  { %8073 = vmatmul.mubr.msk.f32.gmra.mrb[66].mxu0 %vm349_vm0, %v12762_v45  ;;  %v8120_v45 = vld [vmem:[%s14592_s5 + $0x360] sm:$0xff] }
 0x3ad   :  { %1391 = vmatprep.mubr.f32.mxu0 %v12335_v13 }
 0x3b0   :  { %8074 = vmatmul.mubr.msk.f32.gmra.mrb[68].mxu0 %vm349_vm0, %v12765_v46  ;;  %v8122_v46 = vld [vmem:[%s14592_s5 + $0x370] sm:$0xff] }
 0x3b1   :  { %1397 = vmatprep.mubr.f32.mxu0 %v12335_v13  ;;  %v10557_v63 = vpack.c.bf16 %v8122_v46, %v8120_v45  ;;  %v1408_v45 = vld [vmem:[%s14592_s5 + $0x20] sm:$0xff]  ;;  %v1410_v46 = vld [vmem:[%s14592_s5 + $0x30] sm:$0xff] }
 0x3b3   :  { %10558 = vmatpush1.bf16.msra.mxu1 %v10557_v63  ;;  %v1413_v63 = vld [vmem:[%s14592_s5 + $0x48] sm:$0xff] }
 0x3b4   :  { %8075 = vmatmul.mubr.msk.f32.gmra.mrb[70].mxu0 %vm349_vm0, %v12772_v47  ;;  %v8125_v47 = vld [vmem:[%s14592_s5 + $0x388] sm:$0xff] }
 0x3b5   :  { %2139 = vmatprep.mubr.f32.mxu0 %v12335_v13  ;;  %v10559_v20 = vpack.c.bf16 %v8127_v2, %v8125_v47  ;;  %v1415_v47 = vld [vmem:[%s14592_s5 + $0x58] sm:$0xff] }
 0x3b6   :  { %v10583_v52 = vpack.c.bf16 %v1415_v47, %v1413_v63  ;;  %v1428_v63 = vld [vmem:[%s14592_s5 + $0xc0] sm:$0xff]  ;;  %v1430_v47 = vld [vmem:[%s14592_s5 + $0xd0] sm:$0xff] }
 0x3b7   :  { %10560 = vmatprep.subr.bf16.mxu1 %v10559_v20  ;;  %v10581_v20 = vpack.c.bf16 %v1410_v46, %v1408_v45 }
 0x3b8   :  { %10562 = vmatpush1.bf16.msra.mxu1 %v10561_v53  ;;  %v1412_v53 = vld [vmem:[%s14592_s5 + $0x40] sm:$0xff] }
 0x3b9   :  { %10564 = vmatprep.subr.bf16.mxu1 %v10563_v62  ;;  %v1419_v62 = vld [vmem:[%s14592_s5 + $0x78] sm:$0xff]  ;;  %v10585_v10 = vpack.c.bf16 %v1414_v55, %v1412_v53 }
 0x3ba   :  { %v10587_v57 = vpack.c.bf16 %v1419_v62, %v1417_v56  ;;  %v1432_v56 = vld [vmem:[%s14592_s5 + $0xe0] sm:$0xff]  ;;  %v1434_v62 = vld [vmem:[%s14592_s5 + $0xf0] sm:$0xff] }
 0x3bc   :  { %10566 = vmatpush1.bf16.msra.mxu1 %v10565_v54 }
 0x3bd   :  { %10568 = vmatprep.subr.bf16.mxu1 %v10567_v11  ;;  %v1418_v11 = vld [vmem:[%s14592_s5 + $0x70] sm:$0xff] }
 0x3be   :  { %v10589_v59 = vpack.c.bf16 %v1418_v11, %v1416_v48 }
 0x3c0   :  { %10570 = vmatpush1.bf16.msra.mxu1 %v10569_v16 }
 0x3c1   :  { %10572 = vmatprep.subr.bf16.mxu1 %v10571_v61  ;;  %v10591_v61 = vpack.c.bf16 %v1423_v50, %v1421_v58  ;;  %v1436_v58 = vld [vmem:[%s14592_s5 + $0x100] sm:$0xff]  ;;  %v1438_v50 = vld [vmem:[%s14592_s5 + $0x110] sm:$0xff] }
 0x3c4   :  { %10574 = vmatpush1.bf16.msra.mxu1 %v10573_v7  ;;  %v1425_v7 = vld [vmem:[%s14592_s5 + $0xa8] sm:$0xff] }
 0x3c5   :  { %10576 = vmatprep.subr.bf16.mxu1 %v10575_v14  ;;  %v10593_v14 = vpack.c.bf16 %v1422_v60, %v1420_v24  ;;  %v10595_v38 = vpack.c.bf16 %v1427_v23, %v1425_v7  ;;  %v1440_v60 = vld [vmem:[%s14592_s5 + $0x120] sm:$0xff]  ;;  %v1442_v7 = vld [vmem:[%s14592_s5 + $0x130] sm:$0xff] }
 0x42b   :  { %v13135_v15 = vpop.f32.mrb[24].mxu0 }
 0x42c   :  { %v13137_v17 = vpop.f32.mrb[25].mxu0 }
 0x42f   :  { %v13139_v51 = vpop.f32.mrb[26].mxu0 }
 0x430   :  { %v13141_v8 = vpop.f32.mrb[27].mxu0 }
 0x433   :  { %v13143_v25 = vpop.f32.mrb[28].mxu0 }
 0x434   :  { %v13145_v26 = vpop.f32.mrb[29].mxu0 }
 0x437   :  { %v13147_v27 = vpop.f32.mrb[30].mxu0 }
 0x438   :  { %v13149_v28 = vpop.f32.mrb[31].mxu0 }
 0x43b   :  { %v13151_v29 = vpop.f32.mrb[32].mxu0 }
 0x43c   :  { %v13153_v30 = vpop.f32.mrb[33].mxu0 }
 0x43f   :  { %v13155_v31 = vpop.f32.mrb[34].mxu0 }
 0x440   :  { %v13157_v32 = vpop.f32.mrb[35].mxu0 }
 0x443   :  { %v13159_v33 = vpop.f32.mrb[36].mxu0 }
 0x444   :  { %v13161_v34 = vpop.f32.mrb[37].mxu0 }
 0x447   :  { %v13163_v35 = vpop.f32.mrb[38].mxu0 }
 0x448   :  { %v13165_v36 = vpop.f32.mrb[39].mxu0 }
 0x44b   :  { %v1309_v41 = vpop.f32.mrb[40].mxu0 }
 0x44c   :  { %v1311_v43 = vpop.f32.mrb[41].mxu0 }
 0x44d   :  { %1597 = vmatprep.mubr.f32.mxu1 %v1311_v43 }
 0x44e   :  { %1598 = vmatmul.mubr.f32.vlgmr.msra.gmra.mrb[16].mxu1 %v1309_v41  ;;  %v1429_v41 = vld [vmem:[%s14592_s5 + $0xc8] sm:$0xff] }
 0x44f   :  { %10578 = vmatpush1.bf16.msra.mxu1 %v10577_v42  ;;  %v1315_v2 = vpop.f32.mrb[42].mxu0  ;;  %v1431_v42 = vld [vmem:[%s14592_s5 + $0xd8] sm:$0xff] }
 0x450   :  { %v1317_v19 = vpop.f32.mrb[43].mxu0  ;;  %10580 = vmatprep.subr.bf16.mxu1 %v10579_v44  ;;  %v10597_v44 = vpack.c.bf16 %v1426_v40, %v1424_v39  ;;  %v10599_v46 = vpack.c.bf16 %v1431_v42, %v1429_v41  ;;  %v1444_v39 = vld [vmem:[%s14592_s5 + $0x140] sm:$0xff]  ;;  %v1446_v40 = vld [vmem:[%s14592_s5 + $0x150] sm:$0xff]  ;;  %v1449_v42 = vld [vmem:[%s14592_s5 + $0x168] sm:$0xff] }
 0x451   :  { %1603 = vmatprep.mubr.f32.mxu1 %v1317_v19 }
 0x452   :  { %1604 = vmatmul.mubr.f32.gmra.mrb[18].mxu1 %v1315_v2  ;;  %v1433_v2 = vld [vmem:[%s14592_s5 + $0xe8] sm:$0xff] }
 0x453   :  { %10582 = vmatpush1.bf16.msra.mxu1 %v10581_v20  ;;  %v1321_v4 = vpop.f32.mrb[44].mxu0  ;;  %v1435_v20 = vld [vmem:[%s14592_s5 + $0xf8] sm:$0xff] }
 0x454   :  { %v1323_v54 = vpop.f32.mrb[45].mxu0  ;;  %10584 = vmatprep.subr.bf16.mxu1 %v10583_v52  ;;  %v10601_v52 = vpack.c.bf16 %v1430_v47, %v1428_v63  ;;  %v10603_v55 = vpack.c.bf16 %v1435_v20, %v1433_v2  ;;  %v1448_v63 = vld [vmem:[%s14592_s5 + $0x160] sm:$0xff]  ;;  %v1450_v47 = vld [vmem:[%s14592_s5 + $0x170] sm:$0xff]  ;;  %v1453_v20 = vld [vmem:[%s14592_s5 + $0x188] sm:$0xff] }
 0x455   :  { %1609 = vmatprep.mubr.f32.mxu1 %v1323_v54 }
 0x456   :  { %1610 = vmatmul.mubr.f32.gmra.mrb[20].mxu1 %v1321_v4  ;;  %v1437_v4 = vld [vmem:[%s14592_s5 + $0x108] sm:$0xff] }
 0x457   :  { %10586 = vmatpush1.bf16.msra.mxu1 %v10585_v10  ;;  %v1327_v16 = vpop.f32.mrb[46].mxu0  ;;  %v1439_v10 = vld [vmem:[%s14592_s5 + $0x118] sm:$0xff] }
 0x458   :  { %v1329_v18 = vpop.f32.mrb[47].mxu0  ;;  %10588 = vmatprep.subr.bf16.mxu1 %v10587_v57  ;;  %v10605_v57 = vpack.c.bf16 %v1434_v62, %v1432_v56  ;;  %v10607_v11 = vpack.c.bf16 %v1439_v10, %v1437_v4  ;;  %v1452_v56 = vld [vmem:[%s14592_s5 + $0x180] sm:$0xff]  ;;  %v1454_v62 = vld [vmem:[%s14592_s5 + $0x190] sm:$0xff]  ;;  %v1457_v10 = vld [vmem:[%s14592_s5 + $0x1a8] sm:$0xff] }
 0x459   :  { %1615 = vmatprep.mubr.f32.mxu1 %v1329_v18  ;;  %v10609_v18 = vpack.c.bf16 %v1438_v50, %v1436_v58  ;;  %v1456_v58 = vld [vmem:[%s14592_s5 + $0x1a0] sm:$0xff]  ;;  %v1458_v50 = vld [vmem:[%s14592_s5 + $0x1b0] sm:$0xff] }
 0x45a   :  { %1616 = vmatmul.mubr.f32.gmra.mrb[22].mxu1 %v1327_v16  ;;  %v1441_v16 = vld [vmem:[%s14592_s5 + $0x128] sm:$0xff] }
 0x45b   :  { %10590 = vmatpush1.bf16.msra.mxu1 %v10589_v59  ;;  %v1333_v0 = vpop.f32.mrb[48].mxu0  ;;  %v1443_v59 = vld [vmem:[%s14592_s5 + $0x138] sm:$0xff] }
 0x45c   :  { %v1335_v37 = vpop.f32.mrb[49].mxu0  ;;  %10592 = vmatprep.subr.bf16.mxu1 %v10591_v61  ;;  %v10611_v24 = vpack.c.bf16 %v1443_v59, %v1441_v16  ;;  %v1461_v59 = vld [vmem:[%s14592_s5 + $0x1c8] sm:$0xff] }
 0x45d   :  { %1621 = vmatprep.mubr.f32.mxu1 %v1335_v37  ;;  %v10613_v37 = vpack.c.bf16 %v1442_v7, %v1440_v60 }
 0x45e   :  { %1622 = vmatmul.mubr.f32.gmra.mrb[24].mxu1 %v1333_v0  ;;  %v1445_v0 = vld [vmem:[%s14592_s5 + $0x148] sm:$0xff] }
 0x45f   :  { %10594 = vmatpush1.bf16.msra.mxu1 %v10593_v14  ;;  %v1339_v43 = vpop.f32.mrb[50].mxu0  ;;  %v1447_v14 = vld [vmem:[%s14592_s5 + $0x158] sm:$0xff] }
 0x460   :  { %v1341_v45 = vpop.f32.mrb[51].mxu0  ;;  %10596 = vmatprep.subr.bf16.mxu1 %v10595_v38 }
 0x461   :  { %1627 = vmatprep.mubr.f32.mxu1 %v1341_v45 }
 0x462   :  { %1628 = vmatmul.mubr.f32.gmra.mrb[26].mxu1 %v1339_v43  ;;  %v1451_v43 = vld [vmem:[%s14592_s5 + $0x178] sm:$0xff] }
 0x463   :  { %10598 = vmatpush1.bf16.msra.mxu1 %v10597_v44  ;;  %v1345_v19 = vpop.f32.mrb[52].mxu0  ;;  %v10617_v44 = vpack.c.bf16 %v1446_v40, %v1444_v39  ;;  %v1467_v39 = vld [vmem:[%s14592_s5 + $0x1f8] sm:$0xff] }
 0x464   :  { %v1347_v53 = vpop.f32.mrb[53].mxu0  ;;  %10600 = vmatprep.subr.bf16.mxu1 %v10599_v46  ;;  %v10619_v46 = vpack.c.bf16 %v1451_v43, %v1449_v42 }
 0x465   :  { %1633 = vmatprep.mubr.f32.mxu1 %v1347_v53 }
 0x466   :  { %1634 = vmatmul.mubr.f32.gmra.mrb[28].mxu1 %v1345_v19  ;;  %v1455_v19 = vld [vmem:[%s14592_s5 + $0x198] sm:$0xff] }
 0x467   :  { %10602 = vmatpush1.bf16.msra.mxu1 %v10601_v52  ;;  %v1351_v54 = vpop.f32.mrb[54].mxu0  ;;  %v10621_v52 = vpack.c.bf16 %v1450_v47, %v1448_v63  ;;  %v8141_v47 = vld [vmem:[%s14592_s5 + $0x408] sm:$0xff] }
 0x468   :  { %v1353_v48 = vpop.f32.mrb[55].mxu0  ;;  %10604 = vmatprep.subr.bf16.mxu1 %v10603_v55  ;;  %v10623_v55 = vpack.c.bf16 %v1455_v19, %v1453_v20  ;;  %v8143_v20 = vld [vmem:[%s14592_s5 + $0x418] sm:$0xff] }
 0x469   :  { %1639 = vmatprep.mubr.f32.mxu1 %v1353_v48 }
 0x46a   :  { %1640 = vmatmul.mubr.f32.gmra.mrb[30].mxu1 %v1351_v54  ;;  %v1459_v54 = vld [vmem:[%s14592_s5 + $0x1b8] sm:$0xff] }
 0x46b   :  { %10606 = vmatpush1.bf16.msra.mxu1 %v10605_v57  ;;  %1710 = vmatprep.mubr.f32.mxu1 %v13137_v17  ;;  %v13204_v61 = vpop.f32.mrb[56].mxu0  ;;  %v10615_v17 = vpack.c.bf16 %v1447_v14, %v1445_v0  ;;  %v10625_v57 = vpack.c.bf16 %v1454_v62, %v1452_v56  ;;  %v1460_v0 = vld [vmem:[%s14592_s5 + $0x1c0] sm:$0xff]  ;;  %v1462_v14 = vld [vmem:[%s14592_s5 + $0x1d0] sm:$0xff] }
 0x46c   :  { %10608 = vmatprep.subr.bf16.mxu1 %v10607_v11  ;;  %v13208_v23 = vpop.f32.mrb[57].mxu0  ;;  %v10627_v11 = vpack.c.bf16 %v1459_v54, %v1457_v10  ;;  %v10633_v40 = vpack.c.bf16 %v1462_v14, %v1460_v0  ;;  %v8140_v56 = vld [vmem:[%s14592_s5 + $0x400] sm:$0xff]  ;;  %v8142_v62 = vld [vmem:[%s14592_s5 + $0x410] sm:$0xff]  ;;  %v8145_v54 = vld [vmem:[%s14592_s5 + $0x428] sm:$0xff] }
 0x46d   :  { %v8148_v14 = vld [vmem:[%s14592_s5 + $0x440] sm:$0xff] }
 0x46f   :  { %10610 = vmatpush1.bf16.msra.mxu1 %v10609_v18  ;;  %v13212_v38 = vpop.f32.mrb[58].mxu0  ;;  %v1463_v18 = vld [vmem:[%s14592_s5 + $0x1d8] sm:$0xff] }
 0x470   :  { %10612 = vmatprep.subr.bf16.mxu1 %v10611_v24  ;;  %v13216_v41 = vpop.f32.mrb[59].mxu0  ;;  %v10629_v24 = vpack.c.bf16 %v1458_v50, %v1456_v58  ;;  %v10631_v7 = vpack.c.bf16 %v1463_v18, %v1461_v59  ;;  %v8144_v50 = vld [vmem:[%s14592_s5 + $0x420] sm:$0xff]  ;;  %v8146_v59 = vld [vmem:[%s14592_s5 + $0x430] sm:$0xff]  ;;  %v8149_v18 = vld [vmem:[%s14592_s5 + $0x448] sm:$0xff] }
 0x473   :  { %10614 = vmatpush1.bf16.msra.mxu1 %v10613_v37  ;;  %v13220_v45 = vpop.f32.mrb[60].mxu0 }
 0x474   :  { %10616 = vmatprep.subr.bf16.mxu1 %v10615_v17  ;;  %v13224_v2 = vpop.f32.mrb[61].mxu0  ;;  %v1465_v17 = vld [vmem:[%s14592_s5 + $0x1e8] sm:$0xff] }
 0x475   :  { %v10635_v43 = vpack.c.bf16 %v1467_v39, %v1465_v17  ;;  %v8150_v17 = vld [vmem:[%s14592_s5 + $0x450] sm:$0xff]  ;;  %v8153_v39 = vld [vmem:[%s14592_s5 + $0x468] sm:$0xff] }
 0x477   :  { %10618 = vmatpush1.bf16.msra.mxu1 %v10617_v44  ;;  %v13228_v53 = vpop.f32.mrb[62].mxu0  ;;  %v1464_v44 = vld [vmem:[%s14592_s5 + $0x1e0] sm:$0xff] }
 0x478   :  { %10620 = vmatprep.subr.bf16.mxu1 %v10619_v46  ;;  %v13232_v4 = vpop.f32.mrb[63].mxu0  ;;  %v1466_v46 = vld [vmem:[%s14592_s5 + $0x1f0] sm:$0xff] }
 0x479   :  { %v10637_v19 = vpack.c.bf16 %v1466_v46, %v1464_v44  ;;  %v8154_v44 = vld [vmem:[%s14592_s5 + $0x470] sm:$0xff]  ;;  %v8157_v46 = vld [vmem:[%s14592_s5 + $0x488] sm:$0xff] }
 0x47b   :  { %10622 = vmatpush1.bf16.msra.mxu1 %v10621_v52  ;;  %v13236_v48 = vpop.f32.mrb[64].mxu0 }
 0x47c   :  { %10624 = vmatprep.subr.bf16.mxu1 %v10623_v55  ;;  %v13240_v16 = vpop.f32.mrb[65].mxu0  ;;  %v10639_v55 = vpack.c.bf16 %v8143_v20, %v8141_v47  ;;  %v8159_v47 = vld [vmem:[%s14592_s5 + $0x498] sm:$0xff]  ;;  %v8156_v20 = vld [vmem:[%s14592_s5 + $0x480] sm:$0xff] }
 0x47f   :  { %10626 = vmatpush1.bf16.msra.mxu1 %v10625_v57  ;;  %v13244_v60 = vpop.f32.mrb[66].mxu0  ;;  %v8147_v57 = vld [vmem:[%s14592_s5 + $0x438] sm:$0xff] }
 0x480   :  { %10628 = vmatprep.subr.bf16.mxu1 %v10627_v11  ;;  %v13248_v37 = vpop.f32.mrb[67].mxu0  ;;  %v10641_v11 = vpack.c.bf16 %v8142_v62, %v8140_v56  ;;  %v10643_v58 = vpack.c.bf16 %v8147_v57, %v8145_v54  ;;  %v8163_v56 = vld [vmem:[%s14592_s5 + $0x4b8] sm:$0xff]  ;;  %v8160_v62 = vld [vmem:[%s14592_s5 + $0x4a0] sm:$0xff]  ;;  %v8162_v54 = vld [vmem:[%s14592_s5 + $0x4b0] sm:$0xff] }
 0x481   :  { %v8165_v57 = vld [vmem:[%s14592_s5 + $0x4c8] sm:$0xff] }
 0x483   :  { %10630 = vmatpush1.bf16.msra.mxu1 %v10629_v24  ;;  %v13252_v42 = vpop.f32.mrb[68].mxu0  ;;  %v8151_v24 = vld [vmem:[%s14592_s5 + $0x458] sm:$0xff] }
 0x484   :  { %10632 = vmatprep.subr.bf16.mxu1 %v10631_v7  ;;  %v13256_v63 = vpop.f32.mrb[69].mxu0  ;;  %v10645_v7 = vpack.c.bf16 %v8146_v59, %v8144_v50  ;;  %v10647_v0 = vpack.c.bf16 %v8151_v24, %v8149_v18  ;;  %v8166_v50 = vld [vmem:[%s14592_s5 + $0x4d0] sm:$0xff]  ;;  %v8169_v59 = vld [vmem:[%s14592_s5 + $0x4e8] sm:$0xff]  ;;  %v8171_v18 = vld [vmem:[%s14592_s5 + $0x4f8] sm:$0xff] }
 0x485   :  { %v8168_v24 = vld [vmem:[%s14592_s5 + $0x4e0] sm:$0xff] }
 0x487   :  { %10634 = vmatpush1.bf16.msra.mxu1 %v10633_v40  ;;  %v13260_v52 = vpop.f32.mrb[70].mxu0  ;;  %v8155_v40 = vld [vmem:[%s14592_s5 + $0x478] sm:$0xff] }
 0x488   :  { %10636 = vmatprep.subr.bf16.mxu1 %v10635_v43  ;;  %v13264_v10 = vpop.f32.mrb[71].mxu0  ;;  %v8152_v43 = vld [vmem:[%s14592_s5 + $0x460] sm:$0xff] }
 0x48b   :  { %10638 = vmatpush1.bf16.msra.mxu1 %v10637_v19  ;;  %v8158_v19 = vld [vmem:[%s14592_s5 + $0x490] sm:$0xff] }
 0x48c   :  { %10640 = vmatprep.subr.bf16.mxu1 %v10639_v55  ;;  %v8161_v55 = vld [vmem:[%s14592_s5 + $0x4a8] sm:$0xff] }
 0x48e   :  { %1711 = vmatmul.mubr.f32.vlgmr.msra.gmra.mrb[16].mxu1 %v13135_v15  ;;  %v10649_v15 = vpack.c.bf16 %v8150_v17, %v8148_v14  ;;  %v8175_v14 = vld [vmem:[%s14592_s5 + $0x518] sm:$0xff]  ;;  %v8172_v17 = vld [vmem:[%s14592_s5 + $0x500] sm:$0xff] }
 0x48f   :  { %1716 = vmatprep.mubr.f32.mxu1 %v13141_v8  ;;  %10642 = vmatpush1.bf16.msra.mxu1 %v10641_v11  ;;  %v10651_v8 = vpack.c.bf16 %v8155_v40, %v8153_v39  ;;  %v8167_v11 = vld [vmem:[%s14592_s5 + $0x4d8] sm:$0xff]  ;;  %v8174_v39 = vld [vmem:[%s14592_s5 + $0x510] sm:$0xff]  ;;  %v8177_v40 = vld [vmem:[%s14592_s5 + $0x528] sm:$0xff] }
 0x490   :  { %10644 = vmatprep.subr.bf16.mxu1 %v10643_v58  ;;  %v8164_v58 = vld [vmem:[%s14592_s5 + $0x4c0] sm:$0xff] }
 0x492   :  { %1717 = vmatmul.mubr.f32.gmra.mrb[18].mxu1 %v13139_v51  ;;  %v10653_v51 = vpack.c.bf16 %v8154_v44, %v8152_v43  ;;  %v8178_v43 = vld [vmem:[%s14592_s5 + $0x530] sm:$0xff]  ;;  %v8181_v44 = vld [vmem:[%s14592_s5 + $0x548] sm:$0xff] }
 0x493   :  { %1722 = vmatprep.mubr.f32.mxu1 %v13145_v26  ;;  %10646 = vmatpush1.bf16.msra.mxu1 %v10645_v7  ;;  %v10655_v26 = vpack.c.bf16 %v8159_v47, %v8157_v46  ;;  %v8170_v7 = vld [vmem:[%s14592_s5 + $0x4f0] sm:$0xff]  ;;  %v8183_v46 = vld [vmem:[%s14592_s5 + $0x558] sm:$0xff] }
 0x494   :  { %10648 = vmatprep.subr.bf16.mxu1 %v10647_v0  ;;  %v8173_v0 = vld [vmem:[%s14592_s5 + $0x508] sm:$0xff] }
 0x496   :  { %1723 = vmatmul.mubr.f32.gmra.mrb[20].mxu1 %v13143_v25  ;;  %v10657_v25 = vpack.c.bf16 %v8158_v19, %v8156_v20  ;;  %v8185_v20 = vld [vmem:[%s14592_s5 + $0x568] sm:$0xff] }
 0x497   :  { %1728 = vmatprep.mubr.f32.mxu1 %v13149_v28  ;;  %10650 = vmatpush1.bf16.msra.mxu1 %v10649_v15  ;;  %v10659_v28 = vpack.c.bf16 %v8163_v56, %v8161_v55  ;;  %v8179_v15 = vld [vmem:[%s14592_s5 + $0x538] sm:$0xff]  ;;  %v8184_v56 = vld [vmem:[%s14592_s5 + $0x560] sm:$0xff] }
 0x498   :  { %10652 = vmatprep.subr.bf16.mxu1 %v10651_v8  ;;  %v8176_v8 = vld [vmem:[%s14592_s5 + $0x520] sm:$0xff] }
 0x499   :  { %v10677_v47 = vpack.c.bf16 %v8178_v43, %v8176_v8 }
 0x49a   :  { %1729 = vmatmul.mubr.f32.gmra.mrb[22].mxu1 %v13147_v27  ;;  %v10661_v27 = vpack.c.bf16 %v8162_v54, %v8160_v62  ;;  %v8191_v62 = vld [vmem:[%s14592_s5 + $0x598] sm:$0xff] }
 0x49b   :  { %1734 = vmatprep.mubr.f32.mxu1 %v13153_v30  ;;  %10654 = vmatpush1.bf16.msra.mxu1 %v10653_v51  ;;  %v10663_v30 = vpack.c.bf16 %v8167_v11, %v8165_v57  ;;  %v8180_v51 = vld [vmem:[%s14592_s5 + $0x540] sm:$0xff] }
 0x49c   :  { %10656 = vmatprep.subr.bf16.mxu1 %v10655_v26  ;;  %v8182_v26 = vld [vmem:[%s14592_s5 + $0x550] sm:$0xff]  ;;  %v8188_v11 = vld [vmem:[%s14592_s5 + $0x580] sm:$0xff] }
 0x49d   :  { %v10681_v19 = vpack.c.bf16 %v8182_v26, %v8180_v51 }
 0x49e   :  { %1735 = vmatmul.mubr.f32.gmra.mrb[24].mxu1 %v13151_v29  ;;  %v10665_v29 = vpack.c.bf16 %v8166_v50, %v8164_v58  ;;  %v8195_v58 = vld [vmem:[%s14592_s5 + $0x5b8] sm:$0xff] }
 0x49f   :  { %1740 = vmatprep.mubr.f32.mxu1 %v13157_v32  ;;  %10658 = vmatpush1.bf16.msra.mxu1 %v10657_v25  ;;  %v10667_v32 = vpack.c.bf16 %v8171_v18, %v8169_v59  ;;  %v8186_v25 = vld [vmem:[%s14592_s5 + $0x570] sm:$0xff]  ;;  %v8192_v18 = vld [vmem:[%s14592_s5 + $0x5a0] sm:$0xff] }
 0x4a0   :  { %10660 = vmatprep.subr.bf16.mxu1 %v10659_v28  ;;  %v8189_v28 = vld [vmem:[%s14592_s5 + $0x588] sm:$0xff]  ;;  %v10685_v54 = vpack.c.bf16 %v8186_v25, %v8184_v56 }
 0x4a1   :  { %v10687_v57 = vpack.c.bf16 %v8191_v62, %v8189_v28 }
 0x4a2   :  { %1741 = vmatmul.mubr.f32.gmra.mrb[26].mxu1 %v13155_v31  ;;  %v10669_v31 = vpack.c.bf16 %v8170_v7, %v8168_v24  ;;  %v8199_v24 = vld [vmem:[%s14592_s5 + $0x5d8] sm:$0xff] }
 0x4a3   :  { %1746 = vmatprep.mubr.f32.mxu1 %v13161_v34  ;;  %10662 = vmatpush1.bf16.msra.mxu1 %v10661_v27  ;;  %v10671_v34 = vpack.c.bf16 %v8175_v14, %v8173_v0  ;;  %v8190_v27 = vld [vmem:[%s14592_s5 + $0x590] sm:$0xff]  ;;  %v8196_v14 = vld [vmem:[%s14592_s5 + $0x5c0] sm:$0xff] }
 0x4a4   :  { %10664 = vmatprep.subr.bf16.mxu1 %v10663_v30  ;;  %v8193_v30 = vld [vmem:[%s14592_s5 + $0x5a8] sm:$0xff]  ;;  %v10689_v50 = vpack.c.bf16 %v8190_v27, %v8188_v11 }
 0x4a5   :  { %v10691_v59 = vpack.c.bf16 %v8195_v58, %v8193_v30 }
 0x4a6   :  { %1747 = vmatmul.mubr.f32.gmra.mrb[28].mxu1 %v13159_v33  ;;  %v10673_v33 = vpack.c.bf16 %v8174_v39, %v8172_v17  ;;  %v8203_v17 = vld [vmem:[%s14592_s5 + $0x5f8] sm:$0xff] }
 0x4a7   :  { %1752 = vmatprep.mubr.f32.mxu1 %v13165_v36  ;;  %10666 = vmatpush1.bf16.msra.mxu1 %v10665_v29  ;;  %v10675_v36 = vpack.c.bf16 %v8179_v15, %v8177_v40  ;;  %v8194_v29 = vld [vmem:[%s14592_s5 + $0x5b0] sm:$0xff]  ;;  %v8200_v15 = vld [vmem:[%s14592_s5 + $0x5e0] sm:$0xff] }
 0x4a8   :  { %10668 = vmatprep.subr.bf16.mxu1 %v10667_v32  ;;  %v8197_v32 = vld [vmem:[%s14592_s5 + $0x5c8] sm:$0xff]  ;;  %v10693_v7 = vpack.c.bf16 %v8194_v29, %v8192_v18 }
 0x4a9   :  { %v10695_v0 = vpack.c.bf16 %v8199_v24, %v8197_v32 }
 0x4aa   :  { %1753 = vmatmul.mubr.f32.gmra.mrb[30].mxu1 %v13163_v35  ;;  %v10679_v35 = vpack.c.bf16 %v8183_v46, %v8181_v44 }
 0x4ab   :  { %10670 = vmatpush1.bf16.msra.mxu1 %v10669_v31  ;;  %1888 = vmatprep.mubr.f32.mxu1 %v13208_v23  ;;  %v8187_v23 = vld [vmem:[%s14592_s5 + $0x578] sm:$0xff]  ;;  %v8198_v31 = vld [vmem:[%s14592_s5 + $0x5d0] sm:$0xff] }
 0x4ac   :  { %10672 = vmatprep.subr.bf16.mxu1 %v10671_v34  ;;  %v10683_v55 = vpack.c.bf16 %v8187_v23, %v8185_v20  ;;  %v8201_v34 = vld [vmem:[%s14592_s5 + $0x5e8] sm:$0xff]  ;;  %v10697_v39 = vpack.c.bf16 %v8198_v31, %v8196_v14 }
 0x4ad   :  { %v10699_v40 = vpack.c.bf16 %v8203_v17, %v8201_v34 }
 0x4af   :  { %10674 = vmatpush1.bf16.msra.mxu1 %v10673_v33  ;;  %v8202_v33 = vld [vmem:[%s14592_s5 + $0x5f0] sm:$0xff] }
 0x4b0   :  { %10676 = vmatprep.subr.bf16.mxu1 %v10675_v36  ;;  %v10701_v36 = vpack.c.bf16 %v8202_v33, %v8200_v15 }
 0x4b3   :  { %10678 = vmatpush1.bf16.msra.mxu1 %v10677_v47 }
 0x4b4   :  { %10680 = vmatprep.subr.bf16.mxu1 %v10679_v35 }
 0x4b7   :  { %10682 = vmatpush1.bf16.msra.mxu1 %v10681_v19 }
 0x4b8   :  { %10684 = vmatprep.subr.bf16.mxu1 %v10683_v55 }
 0x4bb   :  { %10686 = vmatpush1.bf16.msra.mxu1 %v10685_v54 }
 0x4bc   :  { %10688 = vmatprep.subr.bf16.mxu1 %v10687_v57 }
 0x4bf   :  { %10690 = vmatpush1.bf16.msra.mxu1 %v10689_v50 }
 0x4c0   :  { %10692 = vmatprep.subr.bf16.mxu1 %v10691_v59 }
 0x4c3   :  { %10694 = vmatpush1.bf16.msra.mxu1 %v10693_v7 }
 0x4c4   :  { %10696 = vmatprep.subr.bf16.mxu1 %v10695_v0 }
 0x4c7   :  { %10698 = vmatpush1.bf16.msra.mxu1 %v10697_v39 }
 0x4c8   :  { %10700 = vmatprep.subr.bf16.mxu1 %v10699_v40 }
 0x4cb   :  { %10702 = vmatpush1.bf16.msra.mxu1 %v10701_v36 }
 0x4ce   :  { %1889 = vmatmul.mubr.f32.vlgmr.msra.gmra.mrb[16].mxu1 %v13204_v61  ;;  %v1969_v61 = vld [vmem:[#allocation5] sm:$0xf] }
 0x4cf   :  { %1894 = vmatprep.mubr.f32.mxu1 %v13216_v41  ;;  %v1978_v41 = vrot.slane %v1969_v61, %v1133_v49 }
 0x4d2   :  { %1895 = vmatmul.mubr.f32.gmra.mrb[18].mxu1 %v13212_v38  ;;  %v1974_v38 = vrot.slane %v1969_v61, %v12940_v22 }
 0x4d3   :  { %1900 = vmatprep.mubr.f32.mxu1 %v13224_v2 }
 0x4d6   :  { %1901 = vmatmul.mubr.f32.gmra.mrb[20].mxu1 %v13220_v45 }
 0x4d7   :  { %1906 = vmatprep.mubr.f32.mxu1 %v13232_v4  ;;  %v2008_v4 = vrot.slane %v1969_v61, %v12945_v1 }
 0x4d9   :  { %v13371_v49 = vrot.slane %v2008_v4, %v12945_v1 }
 0x4da   :  { %1907 = vmatmul.mubr.f32.gmra.mrb[22].mxu1 %v13228_v53  ;;  %v13361_v53 = vrot.slane %v1974_v38, %v12940_v22 }
 0x4db   :  { %1912 = vmatprep.mubr.f32.mxu1 %v13240_v16 }
 0x4de   :  { %1913 = vmatmul.mubr.f32.gmra.mrb[24].mxu1 %v13236_v48 }
 0x4df   :  { %1918 = vmatprep.mubr.f32.mxu1 %v13248_v37  ;;  %v2012_v37 = vrot.slane %v1969_v61, %v1167_v6 }
 0x4e1   :  { %v13375_v43 = vrot.slane %v2012_v37, %v12945_v1 }
 0x4e2   :  { %1919 = vmatmul.mubr.f32.gmra.mrb[26].mxu1 %v13244_v60  ;;  %v13365_v60 = vrot.slane %v1978_v41, %v12940_v22 }
 0x4e3   :  { %1924 = vmatprep.mubr.f32.mxu1 %v13256_v63 }
 0x4e6   :  { %1925 = vmatmul.mubr.f32.gmra.mrb[28].mxu1 %v13252_v42 }
 0x4e7   :  { %1930 = vmatprep.mubr.f32.mxu1 %v13264_v10 }
 0x4ea   :  { %1931 = vmatmul.mubr.f32.gmra.mrb[30].mxu1 %v13260_v52 }
 0x5a1   :  { %v1890_v45 = vpop.f32.mrb[16].mxu1 }
 0x5a2   :  { %v1953_v2 = vmax.f32 %v1890_v45, 0.0  ;;  %v1892_v48 = vpop.f32.mrb[17].mxu1 }
 0x5a3   :  { %v1954_v16 = vmax.f32 %v1892_v48, 0.0 }
 0x5a4   :  { %v1989_v63 = vmul.f32 %v13361_v53, %v1953_v2 }
 0x5a5   :  { %v1896_v42 = vpop.f32.mrb[18].mxu1  ;;  %v1990_v8 = vmul.f32 %v13365_v60, %v1954_v16 }
 0x5a6   :  { %v1955_v52 = vmax.f32 %v1896_v42, 0.0  ;;  %v1898_v10 = vpop.f32.mrb[19].mxu1  ;;  %v2023_v6 = vadd.f32 %v13371_v49, %v1989_v63 }
 0x5a7   :  { %v1956_v44 = vmax.f32 %v1898_v10, 0.0  ;;  %v2024_v20 = vadd.f32 %v13375_v43, %v1990_v8 }
 0x5a8   :  { %v1991_v46 = vmul.f32 %v13361_v53, %v1955_v52 }
 0x5a9   :  { %v1992_v47 = vmul.f32 %v13365_v60, %v1956_v44  ;;  %v1902_v21 = vpop.f32.mrb[20].mxu1 }
 0x5aa   :  { %v2025_v35 = vadd.f32 %v13371_v49, %v1991_v46  ;;  %v1957_v51 = vmax.f32 %v1902_v21, 0.0  ;;  %v1904_v26 = vpop.f32.mrb[21].mxu1 }
 0x5ab   :  { %v2026_v23 = vadd.f32 %v13375_v43, %v1992_v47  ;;  %v1958_v19 = vmax.f32 %v1904_v26, 0.0  ;;  %v2198_v26 = vld [vmem:[%s14593_s1 + $0x20] sm:$0xff] }
 0x5ac   :  { %v10705_v55 = vpack.c.bf16 %v2025_v35, %v2023_v6  ;;  %v1993_v28 = vmul.f32 %v13361_v53, %v1957_v51  ;;  %v2195_v51 = vld [vmem:[%s14593_s1 + $0x8] sm:$0xff] }
 0x5ad   :  { %v1908_v56 = vpop.f32.mrb[22].mxu1  ;;  %v10703_v25 = vpack.c.bf16 %v2026_v23, %v2024_v20  ;;  %v1994_v57 = vmul.f32 %v13365_v60, %v1958_v19 }
 0x5ae   :  { %v1959_v62 = vmax.f32 %v1908_v56, 0.0  ;;  %v1910_v54 = vpop.f32.mrb[23].mxu1  ;;  %v2027_v50 = vadd.f32 %v13371_v49, %v1993_v28  ;;  %v2194_v56 = vld [vmem:[%s14593_s1] sm:$0xff]  ;;  %v2204_v28 = vld [vmem:[%s14593_s1 + $0x50] sm:$0xff] }
 0x5af   :  { %v1960_v11 = vmax.f32 %v1910_v54, 0.0  ;;  %10704 = vmatprep.subr.bf16.mxu0 %v10703_v25  ;;  %v2028_v32 = vadd.f32 %v13375_v43, %v1994_v57  ;;  %v2201_v25 = vld [vmem:[%s14593_s1 + $0x38] sm:$0xff]  ;;  %v2200_v54 = vld [vmem:[%s14593_s1 + $0x30] sm:$0xff]  ;;  %v2203_v57 = vld [vmem:[%s14593_s1 + $0x48] sm:$0xff] }
 0x5b0   :  { %v1995_v27 = vmul.f32 %v13361_v53, %v1959_v62  ;;  %10706 = vmatpush1.bf16.msra.mxu0 %v10705_v55  ;;  %v10719_v55 = vpack.c.bf16 %v2198_v26, %v2195_v51  ;;  %v2239_v51 = vld [vmem:[%s14593_s1 + $0x168] sm:$0xff] }
 0x5b1   :  { %v1996_v30 = vmul.f32 %v13365_v60, %v1960_v11  ;;  %v1914_v58 = vpop.f32.mrb[24].mxu1  ;;  %v2207_v11 = vld [vmem:[%s14593_s1 + $0x68] sm:$0xff] }
 0x5b2   :  { %v2029_v59 = vadd.f32 %v13371_v49, %v1995_v27  ;;  %v1961_v18 = vmax.f32 %v1914_v58, 0.0  ;;  %v1916_v29 = vpop.f32.mrb[25].mxu1  ;;  %v2210_v27 = vld [vmem:[%s14593_s1 + $0x80] sm:$0xff]  ;;  %v10725_v58 = vpack.c.bf16 %v2203_v57, %v2200_v54  ;;  %v2243_v26 = vld [vmem:[%s14593_s1 + $0x188] sm:$0xff] }
 0x5b3   :  { %v2030_v24 = vadd.f32 %v13375_v43, %v1996_v30  ;;  %v1962_v7 = vmax.f32 %v1916_v29, 0.0  ;;  %v2040_v30 = vld [vmem:[%s14594_s25 + $0x8] sm:$0xff]  ;;  %v2213_v29 = vld [vmem:[%s14593_s1 + $0x98] sm:$0xff] }
 0x5b4   :  { %v10709_v0 = vpack.c.bf16 %v2029_v59, %v2027_v50  ;;  %v1997_v34 = vmul.f32 %v13361_v53, %v1961_v18  ;;  %v10727_v50 = vpack.c.bf16 %v2210_v27, %v2207_v11  ;;  %v2206_v59 = vld [vmem:[%s14593_s1 + $0x60] sm:$0xff]  ;;  %v2209_v18 = vld [vmem:[%s14593_s1 + $0x78] sm:$0xff]  ;;  %v2251_v54 = vld [vmem:[%s14593_s1 + $0x1c8] sm:$0xff] }
 0x5b5   :  { %v1920_v14 = vpop.f32.mrb[26].mxu1  ;;  %v10707_v31 = vpack.c.bf16 %v2030_v24, %v2028_v32  ;;  %v1998_v40 = vmul.f32 %v13365_v60, %v1962_v7  ;;  %v2216_v32 = vld [vmem:[%s14593_s1 + $0xb0] sm:$0xff]  ;;  %v10729_v7 = vpack.c.bf16 %v2209_v18, %v2206_v59  ;;  %v2255_v57 = vld [vmem:[%s14593_s1 + $0x1e8] sm:$0xff]  ;;  %v2258_v11 = vld [vmem:[%s14593_s1 + $0x200] sm:$0xff] }
 0x5b6   :  { %v1963_v17 = vmax.f32 %v1920_v14, 0.0  ;;  %v1922_v39 = vpop.f32.mrb[27].mxu1  ;;  %v2031_v38 = vadd.f32 %v13371_v49, %v1997_v34  ;;  %v2041_v24 = vld [vmem:[%s14594_s25 + $0x10] sm:$0xff]  ;;  %v2219_v34 = vld [vmem:[%s14593_s1 + $0xc8] sm:$0xff]  ;;  %v2261_v59 = vld [vmem:[%s14593_s1 + $0x218] sm:$0xff] }
 0x5b7   :  { %v1964_v15 = vmax.f32 %v1922_v39, 0.0  ;;  %10708 = vmatprep.subr.bf16.mxu0 %v10707_v31  ;;  %v2032_v4 = vadd.f32 %v13375_v43, %v1998_v40  ;;  %v2212_v14 = vld [vmem:[%s14593_s1 + $0x90] sm:$0xff]  ;;  %v2215_v31 = vld [vmem:[%s14593_s1 + $0xa8] sm:$0xff]  ;;  %v2042_v39 = vld [vmem:[%s14594_s25 + $0x18] sm:$0xff] }
 0x5b8   :  { %v1999_v33 = vmul.f32 %v13361_v53, %v1963_v17  ;;  %10710 = vmatpush1.bf16.msra.mxu0 %v10709_v0  ;;  %v10731_v0 = vpack.c.bf16 %v2216_v32, %v2213_v29  ;;  %v2222_v17 = vld [vmem:[%s14593_s1 + $0xe0] sm:$0xff]  ;;  %v10733_v40 = vpack.c.bf16 %v2215_v31, %v2212_v14  ;;  %v2264_v18 = vld [vmem:[%s14593_s1 + $0x230] sm:$0xff] }
 0x5b9   :  { %v2000_v36 = vmul.f32 %v13365_v60, %v1964_v15  ;;  %v1926_v61 = vpop.f32.mrb[28].mxu1  ;;  %v10735_v15 = vpack.c.bf16 %v2222_v17, %v2219_v34  ;;  %v10763_v32 = vpack.c.bf16 %v2264_v18, %v2261_v59  ;;  %v2270_v14 = vld [vmem:[%s14593_s1 + $0x260] sm:$0xff] }
 0x5ba   :  { %v2033_v41 = vadd.f32 %v13371_v49, %v1999_v33  ;;  %v1965_v45 = vmax.f32 %v1926_v61, 0.0  ;;  %v1928_v2 = vpop.f32.mrb[29].mxu1  ;;  %v2218_v33 = vld [vmem:[%s14593_s1 + $0xc0] sm:$0xff]  ;;  %v2225_v61 = vld [vmem:[%s14593_s1 + $0xf8] sm:$0xff] }
 0x5bb   :  { %v2034_v48 = vadd.f32 %v13375_v43, %v2000_v36  ;;  %v1966_v16 = vmax.f32 %v1928_v2, 0.0  ;;  %v2221_v36 = vld [vmem:[%s14593_s1 + $0xd8] sm:$0xff]  ;;  %v2266_v17 = vld [vmem:[%s14593_s1 + $0x240] sm:$0xff] }
 0x5bc   :  { %v10713_v37 = vpack.c.bf16 %v2033_v41, %v2031_v38  ;;  %v2001_v52 = vmul.f32 %v13361_v53, %v1965_v45  ;;  %v2228_v38 = vld [vmem:[%s14593_s1 + $0x110] sm:$0xff]  ;;  %v2043_v41 = vld [vmem:[%s14594_s25 + $0x20] sm:$0xff]  ;;  %v10737_v45 = vpack.c.bf16 %v2221_v36, %v2218_v33 }
 0x5bd   :  { %v1932_v42 = vpop.f32.mrb[30].mxu1  ;;  %v10711_v63 = vpack.c.bf16 %v2034_v48, %v2032_v4  ;;  %v2002_v44 = vmul.f32 %v13365_v60, %v1966_v16  ;;  %v10739_v2 = vpack.c.bf16 %v2228_v38, %v2225_v61  ;;  %v2224_v4 = vld [vmem:[%s14593_s1 + $0xf0] sm:$0xff]  ;;  %v2227_v48 = vld [vmem:[%s14593_s1 + $0x108] sm:$0xff]  ;;  %v2214_v18 = vld [vmem:[%s14593_s1 + $0xa0] sm:$0xff] }
 0x5be   :  { %v1967_v10 = vmax.f32 %v1932_v42, 0.0  ;;  %v1934_v8 = vpop.f32.mrb[31].mxu1  ;;  %v2035_v6 = vadd.f32 %v13371_v49, %v2001_v52  ;;  %v2231_v16 = vld [vmem:[%s14593_s1 + $0x128] sm:$0xff]  ;;  %v2272_v61 = vld [vmem:[%s14593_s1 + $0x270] sm:$0xff] }
 0x5bf   :  { %v1968_v46 = vmax.f32 %v1934_v8, 0.0  ;;  %10712 = vmatprep.subr.bf16.mxu0 %v10711_v63  ;;  %v2036_v20 = vadd.f32 %v13375_v43, %v2002_v44  ;;  %v2044_v42 = vld [vmem:[%s14594_s25 + $0x28] sm:$0xff]  ;;  %v10741_v63 = vpack.c.bf16 %v2227_v48, %v2224_v4  ;;  %v2233_v8 = vld [vmem:[%s14593_s1 + $0x138] sm:$0xff]  ;;  %v2278_v48 = vld [vmem:[%s14593_s1 + $0x2a0] sm:$0xff] }
 0x5c0   :  { %v2003_v47 = vmul.f32 %v13361_v53, %v1967_v10  ;;  %10714 = vmatpush1.bf16.msra.mxu0 %v10713_v37  ;;  %v2234_v37 = vld [vmem:[%s14593_s1 + $0x140] sm:$0xff]  ;;  %v2237_v44 = vld [vmem:[%s14593_s1 + $0x158] sm:$0xff]  ;;  %v2275_v38 = vld [vmem:[%s14593_s1 + $0x288] sm:$0xff] }
 0x5c1   :  { %v2004_v21 = vmul.f32 %v13365_v60, %v1968_v46  ;;  %v2197_v60 = vld [vmem:[%s14593_s1 + $0x18] sm:$0xff]  ;;  %v10743_v52 = vpack.c.bf16 %v2234_v37, %v2231_v16  ;;  %v2230_v10 = vld [vmem:[%s14593_s1 + $0x120] sm:$0xff]  ;;  %v2240_v46 = vld [vmem:[%s14593_s1 + $0x170] sm:$0xff] }
 0x5c2   :  { %v2037_v35 = vadd.f32 %v13371_v49, %v2003_v47  ;;  %v2039_v49 = vld [vmem:[%s14594_s25] sm:$0xff]  ;;  %v10721_v62 = vpack.c.bf16 %v2197_v60, %v2194_v56  ;;  %v2045_v47 = vld [vmem:[%s14594_s25 + $0x30] sm:$0xff]  ;;  %v2245_v56 = vld [vmem:[%s14593_s1 + $0x198] sm:$0xff] }
 0x5c3   :  { %v2038_v23 = vadd.f32 %v13375_v43, %v2004_v21  ;;  %v10723_v43 = vpack.c.bf16 %v2204_v28, %v2201_v25  ;;  %v10745_v21 = vpack.c.bf16 %v2233_v8, %v2230_v10  ;;  %v2249_v60 = vld [vmem:[%s14593_s1 + $0x1b8] sm:$0xff]  ;;  %v2252_v25 = vld [vmem:[%s14593_s1 + $0x1d0] sm:$0xff]  ;;  %v2047_v28 = vld [vmem:[%s14594_s25 + $0x40] sm:$0xf] }
 0x5c4   :  { %v10717_v19 = vpack.c.bf16 %v2037_v35, %v2035_v6  ;;  %v10747_v6 = vpack.c.bf16 %v2240_v46, %v2237_v44  ;;  %v2236_v35 = vld [vmem:[%s14593_s1 + $0x150] sm:$0xff]  ;;  %v2281_v16 = vld [vmem:[%s14593_s1 + $0x2b8] sm:$0xff]  ;;  %v2287_v8 = vld [vmem:[%s14593_s1 + $0x2e8] sm:$0xff] }
 0x5c5   :  { %v10715_v53 = vpack.c.bf16 %v2038_v23, %v2036_v20  ;;  %v2246_v20 = vld [vmem:[%s14593_s1 + $0x1a0] sm:$0xff]  ;;  %v2046_v23 = vld [vmem:[%s14594_s25 + $0x38] sm:$0xff]  ;;  %v2284_v10 = vld [vmem:[%s14593_s1 + $0x2d0] sm:$0xff] }
 0x5c6   :  { %v2285_v37 = vld [vmem:[%s14593_s1 + $0x2d8] sm:$0xff]  ;;  %v10781_v44 = vpack.c.bf16 %v2287_v8, %v2284_v10  ;;  %v2244_v46 = vld [vmem:[%s14593_s1 + $0x190] sm:$0xff] }
 0x5c7   :  { %10716 = vmatprep.subr.bf16.mxu0 %v10715_v53  ;;  %v10751_v53 = vpack.c.bf16 %v2246_v20, %v2243_v26  ;;  %v2253_v26 = vld [vmem:[%s14593_s1 + $0x1d8] sm:$0xff] }
 0x5c8   :  { %10718 = vmatpush1.bf16.msra.mxu0 %v10717_v19  ;;  %v10749_v19 = vpack.c.bf16 %v2239_v51, %v2236_v35  ;;  %v2199_v35 = vld [vmem:[%s14593_s1 + $0x28] sm:$0xff]  ;;  %v2250_v51 = vld [vmem:[%s14593_s1 + $0x1c0] sm:$0xff]  ;;  %v2289_v10 = vld [vmem:[%s14593_s1 + $0x2f8] sm:$0xff] }
 0x5c9   :  { %10720 = vmatprep.subr.bf16.mxu0 %v10719_v55  ;;  %v2242_v55 = vld [vmem:[%s14593_s1 + $0x180] sm:$0xff] }
 0x5cb   :  { %8204 = vmatmul.mubr.msk.f32.vlgmr.msra.gmra.mrb[72].mxu0 %vm349_vm0, %v2039_v49  ;;  %v10753_v49 = vpack.c.bf16 %v2245_v56, %v2242_v55  ;;  %v2202_v55 = vld [vmem:[%s14593_s1 + $0x40] sm:$0xff]  ;;  %v2205_v56 = vld [vmem:[%s14593_s1 + $0x58] sm:$0xff] }
 0x5cc   :  { %2145 = vmatprep.mubr.f32.mxu0 %v12335_v13  ;;  %10722 = vmatpush1.bf16.msra.mxu0 %v10721_v62  ;;  %v10755_v62 = vpack.c.bf16 %v2252_v25, %v2249_v60  ;;  %v2256_v60 = vld [vmem:[%s14593_s1 + $0x1f0] sm:$0xff]  ;;  %v2259_v25 = vld [vmem:[%s14593_s1 + $0x208] sm:$0xff] }
 0x5cd   :  { %10724 = vmatprep.subr.bf16.mxu0 %v10723_v43  ;;  %v2248_v43 = vld [vmem:[%s14593_s1 + $0x1b0] sm:$0xff] }
 0x5ce   :  { %v10757_v27 = vpack.c.bf16 %v2251_v54, %v2248_v43  ;;  %v10791_v43 = vpack.c.bf16 %v2259_v25, %v2256_v60  ;;  %v2208_v54 = vld [vmem:[%s14593_s1 + $0x70] sm:$0xff] }
 0x5cf   :  { %8205 = vmatmul.mubr.msk.f32.gmra.mrb[74].mxu0 %vm349_vm0, %v2040_v30  ;;  %v10759_v30 = vpack.c.bf16 %v2258_v11, %v2255_v57  ;;  %v2211_v57 = vld [vmem:[%s14593_s1 + $0x88] sm:$0xff]  ;;  %v2262_v11 = vld [vmem:[%s14593_s1 + $0x220] sm:$0xff] }
 0x5d0   :  { %2151 = vmatprep.mubr.f32.mxu0 %v12335_v13  ;;  %10726 = vmatpush1.bf16.msra.mxu0 %v10725_v58  ;;  %v2254_v58 = vld [vmem:[%s14593_s1 + $0x1e0] sm:$0xff] }
 0x5d1   :  { %10728 = vmatprep.subr.bf16.mxu0 %v10727_v50  ;;  %v2257_v50 = vld [vmem:[%s14593_s1 + $0x1f8] sm:$0xff] }
 0x5d2   :  { %v10761_v29 = vpack.c.bf16 %v2257_v50, %v2254_v58  ;;  %v10793_v58 = vpack.c.bf16 %v2211_v57, %v2208_v54 }
 0x5d3   :  { %8206 = vmatmul.mubr.msk.f32.gmra.mrb[76].mxu0 %vm349_vm0, %v2041_v24  ;;  %v2260_v24 = vld [vmem:[%s14593_s1 + $0x210] sm:$0xff] }
 0x5d4   :  { %2157 = vmatprep.mubr.f32.mxu0 %v12335_v13  ;;  %10730 = vmatpush1.bf16.msra.mxu0 %v10729_v7  ;;  %v2263_v7 = vld [vmem:[%s14593_s1 + $0x228] sm:$0xff] }
 0x5d5   :  { %10732 = vmatprep.subr.bf16.mxu0 %v10731_v0  ;;  %v2267_v0 = vld [vmem:[%s14593_s1 + $0x248] sm:$0xff]  ;;  %v10765_v31 = vpack.c.bf16 %v2263_v7, %v2260_v24 }
 0x5d6   :  { %v10767_v34 = vpack.c.bf16 %v2270_v14, %v2267_v0  ;;  %v2271_v24 = vld [vmem:[%s14593_s1 + $0x268] sm:$0xff] }
 0x5d7   :  { %8207 = vmatmul.mubr.msk.f32.gmra.mrb[78].mxu0 %vm349_vm0, %v2042_v39  ;;  %v2269_v39 = vld [vmem:[%s14593_s1 + $0x258] sm:$0xff] }
 0x5d8   :  { %2163 = vmatprep.mubr.f32.mxu0 %v12335_v13  ;;  %10734 = vmatpush1.bf16.msra.mxu0 %v10733_v40  ;;  %v2273_v40 = vld [vmem:[%s14593_s1 + $0x278] sm:$0xff]  ;;  %v10769_v33 = vpack.c.bf16 %v2269_v39, %v2266_v17  ;;  %v2223_v17 = vld [vmem:[%s14593_s1 + $0xe8] sm:$0xff]  ;;  %v2274_v39 = vld [vmem:[%s14593_s1 + $0x280] sm:$0xff] }
 0x5d9   :  { %10736 = vmatprep.subr.bf16.mxu0 %v10735_v15  ;;  %v2276_v15 = vld [vmem:[%s14593_s1 + $0x290] sm:$0xff] }
 0x5da   :  { %v10771_v36 = vpack.c.bf16 %v2276_v15, %v2273_v40  ;;  %v2277_v40 = vld [vmem:[%s14593_s1 + $0x298] sm:$0xff] }
 0x5db   :  { %8208 = vmatmul.mubr.msk.f32.gmra.mrb[80].mxu0 %vm349_vm0, %v2043_v41  ;;  %v2279_v41 = vld [vmem:[%s14593_s1 + $0x2a8] sm:$0xff] }
 0x5dc   :  { %2169 = vmatprep.mubr.f32.mxu0 %v12335_v13  ;;  %10738 = vmatpush1.bf16.msra.mxu0 %v10737_v45  ;;  %v2282_v45 = vld [vmem:[%s14593_s1 + $0x2c0] sm:$0xff] }
 0x5dd   :  { %10740 = vmatprep.subr.bf16.mxu0 %v10739_v2  ;;  %v10773_v2 = vpack.c.bf16 %v2275_v38, %v2272_v61  ;;  %v10775_v4 = vpack.c.bf16 %v2282_v45, %v2279_v41  ;;  %v10803_v61 = vpack.c.bf16 %v2277_v40, %v2274_v39  ;;  %v2226_v38 = vld [vmem:[%s14593_s1 + $0x100] sm:$0xff]  ;;  %v2229_v41 = vld [vmem:[%s14593_s1 + $0x118] sm:$0xff]  ;;  %v2280_v45 = vld [vmem:[%s14593_s1 + $0x2b0] sm:$0xff] }
 0x5de   :  { %v8240_v39 = vld [vmem:[%s14596_s30 + $0x110] sm:$0xff]  ;;  %v8241_v40 = vld [vmem:[%s14596_s30 + $0x118] sm:$0xff] }
 0x5df   :  { %8209 = vmatmul.mubr.msk.f32.gmra.mrb[82].mxu0 %vm349_vm0, %v2044_v42  ;;  %v2288_v42 = vld [vmem:[%s14593_s1 + $0x2f0] sm:$0xff] }
 0x5e0   :  { %2175 = vmatprep.mubr.f32.mxu0 %v12335_v13  ;;  %10742 = vmatpush1.bf16.msra.mxu0 %v10741_v63  ;;  %v10777_v63 = vpack.c.bf16 %v2281_v16, %v2278_v48  ;;  %v10805_v48 = vpack.c.bf16 %v2229_v41, %v2226_v38  ;;  %v10849_v38 = vpack.c.bf16 %v8241_v40, %v8240_v39 }
 0x5e1   :  { %10744 = vmatprep.subr.bf16.mxu0 %v10743_v52  ;;  %v10779_v52 = vpack.c.bf16 %v2288_v42, %v2285_v37  ;;  %v2232_v42 = vld [vmem:[%s14593_s1 + $0x130] sm:$0xff] }
 0x5e3   :  { %8210 = vmatmul.mubr.msk.f32.gmra.mrb[84].mxu0 %vm349_vm0, %v2045_v47  ;;  %v2247_v47 = vld [vmem:[%s14593_s1 + $0x1a8] sm:$0xff] }
 0x5e4   :  { %2181 = vmatprep.mubr.f32.mxu0 %v12335_v13  ;;  %10746 = vmatpush1.bf16.msra.mxu0 %v10745_v21  ;;  %v10783_v21 = vpack.c.bf16 %v2247_v47, %v2244_v46 }
 0x5e5   :  { %10748 = vmatprep.subr.bf16.mxu0 %v10747_v6  ;;  %v2196_v6 = vld [vmem:[%s14593_s1 + $0x10] sm:$0xff] }
 0x5e7   :  { %8211 = vmatmul.mubr.msk.f32.gmra.mrb[86].mxu0 %vm349_vm0, %v2046_v23  ;;  %v10785_v23 = vpack.c.bf16 %v2199_v35, %v2196_v6  ;;  %v2241_v6 = vld [vmem:[%s14593_s1 + $0x178] sm:$0xff] }
 0x5e8   :  { %2187 = vmatprep.mubr.f32.mxu0 %v12335_v13  ;;  %10750 = vmatpush1.bf16.msra.mxu0 %v10749_v19 }
 0x5e9   :  { %10752 = vmatprep.subr.bf16.mxu0 %v10751_v53  ;;  %v10787_v53 = vpack.c.bf16 %v2253_v26, %v2250_v51 }
 0x5eb   :  { %8212 = vmatmul.mubr.msk.f32.gmra.mrb[88].mxu0 %vm349_vm0, %v2047_v28 }
 0x5ec   :  { %10754 = vmatpush1.bf16.msra.mxu0 %v10753_v49  ;;  %v10789_v49 = vpack.c.bf16 %v2205_v56, %v2202_v55 }
 0x5ed   :  { %10756 = vmatprep.subr.bf16.mxu0 %v10755_v62 }
 0x5f0   :  { %10758 = vmatpush1.bf16.msra.mxu0 %v10757_v27  ;;  %v2265_v27 = vld [vmem:[%s14593_s1 + $0x238] sm:$0xff] }
 0x5f1   :  { %10760 = vmatprep.subr.bf16.mxu0 %v10759_v30  ;;  %v10795_v59 = vpack.c.bf16 %v2265_v27, %v2262_v11 }
 0x5f4   :  { %10762 = vmatpush1.bf16.msra.mxu0 %v10761_v29  ;;  %v2217_v29 = vld [vmem:[%s14593_s1 + $0xb8] sm:$0xff] }
 0x5f5   :  { %10764 = vmatprep.subr.bf16.mxu0 %v10763_v32  ;;  %v2268_v32 = vld [vmem:[%s14593_s1 + $0x250] sm:$0xff]  ;;  %v10797_v0 = vpack.c.bf16 %v2217_v29, %v2214_v18 }
 0x5f8   :  { %10766 = vmatpush1.bf16.msra.mxu0 %v10765_v31  ;;  %v10799_v31 = vpack.c.bf16 %v2271_v24, %v2268_v32 }
 0x5f9   :  { %10768 = vmatprep.subr.bf16.mxu0 %v10767_v34  ;;  %v2220_v34 = vld [vmem:[%s14593_s1 + $0xd0] sm:$0xff] }
 0x5fc   :  { %10770 = vmatpush1.bf16.msra.mxu0 %v10769_v33  ;;  %v10801_v33 = vpack.c.bf16 %v2223_v17, %v2220_v34  ;;  %v8257_v34 = vld [vmem:[%s14596_s30 + $0x198] sm:$0xff] }
 0x5fd   :  { %10772 = vmatprep.subr.bf16.mxu0 %v10771_v36 }
 0x600   :  { %10774 = vmatpush1.bf16.msra.mxu0 %v10773_v2  ;;  %v2283_v2 = vld [vmem:[%s14593_s1 + $0x2c8] sm:$0xff] }
 0x601   :  { %10776 = vmatprep.subr.bf16.mxu0 %v10775_v4  ;;  %v10807_v37 = vpack.c.bf16 %v2283_v2, %v2280_v45  ;;  %v8242_v2 = vld [vmem:[%s14596_s30 + $0x120] sm:$0xff] }
 0x604   :  { %10778 = vmatpush1.bf16.msra.mxu0 %v10777_v63  ;;  %v2235_v63 = vld [vmem:[%s14593_s1 + $0x148] sm:$0xff] }
 0x605   :  { %10780 = vmatprep.subr.bf16.mxu0 %v10779_v52  ;;  %v2286_v52 = vld [vmem:[%s14593_s1 + $0x2e0] sm:$0xff] }
 0x606   :  { %v10811_v47 = vpack.c.bf16 %v2289_v10, %v2286_v52 }
 0x608   :  { %10782 = vmatpush1.bf16.msra.mxu0 %v10781_v44  ;;  %v10809_v44 = vpack.c.bf16 %v2235_v63, %v2232_v42  ;;  %v13575_v63 = vld [vmem:[%s14595_s3 + $0x8] sm:$0xff] }
 0x609   :  { %10784 = vmatprep.subr.bf16.mxu0 %v10783_v21  ;;  %v2238_v21 = vld [vmem:[%s14593_s1 + $0x160] sm:$0xff] }
 0x60a   :  { %v10813_v51 = vpack.c.bf16 %v2241_v6, %v2238_v21  ;;  %v8262_v6 = vld [vmem:[%s14596_s30 + $0x1c0] sm:$0xff] }
 0x69e   :  { %v13503_v20 = vpop.f32.mrb[72].mxu0 }
 0x69f   :  { %v13505_v19 = vpop.f32.mrb[73].mxu0 }
 0x6a0   :  { %2354 = vmatprep.mubr.f32.mxu0 %v13505_v19 }
 0x6a1   :  { %2355 = vmatmul.mubr.f32.vlgmr.msra.gmra.mrb[90].mxu0 %v13503_v20 }
 0x6a2   :  { %v13513_v28 = vpop.f32.mrb[74].mxu0  ;;  %10786 = vmatpush3.bf16.msra.mxu0 %v10785_v23 }
 0x6a3   :  { %v13515_v62 = vpop.f32.mrb[75].mxu0  ;;  %10788 = vmatprep.subr.bf16.mxu0 %v10787_v53 }
 0x6a4   :  { %2360 = vmatprep.mubr.f32.mxu0 %v13515_v62 }
 0x6a5   :  { %2361 = vmatmul.mubr.f32.gmra.mrb[92].mxu0 %v13513_v28 }
 0x6a6   :  { %v13523_v30 = vpop.f32.mrb[76].mxu0  ;;  %10790 = vmatpush3.bf16.msra.mxu0 %v10789_v49 }
 0x6a7   :  { %v13525_v50 = vpop.f32.mrb[77].mxu0  ;;  %10792 = vmatprep.subr.bf16.mxu0 %v10791_v43 }
 0x6a8   :  { %2366 = vmatprep.mubr.f32.mxu0 %v13525_v50 }
 0x6a9   :  { %2367 = vmatmul.mubr.f32.gmra.mrb[94].mxu0 %v13523_v30 }
 0x6aa   :  { %v13533_v7 = vpop.f32.mrb[78].mxu0  ;;  %10794 = vmatpush3.bf16.msra.mxu0 %v10793_v58 }
 0x6ab   :  { %v2161_v14 = vpop.f32.mrb[79].mxu0  ;;  %10796 = vmatprep.subr.bf16.mxu0 %v10795_v59 }
 0x6ac   :  { %2372 = vmatprep.mubr.f32.mxu0 %v2161_v14 }
 0x6ad   :  { %2373 = vmatmul.mubr.f32.gmra.mrb[96].mxu0 %v13533_v7 }
 0x6ae   :  { %v2165_v15 = vpop.f32.mrb[80].mxu0  ;;  %10798 = vmatpush3.bf16.msra.mxu0 %v10797_v0 }
 0x6af   :  { %v2167_v36 = vpop.f32.mrb[81].mxu0  ;;  %10800 = vmatprep.subr.bf16.mxu0 %v10799_v31  ;;  %v8256_v31 = vld [vmem:[%s14596_s30 + $0x190] sm:$0xff] }
 0x6b0   :  { %2378 = vmatprep.mubr.f32.mxu0 %v2167_v36 }
 0x6b1   :  { %2379 = vmatmul.mubr.f32.gmra.mrb[98].mxu0 %v2165_v15 }
 0x6b2   :  { %v2171_v4 = vpop.f32.mrb[82].mxu0  ;;  %10802 = vmatpush3.bf16.msra.mxu0 %v10801_v33  ;;  %v8258_v33 = vld [vmem:[%s14596_s30 + $0x1a0] sm:$0xff] }
 0x6b3   :  { %v2173_v16 = vpop.f32.mrb[83].mxu0  ;;  %10804 = vmatprep.subr.bf16.mxu0 %v10803_v61  ;;  %v10847_v61 = vpack.c.bf16 %v8257_v34, %v8256_v31  ;;  %v2524_v34 = vld [vmem:[%s14595_s3 + $0x28] sm:$0xff] }
 0x6b4   :  { %2384 = vmatprep.mubr.f32.mxu0 %v2173_v16 }
 0x6b5   :  { %2385 = vmatmul.mubr.f32.gmra.mrb[100].mxu0 %v2171_v4 }
 0x6b6   :  { %v2177_v8 = vpop.f32.mrb[84].mxu0  ;;  %10806 = vmatpush3.bf16.msra.mxu0 %v10805_v48 }
 0x6b7   :  { %v2179_v46 = vpop.f32.mrb[85].mxu0  ;;  %10808 = vmatprep.subr.bf16.mxu0 %v10807_v37  ;;  %v8261_v37 = vld [vmem:[%s14596_s30 + $0x1b8] sm:$0xff] }
 0x6b8   :  { %2390 = vmatprep.mubr.f32.mxu0 %v2179_v46 }
 0x6b9   :  { %2391 = vmatmul.mubr.f32.gmra.mrb[102].mxu0 %v2177_v8 }
 0x6ba   :  { %v2183_v35 = vpop.f32.mrb[86].mxu0  ;;  %10810 = vmatpush3.bf16.msra.mxu0 %v10809_v44 }
 0x6bb   :  { %v2185_v26 = vpop.f32.mrb[87].mxu0  ;;  %10812 = vmatprep.subr.bf16.mxu0 %v10811_v47  ;;  %v8245_v47 = vld [vmem:[%s14596_s30 + $0x138] sm:$0xff] }
 0x6bc   :  { %2396 = vmatprep.mubr.f32.mxu0 %v2185_v26 }
 0x6bd   :  { %2397 = vmatmul.mubr.f32.gmra.mrb[104].mxu0 %v2183_v35 }
 0x6be   :  { %v2189_v23 = vpop.f32.mrb[88].mxu0  ;;  %10814 = vmatpush3.bf16.msra.mxu0 %v10813_v51  ;;  %v13585_v51 = vld [vmem:[%s14595_s3 + $0x10] sm:$0xff] }
 0x6bf   :  { %v2191_v53 = vpop.f32.mrb[89].mxu0 }
 0x6c0   :  { %2402 = vmatprep.mubr.f32.mxu0 %v2191_v53 }
 0x6c1   :  { %2403 = vmatmul.mubr.f32.gmra.mrb[106].mxu0 %v2189_v23 }
 0x6c2   :  { %2473 = vmatprep.mubr.f32.mxu0 %v13505_v19 }
 0x6c5   :  { %2474 = vmatmul.mubr.f32.vlgmr.msra.gmra.mrb[108].mxu0 %v13503_v20  ;;  %v2519_v20 = vld [vmem:[%s14595_s3] sm:$0xff] }
 0x6c6   :  { %2478 = vmatprep.mubr.f32.mxu0 %v13515_v62  ;;  %9434 = vmatprep.mubr.msk.f32.mxu1 %vm2531_vm2, %v2519_v20 }
 0x6c9   :  { %2479 = vmatmul.mubr.f32.gmra.mrb[110].mxu0 %v13513_v28 }
 0x6ca   :  { %2483 = vmatprep.mubr.f32.mxu0 %v13525_v50 }
 0x6cd   :  { %2484 = vmatmul.mubr.f32.gmra.mrb[112].mxu0 %v13523_v30 }
 0x6ce   :  { %2488 = vmatprep.mubr.f32.mxu0 %v2161_v14 }
 0x6d1   :  { %2489 = vmatmul.mubr.f32.gmra.mrb[114].mxu0 %v13533_v7 }
 0x6d2   :  { %2493 = vmatprep.mubr.f32.mxu0 %v2167_v36  ;;  %v8259_v36 = vld [vmem:[%s14596_s30 + $0x1a8] sm:$0xff] }
 0x6d3   :  { %v10851_v45 = vpack.c.bf16 %v8259_v36, %v8258_v33  ;;  %v2525_v33 = vld [vmem:[%s14595_s3 + $0x30] sm:$0xff] }
 0x6d5   :  { %2494 = vmatmul.mubr.f32.gmra.mrb[116].mxu0 %v2165_v15 }
 0x6d6   :  { %2498 = vmatprep.mubr.f32.mxu0 %v2173_v16  ;;  %v8260_v16 = vld [vmem:[%s14596_s30 + $0x1b0] sm:$0xff] }
 0x6d9   :  { %2499 = vmatmul.mubr.f32.gmra.mrb[118].mxu0 %v2171_v4  ;;  %v8243_v4 = vld [vmem:[%s14596_s30 + $0x128] sm:$0xff] }
 0x6da   :  { %2503 = vmatprep.mubr.f32.mxu0 %v2179_v46  ;;  %v10853_v52 = vpack.c.bf16 %v8243_v4, %v8242_v2  ;;  %v8244_v46 = vld [vmem:[%s14596_s30 + $0x130] sm:$0xff] }
 0x6dd   :  { %2504 = vmatmul.mubr.f32.gmra.mrb[120].mxu0 %v2177_v8  ;;  %v10855_v8 = vpack.c.bf16 %v8261_v37, %v8260_v16  ;;  %v2527_v16 = vld [vmem:[%s14595_s3 + $0x40] sm:$0xff] }
 0x6de   :  { %2508 = vmatprep.mubr.f32.mxu0 %v2185_v26 }
 0x6e1   :  { %2509 = vmatmul.mubr.f32.gmra.mrb[122].mxu0 %v2183_v35  ;;  %v8263_v35 = vld [vmem:[%s14596_s30 + $0x1c8] sm:$0xff] }
 0x6e2   :  { %2513 = vmatprep.mubr.f32.mxu0 %v2191_v53  ;;  %v10857_v53 = vpack.c.bf16 %v8245_v47, %v8244_v46  ;;  %v2530_v46 = vld [vmem:[%s14595_s3 + $0x58] sm:$0xff] }
 0x6e3   :  { %v8269_v47 = vld [vmem:[%s14596_s30 + $0x1f8] sm:$0xff] }
 0x6e5   :  { %2514 = vmatmul.mubr.f32.gmra.mrb[124].mxu0 %v2189_v23 }
 0x6e6   :  { %2642 = vmatprep.mubr.f32.mxu0 %v12335_v13 }
 0x774   :  { %v2356_v19 = vpop.f32.mrb[90].mxu0 }
 0x775   :  { %v2358_v55 = vpop.f32.mrb[91].mxu0 }
 0x778   :  { %v2362_v56 = vpop.f32.mrb[92].mxu0 }
 0x779   :  { %v10817_v60 = vpack.c.bf16 %v2362_v56, %v2356_v19  ;;  %v2364_v25 = vpop.f32.mrb[93].mxu0  ;;  %v10859_v19 = vpack.c.bf16 %v8263_v35, %v8262_v6  ;;  %v8247_v56 = vld [vmem:[%s14596_s30 + $0x148] sm:$0xff]  ;;  %v8252_v6 = vld [vmem:[%s14596_s30 + $0x170] sm:$0xff]  ;;  %v8253_v35 = vld [vmem:[%s14596_s30 + $0x178] sm:$0xff] }
 0x77a   :  { %v10815_v28 = vpack.c.bf16 %v2364_v25, %v2358_v55  ;;  %v8246_v55 = vld [vmem:[%s14596_s30 + $0x140] sm:$0xff]  ;;  %v8264_v25 = vld [vmem:[%s14596_s30 + $0x1d0] sm:$0xff] }
 0x77c   :  { %v2368_v49 = vpop.f32.mrb[94].mxu0  ;;  %10816 = vmatprep.subr.bf16.mxu0 %v10815_v28  ;;  %v8265_v28 = vld [vmem:[%s14596_s30 + $0x1d8] sm:$0xff] }
 0x77d   :  { %v2370_v62 = vpop.f32.mrb[95].mxu0  ;;  %10818 = vmatpush1.bf16.msra.mxu0 %v10817_v60 }
 0x780   :  { %v2374_v43 = vpop.f32.mrb[96].mxu0 }
 0x781   :  { %v10821_v54 = vpack.c.bf16 %v2374_v43, %v2368_v49  ;;  %v2376_v57 = vpop.f32.mrb[97].mxu0  ;;  %v13595_v49 = vld [vmem:[%s14595_s3 + $0x18] sm:$0xff]  ;;  %v10861_v43 = vpack.c.bf16 %v8247_v56, %v8246_v55  ;;  %v8298_v56 = vld [vmem:[%s14596_s30 + $0x2a0] sm:$0xff] }
 0x782   :  { %v10819_v11 = vpack.c.bf16 %v2376_v57, %v2370_v62  ;;  %v10863_v57 = vpack.c.bf16 %v8265_v28, %v8264_v25  ;;  %v8272_v28 = vld [vmem:[%s14596_s30 + $0x210] sm:$0xff] }
 0x784   :  { %v2380_v27 = vpop.f32.mrb[98].mxu0  ;;  %10820 = vmatprep.subr.bf16.mxu0 %v10819_v11  ;;  %v8248_v11 = vld [vmem:[%s14596_s30 + $0x150] sm:$0xff] }
 0x785   :  { %v2382_v30 = vpop.f32.mrb[99].mxu0  ;;  %10822 = vmatpush1.bf16.msra.mxu0 %v10821_v54 }
 0x788   :  { %v2386_v58 = vpop.f32.mrb[100].mxu0 }
 0x789   :  { %v10825_v50 = vpack.c.bf16 %v2386_v58, %v2380_v27  ;;  %v2388_v59 = vpop.f32.mrb[101].mxu0  ;;  %v8249_v27 = vld [vmem:[%s14596_s30 + $0x158] sm:$0xff]  ;;  %v8266_v58 = vld [vmem:[%s14596_s30 + $0x1e0] sm:$0xff] }
 0x78a   :  { %v10823_v18 = vpack.c.bf16 %v2388_v59, %v2382_v30  ;;  %v2523_v59 = vld [vmem:[%s14595_s3 + $0x20] sm:$0xff] }
 0x78c   :  { %v2392_v29 = vpop.f32.mrb[102].mxu0  ;;  %10824 = vmatprep.subr.bf16.mxu0 %v10823_v18 }
 0x78d   :  { %v2394_v32 = vpop.f32.mrb[103].mxu0  ;;  %10826 = vmatpush1.bf16.msra.mxu0 %v10825_v50  ;;  %v8267_v50 = vld [vmem:[%s14596_s30 + $0x1e8] sm:$0xff] }
 0x790   :  { %v2398_v24 = vpop.f32.mrb[104].mxu0 }
 0x791   :  { %v10829_v7 = vpack.c.bf16 %v2398_v24, %v2392_v29  ;;  %v2400_v0 = vpop.f32.mrb[105].mxu0 }
 0x792   :  { %v10827_v14 = vpack.c.bf16 %v2400_v0, %v2394_v32  ;;  %v10865_v32 = vpack.c.bf16 %v8249_v27, %v8248_v11  ;;  %v8250_v0 = vld [vmem:[%s14596_s30 + $0x160] sm:$0xff] }
 0x794   :  { %10828 = vmatprep.subr.bf16.mxu0 %v10827_v14  ;;  %v2404_v17 = vpop.f32.mrb[106].mxu0  ;;  %v8251_v14 = vld [vmem:[%s14596_s30 + $0x168] sm:$0xff] }
 0x795   :  { %10830 = vmatpush1.bf16.msra.mxu0 %v10829_v7  ;;  %v2406_v15 = vpop.f32.mrb[107].mxu0  ;;  %v10867_v7 = vpack.c.bf16 %v8267_v50, %v8266_v58  ;;  %v10869_v39 = vpack.c.bf16 %v8251_v14, %v8250_v0  ;;  %v8301_v0 = vld [vmem:[%s14596_s30 + $0x2b8] sm:$0xff] }
 0x796   :  { %8213 = vmatprep.subr.msk.mxu0 %vm2568_vm3, %v2406_v15 }
 0x798   :  { %v8671_v41 = vpop.f32.mrb[108].mxu0 }
 0x799   :  { %8214 = vmatpush1.msk.msra.mxu0 %vm2568_vm3, %v2404_v17  ;;  %v8672_v48 = vpop.f32.mrb[109].mxu0 }
 0x79a   :  { %8215 = vmatmul.mubr.msk.f32.vlgmr.msra.gmra.mrb[126].mxu0 %vm2531_vm2, %v2519_v20  ;;  %v8673_v42 = vadd.f32 %v8672_v48, %v8671_v41  ;;  %10848 = vmatprep.subr.bf16.mxu0 %v10847_v61 }
 0x79b   :  { %2648 = vmatprep.mubr.f32.mxu0 %v12335_v13  ;;  %10850 = vmatpush3.bf16.msra.mxu0 %v10849_v38 }
 0x79c   :  { %v8674_v10 = vpop.f32.mrb[110].mxu0  ;;  %10852 = vmatprep.subr.bf16.mxu0 %v10851_v45  ;;  %v2526_v45 = vld [vmem:[%s14595_s3 + $0x38] sm:$0xff] }
 0x79d   :  { %v8675_v44 = vpop.f32.mrb[111].mxu0 }
 0x79e   :  { %8216 = vmatmul.mubr.msk.f32.gmra.mrb[128].mxu0 %vm2531_vm2, %v13575_v63  ;;  %v8676_v21 = vadd.f32 %v8675_v44, %v8674_v10  ;;  %v2529_v44 = vld [vmem:[%s14595_s3 + $0x50] sm:$0xff] }
 0x79f   :  { %2654 = vmatprep.mubr.f32.mxu0 %v12335_v13  ;;  %10854 = vmatpush3.bf16.msra.mxu0 %v10853_v52 }
 0x7a0   :  { %v10831_v26 = vpack.c.bf16 %v8676_v21, %v8673_v42  ;;  %v8677_v23 = vpop.f32.mrb[112].mxu0  ;;  %10856 = vmatprep.subr.bf16.mxu0 %v10855_v8  ;;  %v2528_v8 = vld [vmem:[%s14595_s3 + $0x48] sm:$0xff] }
 0x7a1   :  { %v8678_v20 = vpop.f32.mrb[113].mxu0 }
 0x7a2   :  { %8217 = vmatmul.mubr.msk.f32.gmra.mrb[130].mxu0 %vm2531_vm2, %v13585_v51  ;;  %v8679_v60 = vadd.f32 %v8678_v20, %v8677_v23  ;;  %10832 = vmatprep.subr.bf16.mxu1 %v10831_v26  ;;  %v8271_v23 = vld [vmem:[%s14596_s30 + $0x208] sm:$0xff]  ;;  %v8254_v20 = vld [vmem:[%s14596_s30 + $0x180] sm:$0xff] }
 0x7a3   :  { %2660 = vmatprep.mubr.f32.mxu0 %v12335_v13  ;;  %10834 = vmatpush3.bf16.msra.mxu1 %v10831_v26  ;;  %v8270_v26 = vld [vmem:[%s14596_s30 + $0x200] sm:$0xff] }
 0x7a4   :  { %v8680_v62 = vpop.f32.mrb[114].mxu0  ;;  %10858 = vmatpush3.bf16.msra.mxu0 %v10857_v53  ;;  %v10875_v53 = vpack.c.bf16 %v8271_v23, %v8270_v26  ;;  %v8308_v26 = vld [vmem:[%s14596_s30 + $0x2f0] sm:$0xff]  ;;  %v8309_v23 = vld [vmem:[%s14596_s30 + $0x2f8] sm:$0xff] }
 0x7a5   :  { %v8681_v54 = vpop.f32.mrb[115].mxu0  ;;  %10860 = vmatprep.subr.bf16.mxu0 %v10859_v19  ;;  %v8255_v19 = vld [vmem:[%s14596_s30 + $0x188] sm:$0xff] }
 0x7a6   :  { %8218 = vmatmul.mubr.msk.f32.gmra.mrb[132].mxu0 %vm2531_vm2, %v13595_v49  ;;  %v8682_v30 = vadd.f32 %v8681_v54, %v8680_v62  ;;  %v10877_v55 = vpack.c.bf16 %v8255_v19, %v8254_v20  ;;  %v2857_v54 = vld [vmem:[%s14596_s30 + $0x88] sm:$0xff]  ;;  %v10939_v19 = vpack.c.bf16 %v8309_v23, %v8308_v26  ;;  %v2862_v26 = vld [vmem:[%s14596_s30 + $0xb0] sm:$0xff]  ;;  %v2863_v23 = vld [vmem:[%s14596_s30 + $0xb8] sm:$0xff] }
 0x7a7   :  { %2666 = vmatprep.mubr.f32.mxu0 %v12335_v13 }
 0x7a8   :  { %v10835_v18 = vpack.c.bf16 %v8682_v30, %v8679_v60  ;;  %v8683_v29 = vpop.f32.mrb[116].mxu0  ;;  %10862 = vmatpush3.bf16.msra.mxu0 %v10861_v43  ;;  %v8299_v60 = vld [vmem:[%s14596_s30 + $0x2a8] sm:$0xff]  ;;  %v2856_v43 = vld [vmem:[%s14596_s30 + $0x80] sm:$0xff] }
 0x7a9   :  { %v8684_v24 = vpop.f32.mrb[117].mxu0  ;;  %10864 = vmatprep.subr.bf16.mxu0 %v10863_v57  ;;  %v10919_v25 = vpack.c.bf16 %v8299_v60, %v8298_v56  ;;  %v10883_v57 = vpack.c.bf16 %v2857_v54, %v2856_v43  ;;  %v8293_v56 = vld [vmem:[%s14596_s30 + $0x278] sm:$0xff]  ;;  %v8294_v54 = vld [vmem:[%s14596_s30 + $0x280] sm:$0xff] }
 0x7aa   :  { %8219 = vmatmul.mubr.msk.f32.gmra.mrb[134].mxu0 %vm2531_vm2, %v2523_v59  ;;  %v8685_v31 = vadd.f32 %v8684_v24, %v8683_v29  ;;  %10836 = vmatprep.subr.bf16.mxu1 %v10835_v18  ;;  %v8283_v24 = vld [vmem:[%s14596_s30 + $0x228] sm:$0xff] }
 0x7ab   :  { %10838 = vmatpush3.bf16.msra.mxu1 %v10835_v18  ;;  %2672 = vmatprep.mubr.f32.mxu0 %v12335_v13 }
 0x7ac   :  { %v8686_v17 = vpop.f32.mrb[118].mxu0  ;;  %10866 = vmatpush3.bf16.msra.mxu0 %v10865_v32  ;;  %v8282_v32 = vld [vmem:[%s14596_s30 + $0x220] sm:$0xff] }
 0x7ad   :  { %v8687_v40 = vpop.f32.mrb[119].mxu0  ;;  %10868 = vmatprep.subr.bf16.mxu0 %v10867_v7  ;;  %v8300_v7 = vld [vmem:[%s14596_s30 + $0x2b0] sm:$0xff] }
 0x7ae   :  { %v8688_v15 = vadd.f32 %v8687_v40, %v8686_v17  ;;  %8220 = vmatmul.mubr.msk.f32.gmra.mrb[136].mxu0 %vm2531_vm2, %v2524_v34  ;;  %v10923_v17 = vpack.c.bf16 %v8301_v0, %v8300_v7  ;;  %v8285_v40 = vld [vmem:[%s14596_s30 + $0x238] sm:$0xff]  ;;  %v8312_v7 = vld [vmem:[%s14596_s30 + $0x310] sm:$0xff] }
 0x7af   :  { %2678 = vmatprep.mubr.f32.mxu0 %v12335_v13  ;;  %v8313_v0 = vld [vmem:[%s14596_s30 + $0x318] sm:$0xff] }
 0x7b0   :  { %v10839_v36 = vpack.c.bf16 %v8688_v15, %v8685_v31  ;;  %v8689_v61 = vpop.f32.mrb[120].mxu0  ;;  %10870 = vmatpush3.bf16.msra.mxu0 %v10869_v39  ;;  %v10921_v31 = vpack.c.bf16 %v8283_v24, %v8282_v32  ;;  %v8284_v39 = vld [vmem:[%s14596_s30 + $0x230] sm:$0xff]  ;;  %v8302_v15 = vld [vmem:[%s14596_s30 + $0x2c0] sm:$0xff] }
 0x7b1   :  { %v8690_v38 = vpop.f32.mrb[121].mxu0 }
 0x7b2   :  { %v8691_v41 = vadd.f32 %v8690_v38, %v8689_v61  ;;  %10840 = vmatprep.subr.bf16.mxu1 %v10839_v36  ;;  %8221 = vmatmul.mubr.msk.f32.gmra.mrb[138].mxu0 %vm2531_vm2, %v2525_v33 }
 0x7b3   :  { %10842 = vmatpush3.bf16.msra.mxu1 %v10839_v36  ;;  %2684 = vmatprep.mubr.f32.mxu0 %v12335_v13  ;;  %v10925_v36 = vpack.c.bf16 %v8285_v40, %v8284_v39  ;;  %v8296_v39 = vld [vmem:[%s14596_s30 + $0x290] sm:$0xff]  ;;  %v8297_v40 = vld [vmem:[%s14596_s30 + $0x298] sm:$0xff] }
 0x7b4   :  { %v8692_v2 = vpop.f32.mrb[122].mxu0 }
 0x7b5   :  { %v8693_v4 = vpop.f32.mrb[123].mxu0 }
 0x7b6   :  { %v8694_v48 = vadd.f32 %v8693_v4, %v8692_v2  ;;  %8222 = vmatmul.mubr.msk.f32.gmra.mrb[140].mxu0 %vm2531_vm2, %v2526_v45  ;;  %v8304_v4 = vld [vmem:[%s14596_s30 + $0x2d0] sm:$0xff] }
 0x7b7   :  { %2690 = vmatprep.mubr.f32.mxu0 %v12335_v13 }
 0x7b8   :  { %v10843_v37 = vpack.c.bf16 %v8694_v48, %v8691_v41  ;;  %v8695_v42 = vpop.f32.mrb[124].mxu0  ;;  %v8286_v41 = vld [vmem:[%s14596_s30 + $0x240] sm:$0xff]  ;;  %v8305_v48 = vld [vmem:[%s14596_s30 + $0x2d8] sm:$0xff] }
 0x7b9   :  { %v8696_v52 = vpop.f32.mrb[125].mxu0 }
 0x7ba   :  { %10844 = vmatprep.subr.bf16.mxu1 %v10843_v37  ;;  %v8697_v10 = vadd.f32 %v8696_v52, %v8695_v42  ;;  %8223 = vmatmul.mubr.msk.f32.gmra.mrb[142].mxu0 %vm2531_vm2, %v2527_v16  ;;  %v10931_v42 = vpack.c.bf16 %v8305_v48, %v8304_v4  ;;  %v8288_v52 = vld [vmem:[%s14596_s30 + $0x250] sm:$0xff] }
 0x7bb   :  { %10846 = vmatpush3.bf16.msra.mxu1 %v10843_v37  ;;  %2696 = vmatprep.mubr.f32.mxu0 %v12335_v13 }
 0x7bc   :  { %9432 = vmatprep.subr.msk.mxu1 %vm2568_vm3, %v8697_v10 }
 0x7be   :  { %8224 = vmatmul.mubr.msk.f32.gmra.mrb[144].mxu0 %vm2531_vm2, %v2528_v8 }
 0x7bf   :  { %9433 = vmatpush3.msk.msra.mxu1 %vm2568_vm3, %v8697_v10  ;;  %2702 = vmatprep.mubr.f32.mxu0 %v12335_v13  ;;  %v8289_v10 = vld [vmem:[%s14596_s30 + $0x258] sm:$0xff] }
 0x7c0   :  { %9435 = vmatmul.mubr.msk.f32.vlgmr.msra.gmra.mrb[32].mxu1 %vm2531_vm2, %v13575_v63  ;;  %v8268_v63 = vld [vmem:[%s14596_s30 + $0x1f0] sm:$0xff] }
 0x7c1   :  { %9437 = vmatprep.mubr.msk.f32.mxu1 %vm2531_vm2, %v13585_v51  ;;  %v10871_v21 = vpack.c.bf16 %v8269_v47, %v8268_v63  ;;  %v10873_v51 = vpack.c.bf16 %v8253_v35, %v8252_v6  ;;  %v10933_v63 = vpack.c.bf16 %v8289_v10, %v8288_v52  ;;  %v8290_v6 = vld [vmem:[%s14596_s30 + $0x260] sm:$0xff]  ;;  %v8291_v35 = vld [vmem:[%s14596_s30 + $0x268] sm:$0xff]  ;;  %v2842_v10 = vld [vmem:[%s14596_s30 + $0x10] sm:$0xff] }
 0x7c2   :  { %8225 = vmatmul.mubr.msk.f32.gmra.mrb[146].mxu0 %vm2531_vm2, %v2529_v44 }
 0x7c3   :  { %2708 = vmatprep.mubr.f32.mxu0 %v12335_v13  ;;  %10872 = vmatprep.subr.bf16.mxu0 %v10871_v21 }
 0x7c4   :  { %9438 = vmatmul.mubr.msk.f32.gmra.mrb[34].mxu1 %vm2531_vm2, %v13595_v49  ;;  %10874 = vmatpush3.bf16.msra.mxu0 %v10873_v51  ;;  %v8273_v49 = vld [vmem:[%s14596_s30 + $0x218] sm:$0xff] }
 0x7c5   :  { %9440 = vmatprep.mubr.msk.f32.mxu1 %vm2531_vm2, %v2523_v59  ;;  %10876 = vmatprep.subr.bf16.mxu0 %v10875_v53  ;;  %v10879_v62 = vpack.c.bf16 %v8273_v49, %v8272_v28  ;;  %v10937_v53 = vpack.c.bf16 %v8291_v35, %v8290_v6  ;;  %v8311_v28 = vld [vmem:[%s14596_s30 + $0x308] sm:$0xff]  ;;  %v2844_v6 = vld [vmem:[%s14596_s30 + $0x20] sm:$0xff] }
 0x7c6   :  { %8226 = vmatmul.mubr.msk.f32.gmra.mrb[148].mxu0 %vm2531_vm2, %v2530_v46  ;;  %v2845_v35 = vld [vmem:[%s14596_s30 + $0x28] sm:$0xff] }
 0x7c7   :  { %10880 = vmatprep.subr.bf16.mxu1 %v10879_v62 }
 0x7c8   :  { %9441 = vmatmul.mubr.msk.f32.gmra.mrb[36].mxu1 %vm2531_vm2, %v2524_v34  ;;  %10878 = vmatpush3.bf16.msra.mxu0 %v10877_v55  ;;  %v8292_v55 = vld [vmem:[%s14596_s30 + $0x270] sm:$0xff] }
 0x7c9   :  { %9443 = vmatprep.mubr.msk.f32.mxu1 %vm2531_vm2, %v2525_v33  ;;  %10920 = vmatprep.subr.bf16.mxu0 %v10919_v25  ;;  %v8303_v33 = vld [vmem:[%s14596_s30 + $0x2c8] sm:$0xff]  ;;  %v8310_v25 = vld [vmem:[%s14596_s30 + $0x300] sm:$0xff]  ;;  %v10941_v49 = vpack.c.bf16 %v8293_v56, %v8292_v55  ;;  %v2846_v55 = vld [vmem:[%s14596_s30 + $0x30] sm:$0xff] }
 0x7ca   :  { %10882 = vmatpush3.bf16.msra.mxu1 %v10879_v62  ;;  %v10927_v38 = vpack.c.bf16 %v8303_v33, %v8302_v15  ;;  %v10943_v43 = vpack.c.bf16 %v8311_v28, %v8310_v25  ;;  %v2847_v56 = vld [vmem:[%s14596_s30 + $0x38] sm:$0xff]  ;;  %v2865_v25 = vld [vmem:[%s14596_s30 + $0xc8] sm:$0xff] }
 0x7cb   :  { %10884 = vmatprep.subr.bf16.mxu1 %v10883_v57  ;;  %v8295_v57 = vld [vmem:[%s14596_s30 + $0x288] sm:$0xff]  ;;  %v10897_v28 = vpack.c.bf16 %v2847_v56, %v2846_v55  ;;  %v3526_v55 = vld [vmem:[%s14597_s18 + $0x50] sm:$0xff]  ;;  %v3527_v56 = vld [vmem:[%s14597_s18 + $0x58] sm:$0xff] }
 0x7cc   :  { %9444 = vmatmul.mubr.msk.f32.gmra.mrb[38].mxu1 %vm2531_vm2, %v2526_v45  ;;  %v8287_v45 = vld [vmem:[%s14596_s30 + $0x248] sm:$0xff] }
 0x7cd   :  { %9446 = vmatprep.mubr.msk.f32.mxu1 %vm2531_vm2, %v2527_v16  ;;  %v10929_v16 = vpack.c.bf16 %v8287_v45, %v8286_v41  ;;  %v10949_v41 = vpack.c.bf16 %v8297_v40, %v8296_v39  ;;  %v2858_v45 = vld [vmem:[%s14596_s30 + $0x90] sm:$0xff]  ;;  %v2851_v39 = vld [vmem:[%s14596_s30 + $0x58] sm:$0xff]  ;;  %v3517_v40 = vld [vmem:[%s14597_s18 + $0x8] sm:$0xff] }
 0x7d0   :  { %9447 = vmatmul.mubr.msk.f32.gmra.mrb[40].mxu1 %vm2531_vm2, %v2528_v8 }
 0x7d1   :  { %9449 = vmatprep.mubr.msk.f32.mxu1 %vm2531_vm2, %v2529_v44  ;;  %v8306_v44 = vld [vmem:[%s14596_s30 + $0x2e0] sm:$0xff] }
 0x7d4   :  { %9450 = vmatmul.mubr.msk.f32.gmra.mrb[42].mxu1 %vm2531_vm2, %v2530_v46  ;;  %v8307_v46 = vld [vmem:[%s14596_s30 + $0x2e8] sm:$0xff] }
 0x7d5   :  { %v10935_v21 = vpack.c.bf16 %v8307_v46, %v8306_v44  ;;  %v2860_v44 = vld [vmem:[%s14596_s30 + $0xa0] sm:$0xff]  ;;  %v2861_v46 = vld [vmem:[%s14596_s30 + $0xa8] sm:$0xff] }
 0x86d   :  { %v13659_v11 = vpop.f32.mrb[126].mxu0 }
 0x86e   :  { %v13661_v27 = vpop.f32.mrb[127].mxu0 }
 0x871   :  { %v13663_v30 = vpop.f32.mrb[128].mxu0 }
 0x872   :  { %v13665_v58 = vpop.f32.mrb[129].mxu0 }
 0x875   :  { %v13667_v50 = vpop.f32.mrb[130].mxu0 }
 0x876   :  { %v13669_v59 = vpop.f32.mrb[131].mxu0 }
 0x879   :  { %v13671_v18 = vpop.f32.mrb[132].mxu0 }
 0x87a   :  { %v13673_v29 = vpop.f32.mrb[133].mxu0 }
 0x87d   :  { %v2668_v14 = vpop.f32.mrb[134].mxu0 }
 0x87e   :  { %v2670_v34 = vpop.f32.mrb[135].mxu0 }
 0x87f   :  { %2986 = vmatprep.mubr.f32.mxu0 %v2670_v34 }
 0x880   :  { %2987 = vmatmul.mubr.f32.vlgmr.msra.gmra.mrb[150].mxu0 %v2668_v14 }
 0x881   :  { %10922 = vmatpush3.bf16.msra.mxu0 %v10921_v31  ;;  %v2674_v61 = vpop.f32.mrb[136].mxu0  ;;  %v10945_v31 = vpack.c.bf16 %v8295_v57, %v8294_v54  ;;  %v2848_v54 = vld [vmem:[%s14596_s30 + $0x40] sm:$0xff]  ;;  %v2849_v57 = vld [vmem:[%s14596_s30 + $0x48] sm:$0xff] }
 0x882   :  { %10924 = vmatprep.subr.bf16.mxu0 %v10923_v17  ;;  %v2676_v2 = vpop.f32.mrb[137].mxu0  ;;  %v10947_v17 = vpack.c.bf16 %v8313_v0, %v8312_v7  ;;  %v2867_v7 = vld [vmem:[%s14596_s30 + $0xd8] sm:$0xff]  ;;  %v3516_v0 = vld [vmem:[%s14597_s18] sm:$0xff] }
 0x883   :  { %2991 = vmatprep.mubr.f32.mxu0 %v2676_v2  ;;  %v2859_v2 = vld [vmem:[%s14596_s30 + $0x98] sm:$0xff] }
 0x884   :  { %2992 = vmatmul.mubr.f32.gmra.mrb[152].mxu0 %v2674_v61  ;;  %v2840_v61 = vld [vmem:[%s14596_s30] sm:$0xff]  ;;  %v10887_v52 = vpack.c.bf16 %v2859_v2, %v2858_v45 }
 0x885   :  { %10926 = vmatpush3.bf16.msra.mxu0 %v10925_v36  ;;  %v2680_v37 = vpop.f32.mrb[138].mxu0  ;;  %v2852_v2 = vld [vmem:[%s14596_s30 + $0x60] sm:$0xff] }
 0x886   :  { %10928 = vmatprep.subr.bf16.mxu0 %v10927_v38  ;;  %v2682_v8 = vpop.f32.mrb[139].mxu0  ;;  %v2841_v38 = vld [vmem:[%s14596_s30 + $0x8] sm:$0xff] }
 0x887   :  { %2996 = vmatprep.mubr.f32.mxu0 %v2682_v8  ;;  %v2843_v8 = vld [vmem:[%s14596_s30 + $0x18] sm:$0xff] }
 0x888   :  { %2997 = vmatmul.mubr.f32.gmra.mrb[154].mxu0 %v2680_v37  ;;  %v10885_v37 = vpack.c.bf16 %v2841_v38, %v2840_v61  ;;  %v2869_v61 = vld [vmem:[%s14596_s30 + $0xe8] sm:$0xff]  ;;  %v3518_v38 = vld [vmem:[%s14597_s18 + $0x10] sm:$0xff] }
 0x889   :  { %10930 = vmatpush3.bf16.msra.mxu0 %v10929_v16  ;;  %v2686_v47 = vpop.f32.mrb[140].mxu0 }
 0x88a   :  { %10932 = vmatprep.subr.bf16.mxu0 %v10931_v42  ;;  %v2688_v51 = vpop.f32.mrb[141].mxu0 }
 0x88b   :  { %3001 = vmatprep.mubr.f32.mxu0 %v2688_v51 }
 0x88c   :  { %3002 = vmatmul.mubr.f32.gmra.mrb[156].mxu0 %v2686_v47 }
 0x88d   :  { %10934 = vmatpush3.bf16.msra.mxu0 %v10933_v63  ;;  %v2692_v20 = vpop.f32.mrb[142].mxu0  ;;  %v10889_v63 = vpack.c.bf16 %v2843_v8, %v2842_v10  ;;  %v2854_v10 = vld [vmem:[%s14596_s30 + $0x70] sm:$0xff]  ;;  %v2855_v8 = vld [vmem:[%s14596_s30 + $0x78] sm:$0xff] }
 0x88e   :  { %10936 = vmatprep.subr.bf16.mxu0 %v10935_v21  ;;  %v2694_v60 = vpop.f32.mrb[143].mxu0  ;;  %v10891_v21 = vpack.c.bf16 %v2861_v46, %v2860_v44  ;;  %v3521_v44 = vld [vmem:[%s14597_s18 + $0x28] sm:$0xff]  ;;  %v2872_v46 = vld [vmem:[%s14596_s30 + $0x100] sm:$0xff] }
 0x88f   :  { %3385 = vmatprep.mubr.f32.mxu0 %v2694_v60 }
 0x891   :  { %10938 = vmatpush3.bf16.msra.mxu0 %v10937_v53  ;;  %v2698_v62 = vpop.f32.mrb[144].mxu0  ;;  %v10893_v53 = vpack.c.bf16 %v2845_v35, %v2844_v6  ;;  %v3523_v35 = vld [vmem:[%s14597_s18 + $0x38] sm:$0xff] }
 0x892   :  { %10940 = vmatprep.subr.bf16.mxu0 %v10939_v19  ;;  %v2700_v32 = vpop.f32.mrb[145].mxu0  ;;  %v10895_v19 = vpack.c.bf16 %v2863_v23, %v2862_v26  ;;  %v8315_v26 = vld [vmem:[%s14596_s30 + $0x328] sm:$0xff]  ;;  %v3524_v23 = vld [vmem:[%s14597_s18 + $0x40] sm:$0xff] }
 0x893   :  { %v13701_v24 = vpop.f32.mrb[32].mxu1 }
 0x894   :  { %v13705_v14 = vpop.f32.mrb[33].mxu1 }
 0x895   :  { %10942 = vmatpush3.bf16.msra.mxu0 %v10941_v49  ;;  %v13707_v34 = vpop.f32.mrb[146].mxu0 }
 0x896   :  { %10944 = vmatprep.subr.bf16.mxu0 %v10943_v43  ;;  %v2706_v15 = vpop.f32.mrb[147].mxu0  ;;  %v3703_v43 = vld [vmem:[#allocation8 + $0x68] sm:$0xff] }
 0x897   :  { %v13711_v33 = vpop.f32.mrb[34].mxu1 }
 0x898   :  { %v13713_v36 = vpop.f32.mrb[35].mxu1 }
 0x899   :  { %10946 = vmatpush3.bf16.msra.mxu0 %v10945_v31  ;;  %v13719_v4 = vpop.f32.mrb[148].mxu0 }
 0x89a   :  { %10948 = vmatprep.subr.bf16.mxu0 %v10947_v17  ;;  %v2712_v48 = vpop.f32.mrb[149].mxu0 }
 0x89b   :  { %v9442_v16 = vpop.f32.mrb[36].mxu1 }
 0x89c   :  { %v2801_v42 = vpop.f32.mrb[37].mxu1 }
 0x89d   :  { %10950 = vmatpush3.bf16.msra.mxu0 %v10949_v41  ;;  %9456 = vmatprep.mubr.msk.f32.mxu1 %vm2909_vm4, %v2801_v42 }
 0x89e   :  { %9457 = vmatmul.mubr.msk.f32.vlgmr.msra.gmra.mrb[44].mxu1 %vm2909_vm4, %v9442_v16  ;;  %10956 = vmatprep.subr.bf16.mxu0 %v12627_v3  ;;  %v2871_v16 = vld [vmem:[%s14596_s30 + $0xf8] sm:$0xff] }
 0x89f   :  { %10886 = vmatpush3.bf16.msra.mxu1 %v10885_v37  ;;  %v9445_v47 = vpop.f32.mrb[38].mxu1  ;;  %v3520_v37 = vld [vmem:[%s14597_s18 + $0x20] sm:$0xff] }
 0x8a0   :  { %3386 = vmatmul.mubr.f32.vlgmr.msra.gmra.mrb[158].mxu0 %v2692_v20  ;;  %10888 = vmatprep.subr.bf16.mxu1 %v10887_v52  ;;  %v2811_v51 = vpop.f32.mrb[39].mxu1 }
 0x8a1   :  { %10958 = vmatpush3.bf16.msra.mxu0 %v12627_v3  ;;  %3390 = vmatprep.mubr.f32.mxu0 %v2700_v32  ;;  %v2864_v3 = vld [vmem:[%s14596_s30 + $0xc0] sm:$0xff] }
 0x8a2   :  { %10960 = vmatprep.subr.bf16.mxu0 %v12630_v5  ;;  %9459 = vmatprep.mubr.msk.f32.mxu1 %vm2909_vm4, %v2811_v51  ;;  %v8314_v51 = vld [vmem:[%s14596_s30 + $0x320] sm:$0xff] }
 0x8a3   :  { %10890 = vmatpush3.bf16.msra.mxu1 %v10889_v63  ;;  %v13735_v20 = vpop.f32.mrb[40].mxu1  ;;  %v2873_v63 = vld [vmem:[%s14596_s30 + $0x108] sm:$0xff] }
 0x8a4   :  { %3391 = vmatmul.mubr.f32.gmra.mrb[160].mxu0 %v2698_v62  ;;  %10892 = vmatprep.subr.bf16.mxu1 %v10891_v21  ;;  %v13739_v60 = vpop.f32.mrb[41].mxu1  ;;  %v3702_v62 = vld [vmem:[#allocation8 + $0x60] sm:$0xff]  ;;  %v10913_v21 = vpack.c.bf16 %v2855_v8, %v2854_v10  ;;  %v10915_v6 = vpack.c.bf16 %v2873_v63, %v2872_v46  ;;  %v3691_v8 = vld [vmem:[#allocation8 + $0x10] sm:$0xff] }
 0x8a5   :  { %10962 = vmatpush3.bf16.msra.mxu0 %v12630_v5  ;;  %3395 = vmatprep.mubr.f32.mxu0 %v2706_v15  ;;  %v10899_v5 = vpack.c.bf16 %v2865_v25, %v2864_v3  ;;  %v10971_v31 = vpack.c.bf16 %v3703_v43, %v3702_v62  ;;  %v2868_v15 = vld [vmem:[%s14596_s30 + $0xe0] sm:$0xff] }
 0x8a6   :  { %10964 = vmatprep.subr.bf16.mxu0 %v12642_v9  ;;  %9460 = vmatmul.mubr.msk.f32.gmra.mrb[46].mxu1 %vm2909_vm4, %v9445_v47  ;;  %v10907_v45 = vpack.c.bf16 %v2869_v61, %v2868_v15  ;;  %v3522_v47 = vld [vmem:[%s14597_s18 + $0x30] sm:$0xff]  ;;  %v3713_v3 = vld [vmem:[#allocation8 + $0xb8] sm:$0xff] }
 0x8a7   :  { %10894 = vmatpush3.bf16.msra.mxu1 %v10893_v53  ;;  %3168 = vmatprep.mubr.f32.mxu1 %v13661_v27  ;;  %v13747_v49 = vpop.f32.mrb[42].mxu1  ;;  %v2866_v27 = vld [vmem:[%s14596_s30 + $0xd0] sm:$0xff]  ;;  %v10951_v53 = vpack.c.bf16 %v8315_v26, %v8314_v51 }
 0x8a8   :  { %3396 = vmatmul.mubr.f32.gmra.mrb[162].mxu0 %v13707_v34  ;;  %10896 = vmatprep.subr.bf16.mxu1 %v10895_v19  ;;  %v13752_v32 = vpop.f32.mrb[43].mxu1  ;;  %v10901_v34 = vpack.c.bf16 %v2849_v57, %v2848_v54  ;;  %v10903_v17 = vpack.c.bf16 %v2867_v7, %v2866_v27  ;;  %v3525_v19 = vld [vmem:[%s14597_s18 + $0x48] sm:$0xff] }
 0x8a9   :  { %10966 = vmatpush3.bf16.msra.mxu0 %v12642_v9  ;;  %3400 = vmatprep.mubr.f32.mxu0 %v2712_v48  ;;  %v2850_v9 = vld [vmem:[%s14596_s30 + $0x50] sm:$0xff] }
 0x8aa   :  { %10968 = vmatprep.subr.bf16.mxu0 %v12648_v12  ;;  %v10905_v41 = vpack.c.bf16 %v2851_v39, %v2850_v9  ;;  %v2870_v48 = vld [vmem:[%s14596_s30 + $0xf0] sm:$0xff] }
 0x8ab   :  { %10898 = vmatpush3.bf16.msra.mxu1 %v10897_v28  ;;  %v10911_v52 = vpack.c.bf16 %v2871_v16, %v2870_v48  ;;  %v3689_v28 = vld [vmem:[#allocation8] sm:$0xff] }
 0x8ac   :  { %3401 = vmatmul.mubr.f32.gmra.mrb[164].mxu0 %v13719_v4  ;;  %10900 = vmatprep.subr.bf16.mxu1 %v10899_v5  ;;  %v3519_v4 = vld [vmem:[%s14597_s18 + $0x18] sm:$0xff] }
 0x8ad   :  { %10970 = vmatpush3.bf16.msra.mxu0 %v12648_v12  ;;  %9498 = vmatprep.mubr.msk.f32.mxu0 %vm349_vm0, %v3516_v0  ;;  %v2853_v12 = vld [vmem:[%s14596_s30 + $0x68] sm:$0xff] }
 0x8ae   :  { %10972 = vmatprep.subr.bf16.mxu0 %v10971_v31  ;;  %v10909_v42 = vpack.c.bf16 %v2853_v12, %v2852_v2 }
 0x8af   :  { %10902 = vmatpush3.bf16.msra.mxu1 %v10901_v34 }
 0x8b0   :  { %9499 = vmatmul.mubr.msk.f32.vlgmr.msra.gmra.mrb[166].mxu0 %vm349_vm0, %v3517_v40  ;;  %10904 = vmatprep.subr.bf16.mxu1 %v10903_v17 }
 0x8b1   :  { %9501 = vmatprep.mubr.msk.f32.mxu0 %vm349_vm0, %v3518_v38  ;;  %10974 = vmatpush3.bf16.msra.mxu0 %v10971_v31 }
 0x8b3   :  { %10906 = vmatpush3.bf16.msra.mxu1 %v10905_v41 }
 0x8b4   :  { %9502 = vmatmul.mubr.msk.f32.gmra.mrb[168].mxu0 %vm349_vm0, %v3519_v4  ;;  %10908 = vmatprep.subr.bf16.mxu1 %v10907_v45 }
 0x8b5   :  { %9504 = vmatprep.mubr.msk.f32.mxu0 %vm349_vm0, %v3520_v37 }
 0x8b7   :  { %10910 = vmatpush3.bf16.msra.mxu1 %v10909_v42 }
 0x8b8   :  { %9505 = vmatmul.mubr.msk.f32.gmra.mrb[170].mxu0 %vm349_vm0, %v3521_v44  ;;  %10912 = vmatprep.subr.bf16.mxu1 %v10911_v52  ;;  %v3692_v44 = vld [vmem:[#allocation8 + $0x18] sm:$0xff] }
 0x8b9   :  { %9507 = vmatprep.mubr.msk.f32.mxu0 %vm349_vm0, %v3522_v47  ;;  %v10999_v47 = vpack.c.bf16 %v3692_v44, %v3691_v8  ;;  %v3917_v44 = vld [vmem:[#allocation8 + $0x100] sm:$0xff] }
 0x8bb   :  { %10914 = vmatpush3.bf16.msra.mxu1 %v10913_v21  ;;  %v3693_v21 = vld [vmem:[#allocation8 + $0x20] sm:$0xff] }
 0x8bc   :  { %10916 = vmatprep.subr.bf16.mxu1 %v10915_v6  ;;  %9508 = vmatmul.mubr.msk.f32.gmra.mrb[172].mxu0 %vm349_vm0, %v3523_v35 }
 0x8bd   :  { %9510 = vmatprep.mubr.msk.f32.mxu0 %vm349_vm0, %v3524_v23 }
 0x8be   :  { %3169 = vmatmul.mubr.f32.vlgmr.msra.gmra.mrb[48].mxu1 %v13659_v11  ;;  %v3704_v11 = vld [vmem:[#allocation8 + $0x70] sm:$0xff] }
 0x8bf   :  { %3173 = vmatprep.mubr.f32.mxu1 %v13665_v58  ;;  %10918 = vmatpush3.bf16.msra.mxu1 %v10915_v6  ;;  %v3694_v6 = vld [vmem:[#allocation8 + $0x28] sm:$0xff] }
 0x8c0   :  { %10952 = vmatprep.subr.bf16.mxu1 %v10951_v53  ;;  %9511 = vmatmul.mubr.msk.f32.gmra.mrb[174].mxu0 %vm349_vm0, %v3525_v19  ;;  %v11003_v51 = vpack.c.bf16 %v3694_v6, %v3693_v21  ;;  %v3696_v19 = vld [vmem:[#allocation8 + $0x38] sm:$0xff]  ;;  %v3919_v6 = vld [vmem:[#allocation8 + $0x110] sm:$0xff] }
 0x8c1   :  { %9513 = vmatprep.mubr.msk.f32.mxu0 %vm349_vm0, %v3526_v55 }
 0x8c2   :  { %3174 = vmatmul.mubr.f32.gmra.mrb[50].mxu1 %v13663_v30  ;;  %v3705_v30 = vld [vmem:[#allocation8 + $0x78] sm:$0xff] }
 0x8c3   :  { %3178 = vmatprep.mubr.f32.mxu1 %v13669_v59  ;;  %v10975_v58 = vpack.c.bf16 %v3705_v30, %v3704_v11  ;;  %v3707_v59 = vld [vmem:[#allocation8 + $0x88] sm:$0xff] }
 0x8c4   :  { %9514 = vmatmul.mubr.msk.f32.gmra.mrb[176].mxu0 %vm349_vm0, %v3527_v56 }
 0x8c5   :  { %10976 = vmatprep.subr.bf16.mxu0 %v10975_v58 }
 0x8c6   :  { %3179 = vmatmul.mubr.f32.gmra.mrb[52].mxu1 %v13667_v50  ;;  %10978 = vmatpush3.bf16.msra.mxu0 %v10975_v58  ;;  %v3706_v50 = vld [vmem:[#allocation8 + $0x80] sm:$0xff] }
 0x8c7   :  { %3183 = vmatprep.mubr.f32.mxu1 %v13673_v29  ;;  %v3708_v29 = vld [vmem:[#allocation8 + $0x90] sm:$0xff] }
 0x8ca   :  { %3184 = vmatmul.mubr.f32.gmra.mrb[54].mxu1 %v13671_v18  ;;  %v10979_v18 = vpack.c.bf16 %v3707_v59, %v3706_v50 }
 0x8cb   :  { %9466 = vmatprep.mubr.msk.f32.mxu1 %vm2909_vm4, %v13705_v14 }
 0x8cc   :  { %10980 = vmatprep.subr.bf16.mxu0 %v10979_v18 }
 0x8cd   :  { %10982 = vmatpush3.bf16.msra.mxu0 %v10979_v18  ;;  %v3697_v18 = vld [vmem:[#allocation8 + $0x40] sm:$0xff] }
 0x8ce   :  { %9467 = vmatmul.mubr.msk.f32.vlgmr.msra.gmra.mrb[44].mxu1 %vm2909_vm4, %v13701_v24  ;;  %v3709_v24 = vld [vmem:[#allocation8 + $0x98] sm:$0xff] }
 0x8cf   :  { %9469 = vmatprep.mubr.msk.f32.mxu1 %vm2909_vm4, %v13713_v36  ;;  %10954 = vmatpush3.bf16.msra.mxu1 %v10951_v53  ;;  %v10983_v14 = vpack.c.bf16 %v3709_v24, %v3708_v29  ;;  %v3711_v36 = vld [vmem:[#allocation8 + $0xa8] sm:$0xff]  ;;  %v3695_v53 = vld [vmem:[#allocation8 + $0x30] sm:$0xff] }
 0x8d0   :  { %v11007_v30 = vpack.c.bf16 %v3696_v19, %v3695_v53  ;;  %v3698_v29 = vld [vmem:[#allocation8 + $0x48] sm:$0xff] }
 0x8d1   :  { %10984 = vmatprep.subr.bf16.mxu0 %v10983_v14 }
 0x8d2   :  { %9470 = vmatmul.mubr.msk.f32.gmra.mrb[46].mxu1 %vm2909_vm4, %v13711_v33  ;;  %10986 = vmatpush3.bf16.msra.mxu0 %v10983_v14  ;;  %v3710_v33 = vld [vmem:[#allocation8 + $0xa0] sm:$0xff] }
 0x8d3   :  { %9476 = vmatprep.mubr.msk.f32.mxu1 %vm2909_vm4, %v13739_v60  ;;  %v3712_v60 = vld [vmem:[#allocation8 + $0xb0] sm:$0xff] }
 0x8d4   :  { %v10991_v25 = vpack.c.bf16 %v3713_v3, %v3712_v60 }
 0x8d6   :  { %9477 = vmatmul.mubr.msk.f32.vlgmr.msra.gmra.mrb[44].mxu1 %vm2909_vm4, %v13735_v20  ;;  %v10987_v20 = vpack.c.bf16 %v3711_v36, %v3710_v33 }
 0x8d7   :  { %9479 = vmatprep.mubr.msk.f32.mxu1 %vm2909_vm4, %v13752_v32 }
 0x8d8   :  { %10988 = vmatprep.subr.bf16.mxu0 %v10987_v20 }
 0x8d9   :  { %10990 = vmatpush3.bf16.msra.mxu0 %v10987_v20  ;;  %v11011_v20 = vpack.c.bf16 %v3698_v29, %v3697_v18 }
 0x8da   :  { %9480 = vmatmul.mubr.msk.f32.gmra.mrb[46].mxu1 %vm2909_vm4, %v13747_v49  ;;  %10992 = vmatprep.subr.bf16.mxu0 %v10991_v25  ;;  %v3690_v49 = vld [vmem:[#allocation8 + $0x8] sm:$0xff] }
 0x8db   :  { %v10995_v62 = vpack.c.bf16 %v3690_v49, %v3689_v28  ;;  %v3699_v28 = vld [vmem:[#allocation8 + $0x50] sm:$0xff]  ;;  %v3700_v49 = vld [vmem:[#allocation8 + $0x58] sm:$0xff] }
 0x8dd   :  { %10994 = vmatpush3.bf16.msra.mxu0 %v10991_v25 }
 0x8de   :  { %10996 = vmatprep.subr.bf16.mxu0 %v10995_v62 }
 0x953   :  { %v8751_v43 = vpop.f32.mrb[150].mxu0 }
 0x954   :  { %v8752_v5 = vpop.f32.mrb[151].mxu0 }
 0x955   :  { %v8753_v54 = vadd.f32 %v8752_v5, %v8751_v43 }
 0x957   :  { %v8754_v57 = vpop.f32.mrb[152].mxu0 }
 0x958   :  { %v8755_v32 = vpop.f32.mrb[153].mxu0 }
 0x959   :  { %v8756_v27 = vadd.f32 %v8755_v32, %v8754_v57 }
 0x95b   :  { %v8757_v7 = vpop.f32.mrb[154].mxu0 }
 0x95c   :  { %v8758_v0 = vpop.f32.mrb[155].mxu0 }
 0x95d   :  { %v13821_v31 = vadd.f32 %v8758_v0, %v8757_v7  ;;  %v3909_v7 = vld [vmem:[#allocation8 + $0xc0] sm:$0xff]  ;;  %v3910_v0 = vld [vmem:[#allocation8 + $0xc8] sm:$0xff] }
 0x95f   :  { %v8760_v34 = vpop.f32.mrb[156].mxu0 }
 0x960   :  { %v8761_v17 = vpop.f32.mrb[157].mxu0 }
 0x961   :  { %v13823_v9 = vadd.f32 %v8761_v17, %v8760_v34 }
 0x973   :  { %v8851_v39 = vpop.f32.mrb[158].mxu0 }
 0x974   :  { %v8852_v40 = vpop.f32.mrb[159].mxu0 }
 0x975   :  { %v8853_v15 = vadd.f32 %v8852_v40, %v8851_v39 }
 0x977   :  { %v8854_v61 = vpop.f32.mrb[160].mxu0 }
 0x978   :  { %v8855_v38 = vpop.f32.mrb[161].mxu0 }
 0x979   :  { %v8856_v41 = vadd.f32 %v8855_v38, %v8854_v61  ;;  %v3912_v61 = vld [vmem:[#allocation8 + $0xd8] sm:$0xff] }
 0x97b   :  { %v8857_v45 = vpop.f32.mrb[162].mxu0 }
 0x97c   :  { %v8858_v2 = vpop.f32.mrb[163].mxu0 }
 0x97d   :  { %v13825_v12 = vadd.f32 %v8858_v2, %v8857_v45  ;;  %v3914_v45 = vld [vmem:[#allocation8 + $0xe8] sm:$0xff] }
 0x97f   :  { %v8860_v4 = vpop.f32.mrb[164].mxu0 }
 0x980   :  { %v8861_v48 = vpop.f32.mrb[165].mxu0 }
 0x981   :  { %v13827_v16 = vadd.f32 %v8861_v48, %v8860_v4  ;;  %v3916_v4 = vld [vmem:[#allocation8 + $0xf8] sm:$0xff] }
 0x983   :  { %v13829_v37 = vpop.f32.mrb[166].mxu0 }
 0x984   :  { %v3630_v42 = vpop.f32.mrb[167].mxu0 }
 0x987   :  { %v13831_v52 = vpop.f32.mrb[168].mxu0 }
 0x988   :  { %v13833_v10 = vpop.f32.mrb[169].mxu0 }
 0x98b   :  { %v9506_v46 = vpop.f32.mrb[170].mxu0 }
 0x98c   :  { %v3650_v63 = vpop.f32.mrb[171].mxu0 }
 0x98d   :  { %9540 = vmatprep.mubr.msk.f32.mxu0 %vm656_vm1, %v3650_v63 }
 0x98e   :  { %9541 = vmatmul.mubr.msk.f32.vlgmr.msra.gmra.mrb[178].mxu0 %vm656_vm1, %v9506_v46  ;;  %v3918_v46 = vld [vmem:[#allocation8 + $0x108] sm:$0xff] }
 0x98f   :  { %10998 = vmatpush3.bf16.msra.mxu0 %v10995_v62  ;;  %v9509_v35 = vpop.f32.mrb[172].mxu0  ;;  %v11035_v21 = vpack.c.bf16 %v3918_v46, %v3917_v44  ;;  %v13902_v44 = vld [vmem:[%s14598_s22 + $0x20] sm:$0xff] }
 0x990   :  { %11000 = vmatprep.subr.bf16.mxu0 %v10999_v47  ;;  %v3660_v26 = vpop.f32.mrb[173].mxu0 }
 0x991   :  { %v8801_v23 = vpop.f32.mrb[48].mxu1  ;;  %9543 = vmatprep.mubr.msk.f32.mxu0 %vm656_vm1, %v3660_v26  ;;  %v3499_v26 = vld [vmem:[#allocation7] sm:$0x3] }
 0x992   :  { %v8802_v55 = vpop.f32.mrb[49].mxu1  ;;  %9544 = vmatmul.mubr.msk.f32.gmra.mrb[180].mxu0 %vm656_vm1, %v9509_v35  ;;  %v3920_v35 = vld [vmem:[#allocation8 + $0x118] sm:$0xff]  ;;  %v3503_v19 = vrot.slane %v3499_v26, %v12940_v22 }
 0x993   :  { %v8803_v56 = vadd.f32 %v8802_v55, %v8801_v23  ;;  %11002 = vmatpush3.bf16.msra.mxu0 %v10999_v47  ;;  %9570 = vmatprep.mubr.msk.f32.mxu0 %vm656_vm1, %v3630_v42  ;;  %v13840_v11 = vpop.f32.mrb[174].mxu0  ;;  %v4026_v23 = vld [vmem:[#allocation10] sm:$0x3] }
 0x994   :  { %11004 = vmatprep.subr.bf16.mxu0 %v11003_v51  ;;  %v3670_v58 = vpop.f32.mrb[175].mxu0  ;;  %v4038_v18 = vrot.slane %v4026_v23, %v12945_v1 }
 0x995   :  { %v11760_v50 = vadd.f32 %v8803_v56, %v8753_v54  ;;  %v8804_v59 = vpop.f32.mrb[50].mxu1  ;;  %v11015_v54 = vpack.c.bf16 %v3700_v49, %v3699_v28  ;;  %v4030_v56 = vrot.slane %v4026_v23, %v12940_v22  ;;  %v13926_v23 = vld [vmem:[%s14598_s22 + $0x40] sm:$0xff] }
 0x996   :  { %v8805_v24 = vpop.f32.mrb[51].mxu1 }
 0x997   :  { %v8806_v14 = vadd.f32 %v8805_v24, %v8804_v59  ;;  %11006 = vmatpush3.bf16.msra.mxu0 %v11003_v51  ;;  %v11761_v33 = vadd.f32 %v11760_v50, %v8853_v15  ;;  %v13842_v36 = vpop.f32.mrb[176].mxu0  ;;  %v3911_v15 = vld [vmem:[#allocation8 + $0xd0] sm:$0xff] }
 0x998   :  { %11008 = vmatprep.subr.bf16.mxu0 %v11007_v30  ;;  %v13844_v60 = vpop.f32.mrb[177].mxu0  ;;  %v13864_v51 = vld [vmem:[%s14598_s22] sm:$0xff] }
 0x999   :  { %v11757_v3 = vadd.f32 %v8806_v14, %v8756_v27  ;;  %v8807_v25 = vpop.f32.mrb[52].mxu1  ;;  %v11019_v27 = vpack.c.bf16 %v3910_v0, %v3909_v7  ;;  %9614 = vmatprep.mubr.msk.f32.mxu1 %vm4059_vm5, %v13864_v51 }
 0x99a   :  { %v8808_v62 = vpop.f32.mrb[53].mxu1 }
 0x99b   :  { %v8809_v43 = vadd.f32 %v8808_v62, %v8807_v25  ;;  %11010 = vmatpush3.bf16.msra.mxu0 %v11007_v30  ;;  %v11758_v5 = vadd.f32 %v11757_v3, %v8856_v41  ;;  %v11023_v41 = vpack.c.bf16 %v3912_v61, %v3911_v15 }
 0x99c   :  { %11012 = vmatprep.subr.bf16.mxu0 %v11011_v20 }
 0x99d   :  { %v11766_v57 = vadd.f32 %v8809_v43, %v13821_v31  ;;  %v8810_v32 = vpop.f32.mrb[54].mxu1  ;;  %v3913_v31 = vld [vmem:[#allocation8 + $0xe0] sm:$0xff] }
 0x99e   :  { %v8811_v34 = vpop.f32.mrb[55].mxu1  ;;  %v11027_v2 = vpack.c.bf16 %v3914_v45, %v3913_v31 }
 0x99f   :  { %v8812_v17 = vadd.f32 %v8811_v34, %v8810_v32  ;;  %11014 = vmatpush3.bf16.msra.mxu0 %v11011_v20  ;;  %v11767_v39 = vadd.f32 %v11766_v57, %v13825_v12 }
 0x9a0   :  { %11016 = vmatprep.subr.bf16.mxu0 %v11015_v54 }
 0x9a1   :  { %v11763_v40 = vadd.f32 %v8812_v17, %v13823_v9  ;;  %v3915_v9 = vld [vmem:[#allocation8 + $0xf0] sm:$0xff] }
 0x9a3   :  { %11018 = vmatpush3.bf16.msra.mxu0 %v11015_v54  ;;  %v11764_v38 = vadd.f32 %v11763_v40, %v13827_v16 }
 0x9a4   :  { %11020 = vmatprep.subr.bf16.mxu0 %v11019_v27 }
 0x9a6   :  { %9571 = vmatmul.mubr.msk.f32.vlgmr.msra.gmra.mrb[178].mxu0 %vm656_vm1, %v13829_v37  ;;  %v11031_v37 = vpack.c.bf16 %v3916_v4, %v3915_v9  ;;  %v8359_v9 = vld [vmem:[%s14599_s17 + $0x98] sm:$0xff]  ;;  %v13887_v4 = vld [vmem:[%s14598_s22 + $0x8] sm:$0xff] }
 0x9a7   :  { %11022 = vmatpush3.bf16.msra.mxu0 %v11019_v27  ;;  %9573 = vmatprep.mubr.msk.f32.mxu0 %vm656_vm1, %v13833_v10 }
 0x9a8   :  { %11024 = vmatprep.subr.bf16.mxu0 %v11023_v41 }
 0x9a9   :  { %v9478_v12 = vpop.f32.mrb[44].mxu1 }
 0x9aa   :  { %v11759_v48 = vadd.f32 %v11758_v5, %v9478_v12  ;;  %v3472_v42 = vpop.f32.mrb[45].mxu1  ;;  %9574 = vmatmul.mubr.msk.f32.gmra.mrb[180].mxu0 %vm656_vm1, %v13831_v52  ;;  %v11039_v52 = vpack.c.bf16 %v3920_v35, %v3919_v6  ;;  %v8358_v12 = vld [vmem:[%s14599_s17 + $0x90] sm:$0xff]  ;;  %v8364_v35 = vld [vmem:[%s14599_s17 + $0xc0] sm:$0xff] }
 0x9ab   :  { %v11762_v16 = vadd.f32 %v11761_v33, %v3472_v42  ;;  %11026 = vmatpush3.bf16.msra.mxu0 %v11023_v41  ;;  %9600 = vmatprep.mubr.msk.f32.mxu0 %vm656_vm1, %v3670_v58  ;;  %v8357_v41 = vld [vmem:[%s14599_s17 + $0x88] sm:$0xff]  ;;  %v11055_v42 = vpack.c.bf16 %v8359_v9, %v8358_v12  ;;  %v4231_v9 = vld [vmem:[%s14599_s17 + $0x50] sm:$0xff] }
 0x9ac   :  { %11028 = vmatprep.subr.bf16.mxu0 %v11027_v2  ;;  %v3496_v53 = vmax.f32 %v11759_v48, 0.0  ;;  %v13890_v48 = vld [vmem:[%s14598_s22 + $0x10] sm:$0xff] }
 0x9ad   :  { %v9481_v8 = vpop.f32.mrb[46].mxu1  ;;  %v3495_v55 = vmax.f32 %v11762_v16, 0.0  ;;  %v8360_v16 = vld [vmem:[%s14599_s17 + $0xa0] sm:$0xff] }
 0x9ae   :  { %v11765_v10 = vadd.f32 %v11764_v38, %v9481_v8  ;;  %v3482_v63 = vpop.f32.mrb[47].mxu1  ;;  %v3505_v58 = vmul.f32 %v3503_v19, %v3496_v53  ;;  %v8356_v38 = vld [vmem:[%s14599_s17 + $0x80] sm:$0xff]  ;;  %v13899_v8 = vld [vmem:[%s14598_s22 + $0x18] sm:$0xff] }
 0x9af   :  { %v11768_v47 = vadd.f32 %v11767_v39, %v3482_v63  ;;  %11030 = vmatpush3.bf16.msra.mxu0 %v11027_v2  ;;  %v3504_v24 = vmul.f32 %v3503_v19, %v3495_v55  ;;  %v11051_v2 = vpack.c.bf16 %v8357_v41, %v8356_v38  ;;  %v8363_v63 = vld [vmem:[%s14599_s17 + $0xb8] sm:$0xff]  ;;  %v4229_v38 = vld [vmem:[%s14599_s17 + $0x40] sm:$0xff]  ;;  %v4230_v41 = vld [vmem:[%s14599_s17 + $0x48] sm:$0xff] }
 0x9b0   :  { %11032 = vmatprep.subr.bf16.mxu0 %v11031_v37  ;;  %v3498_v50 = vmax.f32 %v11765_v10, 0.0  ;;  %v8362_v10 = vld [vmem:[%s14599_s17 + $0xb0] sm:$0xff]  ;;  %v8367_v55 = vld [vmem:[%s14599_s17 + $0xd8] sm:$0xff] }
 0x9b1   :  { %v3497_v14 = vmax.f32 %v11768_v47, 0.0  ;;  %v13911_v47 = vld [vmem:[%s14598_s22 + $0x28] sm:$0xff]  ;;  %v11063_v6 = vpack.c.bf16 %v8363_v63, %v8362_v10  ;;  %v4235_v63 = vld [vmem:[%s14599_s17 + $0x70] sm:$0xff] }
 0x9b2   :  { %v3507_v25 = vmul.f32 %v3503_v19, %v3498_v50  ;;  %v8369_v50 = vld [vmem:[%s14599_s17 + $0xe8] sm:$0xff] }
 0x9b3   :  { %11034 = vmatpush3.bf16.msra.mxu0 %v11031_v37  ;;  %v3506_v5 = vmul.f32 %v3503_v19, %v3497_v14  ;;  %v8361_v37 = vld [vmem:[%s14599_s17 + $0xa8] sm:$0xff]  ;;  %v8366_v19 = vld [vmem:[%s14599_s17 + $0xd0] sm:$0xff] }
 0x9b4   :  { %11036 = vmatprep.subr.bf16.mxu0 %v11035_v21  ;;  %v11059_v46 = vpack.c.bf16 %v8361_v37, %v8360_v16  ;;  %v4233_v37 = vld [vmem:[%s14599_s17 + $0x60] sm:$0xff] }
 0x9b7   :  { %11038 = vmatpush3.bf16.msra.mxu0 %v11035_v21  ;;  %v13914_v21 = vld [vmem:[%s14598_s22 + $0x30] sm:$0xff] }
 0x9b8   :  { %11040 = vmatprep.subr.bf16.mxu0 %v11039_v52 }
 0x9bb   :  { %11042 = vmatpush3.bf16.msra.mxu0 %v11039_v52  ;;  %v8365_v52 = vld [vmem:[%s14599_s17 + $0xc8] sm:$0xff] }
 0x9bc   :  { %v11067_v53 = vpack.c.bf16 %v8365_v52, %v8364_v35  ;;  %v8372_v52 = vld [vmem:[%s14599_s17 + $0x100] sm:$0xff] }
 0x9be   :  { %9601 = vmatmul.mubr.msk.f32.vlgmr.msra.gmra.mrb[178].mxu0 %vm656_vm1, %v13840_v11  ;;  %v3511_v11 = vrot.slane %v3499_v26, %v12945_v1  ;;  %v13923_v26 = vld [vmem:[%s14598_s22 + $0x38] sm:$0xff] }
 0x9bf   :  { %9603 = vmatprep.mubr.msk.f32.mxu0 %vm656_vm1, %v13844_v60 }
 0x9c0   :  { %v3513_v3 = vadd.f32 %v3511_v11, %v3505_v58  ;;  %v3512_v43 = vadd.f32 %v3511_v11, %v3504_v24  ;;  %v3515_v17 = vadd.f32 %v3511_v11, %v3507_v25  ;;  %v3514_v27 = vadd.f32 %v3511_v11, %v3506_v5  ;;  %v13938_v11 = vld [vmem:[%s14598_s22 + $0x50] sm:$0xff]  ;;  %v8368_v58 = vld [vmem:[%s14599_s17 + $0xe0] sm:$0xff]  ;;  %v8371_v24 = vld [vmem:[%s14599_s17 + $0xf8] sm:$0xff] }
 0x9c2   :  { %9604 = vmatmul.mubr.msk.f32.gmra.mrb[180].mxu0 %vm656_vm1, %v13842_v36 }
 0x9c3   :  { %9754 = vmatprep.mubr.msk.f32.mxu0 %vm4059_vm5, %v13864_v51 }
 0xa91   :  { %v9602_v30 = vpop.f32.mrb[178].mxu0 }
 0xa92   :  { %v4023_v59 = vmax.f32 %v9602_v30, 0.0  ;;  %v3999_v29 = vpop.f32.mrb[179].mxu0  ;;  %v11071_v30 = vpack.c.bf16 %v8367_v55, %v8366_v19  ;;  %v8374_v55 = vld [vmem:[%s14599_s17 + $0x110] sm:$0xff] }
 0xa93   :  { %v4022_v33 = vmax.f32 %v3999_v29, 0.0  ;;  %v8370_v29 = vld [vmem:[%s14599_s17 + $0xf0] sm:$0xff] }
 0xa94   :  { %v4032_v36 = vmul.f32 %v4030_v56, %v4023_v59  ;;  %v13947_v59 = vld [vmem:[%s14598_s22 + $0x58] sm:$0xff]  ;;  %v11079_v14 = vpack.c.bf16 %v8371_v24, %v8370_v29  ;;  %v8378_v24 = vld [vmem:[%s14599_s17 + $0x130] sm:$0xff] }
 0xa95   :  { %v4031_v20 = vmul.f32 %v4030_v56, %v4022_v33  ;;  %v9605_v60 = vpop.f32.mrb[180].mxu0  ;;  %v4221_v33 = vld [vmem:[%s14599_s17] sm:$0xff] }
 0xa96   :  { %v4040_v28 = vadd.f32 %v4038_v18, %v4032_v36  ;;  %v4025_v49 = vmax.f32 %v9605_v60, 0.0  ;;  %v4009_v62 = vpop.f32.mrb[181].mxu0  ;;  %v4222_v36 = vld [vmem:[%s14599_s17 + $0x8] sm:$0xff] }
 0xa97   :  { %v4039_v54 = vadd.f32 %v4038_v18, %v4031_v20  ;;  %v4024_v57 = vmax.f32 %v4009_v62, 0.0  ;;  %v11083_v20 = vpack.c.bf16 %v4222_v36, %v4221_v33  ;;  %v4224_v62 = vld [vmem:[%s14599_s17 + $0x18] sm:$0xff]  ;;  %v8380_v36 = vld [vmem:[%s14599_s17 + $0x140] sm:$0xff] }
 0xa98   :  { %v4044_v32 = vadd.f32 %v4040_v28, %v3513_v3  ;;  %v4034_v7 = vmul.f32 %v4030_v56, %v4025_v49  ;;  %v4223_v49 = vld [vmem:[%s14599_s17 + $0x10] sm:$0xff] }
 0xa99   :  { %v4043_v0 = vadd.f32 %v4039_v54, %v3512_v43  ;;  %v4033_v34 = vmul.f32 %v4030_v56, %v4024_v57  ;;  %v13935_v56 = vld [vmem:[%s14598_s22 + $0x48] sm:$0xff]  ;;  %v11087_v54 = vpack.c.bf16 %v4224_v62, %v4223_v49  ;;  %v4225_v57 = vld [vmem:[%s14599_s17 + $0x20] sm:$0xff] }
 0xa9a   :  { %v4042_v39 = vadd.f32 %v4038_v18, %v4034_v7  ;;  %v8384_v62 = vld [vmem:[%s14599_s17 + $0x160] sm:$0xff] }
 0xa9b   :  { %v4041_v40 = vadd.f32 %v4038_v18, %v4033_v34  ;;  %v13874_v15 = vpack.c.bf16 %v4044_v32, %v4043_v0  ;;  %v11075_v18 = vpack.c.bf16 %v8369_v50, %v8368_v58  ;;  %v4226_v32 = vld [vmem:[%s14599_s17 + $0x28] sm:$0xff]  ;;  %v8376_v50 = vld [vmem:[%s14599_s17 + $0x120] sm:$0xff] }
 0xa9c   :  { %v4046_v61 = vadd.f32 %v4042_v39, %v3515_v17  ;;  %v11091_v0 = vpack.c.bf16 %v4226_v32, %v4225_v57  ;;  %v4227_v17 = vld [vmem:[%s14599_s17 + $0x30] sm:$0xff]  ;;  %v4228_v39 = vld [vmem:[%s14599_s17 + $0x38] sm:$0xff]  ;;  %v4534_v32 = vld [vmem:[#allocation11] sm:$0x3] }
 0xa9d   :  { %v4045_v31 = vadd.f32 %v4041_v40, %v3514_v27  ;;  %11044 = vmatprep.subr.bf16.mxu1 %v13874_v15  ;;  %v11095_v40 = vpack.c.bf16 %v4228_v39, %v4227_v17  ;;  %v4546_v17 = vrot.slane %v4534_v32, %v12945_v1 }
 0xa9e   :  { %11046 = vmatpush3.bf16.msra.mxu1 %v13874_v15 }
 0xa9f   :  { %v13880_v45 = vpack.c.bf16 %v4046_v61, %v4045_v31 }
 0xaa1   :  { %11048 = vmatprep.subr.bf16.mxu1 %v13880_v45 }
 0xaa2   :  { %11050 = vmatpush3.bf16.msra.mxu1 %v13880_v45 }
 0xaa3   :  { %11052 = vmatprep.subr.bf16.mxu1 %v11051_v2 }
 0xaa5   :  { %9615 = vmatmul.mubr.msk.f32.vlgmr.msra.gmra.mrb[56].mxu1 %vm4059_vm5, %v13887_v4 }
 0xaa6   :  { %9617 = vmatprep.mubr.msk.f32.mxu1 %vm4059_vm5, %v13890_v48  ;;  %11054 = vmatpush3.bf16.msra.mxu1 %v11051_v2  ;;  %v11099_v2 = vpack.c.bf16 %v4230_v41, %v4229_v38 }
 0xaa7   :  { %11056 = vmatprep.subr.bf16.mxu1 %v11055_v42 }
 0xaa9   :  { %9618 = vmatmul.mubr.msk.f32.gmra.mrb[58].mxu1 %vm4059_vm5, %v13899_v8 }
 0xaaa   :  { %9620 = vmatprep.mubr.msk.f32.mxu1 %vm4059_vm5, %v13902_v44  ;;  %11058 = vmatpush3.bf16.msra.mxu1 %v11055_v42  ;;  %v4232_v42 = vld [vmem:[%s14599_s17 + $0x58] sm:$0xff] }
 0xaab   :  { %11060 = vmatprep.subr.bf16.mxu1 %v11059_v46  ;;  %v11103_v16 = vpack.c.bf16 %v4232_v42, %v4231_v9 }
 0xaad   :  { %9621 = vmatmul.mubr.msk.f32.gmra.mrb[60].mxu1 %vm4059_vm5, %v13911_v47 }
 0xaae   :  { %9623 = vmatprep.mubr.msk.f32.mxu1 %vm4059_vm5, %v13914_v21  ;;  %11062 = vmatpush3.bf16.msra.mxu1 %v11059_v46  ;;  %v4234_v46 = vld [vmem:[%s14599_s17 + $0x68] sm:$0xff] }
 0xaaf   :  { %11064 = vmatprep.subr.bf16.mxu1 %v11063_v6  ;;  %v11107_v10 = vpack.c.bf16 %v4234_v46, %v4233_v37  ;;  %v8400_v46 = vld [vmem:[%s14600_s0 + $0x80] sm:$0xff] }
 0xab1   :  { %9624 = vmatmul.mubr.msk.f32.gmra.mrb[62].mxu1 %vm4059_vm5, %v13923_v26 }
 0xab2   :  { %9626 = vmatprep.mubr.msk.f32.mxu1 %vm4059_vm5, %v13926_v23  ;;  %11066 = vmatpush3.bf16.msra.mxu1 %v11063_v6  ;;  %v4236_v6 = vld [vmem:[%s14599_s17 + $0x78] sm:$0xff] }
 0xab3   :  { %11068 = vmatprep.subr.bf16.mxu1 %v11067_v53  ;;  %v11111_v35 = vpack.c.bf16 %v4236_v6, %v4235_v63 }
 0xab5   :  { %9627 = vmatmul.mubr.msk.f32.gmra.mrb[64].mxu1 %vm4059_vm5, %v13935_v56 }
 0xab6   :  { %9629 = vmatprep.mubr.msk.f32.mxu1 %vm4059_vm5, %v13938_v11  ;;  %11070 = vmatpush3.bf16.msra.mxu1 %v11067_v53  ;;  %v8373_v53 = vld [vmem:[%s14599_s17 + $0x108] sm:$0xff] }
 0xab7   :  { %11072 = vmatprep.subr.bf16.mxu1 %v11071_v30  ;;  %v11115_v19 = vpack.c.bf16 %v8373_v53, %v8372_v52  ;;  %v8402_v52 = vld [vmem:[%s14600_s0 + $0x90] sm:$0xff]  ;;  %v8403_v53 = vld [vmem:[%s14600_s0 + $0x98] sm:$0xff] }
 0xab9   :  { %9630 = vmatmul.mubr.msk.f32.gmra.mrb[66].mxu1 %vm4059_vm5, %v13947_v59 }
 0xaba   :  { %11074 = vmatpush3.bf16.msra.mxu1 %v11071_v30  ;;  %v8375_v30 = vld [vmem:[%s14599_s17 + $0x118] sm:$0xff] }
 0xabb   :  { %11076 = vmatprep.subr.bf16.mxu1 %v11075_v18  ;;  %v11119_v58 = vpack.c.bf16 %v8375_v30, %v8374_v55  ;;  %v8404_v55 = vld [vmem:[%s14600_s0 + $0xa0] sm:$0xff]  ;;  %v8405_v30 = vld [vmem:[%s14600_s0 + $0xa8] sm:$0xff] }
 0xabe   :  { %11078 = vmatpush3.bf16.msra.mxu1 %v11075_v18  ;;  %v8377_v18 = vld [vmem:[%s14599_s17 + $0x128] sm:$0xff] }
 0xabf   :  { %11080 = vmatprep.subr.bf16.mxu1 %v11079_v14  ;;  %v11123_v29 = vpack.c.bf16 %v8377_v18, %v8376_v50  ;;  %v8406_v50 = vld [vmem:[%s14600_s0 + $0xb0] sm:$0xff]  ;;  %v8407_v18 = vld [vmem:[%s14600_s0 + $0xb8] sm:$0xff] }
 0xac2   :  { %11082 = vmatpush3.bf16.msra.mxu1 %v11079_v14  ;;  %v8379_v14 = vld [vmem:[%s14599_s17 + $0x138] sm:$0xff] }
 0xac3   :  { %11084 = vmatprep.subr.bf16.mxu1 %v11083_v20  ;;  %v11127_v33 = vpack.c.bf16 %v8379_v14, %v8378_v24  ;;  %v8408_v24 = vld [vmem:[%s14600_s0 + $0xc0] sm:$0xff]  ;;  %v8409_v14 = vld [vmem:[%s14600_s0 + $0xc8] sm:$0xff] }
 0xb78   :  { %v9616_v60 = vpop.f32.mrb[56].mxu1 }
 0xb79   :  { %v4162_v3 = vpop.f32.mrb[57].mxu1 }
 0xb7c   :  { %v13955_v25 = vpop.f32.mrb[58].mxu1 }
 0xb7d   :  { %v4172_v28 = vpop.f32.mrb[59].mxu1 }
 0xb80   :  { %v9622_v43 = vpop.f32.mrb[60].mxu1 }
 0xb81   :  { %v4182_v5 = vpop.f32.mrb[61].mxu1 }
 0xb82   :  { %9664 = vmatprep.mubr.f32.mxu1 %v4182_v5  ;;  %v8386_v5 = vld [vmem:[%s14599_s17 + $0x170] sm:$0xff] }
 0xb83   :  { %9665 = vmatmul.mubr.f32.vlgmr.msra.gmra.mrb[68].mxu1 %v9622_v43  ;;  %v8385_v43 = vld [vmem:[%s14599_s17 + $0x168] sm:$0xff] }
 0xb84   :  { %11086 = vmatpush3.bf16.msra.mxu1 %v11083_v20  ;;  %v9625_v7 = vpop.f32.mrb[62].mxu1  ;;  %v8381_v20 = vld [vmem:[%s14599_s17 + $0x148] sm:$0xff] }
 0xb85   :  { %11088 = vmatprep.subr.bf16.mxu1 %v11087_v54  ;;  %v4192_v34 = vpop.f32.mrb[63].mxu1 }
 0xb86   :  { %9667 = vmatprep.mubr.f32.mxu1 %v4192_v34 }
 0xb87   :  { %9668 = vmatmul.mubr.f32.gmra.mrb[70].mxu1 %v9625_v7  ;;  %v4538_v7 = vrot.slane %v4534_v32, %v12940_v22 }
 0xb88   :  { %11090 = vmatpush3.bf16.msra.mxu1 %v11087_v54  ;;  %9702 = vmatprep.mubr.f32.mxu1 %v4162_v3  ;;  %v13963_v27 = vpop.f32.mrb[64].mxu1  ;;  %v8382_v3 = vld [vmem:[%s14599_s17 + $0x150] sm:$0xff]  ;;  %v8387_v54 = vld [vmem:[%s14599_s17 + $0x178] sm:$0xff] }
 0xb89   :  { %11092 = vmatprep.subr.bf16.mxu1 %v11091_v0  ;;  %v4202_v61 = vpop.f32.mrb[65].mxu1  ;;  %v11143_v57 = vpack.c.bf16 %v8387_v54, %v8386_v5  ;;  %v4676_v5 = vld [vmem:[%s14600_s0] sm:$0xff]  ;;  %v4677_v54 = vld [vmem:[%s14600_s0 + $0x8] sm:$0xff] }
 0xb8c   :  { %11094 = vmatpush3.bf16.msra.mxu1 %v11091_v0  ;;  %v13967_v31 = vpop.f32.mrb[66].mxu1 }
 0xb8d   :  { %11096 = vmatprep.subr.bf16.mxu1 %v11095_v40  ;;  %v13969_v12 = vpop.f32.mrb[67].mxu1 }
 0xb90   :  { %11098 = vmatpush3.bf16.msra.mxu1 %v11095_v40 }
 0xb91   :  { %11100 = vmatprep.subr.bf16.mxu1 %v11099_v2 }
 0xb94   :  { %11102 = vmatpush3.bf16.msra.mxu1 %v11099_v2 }
 0xb95   :  { %11104 = vmatprep.subr.bf16.mxu1 %v11103_v16 }
 0xb98   :  { %11106 = vmatpush3.bf16.msra.mxu1 %v11103_v16 }
 0xb99   :  { %11108 = vmatprep.subr.bf16.mxu1 %v11107_v10 }
 0xb9c   :  { %11110 = vmatpush3.bf16.msra.mxu1 %v11107_v10  ;;  %v8401_v10 = vld [vmem:[%s14600_s0 + $0x88] sm:$0xff] }
 0xb9d   :  { %11112 = vmatprep.subr.bf16.mxu1 %v11111_v35 }
 0xba0   :  { %11114 = vmatpush3.bf16.msra.mxu1 %v11111_v35  ;;  %v11155_v35 = vpack.c.bf16 %v8401_v10, %v8400_v46  ;;  %v4684_v46 = vld [vmem:[%s14600_s0 + $0x40] sm:$0xff]  ;;  %v4685_v10 = vld [vmem:[%s14600_s0 + $0x48] sm:$0xff] }
 0xba1   :  { %11116 = vmatprep.subr.bf16.mxu1 %v11115_v19 }
 0xba3   :  { %9703 = vmatmul.mubr.f32.vlgmr.msra.gmra.mrb[68].mxu1 %v9616_v60  ;;  %v11131_v60 = vpack.c.bf16 %v8381_v20, %v8380_v36  ;;  %v8410_v36 = vld [vmem:[%s14600_s0 + $0xd0] sm:$0xff]  ;;  %v8411_v20 = vld [vmem:[%s14600_s0 + $0xd8] sm:$0xff] }
 0xba4   :  { %11118 = vmatpush3.bf16.msra.mxu1 %v11115_v19  ;;  %9705 = vmatprep.mubr.f32.mxu1 %v4172_v28  ;;  %v8383_v28 = vld [vmem:[%s14599_s17 + $0x158] sm:$0xff]  ;;  %v11159_v19 = vpack.c.bf16 %v8403_v53, %v8402_v52  ;;  %v4686_v52 = vld [vmem:[%s14600_s0 + $0x50] sm:$0xff] }
 0xba5   :  { %11120 = vmatprep.subr.bf16.mxu1 %v11119_v58  ;;  %v11135_v49 = vpack.c.bf16 %v8383_v28, %v8382_v3  ;;  %v8412_v3 = vld [vmem:[%s14600_s0 + $0xe0] sm:$0xff]  ;;  %v8413_v28 = vld [vmem:[%s14600_s0 + $0xe8] sm:$0xff]  ;;  %v4687_v53 = vld [vmem:[%s14600_s0 + $0x58] sm:$0xff] }
 0xba7   :  { %9706 = vmatmul.mubr.f32.gmra.mrb[70].mxu1 %v13955_v25  ;;  %v11139_v25 = vpack.c.bf16 %v8385_v43, %v8384_v62  ;;  %v8414_v62 = vld [vmem:[%s14600_s0 + $0xf0] sm:$0xff]  ;;  %v8415_v43 = vld [vmem:[%s14600_s0 + $0xf8] sm:$0xff] }
 0xba8   :  { %11122 = vmatpush3.bf16.msra.mxu1 %v11119_v58  ;;  %9740 = vmatprep.mubr.f32.mxu1 %v4202_v61  ;;  %v11163_v58 = vpack.c.bf16 %v8405_v30, %v8404_v55  ;;  %v4688_v55 = vld [vmem:[%s14600_s0 + $0x60] sm:$0xff]  ;;  %v4689_v30 = vld [vmem:[%s14600_s0 + $0x68] sm:$0xff] }
 0xba9   :  { %11124 = vmatprep.subr.bf16.mxu1 %v11123_v29 }
 0xbac   :  { %11126 = vmatpush3.bf16.msra.mxu1 %v11123_v29  ;;  %v11167_v29 = vpack.c.bf16 %v8407_v18, %v8406_v50  ;;  %v4690_v50 = vld [vmem:[%s14600_s0 + $0x70] sm:$0xff]  ;;  %v4691_v18 = vld [vmem:[%s14600_s0 + $0x78] sm:$0xff] }
 0xbad   :  { %11128 = vmatprep.subr.bf16.mxu1 %v11127_v33 }
 0xbb0   :  { %11130 = vmatpush3.bf16.msra.mxu1 %v11127_v33  ;;  %v11171_v33 = vpack.c.bf16 %v8409_v14, %v8408_v24  ;;  %v8416_v24 = vld [vmem:[%s14600_s0 + $0x100] sm:$0xff]  ;;  %v8417_v14 = vld [vmem:[%s14600_s0 + $0x108] sm:$0xff] }
 0xbb1   :  { %11132 = vmatprep.subr.bf16.mxu1 %v11131_v60 }
 0xbb4   :  { %11134 = vmatpush3.bf16.msra.mxu1 %v11131_v60  ;;  %v11175_v60 = vpack.c.bf16 %v8411_v20, %v8410_v36  ;;  %v8418_v36 = vld [vmem:[%s14600_s0 + $0x110] sm:$0xff]  ;;  %v8419_v20 = vld [vmem:[%s14600_s0 + $0x118] sm:$0xff] }
 0xbb5   :  { %11136 = vmatprep.subr.bf16.mxu1 %v11135_v49 }
 0xbb8   :  { %11138 = vmatpush3.bf16.msra.mxu1 %v11135_v49  ;;  %v11179_v49 = vpack.c.bf16 %v8413_v28, %v8412_v3  ;;  %v8420_v3 = vld [vmem:[%s14600_s0 + $0x120] sm:$0xff]  ;;  %v8421_v28 = vld [vmem:[%s14600_s0 + $0x128] sm:$0xff] }
 0xbb9   :  { %11140 = vmatprep.subr.bf16.mxu1 %v11139_v25 }
 0xbbc   :  { %11142 = vmatpush3.bf16.msra.mxu1 %v11139_v25  ;;  %v11183_v25 = vpack.c.bf16 %v8415_v43, %v8414_v62  ;;  %v8422_v62 = vld [vmem:[%s14600_s0 + $0x130] sm:$0xff]  ;;  %v8423_v43 = vld [vmem:[%s14600_s0 + $0x138] sm:$0xff] }
 0xbbd   :  { %11144 = vmatprep.subr.bf16.mxu1 %v11143_v57 }
 0xbc0   :  { %11146 = vmatpush3.bf16.msra.mxu1 %v11143_v57  ;;  %v11187_v57 = vpack.c.bf16 %v4677_v54, %v4676_v5  ;;  %v8424_v5 = vld [vmem:[%s14600_s0 + $0x140] sm:$0xff]  ;;  %v8425_v54 = vld [vmem:[%s14600_s0 + $0x148] sm:$0xff] }
 0xbc3   :  { %9741 = vmatmul.mubr.f32.vlgmr.msra.gmra.mrb[68].mxu1 %v13963_v27 }
 0xbc4   :  { %9743 = vmatprep.mubr.f32.mxu1 %v13969_v12 }
 0xbc7   :  { %9744 = vmatmul.mubr.f32.gmra.mrb[70].mxu1 %v13967_v31 }
 0xbc8   :  { %9894 = vmatprep.mubr.msk.f32.mxu1 %vm4059_vm5, %v13864_v51 }
 0xc96   :  { %v9742_v0 = vpop.f32.mrb[68].mxu1 }
 0xc97   :  { %v4531_v34 = vmax.f32 %v9742_v0, 0.0  ;;  %v4507_v39 = vpop.f32.mrb[69].mxu1 }
 0xc98   :  { %v4530_v40 = vmax.f32 %v4507_v39, 0.0  ;;  %v4679_v39 = vld [vmem:[%s14600_s0 + $0x18] sm:$0xff] }
 0xc99   :  { %v4540_v61 = vmul.f32 %v4538_v7, %v4531_v34 }
 0xc9a   :  { %v4539_v27 = vmul.f32 %v4538_v7, %v4530_v40  ;;  %v9745_v38 = vpop.f32.mrb[70].mxu1 }
 0xc9b   :  { %v4548_v41 = vadd.f32 %v4546_v17, %v4540_v61  ;;  %v4533_v31 = vmax.f32 %v9745_v38, 0.0  ;;  %v4517_v2 = vpop.f32.mrb[71].mxu1  ;;  %v4680_v38 = vld [vmem:[%s14600_s0 + $0x20] sm:$0xff] }
 0xc9c   :  { %v4547_v51 = vadd.f32 %v4546_v17, %v4539_v27  ;;  %v4532_v12 = vmax.f32 %v4517_v2, 0.0 }
 0xc9d   :  { %v4542_v9 = vmul.f32 %v4538_v7, %v4533_v31 }
 0xc9e   :  { %v4541_v42 = vmul.f32 %v4538_v7, %v4532_v12  ;;  %v11147_v16 = vpack.c.bf16 %v4548_v41, %v4547_v51  ;;  %v4681_v41 = vld [vmem:[%s14600_s0 + $0x28] sm:$0xff]  ;;  %v4682_v12 = vld [vmem:[%s14600_s0 + $0x30] sm:$0xff] }
 0xc9f   :  { %v4550_v37 = vadd.f32 %v4546_v17, %v4542_v9  ;;  %v11195_v2 = vpack.c.bf16 %v4681_v41, %v4680_v38  ;;  %v4683_v9 = vld [vmem:[%s14600_s0 + $0x38] sm:$0xff]  ;;  %v4989_v38 = vld [vmem:[#allocation13] sm:$0x3] }
 0xca0   :  { %v4549_v63 = vadd.f32 %v4546_v17, %v4541_v42  ;;  %11148 = vmatprep.subr.bf16.mxu0 %v11147_v16  ;;  %v4678_v17 = vld [vmem:[%s14600_s0 + $0x10] sm:$0xff]  ;;  %v4993_v41 = vrot.slane %v4989_v38, %v12940_v22 }
 0xca1   :  { %11150 = vmatpush3.bf16.msra.mxu0 %v11147_v16  ;;  %v11191_v27 = vpack.c.bf16 %v4679_v39, %v4678_v17  ;;  %v11199_v16 = vpack.c.bf16 %v4683_v9, %v4682_v12  ;;  %v8428_v17 = vld [vmem:[%s14600_s0 + $0x160] sm:$0xff]  ;;  %v8429_v39 = vld [vmem:[%s14600_s0 + $0x168] sm:$0xff] }
 0xca2   :  { %v11151_v6 = vpack.c.bf16 %v4550_v37, %v4549_v63 }
 0xca4   :  { %11152 = vmatprep.subr.bf16.mxu0 %v11151_v6 }
 0xca5   :  { %11154 = vmatpush3.bf16.msra.mxu0 %v11151_v6  ;;  %v11203_v6 = vpack.c.bf16 %v4685_v10, %v4684_v46 }
 0xca6   :  { %11156 = vmatprep.subr.bf16.mxu0 %v11155_v35 }
 0xca8   :  { %9755 = vmatmul.mubr.msk.f32.vlgmr.msra.gmra.mrb[182].mxu0 %vm4059_vm5, %v13887_v4 }
 0xca9   :  { %9757 = vmatprep.mubr.msk.f32.mxu0 %vm4059_vm5, %v13890_v48  ;;  %11158 = vmatpush3.bf16.msra.mxu0 %v11155_v35 }
 0xcaa   :  { %11160 = vmatprep.subr.bf16.mxu0 %v11159_v19 }
 0xcac   :  { %9758 = vmatmul.mubr.msk.f32.gmra.mrb[184].mxu0 %vm4059_vm5, %v13899_v8 }
 0xcad   :  { %9760 = vmatprep.mubr.msk.f32.mxu0 %vm4059_vm5, %v13902_v44  ;;  %11162 = vmatpush3.bf16.msra.mxu0 %v11159_v19  ;;  %v11207_v19 = vpack.c.bf16 %v4687_v53, %v4686_v52 }
 0xcae   :  { %11164 = vmatprep.subr.bf16.mxu0 %v11163_v58 }
 0xcb0   :  { %9761 = vmatmul.mubr.msk.f32.gmra.mrb[186].mxu0 %vm4059_vm5, %v13911_v47 }
 0xcb1   :  { %9763 = vmatprep.mubr.msk.f32.mxu0 %vm4059_vm5, %v13914_v21  ;;  %11166 = vmatpush3.bf16.msra.mxu0 %v11163_v58  ;;  %v11211_v58 = vpack.c.bf16 %v4689_v30, %v4688_v55  ;;  %v8444_v30 = vld [vmem:[%s14601_s27 + $0x80] sm:$0xff] }
 0xcb2   :  { %11168 = vmatprep.subr.bf16.mxu0 %v11167_v29 }
 0xcb4   :  { %9764 = vmatmul.mubr.msk.f32.gmra.mrb[188].mxu0 %vm4059_vm5, %v13923_v26 }
 0xcb5   :  { %9766 = vmatprep.mubr.msk.f32.mxu0 %vm4059_vm5, %v13926_v23  ;;  %11170 = vmatpush3.bf16.msra.mxu0 %v11167_v29  ;;  %v11215_v29 = vpack.c.bf16 %v4691_v18, %v4690_v50 }
 0xcb6   :  { %11172 = vmatprep.subr.bf16.mxu0 %v11171_v33 }
 0xcb8   :  { %9767 = vmatmul.mubr.msk.f32.gmra.mrb[190].mxu0 %vm4059_vm5, %v13935_v56 }
 0xcb9   :  { %9769 = vmatprep.mubr.msk.f32.mxu0 %vm4059_vm5, %v13938_v11  ;;  %11174 = vmatpush3.bf16.msra.mxu0 %v11171_v33  ;;  %v11219_v33 = vpack.c.bf16 %v8417_v14, %v8416_v24  ;;  %v8446_v24 = vld [vmem:[%s14601_s27 + $0x90] sm:$0xff]  ;;  %v8447_v14 = vld [vmem:[%s14601_s27 + $0x98] sm:$0xff] }
 0xcba   :  { %11176 = vmatprep.subr.bf16.mxu0 %v11175_v60 }
 0xcbc   :  { %9770 = vmatmul.mubr.msk.f32.gmra.mrb[192].mxu0 %vm4059_vm5, %v13947_v59 }
 0xcbd   :  { %11178 = vmatpush3.bf16.msra.mxu0 %v11175_v60  ;;  %v11223_v60 = vpack.c.bf16 %v8419_v20, %v8418_v36  ;;  %v8448_v36 = vld [vmem:[%s14601_s27 + $0xa0] sm:$0xff]  ;;  %v8449_v20 = vld [vmem:[%s14601_s27 + $0xa8] sm:$0xff] }
 0xcbe   :  { %11180 = vmatprep.subr.bf16.mxu0 %v11179_v49 }
 0xcc1   :  { %11182 = vmatpush3.bf16.msra.mxu0 %v11179_v49  ;;  %v11227_v49 = vpack.c.bf16 %v8421_v28, %v8420_v3  ;;  %v8450_v3 = vld [vmem:[%s14601_s27 + $0xb0] sm:$0xff]  ;;  %v8451_v28 = vld [vmem:[%s14601_s27 + $0xb8] sm:$0xff] }
 0xcc2   :  { %11184 = vmatprep.subr.bf16.mxu0 %v11183_v25 }
 0xcc5   :  { %11186 = vmatpush3.bf16.msra.mxu0 %v11183_v25  ;;  %v11231_v25 = vpack.c.bf16 %v8423_v43, %v8422_v62  ;;  %v8455_v43 = vld [vmem:[%s14601_s27 + $0xd8] sm:$0xff] }
 0xcc6   :  { %11188 = vmatprep.subr.bf16.mxu0 %v11187_v57 }
 0xd7b   :  { %v9756_v32 = vpop.f32.mrb[182].mxu0 }
 0xd7c   :  { %v4617_v7 = vpop.f32.mrb[183].mxu0 }
 0xd7f   :  { %v14041_v0 = vpop.f32.mrb[184].mxu0 }
 0xd80   :  { %v4627_v34 = vpop.f32.mrb[185].mxu0 }
 0xd83   :  { %v9762_v40 = vpop.f32.mrb[186].mxu0 }
 0xd84   :  { %v4637_v61 = vpop.f32.mrb[187].mxu0 }
 0xd85   :  { %9804 = vmatprep.mubr.f32.mxu0 %v4637_v61  ;;  %v8431_v61 = vld [vmem:[%s14600_s0 + $0x178] sm:$0xff] }
 0xd86   :  { %9805 = vmatmul.mubr.f32.vlgmr.msra.gmra.mrb[194].mxu0 %v9762_v40  ;;  %v8430_v40 = vld [vmem:[%s14600_s0 + $0x170] sm:$0xff] }
 0xd87   :  { %11190 = vmatpush3.bf16.msra.mxu0 %v11187_v57  ;;  %v9765_v31 = vpop.f32.mrb[188].mxu0  ;;  %v11235_v57 = vpack.c.bf16 %v8425_v54, %v8424_v5 }
 0xd88   :  { %11192 = vmatprep.subr.bf16.mxu0 %v11191_v27  ;;  %v4647_v51 = vpop.f32.mrb[189].mxu0 }
 0xd89   :  { %9807 = vmatprep.mubr.f32.mxu0 %v4647_v51  ;;  %v5001_v51 = vrot.slane %v4989_v38, %v12945_v1 }
 0xd8a   :  { %9808 = vmatmul.mubr.f32.gmra.mrb[196].mxu0 %v9765_v31 }
 0xd8b   :  { %11194 = vmatpush3.bf16.msra.mxu0 %v11191_v27  ;;  %9842 = vmatprep.mubr.f32.mxu0 %v4617_v7  ;;  %v14049_v42 = vpop.f32.mrb[190].mxu0  ;;  %v8427_v7 = vld [vmem:[%s14600_s0 + $0x158] sm:$0xff]  ;;  %v11247_v27 = vpack.c.bf16 %v8431_v61, %v8430_v40  ;;  %v5135_v61 = vld [vmem:[%s14601_s27 + $0x20] sm:$0xff] }
 0xd8c   :  { %11196 = vmatprep.subr.bf16.mxu0 %v11195_v2  ;;  %v4657_v37 = vpop.f32.mrb[191].mxu0 }
 0xd8f   :  { %11198 = vmatpush3.bf16.msra.mxu0 %v11195_v2  ;;  %v14053_v63 = vpop.f32.mrb[192].mxu0 }
 0xd90   :  { %11200 = vmatprep.subr.bf16.mxu0 %v11199_v16  ;;  %v14055_v35 = vpop.f32.mrb[193].mxu0 }
 0xd93   :  { %11202 = vmatpush3.bf16.msra.mxu0 %v11199_v16 }
 0xd94   :  { %11204 = vmatprep.subr.bf16.mxu0 %v11203_v6 }
 0xd97   :  { %11206 = vmatpush3.bf16.msra.mxu0 %v11203_v6 }
 0xd98   :  { %11208 = vmatprep.subr.bf16.mxu0 %v11207_v19 }
 0xd9b   :  { %11210 = vmatpush3.bf16.msra.mxu0 %v11207_v19 }
 0xd9c   :  { %11212 = vmatprep.subr.bf16.mxu0 %v11211_v58 }
 0xd9f   :  { %11214 = vmatpush3.bf16.msra.mxu0 %v11211_v58  ;;  %v8445_v58 = vld [vmem:[%s14601_s27 + $0x88] sm:$0xff] }
 0xda0   :  { %11216 = vmatprep.subr.bf16.mxu0 %v11215_v29 }
 0xda3   :  { %11218 = vmatpush3.bf16.msra.mxu0 %v11215_v29  ;;  %v11259_v29 = vpack.c.bf16 %v8445_v58, %v8444_v30  ;;  %v5145_v30 = vld [vmem:[%s14601_s27 + $0x70] sm:$0xff]  ;;  %v5146_v58 = vld [vmem:[%s14601_s27 + $0x78] sm:$0xff] }
 0xda4   :  { %11220 = vmatprep.subr.bf16.mxu0 %v11219_v33 }
 0xda6   :  { %9843 = vmatmul.mubr.f32.vlgmr.msra.gmra.mrb[194].mxu0 %v9756_v32  ;;  %v8426_v32 = vld [vmem:[%s14600_s0 + $0x150] sm:$0xff] }
 0xda7   :  { %11222 = vmatpush3.bf16.msra.mxu0 %v11219_v33  ;;  %9845 = vmatprep.mubr.f32.mxu0 %v4627_v34  ;;  %v11239_v34 = vpack.c.bf16 %v8427_v7, %v8426_v32  ;;  %v11263_v33 = vpack.c.bf16 %v8447_v14, %v8446_v24  ;;  %v8462_v14 = vld [vmem:[%s14601_s27 + $0x110] sm:$0xff] }
 0xda8   :  { %11224 = vmatprep.subr.bf16.mxu0 %v11223_v60 }
 0xdaa   :  { %9846 = vmatmul.mubr.f32.gmra.mrb[196].mxu0 %v14041_v0  ;;  %v11243_v0 = vpack.c.bf16 %v8429_v39, %v8428_v17  ;;  %v5134_v17 = vld [vmem:[%s14601_s27 + $0x18] sm:$0xff] }
 0xdab   :  { %11226 = vmatpush3.bf16.msra.mxu0 %v11223_v60  ;;  %9880 = vmatprep.mubr.f32.mxu0 %v4657_v37  ;;  %v11267_v60 = vpack.c.bf16 %v8449_v20, %v8448_v36  ;;  %v8464_v20 = vld [vmem:[%s14601_s27 + $0x120] sm:$0xff] }
 0xdac   :  { %11228 = vmatprep.subr.bf16.mxu0 %v11227_v49 }
 0xdaf   :  { %11230 = vmatpush3.bf16.msra.mxu0 %v11227_v49  ;;  %v8452_v49 = vld [vmem:[%s14601_s27 + $0xc0] sm:$0xff] }
 0xdb0   :  { %11232 = vmatprep.subr.bf16.mxu0 %v11231_v25 }
 0xdb3   :  { %11234 = vmatpush3.bf16.msra.mxu0 %v11231_v25  ;;  %v8457_v25 = vld [vmem:[%s14601_s27 + $0xe8] sm:$0xff] }
 0xdb4   :  { %11236 = vmatprep.subr.bf16.mxu0 %v11235_v57 }
 0xdb7   :  { %11238 = vmatpush3.bf16.msra.mxu0 %v11235_v57 }
 0xdb8   :  { %11240 = vmatprep.subr.bf16.mxu0 %v11239_v34 }
 0xdbb   :  { %11242 = vmatpush3.bf16.msra.mxu0 %v11239_v34  ;;  %v5133_v34 = vld [vmem:[%s14601_s27 + $0x10] sm:$0xff] }
 0xdbc   :  { %11244 = vmatprep.subr.bf16.mxu0 %v11243_v0  ;;  %v11295_v40 = vpack.c.bf16 %v5134_v17, %v5133_v34 }
 0xdbf   :  { %11246 = vmatpush3.bf16.msra.mxu0 %v11243_v0 }
 0xdc0   :  { %11248 = vmatprep.subr.bf16.mxu0 %v11247_v27 }
 0xdc3   :  { %11250 = vmatpush3.bf16.msra.mxu0 %v11247_v27  ;;  %v5136_v27 = vld [vmem:[%s14601_s27 + $0x28] sm:$0xff] }
 0xdc6   :  { %9881 = vmatmul.mubr.f32.vlgmr.msra.gmra.mrb[194].mxu0 %v14049_v42 }
 0xdc7   :  { %9883 = vmatprep.mubr.f32.mxu0 %v14055_v35 }
 0xdca   :  { %9884 = vmatmul.mubr.f32.gmra.mrb[196].mxu0 %v14053_v63 }
 0xdcb   :  { %10034 = vmatprep.mubr.msk.f32.mxu0 %vm12337_vm6, %v12335_v13 }
 0xe99   :  { %v9882_v31 = vpop.f32.mrb[194].mxu0 }
 0xe9a   :  { %v4986_v2 = vmax.f32 %v9882_v31, 0.0  ;;  %v4962_v12 = vpop.f32.mrb[195].mxu0 }
 0xe9b   :  { %v4985_v9 = vmax.f32 %v4962_v12, 0.0 }
 0xe9c   :  { %v4995_v16 = vmul.f32 %v4993_v41, %v4986_v2  ;;  %v5137_v2 = vld [vmem:[%s14601_s27 + $0x30] sm:$0xff] }
 0xe9d   :  { %v4994_v37 = vmul.f32 %v4993_v41, %v4985_v9  ;;  %v9885_v46 = vpop.f32.mrb[196].mxu0 }
 0xe9e   :  { %v5003_v10 = vadd.f32 %v5001_v51, %v4995_v16  ;;  %v4988_v42 = vmax.f32 %v9885_v46, 0.0  ;;  %v4972_v6 = vpop.f32.mrb[197].mxu0  ;;  %v5140_v46 = vld [vmem:[%s14601_s27 + $0x48] sm:$0xff] }
 0xe9f   :  { %v5002_v63 = vadd.f32 %v5001_v51, %v4994_v37  ;;  %v4987_v35 = vmax.f32 %v4972_v6, 0.0  ;;  %v5139_v37 = vld [vmem:[%s14601_s27 + $0x40] sm:$0xff] }
 0xea0   :  { %v4997_v52 = vmul.f32 %v4993_v41, %v4988_v42  ;;  %v11307_v42 = vpack.c.bf16 %v5140_v46, %v5139_v37 }
 0xea1   :  { %v4996_v53 = vmul.f32 %v4993_v41, %v4987_v35  ;;  %v11251_v19 = vpack.c.bf16 %v5003_v10, %v5002_v63  ;;  %v11299_v41 = vpack.c.bf16 %v5136_v27, %v5135_v61  ;;  %v5141_v63 = vld [vmem:[%s14601_s27 + $0x50] sm:$0xff]  ;;  %v5142_v35 = vld [vmem:[%s14601_s27 + $0x58] sm:$0xff] }
 0xea2   :  { %v5005_v55 = vadd.f32 %v5001_v51, %v4997_v52  ;;  %v11311_v52 = vpack.c.bf16 %v5142_v35, %v5141_v63  ;;  %v5576_v35 = vld [vmem:[%s14602_s23 + $0x28] sm:$0xff] }
 0xea3   :  { %v5004_v50 = vadd.f32 %v5001_v51, %v4996_v53  ;;  %11252 = vmatprep.subr.bf16.mxu1 %v11251_v19  ;;  %v5138_v51 = vld [vmem:[%s14601_s27 + $0x38] sm:$0xff]  ;;  %v5143_v53 = vld [vmem:[%s14601_s27 + $0x60] sm:$0xff] }
 0xea4   :  { %11254 = vmatpush3.bf16.msra.mxu1 %v11251_v19  ;;  %v11303_v9 = vpack.c.bf16 %v5138_v51, %v5137_v2  ;;  %v5144_v19 = vld [vmem:[%s14601_s27 + $0x68] sm:$0xff] }
 0xea5   :  { %v11255_v18 = vpack.c.bf16 %v5005_v55, %v5004_v50  ;;  %v11315_v55 = vpack.c.bf16 %v5144_v19, %v5143_v53  ;;  %v11319_v50 = vpack.c.bf16 %v5146_v58, %v5145_v30  ;;  %v5461_v53 = vld [vmem:[%s14603_s19] sm:$0xff]  ;;  %v5577_v58 = vld [vmem:[%s14602_s23 + $0x30] sm:$0xff] }
 0xea6   :  { %v5575_v30 = vld [vmem:[%s14602_s23 + $0x20] sm:$0xff] }
 0xea7   :  { %11256 = vmatprep.subr.bf16.mxu1 %v11255_v18 }
 0xea8   :  { %11258 = vmatpush3.bf16.msra.mxu1 %v11255_v18  ;;  %v8460_v18 = vld [vmem:[%s14601_s27 + $0x100] sm:$0xff] }
 0xea9   :  { %11260 = vmatprep.subr.bf16.mxu1 %v11259_v29 }
 0xeab   :  { %9895 = vmatmul.mubr.msk.f32.vlgmr.msra.gmra.mrb[72].mxu1 %vm4059_vm5, %v13887_v4  ;;  %v11271_v4 = vpack.c.bf16 %v8451_v28, %v8450_v3  ;;  %v8466_v28 = vld [vmem:[%s14601_s27 + $0x130] sm:$0xff] }
 0xeac   :  { %9897 = vmatprep.mubr.msk.f32.mxu1 %vm4059_vm5, %v13890_v48  ;;  %11262 = vmatpush3.bf16.msra.mxu1 %v11259_v29  ;;  %v8453_v48 = vld [vmem:[%s14601_s27 + $0xc8] sm:$0xff] }
 0xead   :  { %11264 = vmatprep.subr.bf16.mxu1 %v11263_v33  ;;  %v11275_v62 = vpack.c.bf16 %v8453_v48, %v8452_v49  ;;  %v8461_v29 = vld [vmem:[%s14601_s27 + $0x108] sm:$0xff]  ;;  %v8468_v48 = vld [vmem:[%s14601_s27 + $0x140] sm:$0xff] }
 0xeae   :  { %v11323_v24 = vpack.c.bf16 %v8461_v29, %v8460_v18  ;;  %v5582_v18 = vld [vmem:[%s14602_s23 + $0x58] sm:$0xff]  ;;  %v5462_v29 = vld [vmem:[%s14603_s19 + $0x8] sm:$0xff] }
 0xeaf   :  { %9898 = vmatmul.mubr.msk.f32.gmra.mrb[74].mxu1 %vm4059_vm5, %v13899_v8  ;;  %v8454_v8 = vld [vmem:[%s14601_s27 + $0xd0] sm:$0xff] }
 0xeb0   :  { %9900 = vmatprep.mubr.msk.f32.mxu1 %vm4059_vm5, %v13902_v44  ;;  %11266 = vmatpush3.bf16.msra.mxu1 %v11263_v33  ;;  %v11279_v44 = vpack.c.bf16 %v8455_v43, %v8454_v8  ;;  %v8463_v33 = vld [vmem:[%s14601_s27 + $0x118] sm:$0xff]  ;;  %v8470_v43 = vld [vmem:[%s14601_s27 + $0x150] sm:$0xff] }
 0xeb1   :  { %11268 = vmatprep.subr.bf16.mxu1 %v11267_v60  ;;  %v11327_v36 = vpack.c.bf16 %v8463_v33, %v8462_v14  ;;  %v5579_v33 = vld [vmem:[%s14602_s23 + $0x40] sm:$0xff] }
 0xeb3   :  { %9901 = vmatmul.mubr.msk.f32.gmra.mrb[76].mxu1 %vm4059_vm5, %v13911_v47  ;;  %v8456_v47 = vld [vmem:[%s14601_s27 + $0xe0] sm:$0xff] }
 0xeb4   :  { %9903 = vmatprep.mubr.msk.f32.mxu1 %vm4059_vm5, %v13914_v21  ;;  %11270 = vmatpush3.bf16.msra.mxu1 %v11267_v60  ;;  %v11283_v21 = vpack.c.bf16 %v8457_v25, %v8456_v47  ;;  %v8465_v60 = vld [vmem:[%s14601_s27 + $0x128] sm:$0xff]  ;;  %v8472_v25 = vld [vmem:[%s14601_s27 + $0x160] sm:$0xff] }
 0xeb5   :  { %11272 = vmatprep.subr.bf16.mxu1 %v11271_v4  ;;  %v11331_v3 = vpack.c.bf16 %v8465_v60, %v8464_v20  ;;  %v5584_v20 = vld [vmem:[%s14602_s23 + $0x68] sm:$0xff]  ;;  %v5586_v60 = vld [vmem:[%s14602_s23 + $0x78] sm:$0xff] }
 0xeb7   :  { %9904 = vmatmul.mubr.msk.f32.gmra.mrb[78].mxu1 %vm4059_vm5, %v13923_v26  ;;  %v8458_v26 = vld [vmem:[%s14601_s27 + $0xf0] sm:$0xff] }
 0xeb8   :  { %9906 = vmatprep.mubr.msk.f32.mxu1 %vm4059_vm5, %v13926_v23  ;;  %11274 = vmatpush3.bf16.msra.mxu1 %v11271_v4  ;;  %v8459_v23 = vld [vmem:[%s14601_s27 + $0xf8] sm:$0xff] }
 0xeb9   :  { %11276 = vmatprep.subr.bf16.mxu1 %v11275_v62  ;;  %v11287_v5 = vpack.c.bf16 %v8459_v23, %v8458_v26  ;;  %v8467_v4 = vld [vmem:[%s14601_s27 + $0x138] sm:$0xff]  ;;  %v8474_v23 = vld [vmem:[%s14601_s27 + $0x170] sm:$0xff] }
 0xeba   :  { %v11335_v49 = vpack.c.bf16 %v8467_v4, %v8466_v28  ;;  %v11373_v4 = vpack.c.bf16 %v5586_v60, %v5584_v20  ;;  %v8499_v60 = vld [vmem:[%s14604_s26 + $0xe0] sm:$0xff] }
 0xebb   :  { %9907 = vmatmul.mubr.msk.f32.gmra.mrb[80].mxu1 %vm4059_vm5, %v13935_v56  ;;  %v5131_v56 = vld [vmem:[%s14601_s27] sm:$0xff] }
 0xebc   :  { %9909 = vmatprep.mubr.msk.f32.mxu1 %vm4059_vm5, %v13938_v11  ;;  %11278 = vmatpush3.bf16.msra.mxu1 %v11275_v62  ;;  %v5132_v11 = vld [vmem:[%s14601_s27 + $0x8] sm:$0xff] }
 0xebd   :  { %11280 = vmatprep.subr.bf16.mxu1 %v11279_v44  ;;  %v11291_v54 = vpack.c.bf16 %v5132_v11, %v5131_v56  ;;  %v8469_v62 = vld [vmem:[%s14601_s27 + $0x148] sm:$0xff]  ;;  %v12336_v11 = vmov 0.0|0.0  }
 0xebe   :  { %v11339_v8 = vpack.c.bf16 %v8469_v62, %v8468_v48  ;;  %11355 = vmatprep.subr.bf16.mxu0 %v12336_v11  ;;  %v5585_v48 = vld [vmem:[%s14602_s23 + $0x70] sm:$0xff]  ;;  %v5588_v62 = vld [vmem:[%s14602_s23 + $0x88] sm:$0xff] }
 0xebf   :  { %9910 = vmatmul.mubr.msk.f32.gmra.mrb[82].mxu1 %vm4059_vm5, %v13947_v59 }
 0xec0   :  { %11282 = vmatpush3.bf16.msra.mxu1 %v11279_v44  ;;  %v8471_v44 = vld [vmem:[%s14601_s27 + $0x158] sm:$0xff] }
 0xec1   :  { %11284 = vmatprep.subr.bf16.mxu1 %v11283_v21  ;;  %v11343_v47 = vpack.c.bf16 %v8471_v44, %v8470_v43  ;;  %v5464_v43 = vld [vmem:[%s14603_s19 + $0x18] sm:$0xff] }
 0xec4   :  { %11286 = vmatpush3.bf16.msra.mxu1 %v11283_v21  ;;  %v8473_v21 = vld [vmem:[%s14601_s27 + $0x168] sm:$0xff] }
 0xec5   :  { %11288 = vmatprep.subr.bf16.mxu1 %v11287_v5  ;;  %v11347_v26 = vpack.c.bf16 %v8473_v21, %v8472_v25  ;;  %v5587_v25 = vld [vmem:[%s14602_s23 + $0x80] sm:$0xff]  ;;  %v5589_v21 = vld [vmem:[%s14602_s23 + $0x90] sm:$0xff] }
 0xec8   :  { %11290 = vmatpush3.bf16.msra.mxu1 %v11287_v5  ;;  %v8475_v5 = vld [vmem:[%s14601_s27 + $0x178] sm:$0xff] }
 0xec9   :  { %11292 = vmatprep.subr.bf16.mxu1 %v11291_v54  ;;  %v11351_v56 = vpack.c.bf16 %v8475_v5, %v8474_v23  ;;  %v5594_v23 = vld [vmem:[%s14602_s23 + $0xb8] sm:$0xff]  ;;  %v5465_v5 = vld [vmem:[%s14603_s19 + $0x20] sm:$0xf] }
 0xf7e   :  { %v9896_v57 = vpop.f32.mrb[72].mxu1 }
 0xf7f   :  { %v5072_v32 = vpop.f32.mrb[73].mxu1 }
 0xf82   :  { %v14125_v7 = vpop.f32.mrb[74].mxu1 }
 0xf83   :  { %v5082_v59 = vpop.f32.mrb[75].mxu1 }
 0xf86   :  { %v9902_v39 = vpop.f32.mrb[76].mxu1 }
 0xf87   :  { %v5092_v0 = vpop.f32.mrb[77].mxu1 }
 0xf88   :  { %9944 = vmatprep.mubr.f32.mxu1 %v5092_v0 }
 0xf89   :  { %9945 = vmatmul.mubr.f32.vlgmr.msra.gmra.mrb[84].mxu1 %v9902_v39 }
 0xf8a   :  { %11294 = vmatpush3.bf16.msra.mxu1 %v11291_v54  ;;  %v9905_v38 = vpop.f32.mrb[78].mxu1  ;;  %v5444_v54 = vld [vmem:[#allocation14] sm:$0x3] }
 0xf8b   :  { %11296 = vmatprep.subr.bf16.mxu1 %v11295_v40  ;;  %v5102_v31 = vpop.f32.mrb[79].mxu1 }
 0xf8c   :  { %9947 = vmatprep.mubr.f32.mxu1 %v5102_v31 }
 0xf8d   :  { %9948 = vmatmul.mubr.f32.gmra.mrb[86].mxu1 %v9905_v38 }
 0xf8e   :  { %11298 = vmatpush3.bf16.msra.mxu1 %v11295_v40  ;;  %9982 = vmatprep.mubr.f32.mxu1 %v5072_v32  ;;  %v14133_v12 = vpop.f32.mrb[80].mxu1 }
 0xf8f   :  { %11300 = vmatprep.subr.bf16.mxu1 %v11299_v41  ;;  %v5112_v16 = vpop.f32.mrb[81].mxu1 }
 0xf92   :  { %11302 = vmatpush3.bf16.msra.mxu1 %v11299_v41  ;;  %v14137_v10 = vpop.f32.mrb[82].mxu1 }
 0xf93   :  { %11304 = vmatprep.subr.bf16.mxu1 %v11303_v9  ;;  %v14139_v6 = vpop.f32.mrb[83].mxu1 }
 0xf96   :  { %11306 = vmatpush3.bf16.msra.mxu1 %v11303_v9  ;;  %v5572_v9 = vld [vmem:[%s14602_s23 + $0x8] sm:$0xff] }
 0xf97   :  { %11308 = vmatprep.subr.bf16.mxu1 %v11307_v42 }
 0xf9a   :  { %11310 = vmatpush3.bf16.msra.mxu1 %v11307_v42  ;;  %v5571_v42 = vld [vmem:[%s14602_s23] sm:$0xff] }
 0xf9b   :  { %11312 = vmatprep.subr.bf16.mxu1 %v11311_v52 }
 0xf9e   :  { %11314 = vmatpush3.bf16.msra.mxu1 %v11311_v52  ;;  %v5578_v52 = vld [vmem:[%s14602_s23 + $0x38] sm:$0xff] }
 0xf9f   :  { %11316 = vmatprep.subr.bf16.mxu1 %v11315_v55 }
 0xfa2   :  { %11318 = vmatpush3.bf16.msra.mxu1 %v11315_v55  ;;  %v11365_v55 = vpack.c.bf16 %v5578_v52, %v5576_v35  ;;  %v8489_v35 = vld [vmem:[%s14604_s26 + $0x90] sm:$0xff]  ;;  %v8490_v52 = vld [vmem:[%s14604_s26 + $0x98] sm:$0xff] }
 0xfa3   :  { %11320 = vmatprep.subr.bf16.mxu1 %v11319_v50 }
 0xfa6   :  { %11322 = vmatpush3.bf16.msra.mxu1 %v11319_v50  ;;  %v5580_v50 = vld [vmem:[%s14602_s23 + $0x48] sm:$0xff] }
 0xfa7   :  { %11324 = vmatprep.subr.bf16.mxu1 %v11323_v24  ;;  %v11369_v14 = vpack.c.bf16 %v5582_v18, %v5580_v50  ;;  %v8494_v50 = vld [vmem:[%s14604_s26 + $0xb8] sm:$0xff] }
 0xfa9   :  { %9983 = vmatmul.mubr.f32.vlgmr.msra.gmra.mrb[84].mxu1 %v9896_v57  ;;  %v5448_v57 = vrot.slane %v5444_v54, %v12940_v22 }
 0xfaa   :  { %11326 = vmatpush3.bf16.msra.mxu1 %v11323_v24  ;;  %9985 = vmatprep.mubr.f32.mxu1 %v5082_v59  ;;  %v5456_v59 = vrot.slane %v5444_v54, %v12945_v1  ;;  %v11367_v24 = vpack.c.bf16 %v5577_v58, %v5575_v30  ;;  %v8493_v58 = vld [vmem:[%s14604_s26 + $0xb0] sm:$0xff] }
 0xfab   :  { %11328 = vmatprep.subr.bf16.mxu1 %v11327_v36  ;;  %v11408_v18 = vpack.c.bf16 %v8494_v50, %v8493_v58  ;;  %v8546_v58 = vld [vmem:[%s14606_s24 + $0xc8] sm:$0xff] }
 0xfad   :  { %9986 = vmatmul.mubr.f32.gmra.mrb[86].mxu1 %v14125_v7 }
 0xfae   :  { %11330 = vmatpush3.bf16.msra.mxu1 %v11327_v36  ;;  %10020 = vmatprep.mubr.f32.mxu1 %v5112_v16  ;;  %v5574_v16 = vld [vmem:[%s14602_s23 + $0x18] sm:$0xff]  ;;  %v5581_v36 = vld [vmem:[%s14602_s23 + $0x50] sm:$0xff] }
 0xfaf   :  { %11332 = vmatprep.subr.bf16.mxu1 %v11331_v3  ;;  %v11371_v28 = vpack.c.bf16 %v5581_v36, %v5579_v33  ;;  %v8497_v33 = vld [vmem:[%s14604_s26 + $0xd0] sm:$0xff]  ;;  %v8498_v36 = vld [vmem:[%s14604_s26 + $0xd8] sm:$0xff] }
 0xfb0   :  { %v11414_v20 = vpack.c.bf16 %v8498_v36, %v8497_v33  ;;  %v8550_v33 = vld [vmem:[%s14606_s24 + $0xe8] sm:$0xff] }
 0xfb2   :  { %11334 = vmatpush3.bf16.msra.mxu1 %v11331_v3  ;;  %v5463_v3 = vld [vmem:[%s14603_s19 + $0x10] sm:$0xff] }
 0xfb3   :  { %11336 = vmatprep.subr.bf16.mxu1 %v11335_v49 }
 0xfb6   :  { %11338 = vmatpush3.bf16.msra.mxu1 %v11335_v49  ;;  %v5583_v49 = vld [vmem:[%s14602_s23 + $0x60] sm:$0xff] }
 0xfb7   :  { %11340 = vmatprep.subr.bf16.mxu1 %v11339_v8  ;;  %v11375_v44 = vpack.c.bf16 %v5585_v48, %v5583_v49  ;;  %v8502_v49 = vld [vmem:[%s14604_s26 + $0xf8] sm:$0xff] }
 0xfba   :  { %11342 = vmatpush3.bf16.msra.mxu1 %v11339_v8  ;;  %v5590_v8 = vld [vmem:[%s14602_s23 + $0x98] sm:$0xff] }
 0xfbb   :  { %11344 = vmatprep.subr.bf16.mxu1 %v11343_v47 }
 0xfbe   :  { %11346 = vmatpush3.bf16.msra.mxu1 %v11343_v47  ;;  %v11377_v47 = vpack.c.bf16 %v5590_v8, %v5588_v62  ;;  %v8503_v62 = vld [vmem:[%s14604_s26 + $0x100] sm:$0xff]  ;;  %v8504_v8 = vld [vmem:[%s14604_s26 + $0x108] sm:$0xff] }
 0xfbf   :  { %11348 = vmatprep.subr.bf16.mxu1 %v11347_v26 }
 0xfc2   :  { %11350 = vmatpush3.bf16.msra.mxu1 %v11347_v26  ;;  %v5592_v26 = vld [vmem:[%s14602_s23 + $0xa8] sm:$0xff] }
 0xfc3   :  { %11352 = vmatprep.subr.bf16.mxu1 %v11351_v56  ;;  %v11381_v54 = vpack.c.bf16 %v5594_v23, %v5592_v26 }
 0xfc6   :  { %11354 = vmatpush3.bf16.msra.mxu1 %v11351_v56  ;;  %v11379_v56 = vpack.c.bf16 %v5589_v21, %v5587_v25 }
 0xfc9   :  { %10021 = vmatmul.mubr.f32.vlgmr.msra.gmra.mrb[84].mxu1 %v14133_v12 }
 0xfca   :  { %10023 = vmatprep.mubr.f32.mxu1 %v14139_v6  ;;  %v5573_v6 = vld [vmem:[%s14602_s23 + $0x10] sm:$0xff] }
 0xfcb   :  { %v11363_v19 = vpack.c.bf16 %v5573_v6, %v5571_v42 }
 0xfcd   :  { %10024 = vmatmul.mubr.f32.gmra.mrb[86].mxu1 %v14137_v10  ;;  %v11361_v10 = vpack.c.bf16 %v5574_v16, %v5572_v9 }
 0xfce   :  { %5793 = vmatprep.mubr.f32.mxu1 %v12335_v13 }
0x109c   :  { %v10022_v32 = vpop.f32.mrb[84].mxu1 }
0x109d   :  { %v5441_v7 = vmax.f32 %v10022_v32, 0.0  ;;  %v5417_v34 = vpop.f32.mrb[85].mxu1  ;;  %v5593_v32 = vld [vmem:[%s14602_s23 + $0xb0] sm:$0xff] }
0x109e   :  { %v5440_v17 = vmax.f32 %v5417_v34, 0.0 }
0x109f   :  { %v5450_v39 = vmul.f32 %v5448_v57, %v5441_v7  ;;  %v5596_v7 = vld [vmem:[%s14602_s23 + $0xc8] sm:$0xff] }
0x10a0   :  { %v5449_v0 = vmul.f32 %v5448_v57, %v5440_v17  ;;  %v10025_v40 = vpop.f32.mrb[86].mxu1 }
0x10a1   :  { %v5458_v61 = vadd.f32 %v5456_v59, %v5450_v39  ;;  %v5443_v27 = vmax.f32 %v10025_v40, 0.0  ;;  %v5427_v38 = vpop.f32.mrb[87].mxu1  ;;  %v5595_v39 = vld [vmem:[%s14602_s23 + $0xc0] sm:$0xff]  ;;  %v5600_v40 = vld [vmem:[%s14602_s23 + $0xe8] sm:$0xff] }
0x10a2   :  { %v5457_v41 = vadd.f32 %v5456_v59, %v5449_v0  ;;  %v5442_v31 = vmax.f32 %v5427_v38, 0.0  ;;  %v5597_v0 = vld [vmem:[%s14602_s23 + $0xd0] sm:$0xff] }
0x10a3   :  { %v5452_v2 = vmul.f32 %v5448_v57, %v5443_v27  ;;  %v11387_v27 = vpack.c.bf16 %v5597_v0, %v5595_v39  ;;  %v8537_v39 = vld [vmem:[%s14606_s24 + $0x80] sm:$0xff]  ;;  %v8538_v0 = vld [vmem:[%s14606_s24 + $0x88] sm:$0xff] }
0x10a4   :  { %v11356_v51 = vpack.c.bf16 %v5458_v61, %v5457_v41  ;;  %v5451_v12 = vmul.f32 %v5448_v57, %v5442_v31  ;;  %v5591_v57 = vld [vmem:[%s14602_s23 + $0xa0] sm:$0xff]  ;;  %v5602_v61 = vld [vmem:[%s14602_s23 + $0xf8] sm:$0xff]  ;;  %v5601_v31 = vld [vmem:[%s14602_s23 + $0xf0] sm:$0xff] }
0x10a5   :  { %v5460_v37 = vadd.f32 %v5456_v59, %v5452_v2  ;;  %v11383_v34 = vpack.c.bf16 %v5593_v32, %v5591_v57  ;;  %v11389_v38 = vpack.c.bf16 %v5602_v61, %v5600_v40  ;;  %v5599_v41 = vld [vmem:[%s14602_s23 + $0xe0] sm:$0xff]  ;;  %v5699_v40 = vld [vmem:[%s14605_s28 + $0x8] sm:$0xff]  ;;  %v11490_v61 = vpack.c.bf16 %v8538_v0, %v8537_v39  ;;  %v5836_v39 = vld [vmem:[%s14604_s26 + $0x30] sm:$0xff] }
0x10a6   :  { %v5459_v46 = vadd.f32 %v5456_v59, %v5451_v12  ;;  %11357 = vmatpush3.bf16.msra.mxu0 %v11356_v51  ;;  %v5598_v59 = vld [vmem:[%s14602_s23 + $0xd8] sm:$0xff]  ;;  %v11391_v2 = vpack.c.bf16 %v5601_v31, %v5599_v41  ;;  %v6146_v41 = vld [vmem:[%s14607_s6] sm:$0xff]  ;;  %v8539_v31 = vld [vmem:[%s14606_s24 + $0x90] sm:$0xff] }
0x10a7   :  { %11358 = vmatprep.subr.bf16.mxu0 %v12336_v11  ;;  %v11385_v17 = vpack.c.bf16 %v5598_v59, %v5596_v7  ;;  %v5837_v0 = vld [vmem:[%s14604_s26 + $0x38] sm:$0xff] }
0x10a8   :  { %v11359_v63 = vpack.c.bf16 %v5460_v37, %v5459_v46 }
0x10aa   :  { %11360 = vmatpush3.bf16.msra.mxu0 %v11359_v63 }
0x10ab   :  { %11362 = vmatprep.subr.bf16.mxu0 %v11361_v10 }
0x10ad   :  { %10035 = vmatmul.mubr.msk.f32.vlgmr.msra.gmra.mrb[198].mxu0 %vm4059_vm5, %v5461_v53  ;;  %v8491_v53 = vld [vmem:[%s14604_s26 + $0xa0] sm:$0xff] }
0x10ae   :  { %10037 = vmatprep.mubr.msk.f32.mxu0 %vm12337_vm6, %v12335_v13  ;;  %11364 = vmatpush1.bf16.msra.mxu0 %v11363_v19  ;;  %v11402_v19 = vpack.c.bf16 %v8490_v52, %v8489_v35  ;;  %v8506_v35 = vld [vmem:[%s14604_s26 + $0x118] sm:$0xff] }
0x10af   :  { %11366 = vmatprep.subr.bf16.mxu0 %v11365_v55  ;;  %v8492_v55 = vld [vmem:[%s14604_s26 + $0xa8] sm:$0xff] }
0x10b0   :  { %v11405_v30 = vpack.c.bf16 %v8492_v55, %v8491_v53  ;;  %v8543_v53 = vld [vmem:[%s14606_s24 + $0xb0] sm:$0xff] }
0x10b1   :  { %10038 = vmatmul.mubr.msk.f32.gmra.mrb[200].mxu0 %vm4059_vm5, %v5462_v29  ;;  %v8495_v29 = vld [vmem:[%s14604_s26 + $0xc0] sm:$0xff] }
0x10b2   :  { %10040 = vmatprep.mubr.msk.f32.mxu0 %vm12337_vm6, %v12335_v13  ;;  %11368 = vmatpush1.bf16.msra.mxu0 %v11367_v24  ;;  %v8496_v24 = vld [vmem:[%s14604_s26 + $0xc8] sm:$0xff] }
0x10b3   :  { %11370 = vmatprep.subr.bf16.mxu0 %v11369_v14  ;;  %v11411_v14 = vpack.c.bf16 %v8496_v24, %v8495_v29  ;;  %v8548_v29 = vld [vmem:[%s14606_s24 + $0xd8] sm:$0xff] }
0x10b5   :  { %10041 = vmatmul.mubr.msk.f32.gmra.mrb[202].mxu0 %vm4059_vm5, %v5463_v3  ;;  %v8500_v3 = vld [vmem:[%s14604_s26 + $0xe8] sm:$0xff] }
0x10b6   :  { %10043 = vmatprep.mubr.msk.f32.mxu0 %vm12337_vm6, %v12335_v13  ;;  %11372 = vmatpush1.bf16.msra.mxu0 %v11371_v28  ;;  %v11417_v28 = vpack.c.bf16 %v8500_v3, %v8499_v60  ;;  %v8552_v60 = vld [vmem:[%s14606_s24 + $0xf8] sm:$0xff] }
0x10b7   :  { %11374 = vmatprep.subr.bf16.mxu0 %v11373_v4  ;;  %v8501_v4 = vld [vmem:[%s14604_s26 + $0xf0] sm:$0xff] }
0x10b8   :  { %v11420_v48 = vpack.c.bf16 %v8502_v49, %v8501_v4  ;;  %v6266_v4 = vld [vmem:[%s14606_s24 + $0x8] sm:$0xff] }
0x10b9   :  { %10044 = vmatmul.mubr.msk.f32.gmra.mrb[204].mxu0 %vm4059_vm5, %v5464_v43  ;;  %v11423_v43 = vpack.c.bf16 %v8504_v8, %v8503_v62 }
0x10ba   :  { %10046 = vmatprep.mubr.msk.f32.mxu0 %vm12337_vm6, %v12335_v13  ;;  %11376 = vmatpush1.bf16.msra.mxu0 %v11375_v44 }
0x10bb   :  { %11378 = vmatprep.subr.bf16.mxu0 %v11377_v47 }
0x10bd   :  { %10047 = vmatmul.mubr.msk.f32.gmra.mrb[206].mxu0 %vm4059_vm5, %v5465_v5 }
0x10be   :  { %11380 = vmatpush1.bf16.msra.mxu0 %v11379_v56  ;;  %5667 = vmatprep.mubr.f32.mxu0 %v12335_v13 }
0x10bf   :  { %11382 = vmatprep.subr.bf16.mxu0 %v11381_v54 }
0x10c2   :  { %11384 = vmatpush1.bf16.msra.mxu0 %v11383_v34 }
0x10c3   :  { %11386 = vmatprep.subr.bf16.mxu0 %v11385_v17  ;;  %v5698_v17 = vld [vmem:[%s14605_s28] sm:$0xff] }
0x10c6   :  { %11388 = vmatpush1.bf16.msra.mxu0 %v11387_v27  ;;  %v5700_v27 = vld [vmem:[%s14605_s28 + $0x10] sm:$0xff] }
0x10c7   :  { %11390 = vmatprep.subr.bf16.mxu0 %v11389_v38  ;;  %v5702_v38 = vld [vmem:[%s14605_s28 + $0x20] sm:$0xff] }
0x10ca   :  { %11392 = vmatpush1.bf16.msra.mxu0 %v11391_v2  ;;  %v8540_v2 = vld [vmem:[%s14606_s24 + $0x98] sm:$0xff] }
0x10cb   :  { %11401 = vmatprep.subr.bf16.mxu0 %v12336_v11 }
0x1180   :  { %v5547_v51 = vpop.f32.mrb[198].mxu0 }
0x1181   :  { %5668 = vmatmul.mubr.f32.vlgmr.msra.gmra.mrb[208].mxu0 %v5547_v51  ;;  %v10036_v12 = vpop.f32.mrb[199].mxu0  ;;  %v6147_v51 = vld [vmem:[%s14607_s6 + $0x8] sm:$0xff] }
0x1182   :  { %5673 = vmatprep.mubr.f32.mxu0 %v12335_v13  ;;  %11403 = vmatpush1.bf16.msra.mxu0 %v11402_v19  ;;  %v6148_v12 = vld [vmem:[%s14607_s6 + $0x10] sm:$0xff]  ;;  %v8544_v19 = vld [vmem:[%s14606_s24 + $0xb8] sm:$0xff] }
0x1183   :  { %11404 = vmatprep.subr.bf16.mxu0 %v12336_v11  ;;  %v11502_v55 = vpack.c.bf16 %v8544_v19, %v8543_v53 }
0x1184   :  { %v5552_v9 = vpop.f32.mrb[200].mxu0 }
0x1185   :  { %5674 = vmatmul.mubr.f32.gmra.mrb[210].mxu0 %v5552_v9  ;;  %v10039_v16 = vpop.f32.mrb[201].mxu0  ;;  %v11494_v9 = vpack.c.bf16 %v8540_v2, %v8539_v31  ;;  %v5840_v2 = vld [vmem:[%s14604_s26 + $0x50] sm:$0xff] }
0x1186   :  { %5679 = vmatprep.mubr.f32.mxu0 %v12335_v13  ;;  %11406 = vmatpush1.bf16.msra.mxu0 %v11405_v30  ;;  %v6149_v16 = vld [vmem:[%s14607_s6 + $0x18] sm:$0xff]  ;;  %v8545_v30 = vld [vmem:[%s14606_s24 + $0xc0] sm:$0xff] }
0x1187   :  { %11407 = vmatprep.subr.bf16.mxu0 %v12336_v11  ;;  %v11506_v50 = vpack.c.bf16 %v8546_v58, %v8545_v30  ;;  %v5845_v30 = vld [vmem:[%s14604_s26 + $0x78] sm:$0xff] }
0x1188   :  { %v5557_v37 = vpop.f32.mrb[202].mxu0 }
0x1189   :  { %5680 = vmatmul.mubr.f32.gmra.mrb[212].mxu0 %v5557_v37  ;;  %v10042_v46 = vpop.f32.mrb[203].mxu0  ;;  %v6150_v37 = vld [vmem:[%s14607_s6 + $0x20] sm:$0xff] }
0x118a   :  { %5685 = vmatprep.mubr.f32.mxu0 %v12335_v13  ;;  %11409 = vmatpush1.bf16.msra.mxu0 %v11408_v18  ;;  %v6151_v46 = vld [vmem:[%s14607_s6 + $0x28] sm:$0xff]  ;;  %v8547_v18 = vld [vmem:[%s14606_s24 + $0xd0] sm:$0xff] }
0x118b   :  { %11410 = vmatprep.subr.bf16.mxu0 %v12336_v11  ;;  %v11510_v24 = vpack.c.bf16 %v8548_v29, %v8547_v18  ;;  %v6272_v18 = vld [vmem:[%s14606_s24 + $0x38] sm:$0xff] }
0x118c   :  { %v5562_v10 = vpop.f32.mrb[204].mxu0 }
0x118d   :  { %5686 = vmatmul.mubr.f32.gmra.mrb[214].mxu0 %v5562_v10  ;;  %v10045_v42 = vpop.f32.mrb[205].mxu0  ;;  %v8541_v10 = vld [vmem:[%s14606_s24 + $0xa0] sm:$0xff] }
0x118e   :  { %5691 = vmatprep.mubr.f32.mxu0 %v12335_v13  ;;  %11412 = vmatpush1.bf16.msra.mxu0 %v11411_v14  ;;  %v8542_v42 = vld [vmem:[%s14606_s24 + $0xa8] sm:$0xff]  ;;  %v8549_v14 = vld [vmem:[%s14606_s24 + $0xe0] sm:$0xff] }
0x118f   :  { %11413 = vmatprep.subr.bf16.mxu0 %v12336_v11  ;;  %v11514_v36 = vpack.c.bf16 %v8550_v33, %v8549_v14  ;;  %v5846_v14 = vld [vmem:[%s14604_s26 + $0x80] sm:$0xff]  ;;  %v5847_v33 = vld [vmem:[%s14604_s26 + $0x88] sm:$0xff] }
0x1190   :  { %v5567_v6 = vpop.f32.mrb[206].mxu0 }
0x1191   :  { %5692 = vmatmul.mubr.f32.gmra.mrb[216].mxu0 %v5567_v6  ;;  %v10048_v63 = vpop.f32.mrb[207].mxu0  ;;  %v11498_v6 = vpack.c.bf16 %v8542_v42, %v8541_v10  ;;  %v5842_v42 = vld [vmem:[%s14604_s26 + $0x60] sm:$0xff] }
0x1192   :  { %11415 = vmatpush1.bf16.msra.mxu0 %v11414_v20  ;;  %v8505_v63 = vld [vmem:[%s14604_s26 + $0x110] sm:$0xff] }
0x1193   :  { %11416 = vmatprep.subr.bf16.mxu0 %v12336_v11  ;;  %v11426_v52 = vpack.c.bf16 %v8506_v35, %v8505_v63  ;;  %v8551_v20 = vld [vmem:[%s14606_s24 + $0xf0] sm:$0xff]  ;;  %v6269_v63 = vld [vmem:[%s14606_s24 + $0x20] sm:$0xff]  ;;  %v6270_v35 = vld [vmem:[%s14606_s24 + $0x28] sm:$0xff] }
0x1194   :  { %v11518_v3 = vpack.c.bf16 %v8552_v60, %v8551_v20  ;;  %v11530_v19 = vpack.c.bf16 %v6270_v35, %v6269_v63  ;;  %v6274_v20 = vld [vmem:[%s14606_s24 + $0x48] sm:$0xff]  ;;  %v11453_v60 = vpack.c.bf16 %v5847_v33, %v5846_v14  ;;  %v8559_v63 = vld [vmem:[%s14606_s24 + $0x130] sm:$0xff]  ;;  %v8560_v35 = vld [vmem:[%s14606_s24 + $0x138] sm:$0xff] }
0x1195   :  { %v8563_v14 = vld [vmem:[%s14606_s24 + $0x150] sm:$0xff]  ;;  %v8564_v33 = vld [vmem:[%s14606_s24 + $0x158] sm:$0xff] }
0x1196   :  { %11418 = vmatpush1.bf16.msra.mxu0 %v11417_v28  ;;  %v6265_v28 = vld [vmem:[%s14606_s24] sm:$0xff] }
0x1197   :  { %11419 = vmatprep.subr.bf16.mxu0 %v12336_v11  ;;  %v11522_v49 = vpack.c.bf16 %v6266_v4, %v6265_v28  ;;  %v8511_v28 = vld [vmem:[%s14604_s26 + $0x120] sm:$0xff]  ;;  %v8512_v4 = vld [vmem:[%s14604_s26 + $0x128] sm:$0xff] }
0x119a   :  { %11421 = vmatpush1.bf16.msra.mxu0 %v11420_v48 }
0x119b   :  { %11422 = vmatprep.subr.bf16.mxu0 %v12336_v11 }
0x119e   :  { %11424 = vmatpush1.bf16.msra.mxu0 %v11423_v43 }
0x119f   :  { %11425 = vmatprep.subr.bf16.mxu0 %v12336_v11 }
0x11a2   :  { %11427 = vmatpush1.bf16.msra.mxu0 %v11426_v52 }
0x11a3   :  { %11428 = vmatprep.subr.bf16.mxu0 %v12336_v11 }
0x1254   :  { %v5669_v44 = vpop.f32.mrb[208].mxu0 }
0x1255   :  { %v5671_v47 = vpop.f32.mrb[209].mxu0 }
0x1258   :  { %v5675_v25 = vpop.f32.mrb[210].mxu0 }
0x1259   :  { %v11395_v21 = vpack.c.bf16 %v5675_v25, %v5669_v44  ;;  %v5677_v26 = vpop.f32.mrb[211].mxu0  ;;  %v5830_v44 = vld [vmem:[%s14604_s26] sm:$0xff] }
0x125a   :  { %v11393_v23 = vpack.c.bf16 %v5677_v26, %v5671_v47  ;;  %v5831_v47 = vld [vmem:[%s14604_s26 + $0x8] sm:$0xff] }
0x125c   :  { %v5681_v5 = vpop.f32.mrb[212].mxu0  ;;  %11394 = vmatprep.subr.bf16.mxu1 %v11393_v23  ;;  %v5832_v23 = vld [vmem:[%s14604_s26 + $0x10] sm:$0xff] }
0x125d   :  { %v5683_v56 = vpop.f32.mrb[213].mxu0  ;;  %11396 = vmatpush1.bf16.msra.mxu1 %v11395_v21  ;;  %v11429_v21 = vpack.c.bf16 %v5831_v47, %v5830_v44  ;;  %v11456_v44 = vpack.c.bf16 %v8512_v4, %v8511_v28  ;;  %v8567_v4 = vld [vmem:[%s14606_s24 + $0x170] sm:$0xff] }
0x1260   :  { %v5687_v54 = vpop.f32.mrb[214].mxu0 }
0x1261   :  { %v11399_v57 = vpack.c.bf16 %v5687_v54, %v5681_v5  ;;  %v5689_v32 = vpop.f32.mrb[215].mxu0  ;;  %v5833_v5 = vld [vmem:[%s14604_s26 + $0x18] sm:$0xff] }
0x1262   :  { %v11397_v7 = vpack.c.bf16 %v5689_v32, %v5683_v56  ;;  %v11432_v56 = vpack.c.bf16 %v5833_v5, %v5832_v23  ;;  %v5835_v32 = vld [vmem:[%s14604_s26 + $0x28] sm:$0xff] }
0x1263   :  { %v6278_v23 = vld [vmem:[%s14606_s24 + $0x68] sm:$0xff] }
0x1264   :  { %11398 = vmatprep.subr.bf16.mxu1 %v11397_v7  ;;  %v5693_v59 = vpop.f32.mrb[216].mxu0 }
0x1265   :  { %11400 = vmatpush1.bf16.msra.mxu1 %v11399_v57  ;;  %v5695_v34 = vpop.f32.mrb[217].mxu0  ;;  %v5834_v57 = vld [vmem:[%s14604_s26 + $0x20] sm:$0xff] }
0x1266   :  { %8481 = vmatprep.subr.msk.mxu1 %vm2568_vm3, %v5695_v34 }
0x1269   :  { %8482 = vmatpush1.msk.msra.mxu1 %vm2568_vm3, %v5693_v59  ;;  %v11435_v59 = vpack.c.bf16 %v5835_v32, %v5834_v57  ;;  %v8516_v57 = vld [vmem:[%s14604_s26 + $0x148] sm:$0xff]  ;;  %v6279_v32 = vld [vmem:[%s14606_s24 + $0x70] sm:$0xff] }
0x126a   :  { %8483 = vmatmul.mubr.msk.f32.vlgmr.msra.gmra.mrb[88].mxu1 %vm5704_vm7, %v5698_v17  ;;  %11483 = vmatprep.subr.bf16.mxu1 %v13874_v15 }
0x126b   :  { %11485 = vmatpush3.bf16.msra.mxu1 %v13874_v15  ;;  %5799 = vmatprep.mubr.f32.mxu1 %v12335_v13  ;;  %v5701_v15 = vld [vmem:[%s14605_s28 + $0x18] sm:$0xff] }
0x126c   :  { %11487 = vmatprep.subr.bf16.mxu1 %v13880_v45 }
0x126e   :  { %8484 = vmatmul.mubr.msk.f32.gmra.mrb[90].mxu1 %vm5704_vm7, %v5699_v40  ;;  %v11438_v40 = vpack.c.bf16 %v5837_v0, %v5836_v39  ;;  %v8517_v39 = vld [vmem:[%s14604_s26 + $0x150] sm:$0xff]  ;;  %v8518_v0 = vld [vmem:[%s14604_s26 + $0x158] sm:$0xff] }
0x126f   :  { %11489 = vmatpush3.bf16.msra.mxu1 %v13880_v45  ;;  %5805 = vmatprep.mubr.f32.mxu1 %v12335_v13  ;;  %v5703_v45 = vld [vmem:[%s14605_s28 + $0x28] sm:$0xff] }
0x1270   :  { %11491 = vmatprep.subr.bf16.mxu1 %v11490_v61 }
0x1272   :  { %8485 = vmatmul.mubr.msk.f32.gmra.mrb[92].mxu1 %vm5704_vm7, %v5700_v27 }
0x1273   :  { %5811 = vmatprep.mubr.f32.mxu1 %v12335_v13 }
0x1276   :  { %8486 = vmatmul.mubr.msk.f32.gmra.mrb[94].mxu1 %vm5704_vm7, %v5701_v15  ;;  %v5838_v15 = vld [vmem:[%s14604_s26 + $0x40] sm:$0xff] }
0x1277   :  { %5817 = vmatprep.mubr.f32.mxu1 %v12335_v13 }
0x127a   :  { %8487 = vmatmul.mubr.msk.f32.gmra.mrb[96].mxu1 %vm5704_vm7, %v5702_v38  ;;  %v5839_v38 = vld [vmem:[%s14604_s26 + $0x48] sm:$0xff] }
0x127b   :  { %5823 = vmatprep.mubr.f32.mxu1 %v12335_v13 }
0x127e   :  { %8488 = vmatmul.mubr.msk.f32.gmra.mrb[98].mxu1 %vm5704_vm7, %v5703_v45 }
0x127f   :  { %10057 = vmatprep.mubr.msk.f32.mxu1 %vm4059_vm5, %v6146_v41  ;;  %v11441_v41 = vpack.c.bf16 %v5839_v38, %v5838_v15  ;;  %v8554_v15 = vld [vmem:[%s14606_s24 + $0x108] sm:$0xff]  ;;  %v8519_v38 = vld [vmem:[%s14604_s26 + $0x160] sm:$0xff] }
0x1282   :  { %10058 = vmatmul.mubr.msk.f32.vlgmr.msra.gmra.mrb[100].mxu1 %vm4059_vm5, %v6147_v51  ;;  %v5841_v51 = vld [vmem:[%s14604_s26 + $0x58] sm:$0xff] }
0x1283   :  { %10060 = vmatprep.mubr.msk.f32.mxu1 %vm4059_vm5, %v6148_v12  ;;  %11493 = vmatpush3.bf16.msra.mxu1 %v11490_v61  ;;  %v6267_v12 = vld [vmem:[%s14606_s24 + $0x10] sm:$0xff] }
0x1284   :  { %11495 = vmatprep.subr.bf16.mxu1 %v11494_v9 }
0x1286   :  { %10061 = vmatmul.mubr.msk.f32.gmra.mrb[102].mxu1 %vm4059_vm5, %v6149_v16 }
0x1287   :  { %10063 = vmatprep.mubr.msk.f32.mxu1 %vm4059_vm5, %v6150_v37  ;;  %11497 = vmatpush3.bf16.msra.mxu1 %v11494_v9  ;;  %v6268_v9 = vld [vmem:[%s14606_s24 + $0x18] sm:$0xff]  ;;  %v11444_v37 = vpack.c.bf16 %v5841_v51, %v5840_v2 }
0x1288   :  { %11499 = vmatprep.subr.bf16.mxu1 %v11498_v6  ;;  %v11526_v10 = vpack.c.bf16 %v6268_v9, %v6267_v12  ;;  %v8556_v2 = vld [vmem:[%s14606_s24 + $0x118] sm:$0xff]  ;;  %v8521_v12 = vld [vmem:[%s14604_s26 + $0x170] sm:$0xff] }
0x1289   :  { %v8522_v9 = vld [vmem:[%s14604_s26 + $0x178] sm:$0xff] }
0x128a   :  { %10064 = vmatmul.mubr.msk.f32.gmra.mrb[104].mxu1 %vm4059_vm5, %v6151_v46 }
0x128b   :  { %11501 = vmatpush3.bf16.msra.mxu1 %v11498_v6  ;;  %v5843_v6 = vld [vmem:[%s14604_s26 + $0x68] sm:$0xff] }
0x128c   :  { %11503 = vmatprep.subr.bf16.mxu1 %v11502_v55  ;;  %v11447_v52 = vpack.c.bf16 %v5843_v6, %v5842_v42  ;;  %v8523_v42 = vld [vmem:[%s14604_s26 + $0x180] sm:$0xff]  ;;  %v8524_v6 = vld [vmem:[%s14604_s26 + $0x188] sm:$0xff] }
0x128f   :  { %11505 = vmatpush3.bf16.msra.mxu1 %v11502_v55  ;;  %v5844_v55 = vld [vmem:[%s14604_s26 + $0x70] sm:$0xff] }
0x1290   :  { %11507 = vmatprep.subr.bf16.mxu1 %v11506_v50  ;;  %v11450_v29 = vpack.c.bf16 %v5845_v30, %v5844_v55  ;;  %v8526_v55 = vld [vmem:[%s14604_s26 + $0x198] sm:$0xff]  ;;  %v8561_v30 = vld [vmem:[%s14606_s24 + $0x140] sm:$0xff] }
0x1293   :  { %11509 = vmatpush3.bf16.msra.mxu1 %v11506_v50  ;;  %v6271_v50 = vld [vmem:[%s14606_s24 + $0x30] sm:$0xff] }
0x1294   :  { %11511 = vmatprep.subr.bf16.mxu1 %v11510_v24 }
0x1297   :  { %11513 = vmatpush3.bf16.msra.mxu1 %v11510_v24  ;;  %v11534_v24 = vpack.c.bf16 %v6272_v18, %v6271_v50  ;;  %v8562_v50 = vld [vmem:[%s14606_s24 + $0x148] sm:$0xff] }
0x1298   :  { %11515 = vmatprep.subr.bf16.mxu1 %v11514_v36  ;;  %v11570_v18 = vpack.c.bf16 %v8562_v50, %v8561_v30  ;;  %v6678_v50 = vld [vmem:[#allocation19] sm:$0xff] }
0x129b   :  { %11517 = vmatpush3.bf16.msra.mxu1 %v11514_v36  ;;  %v6273_v36 = vld [vmem:[%s14606_s24 + $0x40] sm:$0xff] }
0x129c   :  { %11519 = vmatprep.subr.bf16.mxu1 %v11518_v3 }
0x129f   :  { %11521 = vmatpush3.bf16.msra.mxu1 %v11518_v3  ;;  %v11538_v3 = vpack.c.bf16 %v6274_v20, %v6273_v36  ;;  %v11574_v20 = vpack.c.bf16 %v8564_v33, %v8563_v14  ;;  %v6680_v14 = vld [vmem:[#allocation19 + $0x10] sm:$0xff]  ;;  %v6681_v33 = vld [vmem:[#allocation19 + $0x18] sm:$0xff] }
0x12a0   :  { %11523 = vmatprep.subr.bf16.mxu1 %v11522_v49 }
0x133d   :  { %v14310_v48 = vpop.f32.mrb[88].mxu1 }
0x133e   :  { %v5797_v62 = vpop.f32.mrb[89].mxu1 }
0x1341   :  { %v14312_v8 = vpop.f32.mrb[90].mxu1 }
0x1342   :  { %v14314_v43 = vpop.f32.mrb[91].mxu1 }
0x1345   :  { %v5807_v25 = vpop.f32.mrb[92].mxu1 }
0x1346   :  { %v5809_v26 = vpop.f32.mrb[93].mxu1 }
0x1347   :  { %8507 = vmatprep.mubr.msk.f32.mxu0 %vm2909_vm4, %v5809_v26  ;;  %v6277_v26 = vld [vmem:[%s14606_s24 + $0x60] sm:$0xff] }
0x1348   :  { %5938 = vmatmul.mubr.f32.vlgmr.msra.gmra.mrb[218].mxu0 %v5807_v25  ;;  %v8513_v25 = vld [vmem:[%s14604_s26 + $0x130] sm:$0xff] }
0x1349   :  { %11430 = vmatpush1.bf16.msra.mxu0 %v11429_v21  ;;  %v5813_v54 = vpop.f32.mrb[94].mxu1  ;;  %v8514_v21 = vld [vmem:[%s14604_s26 + $0x138] sm:$0xff] }
0x134a   :  { %11431 = vmatprep.subr.bf16.mxu0 %v12336_v11  ;;  %v5815_v7 = vpop.f32.mrb[95].mxu1  ;;  %v11459_v5 = vpack.c.bf16 %v8514_v21, %v8513_v25  ;;  %v6689_v25 = vld [vmem:[#allocation19 + $0x50] sm:$0xff] }
0x134b   :  { %8508 = vmatprep.mubr.msk.f32.mxu0 %vm2909_vm4, %v5815_v7  ;;  %v6280_v7 = vld [vmem:[%s14606_s24 + $0x78] sm:$0xff] }
0x134c   :  { %5943 = vmatmul.mubr.f32.gmra.mrb[220].mxu0 %v5813_v54  ;;  %v8515_v54 = vld [vmem:[%s14604_s26 + $0x140] sm:$0xff] }
0x134d   :  { %11433 = vmatpush1.bf16.msra.mxu0 %v11432_v56  ;;  %v14325_v34 = vpop.f32.mrb[96].mxu1  ;;  %8509 = vmatprep.mubr.msk.f32.mxu0 %vm2909_vm4, %v5797_v62  ;;  %v6276_v62 = vld [vmem:[%s14606_s24 + $0x58] sm:$0xff]  ;;  %v11546_v56 = vpack.c.bf16 %v6278_v23, %v6277_v26 }
0x134e   :  { %11434 = vmatprep.subr.bf16.mxu0 %v12336_v11  ;;  %v14329_v17 = vpop.f32.mrb[97].mxu1  ;;  %v6691_v23 = vld [vmem:[#allocation19 + $0x60] sm:$0xff] }
0x1351   :  { %11436 = vmatpush1.bf16.msra.mxu0 %v11435_v59  ;;  %v14333_v61 = vpop.f32.mrb[98].mxu1  ;;  %v11550_v59 = vpack.c.bf16 %v6280_v7, %v6279_v32  ;;  %v6133_v32 = vld [vmem:[#allocation16] sm:$0x3]  ;;  %v6544_v7 = vld [vmem:[#allocation17] sm:$0x3] }
0x1352   :  { %11437 = vmatprep.subr.bf16.mxu0 %v12336_v11  ;;  %v14336_v27 = vpop.f32.mrb[99].mxu1 }
0x1355   :  { %11439 = vmatpush1.bf16.msra.mxu0 %v11438_v40  ;;  %v14340_v45 = vpop.f32.mrb[100].mxu1  ;;  %v8553_v40 = vld [vmem:[%s14606_s24 + $0x100] sm:$0xff] }
0x1356   :  { %11440 = vmatprep.subr.bf16.mxu0 %v12336_v11  ;;  %v6236_v31 = vpop.f32.mrb[101].mxu1 }
0x1359   :  { %11442 = vmatpush1.bf16.msra.mxu0 %v11441_v41  ;;  %v10062_v16 = vpop.f32.mrb[102].mxu1  ;;  %v8520_v41 = vld [vmem:[%s14604_s26 + $0x168] sm:$0xff] }
0x135a   :  { %v6246_v46 = vpop.f32.mrb[103].mxu1  ;;  %11443 = vmatprep.subr.bf16.mxu0 %v12336_v11  ;;  %v11468_v51 = vpack.c.bf16 %v8520_v41, %v8519_v38 }
0x135b   :  { %10098 = vmatprep.mubr.f32.mxu1 %v6246_v46  ;;  %v11471_v46 = vpack.c.bf16 %v8522_v9, %v8521_v12 }
0x135c   :  { %10099 = vmatmul.mubr.f32.vlgmr.msra.gmra.mrb[106].mxu1 %v10062_v16  ;;  %v8557_v16 = vld [vmem:[%s14606_s24 + $0x120] sm:$0xff] }
0x135d   :  { %11445 = vmatpush1.bf16.msra.mxu0 %v11444_v37  ;;  %11525 = vmatpush3.bf16.msra.mxu1 %v11522_v49  ;;  %v14352_v53 = vpop.f32.mrb[104].mxu1  ;;  %v6275_v49 = vld [vmem:[%s14606_s24 + $0x50] sm:$0xff]  ;;  %v8558_v37 = vld [vmem:[%s14606_s24 + $0x128] sm:$0xff] }
0x135e   :  { %11446 = vmatprep.subr.bf16.mxu0 %v12336_v11  ;;  %11527 = vmatprep.subr.bf16.mxu1 %v11526_v10  ;;  %v14357_v58 = vpop.f32.mrb[105].mxu1  ;;  %v11542_v47 = vpack.c.bf16 %v6276_v62, %v6275_v49  ;;  %v8568_v49 = vld [vmem:[%s14606_s24 + $0x178] sm:$0xff] }
0x135f   :  { %10133 = vmatprep.mubr.f32.mxu1 %v6236_v31  ;;  %v8555_v31 = vld [vmem:[%s14606_s24 + $0x110] sm:$0xff]  ;;  %v11582_v62 = vpack.c.bf16 %v8568_v49, %v8567_v4 }
0x1361   :  { %11448 = vmatpush1.bf16.msra.mxu0 %v11447_v52  ;;  %11529 = vmatpush3.bf16.msra.mxu1 %v11526_v10  ;;  %v11562_v10 = vpack.c.bf16 %v8558_v37, %v8557_v16  ;;  %v11566_v52 = vpack.c.bf16 %v8560_v35, %v8559_v63  ;;  %v14448_v63 = vld [vmem:[%s14608_s2 + $0x10] sm:$0xff]  ;;  %v14455_v35 = vld [vmem:[%s14608_s2 + $0x18] sm:$0xff] }
0x1362   :  { %11449 = vmatprep.subr.bf16.mxu0 %v12336_v11  ;;  %11531 = vmatprep.subr.bf16.mxu1 %v11530_v19 }
0x1365   :  { %11451 = vmatpush1.bf16.msra.mxu0 %v11450_v29  ;;  %11533 = vmatpush3.bf16.msra.mxu1 %v11530_v19  ;;  %v8525_v19 = vld [vmem:[%s14604_s26 + $0x190] sm:$0xff]  ;;  %v8527_v29 = vld [vmem:[%s14604_s26 + $0x1a0] sm:$0xff] }
0x1366   :  { %11452 = vmatprep.subr.bf16.mxu0 %v12336_v11  ;;  %11535 = vmatprep.subr.bf16.mxu1 %v11534_v24 }
0x1369   :  { %11454 = vmatpush1.bf16.msra.mxu0 %v11453_v60  ;;  %11537 = vmatpush3.bf16.msra.mxu1 %v11534_v24  ;;  %v8528_v24 = vld [vmem:[%s14604_s26 + $0x1a8] sm:$0xff]  ;;  %v8565_v60 = vld [vmem:[%s14606_s24 + $0x160] sm:$0xff] }
0x136a   :  { %11455 = vmatprep.subr.bf16.mxu0 %v12336_v11  ;;  %11539 = vmatprep.subr.bf16.mxu1 %v11538_v3  ;;  %v11480_v36 = vpack.c.bf16 %v8528_v24, %v8527_v29 }
0x136c   :  { %6019 = vmatmul.mubr.f32.vlgmr.msra.gmra.mrb[218].mxu0 %v14310_v48  ;;  %v11462_v48 = vpack.c.bf16 %v8516_v57, %v8515_v54 }
0x136d   :  { %11457 = vmatpush1.bf16.msra.mxu0 %v11456_v44  ;;  %11541 = vmatpush3.bf16.msra.mxu1 %v11538_v3  ;;  %v8566_v3 = vld [vmem:[%s14606_s24 + $0x168] sm:$0xff]  ;;  %v14430_v44 = vld [vmem:[%s14608_s2] sm:$0xff] }
0x136e   :  { %11458 = vmatprep.subr.bf16.mxu0 %v12336_v11  ;;  %11543 = vmatprep.subr.bf16.mxu1 %v11542_v47  ;;  %v11578_v28 = vpack.c.bf16 %v8566_v3, %v8565_v60  ;;  %v11610_v60 = vpack.c.bf16 %v6681_v33, %v6680_v14  ;;  %v6682_v3 = vld [vmem:[#allocation19 + $0x20] sm:$0xff]  ;;  %v7061_v33 = vld [vmem:[#allocation20 + $0x10] sm:$0xff] }
0x136f   :  { %8510 = vmatprep.mubr.msk.f32.mxu0 %vm2909_vm4, %v14314_v43  ;;  %v11554_v43 = vpack.c.bf16 %v8554_v15, %v8553_v40 }
0x1370   :  { %6024 = vmatmul.mubr.f32.gmra.mrb[220].mxu0 %v14312_v8  ;;  %v11465_v8 = vpack.c.bf16 %v8518_v0, %v8517_v39  ;;  %v6137_v39 = vrot.slane %v6133_v32, %v12940_v22  ;;  %v6548_v0 = vrot.slane %v6544_v7, %v12940_v22 }
0x1371   :  { %11460 = vmatpush1.bf16.msra.mxu0 %v11459_v5  ;;  %11545 = vmatpush3.bf16.msra.mxu1 %v11542_v47  ;;  %v6687_v47 = vld [vmem:[#allocation19 + $0x40] sm:$0xff]  ;;  %v6692_v5 = vld [vmem:[#allocation19 + $0x68] sm:$0xff] }
0x1372   :  { %11461 = vmatprep.subr.bf16.mxu0 %v12336_v11  ;;  %11547 = vmatprep.subr.bf16.mxu1 %v11546_v56 }
0x1373   :  { %8529 = vmatprep.mubr.msk.f32.mxu0 %vm2909_vm4, %v14329_v17  ;;  %v11558_v17 = vpack.c.bf16 %v8556_v2, %v8555_v31  ;;  %v6143_v31 = vrot.slane %v6133_v32, %v12945_v1  ;;  %v6865_v32 = vld [vmem:[#allocation19 + $0xb8] sm:$0xff] }
0x1375   :  { %11463 = vmatpush1.bf16.msra.mxu0 %v11462_v48  ;;  %11549 = vmatpush3.bf16.msra.mxu1 %v11546_v56 }
0x1376   :  { %11464 = vmatprep.subr.bf16.mxu0 %v12336_v11  ;;  %11551 = vmatprep.subr.bf16.mxu1 %v11550_v59 }
0x1379   :  { %11466 = vmatpush1.bf16.msra.mxu0 %v11465_v8  ;;  %11553 = vmatpush3.bf16.msra.mxu1 %v11550_v59 }
0x137a   :  { %11467 = vmatprep.subr.bf16.mxu0 %v12336_v11  ;;  %11555 = vmatprep.subr.bf16.mxu1 %v11554_v43 }
0x137c   :  { %10134 = vmatmul.mubr.f32.vlgmr.msra.gmra.mrb[106].mxu1 %v14340_v45  ;;  %v11474_v45 = vpack.c.bf16 %v8524_v6, %v8523_v42  ;;  %v14445_v6 = vld [vmem:[%s14608_s2 + $0x8] sm:$0xff] }
0x137d   :  { %11469 = vmatpush1.bf16.msra.mxu0 %v11468_v51  ;;  %11557 = vmatpush3.bf16.msra.mxu1 %v11554_v43  ;;  %v6554_v43 = vrot.slane %v6544_v7, %v12945_v1 }
0x137e   :  { %11470 = vmatprep.subr.bf16.mxu0 %v12336_v11  ;;  %11559 = vmatprep.subr.bf16.mxu1 %v11558_v17 }
0x137f   :  { %10168 = vmatprep.mubr.f32.mxu1 %v14357_v58  ;;  %v11477_v58 = vpack.c.bf16 %v8526_v55, %v8525_v19  ;;  %v6693_v19 = vld [vmem:[#allocation19 + $0x70] sm:$0xff]  ;;  %v6694_v55 = vld [vmem:[#allocation19 + $0x78] sm:$0xff] }
0x1380   :  { %v11602_v30 = vpack.c.bf16 %v6694_v55, %v6693_v19  ;;  %v7074_v55 = vld [vmem:[#allocation20 + $0x70] sm:$0xff] }
0x1381   :  { %11472 = vmatpush1.bf16.msra.mxu0 %v11471_v46  ;;  %11561 = vmatpush3.bf16.msra.mxu1 %v11558_v17 }
0x1382   :  { %11473 = vmatprep.subr.bf16.mxu0 %v12336_v11  ;;  %11563 = vmatprep.subr.bf16.mxu1 %v11562_v10 }
0x1385   :  { %11475 = vmatpush1.bf16.msra.mxu0 %v11474_v45  ;;  %11565 = vmatpush3.bf16.msra.mxu1 %v11562_v10  ;;  %v14458_v45 = vld [vmem:[%s14608_s2 + $0x20] sm:$0xff] }
0x1386   :  { %11476 = vmatprep.subr.bf16.mxu0 %v12336_v11  ;;  %11567 = vmatprep.subr.bf16.mxu1 %v11566_v52 }
0x1389   :  { %11478 = vmatpush1.bf16.msra.mxu0 %v11477_v58  ;;  %11569 = vmatpush3.bf16.msra.mxu1 %v11566_v52  ;;  %v14465_v52 = vld [vmem:[%s14608_s2 + $0x28] sm:$0xff]  ;;  %v6679_v58 = vld [vmem:[#allocation19 + $0x8] sm:$0xff] }
0x138a   :  { %11479 = vmatprep.subr.bf16.mxu0 %v12336_v11  ;;  %11571 = vmatprep.subr.bf16.mxu1 %v11570_v18 }
0x138d   :  { %11481 = vmatpush1.bf16.msra.mxu0 %v11480_v36  ;;  %11573 = vmatpush3.bf16.msra.mxu1 %v11570_v18  ;;  %v11606_v18 = vpack.c.bf16 %v6679_v58, %v6678_v50  ;;  %v7059_v58 = vld [vmem:[#allocation20] sm:$0xff] }
0x138e   :  { %11575 = vmatprep.subr.bf16.mxu1 %v11574_v20 }
0x1390   :  { %6119 = vmatmul.mubr.f32.vlgmr.msra.gmra.mrb[218].mxu0 %v14325_v34  ;;  %v6688_v34 = vld [vmem:[#allocation19 + $0x48] sm:$0xff] }
0x1391   :  { %8530 = vmatprep.mubr.msk.f32.mxu0 %vm2909_vm4, %v14336_v27  ;;  %11577 = vmatpush3.bf16.msra.mxu1 %v11574_v20  ;;  %v11590_v21 = vpack.c.bf16 %v6688_v34, %v6687_v47  ;;  %v6690_v27 = vld [vmem:[#allocation19 + $0x58] sm:$0xff]  ;;  %v6684_v47 = vld [vmem:[#allocation19 + $0x30] sm:$0xff] }
0x1392   :  { %11579 = vmatprep.subr.bf16.mxu1 %v11578_v28  ;;  %v11594_v26 = vpack.c.bf16 %v6690_v27, %v6689_v25  ;;  %v6685_v34 = vld [vmem:[#allocation19 + $0x38] sm:$0xff]  ;;  %v6859_v27 = vld [vmem:[#allocation19 + $0x88] sm:$0xff] }
0x1393   :  { %11591 = vmatprep.subr.bf16.mxu0 %v11590_v21  ;;  %v11618_v25 = vpack.c.bf16 %v6685_v34, %v6684_v47  ;;  %v7065_v34 = vld [vmem:[#allocation20 + $0x30] sm:$0xff] }
0x1394   :  { %6124 = vmatmul.mubr.f32.gmra.mrb[220].mxu0 %v14333_v61  ;;  %v11598_v61 = vpack.c.bf16 %v6692_v5, %v6691_v23  ;;  %v6860_v23 = vld [vmem:[#allocation19 + $0x90] sm:$0xff]  ;;  %v6861_v5 = vld [vmem:[#allocation19 + $0x98] sm:$0xff] }
0x1395   :  { %11581 = vmatpush3.bf16.msra.mxu1 %v11578_v28  ;;  %11593 = vmatpush3.bf16.msra.mxu0 %v11590_v21  ;;  %v6683_v28 = vld [vmem:[#allocation19 + $0x28] sm:$0xff]  ;;  %v6858_v21 = vld [vmem:[#allocation19 + $0x80] sm:$0xff] }
0x1396   :  { %11583 = vmatprep.subr.bf16.mxu1 %v11582_v62  ;;  %11595 = vmatprep.subr.bf16.mxu0 %v11594_v26  ;;  %v11614_v49 = vpack.c.bf16 %v6683_v28, %v6682_v3  ;;  %v7063_v28 = vld [vmem:[#allocation20 + $0x20] sm:$0xff] }
0x1399   :  { %11585 = vmatpush3.bf16.msra.mxu1 %v11582_v62  ;;  %11597 = vmatpush3.bf16.msra.mxu0 %v11594_v26  ;;  %v11622_v26 = vpack.c.bf16 %v6859_v27, %v6858_v21  ;;  %v7239_v27 = vld [vmem:[#allocation20 + $0x80] sm:$0xff] }
0x139a   :  { %11599 = vmatprep.subr.bf16.mxu0 %v11598_v61 }
0x139c   :  { %10169 = vmatmul.mubr.f32.vlgmr.msra.gmra.mrb[106].mxu1 %v14352_v53 }
0x139d   :  { %10175 = vmatprep.mubr.msk.f32.mxu1 %vm2909_vm4, %v14430_v44  ;;  %11601 = vmatpush3.bf16.msra.mxu0 %v11598_v61  ;;  %v11626_v61 = vpack.c.bf16 %v6861_v5, %v6860_v23  ;;  %v7241_v5 = vld [vmem:[#allocation20 + $0x90] sm:$0xff] }
0x139e   :  { %11603 = vmatprep.subr.bf16.mxu0 %v11602_v30 }
0x13a1   :  { %11605 = vmatpush3.bf16.msra.mxu0 %v11602_v30  ;;  %v7075_v30 = vld [vmem:[#allocation20 + $0x78] sm:$0xff] }
0x13a2   :  { %11607 = vmatprep.subr.bf16.mxu0 %v11606_v18  ;;  %v11654_v50 = vpack.c.bf16 %v7075_v30, %v7074_v55  ;;  %v7455_v30 = vld [vmem:[#allocation22 + $0x70] sm:$0xff] }
0x1463   :  { %v6120_v53 = vpop.f32.mrb[218].mxu0 }
0x1464   :  { %v6122_v56 = vpop.f32.mrb[219].mxu0  ;;  %v6131_v59 = vmax.f32 %v6120_v53, 0.0  ;;  %v6862_v53 = vld [vmem:[#allocation19 + $0xa0] sm:$0xff] }
0x1465   :  { %v6863_v56 = vld [vmem:[#allocation19 + $0xa8] sm:$0xff] }
0x1466   :  { %v6138_v41 = vmul.f32 %v6137_v39, %v6131_v59 }
0x1467   :  { %v6125_v54 = vpop.f32.mrb[220].mxu0 }
0x1468   :  { %v6127_v57 = vpop.f32.mrb[221].mxu0  ;;  %v6132_v48 = vmax.f32 %v6125_v54, 0.0  ;;  %v6144_v16 = vadd.f32 %v6143_v31, %v6138_v41  ;;  %v11630_v54 = vpack.c.bf16 %v6863_v56, %v6862_v53  ;;  %v7243_v56 = vld [vmem:[#allocation20 + $0xa0] sm:$0xff] }
0x1469   :  { %v6864_v57 = vld [vmem:[#allocation19 + $0xb0] sm:$0xff] }
0x146a   :  { %v6139_v15 = vmul.f32 %v6137_v39, %v6132_v48  ;;  %v11634_v7 = vpack.c.bf16 %v6865_v32, %v6864_v57  ;;  %v6951_v48 = vld [vmem:[%s14609_s8] sm:$0x3]  ;;  %v7245_v32 = vld [vmem:[#allocation20 + $0xb0] sm:$0xff] }
0x146b   :  { %v6955_v59 = vrot.slane %v6951_v48, %v12940_v22 }
0x146c   :  { %v6145_v12 = vadd.f32 %v6143_v31, %v6139_v15  ;;  %v7068_v31 = vld [vmem:[#allocation20 + $0x40] sm:$0xff] }
0x146f   :  { %v10170_v40 = vpop.f32.mrb[106].mxu1 }
0x1470   :  { %v6543_v8 = vmax.f32 %v10170_v40, 0.0  ;;  %v6531_v38 = vpop.f32.mrb[107].mxu1  ;;  %v6961_v40 = vrot.slane %v6951_v48, %v12945_v1 }
0x1471   :  { %v6542_v2 = vmax.f32 %v6531_v38, 0.0 }
0x1472   :  { %v6550_v51 = vmul.f32 %v6548_v0, %v6543_v8 }
0x1473   :  { %v6549_v17 = vmul.f32 %v6548_v0, %v6542_v2  ;;  %v7069_v2 = vld [vmem:[#allocation20 + $0x48] sm:$0xff] }
0x1474   :  { %v6556_v9 = vadd.f32 %v6554_v43, %v6550_v51 }
0x1475   :  { %v6555_v37 = vadd.f32 %v6554_v43, %v6549_v17 }
0x1476   :  { %v14438_v46 = vadd.f32 %v6556_v9, %v6145_v12  ;;  %v11642_v12 = vpack.c.bf16 %v7069_v2, %v7068_v31  ;;  %v7070_v9 = vld [vmem:[#allocation20 + $0x50] sm:$0xff]  ;;  %v7449_v2 = vld [vmem:[#allocation22 + $0x40] sm:$0xff] }
0x1477   :  { %v14440_v10 = vadd.f32 %v6555_v37, %v6144_v16  ;;  %v7071_v16 = vld [vmem:[#allocation20 + $0x58] sm:$0xff]  ;;  %v7072_v37 = vld [vmem:[#allocation20 + $0x60] sm:$0xff] }
0x1479   :  { %v11586_v42 = vpack.c.bf16 %v14438_v46, %v14440_v10 }
0x147b   :  { %11587 = vmatprep.subr.bf16.mxu1 %v11586_v42 }
0x147c   :  { %11589 = vmatpush3.bf16.msra.mxu1 %v11586_v42  ;;  %v7073_v42 = vld [vmem:[#allocation20 + $0x68] sm:$0xff] }
0x147d   :  { %v11650_v19 = vpack.c.bf16 %v7073_v42, %v7072_v37  ;;  %v7453_v42 = vld [vmem:[#allocation22 + $0x60] sm:$0xff] }
0x147f   :  { %10176 = vmatmul.mubr.msk.f32.vlgmr.msra.gmra.mrb[108].mxu1 %vm2909_vm4, %v14445_v6 }
0x1480   :  { %10178 = vmatprep.mubr.msk.f32.mxu1 %vm2909_vm4, %v14448_v63 }
0x1483   :  { %10179 = vmatmul.mubr.msk.f32.gmra.mrb[110].mxu1 %vm2909_vm4, %v14455_v35 }
0x1484   :  { %10181 = vmatprep.mubr.msk.f32.mxu1 %vm2909_vm4, %v14458_v45 }
0x1487   :  { %10182 = vmatmul.mubr.msk.f32.gmra.mrb[112].mxu1 %vm2909_vm4, %v14465_v52 }
0x1488   :  { %10245 = vmatprep.mubr.msk.f32.mxu1 %vm2909_vm4, %v14430_v44 }
0x1552   :  { %v10177_v29 = vpop.f32.mrb[108].mxu1 }
0x1553   :  { %v6649_v24 = vpop.f32.mrb[109].mxu1 }
0x1556   :  { %v10180_v36 = vpop.f32.mrb[110].mxu1 }
0x1557   :  { %v6659_v20 = vpop.f32.mrb[111].mxu1 }
0x1558   :  { %10200 = vmatprep.mubr.msk.f32.mxu0 %vm349_vm0, %v6659_v20 }
0x1559   :  { %10201 = vmatmul.mubr.msk.f32.vlgmr.msra.gmra.mrb[222].mxu0 %vm349_vm0, %v10180_v36  ;;  %v7062_v36 = vld [vmem:[#allocation20 + $0x18] sm:$0xff] }
0x155a   :  { %11609 = vmatpush3.bf16.msra.mxu0 %v11606_v18  ;;  %10219 = vmatprep.mubr.msk.f32.mxu0 %vm349_vm0, %v6649_v24  ;;  %v10183_v4 = vpop.f32.mrb[112].mxu1  ;;  %v7060_v18 = vld [vmem:[#allocation20 + $0x8] sm:$0xff]  ;;  %v11662_v3 = vpack.c.bf16 %v7062_v36, %v7061_v33 }
0x155b   :  { %11611 = vmatprep.subr.bf16.mxu0 %v11610_v60  ;;  %v6669_v62 = vpop.f32.mrb[113].mxu1 }
0x155e   :  { %11613 = vmatpush3.bf16.msra.mxu0 %v11610_v60 }
0x155f   :  { %11615 = vmatprep.subr.bf16.mxu0 %v11614_v49 }
0x1562   :  { %11617 = vmatpush3.bf16.msra.mxu0 %v11614_v49 }
0x1563   :  { %11619 = vmatprep.subr.bf16.mxu0 %v11618_v25 }
0x1566   :  { %11621 = vmatpush3.bf16.msra.mxu0 %v11618_v25  ;;  %v7066_v25 = vld [vmem:[#allocation20 + $0x38] sm:$0xff] }
0x1567   :  { %11623 = vmatprep.subr.bf16.mxu0 %v11622_v26  ;;  %v11670_v21 = vpack.c.bf16 %v7066_v25, %v7065_v34  ;;  %v7621_v34 = vld [vmem:[#allocation22 + $0x88] sm:$0xff] }
0x1569   :  { %10220 = vmatmul.mubr.msk.f32.vlgmr.msra.gmra.mrb[222].mxu0 %vm349_vm0, %v10177_v29  ;;  %v11658_v29 = vpack.c.bf16 %v7060_v18, %v7059_v58  ;;  %v7441_v58 = vld [vmem:[#allocation22 + $0x8] sm:$0xff] }
0x156a   :  { %11625 = vmatpush3.bf16.msra.mxu0 %v11622_v26  ;;  %10238 = vmatprep.mubr.msk.f32.mxu0 %vm349_vm0, %v6669_v62  ;;  %v7240_v26 = vld [vmem:[#allocation20 + $0x88] sm:$0xff] }
0x156b   :  { %11627 = vmatprep.subr.bf16.mxu0 %v11626_v61  ;;  %v11674_v23 = vpack.c.bf16 %v7240_v26, %v7239_v27  ;;  %v7623_v27 = vld [vmem:[#allocation22 + $0x98] sm:$0xff] }
0x156e   :  { %11629 = vmatpush3.bf16.msra.mxu0 %v11626_v61  ;;  %v7242_v61 = vld [vmem:[#allocation20 + $0x98] sm:$0xff] }
0x156f   :  { %11631 = vmatprep.subr.bf16.mxu0 %v11630_v54  ;;  %v11678_v53 = vpack.c.bf16 %v7242_v61, %v7241_v5  ;;  %v7625_v5 = vld [vmem:[#allocation22 + $0xa8] sm:$0xff] }
0x1572   :  { %11633 = vmatpush3.bf16.msra.mxu0 %v11630_v54  ;;  %v7244_v54 = vld [vmem:[#allocation20 + $0xa8] sm:$0xff] }
0x1573   :  { %11635 = vmatprep.subr.bf16.mxu0 %v11634_v7  ;;  %v11682_v57 = vpack.c.bf16 %v7244_v54, %v7243_v56  ;;  %v7627_v56 = vld [vmem:[#allocation22 + $0xb8] sm:$0xff] }
0x1576   :  { %11637 = vmatpush3.bf16.msra.mxu0 %v11634_v7  ;;  %v7246_v7 = vld [vmem:[#allocation20 + $0xb8] sm:$0xff] }
0x1577   :  { %v11686_v48 = vpack.c.bf16 %v7246_v7, %v7245_v32 }
0x1579   :  { %10239 = vmatmul.mubr.msk.f32.vlgmr.msra.gmra.mrb[222].mxu0 %vm349_vm0, %v10183_v4  ;;  %v7064_v4 = vld [vmem:[#allocation20 + $0x28] sm:$0xff] }
0x157a   :  { %10315 = vmatprep.mubr.msk.f32.mxu0 %vm2909_vm4, %v14430_v44  ;;  %v11646_v44 = vpack.c.bf16 %v7071_v16, %v7070_v9  ;;  %v11666_v62 = vpack.c.bf16 %v7064_v4, %v7063_v28  ;;  %v7451_v16 = vld [vmem:[#allocation22 + $0x50] sm:$0xff] }
0x157b   :  { %v7446_v4 = vld [vmem:[#allocation22 + $0x30] sm:$0xff] }
0x164c   :  { %v10240_v39 = vpop.f32.mrb[222].mxu0 }
0x164d   :  { %v6950_v0 = vmax.f32 %v10240_v39, 0.0  ;;  %v6938_v15 = vpop.f32.mrb[223].mxu0 }
0x164e   :  { %v6949_v8 = vmax.f32 %v6938_v15, 0.0 }
0x164f   :  { %v6957_v43 = vmul.f32 %v6955_v59, %v6950_v0 }
0x1650   :  { %v6956_v38 = vmul.f32 %v6955_v59, %v6949_v8  ;;  %v7332_v59 = vld [vmem:[%s14610_s7] sm:$0x3] }
0x1651   :  { %v6963_v41 = vadd.f32 %v6961_v40, %v6957_v43  ;;  %v7336_v39 = vrot.slane %v7332_v59, %v12940_v22  ;;  %v7342_v15 = vrot.slane %v7332_v59, %v12945_v1 }
0x1652   :  { %v6962_v51 = vadd.f32 %v6961_v40, %v6956_v38 }
0x1654   :  { %v11638_v17 = vpack.c.bf16 %v6963_v41, %v6962_v51  ;;  %v7450_v51 = vld [vmem:[#allocation22 + $0x48] sm:$0xff] }
0x1655   :  { %v11694_v9 = vpack.c.bf16 %v7450_v51, %v7449_v2 }
0x1656   :  { %11639 = vmatprep.subr.bf16.mxu1 %v11638_v17 }
0x1657   :  { %11641 = vmatpush3.bf16.msra.mxu1 %v11638_v17 }
0x1658   :  { %11643 = vmatprep.subr.bf16.mxu1 %v11642_v12 }
0x165a   :  { %10246 = vmatmul.mubr.msk.f32.vlgmr.msra.gmra.mrb[114].mxu1 %vm2909_vm4, %v14445_v6 }
0x165b   :  { %10248 = vmatprep.mubr.msk.f32.mxu1 %vm2909_vm4, %v14448_v63  ;;  %11645 = vmatpush3.bf16.msra.mxu1 %v11642_v12 }
0x165c   :  { %11647 = vmatprep.subr.bf16.mxu1 %v11646_v44 }
0x165e   :  { %10249 = vmatmul.mubr.msk.f32.gmra.mrb[116].mxu1 %vm2909_vm4, %v14455_v35 }
0x165f   :  { %10251 = vmatprep.mubr.msk.f32.mxu1 %vm2909_vm4, %v14458_v45  ;;  %11649 = vmatpush3.bf16.msra.mxu1 %v11646_v44  ;;  %v7452_v44 = vld [vmem:[#allocation22 + $0x58] sm:$0xff] }
0x1660   :  { %11651 = vmatprep.subr.bf16.mxu1 %v11650_v19  ;;  %v11698_v37 = vpack.c.bf16 %v7452_v44, %v7451_v16  ;;  %v7808_v44 = vld [vmem:[%s12532_s29 + $0x30] sm:$0xff] }
0x1662   :  { %10252 = vmatmul.mubr.msk.f32.gmra.mrb[118].mxu1 %vm2909_vm4, %v14465_v52 }
0x1663   :  { %11653 = vmatpush3.bf16.msra.mxu1 %v11650_v19  ;;  %v7454_v19 = vld [vmem:[#allocation22 + $0x68] sm:$0xff] }
0x1664   :  { %11655 = vmatprep.subr.bf16.mxu1 %v11654_v50  ;;  %v11702_v55 = vpack.c.bf16 %v7454_v19, %v7453_v42 }
0x1667   :  { %11657 = vmatpush3.bf16.msra.mxu1 %v11654_v50 }
0x1668   :  { %11659 = vmatprep.subr.bf16.mxu1 %v11658_v29 }
0x172d   :  { %v10247_v24 = vpop.f32.mrb[114].mxu1 }
0x172e   :  { %v7030_v14 = vpop.f32.mrb[115].mxu1 }
0x1731   :  { %v10250_v20 = vpop.f32.mrb[116].mxu1 }
0x1732   :  { %v7040_v60 = vpop.f32.mrb[117].mxu1 }
0x1733   :  { %10270 = vmatprep.mubr.msk.f32.mxu1 %vm349_vm0, %v7040_v60 }
0x1734   :  { %10271 = vmatmul.mubr.msk.f32.vlgmr.msra.gmra.mrb[120].mxu1 %vm349_vm0, %v10250_v20  ;;  %v7445_v20 = vld [vmem:[#allocation22 + $0x28] sm:$0xff] }
0x1735   :  { %11661 = vmatpush3.bf16.msra.mxu1 %v11658_v29  ;;  %10289 = vmatprep.mubr.msk.f32.mxu1 %vm349_vm0, %v7030_v14  ;;  %v10253_v49 = vpop.f32.mrb[118].mxu1  ;;  %v7443_v14 = vld [vmem:[#allocation22 + $0x18] sm:$0xff] }
0x1736   :  { %11663 = vmatprep.subr.bf16.mxu1 %v11662_v3  ;;  %v7050_v47 = vpop.f32.mrb[119].mxu1 }
0x1739   :  { %11665 = vmatpush3.bf16.msra.mxu1 %v11662_v3 }
0x173a   :  { %11667 = vmatprep.subr.bf16.mxu1 %v11666_v62 }
0x173d   :  { %11669 = vmatpush3.bf16.msra.mxu1 %v11666_v62 }
0x173e   :  { %11671 = vmatprep.subr.bf16.mxu1 %v11670_v21 }
0x1741   :  { %11673 = vmatpush3.bf16.msra.mxu1 %v11670_v21  ;;  %v7622_v21 = vld [vmem:[#allocation22 + $0x90] sm:$0xff] }
0x1742   :  { %11675 = vmatprep.subr.bf16.mxu1 %v11674_v23  ;;  %v11730_v26 = vpack.c.bf16 %v7623_v27, %v7622_v21 }
0x1744   :  { %10290 = vmatmul.mubr.msk.f32.vlgmr.msra.gmra.mrb[120].mxu1 %vm349_vm0, %v10247_v24  ;;  %v7442_v24 = vld [vmem:[#allocation22 + $0x10] sm:$0xff] }
0x1745   :  { %11677 = vmatpush3.bf16.msra.mxu1 %v11674_v23  ;;  %10308 = vmatprep.mubr.msk.f32.mxu1 %vm349_vm0, %v7050_v47  ;;  %v11714_v36 = vpack.c.bf16 %v7443_v14, %v7442_v24  ;;  %v7620_v47 = vld [vmem:[#allocation22 + $0x80] sm:$0xff] }
0x1746   :  { %11679 = vmatprep.subr.bf16.mxu1 %v11678_v53  ;;  %v11726_v25 = vpack.c.bf16 %v7621_v34, %v7620_v47  ;;  %v7624_v23 = vld [vmem:[#allocation22 + $0xa0] sm:$0xff] }
0x1747   :  { %v11734_v61 = vpack.c.bf16 %v7625_v5, %v7624_v23 }
0x1749   :  { %11681 = vmatpush3.bf16.msra.mxu1 %v11678_v53  ;;  %v7626_v53 = vld [vmem:[#allocation22 + $0xb0] sm:$0xff] }
0x174a   :  { %11683 = vmatprep.subr.bf16.mxu1 %v11682_v57  ;;  %v11738_v54 = vpack.c.bf16 %v7627_v56, %v7626_v53 }
0x174d   :  { %11685 = vmatpush3.bf16.msra.mxu1 %v11682_v57  ;;  %v7713_v57 = vld [vmem:[%s12522_s20] sm:$0x3] }
0x174e   :  { %11687 = vmatprep.subr.bf16.mxu1 %v11686_v48  ;;  %v7717_v32 = vrot.slane %v7713_v57, %v12940_v22  ;;  %v7723_v59 = vrot.slane %v7713_v57, %v12945_v1  ;;  %v7802_v22 = vld [vmem:[%s12532_s29] sm:$0xff] }
0x174f   :  { %v7728_v1 = vld [vmem:[%s12527_s13] sm:$0x3]  ;;  %s12338_s13 = smov [#allocation23]  }
0x1751   :  { %11689 = vmatpush3.bf16.msra.mxu1 %v11686_v48 }
0x1752   :  { %11742 = vmatprep.subr.bf16.mxu1 %v12336_v11 }
0x1754   :  { %10309 = vmatmul.mubr.msk.f32.vlgmr.msra.gmra.mrb[120].mxu1 %vm349_vm0, %v10253_v49  ;;  %v7447_v49 = vld [vmem:[#allocation22 + $0x38] sm:$0xff] }
0x1755   :  { %10385 = vmatprep.mubr.msk.f32.mxu1 %vm12337_vm6, %v12335_v13  ;;  %v11722_v62 = vpack.c.bf16 %v7447_v49, %v7446_v4 }
0x1827   :  { %v10310_v0 = vpop.f32.mrb[120].mxu1 }
0x1828   :  { %v7331_v40 = vmax.f32 %v10310_v0, 0.0  ;;  %v7319_v8 = vpop.f32.mrb[121].mxu1 }
0x1829   :  { %v7330_v43 = vmax.f32 %v7319_v8, 0.0 }
0x182a   :  { %v7338_v38 = vmul.f32 %v7336_v39, %v7331_v40 }
0x182b   :  { %v7337_v41 = vmul.f32 %v7336_v39, %v7330_v43 }
0x182c   :  { %v7344_v31 = vadd.f32 %v7342_v15, %v7338_v38 }
0x182d   :  { %v7343_v17 = vadd.f32 %v7342_v15, %v7337_v41 }
0x182f   :  { %v11690_v12 = vpack.c.bf16 %v7344_v31, %v7343_v17  ;;  %v7803_v31 = vld [vmem:[%s12532_s29 + $0x8] sm:$0xff]  ;;  %v7804_v17 = vld [vmem:[%s12532_s29 + $0x10] sm:$0xff] }
0x1830   :  { %v11746_v51 = vpack.c.bf16 %v7803_v31, %v7802_v22 }
0x1831   :  { %11691 = vmatprep.subr.bf16.mxu0 %v11690_v12 }
0x1832   :  { %11693 = vmatpush3.bf16.msra.mxu0 %v11690_v12  ;;  %v7805_v12 = vld [vmem:[%s12532_s29 + $0x18] sm:$0xff] }
0x1833   :  { %11695 = vmatprep.subr.bf16.mxu0 %v11694_v9 }
0x1835   :  { %10316 = vmatmul.mubr.msk.f32.vlgmr.msra.gmra.mrb[224].mxu0 %vm2909_vm4, %v14445_v6  ;;  %v7456_v6 = vld [vmem:[#allocation22 + $0x78] sm:$0xff] }
0x1836   :  { %10318 = vmatprep.mubr.msk.f32.mxu0 %vm2909_vm4, %v14448_v63  ;;  %11697 = vmatpush3.bf16.msra.mxu0 %v11694_v9  ;;  %v11706_v50 = vpack.c.bf16 %v7456_v6, %v7455_v30  ;;  %v7440_v63 = vld [vmem:[#allocation22] sm:$0xff]  ;;  %v7807_v9 = vld [vmem:[%s12532_s29 + $0x28] sm:$0xff] }
0x1837   :  { %11699 = vmatprep.subr.bf16.mxu0 %v11698_v37  ;;  %v11710_v18 = vpack.c.bf16 %v7441_v58, %v7440_v63 }
0x1839   :  { %10319 = vmatmul.mubr.msk.f32.gmra.mrb[226].mxu0 %vm2909_vm4, %v14455_v35 }
0x183a   :  { %10321 = vmatprep.mubr.msk.f32.mxu0 %vm2909_vm4, %v14458_v45  ;;  %11701 = vmatpush3.bf16.msra.mxu0 %v11698_v37  ;;  %v7809_v37 = vld [vmem:[%s12532_s29 + $0x38] sm:$0xff] }
0x183b   :  { %11703 = vmatprep.subr.bf16.mxu0 %v11702_v55  ;;  %v11755_v42 = vpack.c.bf16 %v7809_v37, %v7808_v44 }
0x183d   :  { %10322 = vmatmul.mubr.msk.f32.gmra.mrb[228].mxu0 %vm2909_vm4, %v14465_v52  ;;  %v7444_v52 = vld [vmem:[#allocation22 + $0x20] sm:$0xff] }
0x183e   :  { %11705 = vmatpush3.bf16.msra.mxu0 %v11702_v55  ;;  %v11718_v3 = vpack.c.bf16 %v7445_v20, %v7444_v52 }
0x183f   :  { %11707 = vmatprep.subr.bf16.mxu0 %v11706_v50 }
0x1842   :  { %11709 = vmatpush3.bf16.msra.mxu0 %v11706_v50 }
0x1843   :  { %11711 = vmatprep.subr.bf16.mxu0 %v11710_v18 }
0x1908   :  { %v10317_v29 = vpop.f32.mrb[224].mxu0 }
0x1909   :  { %v7411_v35 = vpop.f32.mrb[225].mxu0 }
0x190c   :  { %v10320_v45 = vpop.f32.mrb[226].mxu0 }
0x190d   :  { %v7421_v33 = vpop.f32.mrb[227].mxu0 }
0x190e   :  { %10340 = vmatprep.mubr.msk.f32.mxu0 %vm349_vm0, %v7421_v33 }
0x190f   :  { %10341 = vmatmul.mubr.msk.f32.vlgmr.msra.gmra.mrb[230].mxu0 %vm349_vm0, %v10320_v45 }
0x1910   :  { %11713 = vmatpush3.bf16.msra.mxu0 %v11710_v18  ;;  %10359 = vmatprep.mubr.msk.f32.mxu0 %vm349_vm0, %v7411_v35  ;;  %v10323_v60 = vpop.f32.mrb[228].mxu0 }
0x1911   :  { %11715 = vmatprep.subr.bf16.mxu0 %v11714_v36  ;;  %v7431_v28 = vpop.f32.mrb[229].mxu0 }
0x1914   :  { %11717 = vmatpush3.bf16.msra.mxu0 %v11714_v36 }
0x1915   :  { %11719 = vmatprep.subr.bf16.mxu0 %v11718_v3 }
0x1918   :  { %11721 = vmatpush3.bf16.msra.mxu0 %v11718_v3 }
0x1919   :  { %11723 = vmatprep.subr.bf16.mxu0 %v11722_v62 }
0x191c   :  { %11725 = vmatpush3.bf16.msra.mxu0 %v11722_v62 }
0x191d   :  { %11727 = vmatprep.subr.bf16.mxu0 %v11726_v25 }
0x191f   :  { %10360 = vmatmul.mubr.msk.f32.vlgmr.msra.gmra.mrb[230].mxu0 %vm349_vm0, %v10317_v29 }
0x1920   :  { %11729 = vmatpush3.bf16.msra.mxu0 %v11726_v25  ;;  %10378 = vmatprep.mubr.msk.f32.mxu0 %vm349_vm0, %v7431_v28 }
0x1921   :  { %11731 = vmatprep.subr.bf16.mxu0 %v11730_v26 }
0x1924   :  { %11733 = vmatpush3.bf16.msra.mxu0 %v11730_v26 }
0x1925   :  { %11735 = vmatprep.subr.bf16.mxu0 %v11734_v61 }
0x1928   :  { %11737 = vmatpush3.bf16.msra.mxu0 %v11734_v61 }
0x1929   :  { %11739 = vmatprep.subr.bf16.mxu0 %v11738_v54 }
0x192c   :  { %11741 = vmatpush3.bf16.msra.mxu0 %v11738_v54 }
0x192f   :  { %10379 = vmatmul.mubr.msk.f32.vlgmr.msra.gmra.mrb[230].mxu0 %vm349_vm0, %v10323_v60 }
0x1a02   :  { %v10380_v7 = vpop.f32.mrb[230].mxu0 }
0x1a03   :  { %v7712_v48 = vmax.f32 %v10380_v7, 0.0  ;;  %v7700_v39 = vpop.f32.mrb[231].mxu0 }
0x1a04   :  { %v7711_v0 = vmax.f32 %v7700_v39, 0.0 }
0x1a05   :  { %v7719_v40 = vmul.f32 %v7717_v32, %v7712_v48 }
0x1a06   :  { %v7718_v15 = vmul.f32 %v7717_v32, %v7711_v0 }
0x1a07   :  { %v7725_v8 = vadd.f32 %v7723_v59, %v7719_v40 }
0x1a08   :  { %v7724_v43 = vadd.f32 %v7723_v59, %v7718_v15 }
0x1a09   :  { %v7727_v38 = vadd.f32 %v7725_v8, %v14438_v46  ;;  %v11749_v46 = vpack.c.bf16 %v7805_v12, %v7804_v17 }
0x1a0a   :  { %v7726_v41 = vadd.f32 %v7724_v43, %v14440_v10  ;;  %v7806_v10 = vld [vmem:[%s12532_s29 + $0x20] sm:$0xff]  ;;  %s7903_s29 = sshll.u32 %s12338_s13, 4  ;;  %s7904_s29 = int_to_ptr.vmem [resolvable:$true] %s7903_s29 }
0x1a0b   :  { %v11752_v16 = vpack.c.bf16 %v7807_v9, %v7806_v10  ;;  %s12244_s20 = scalar_lea.vmem %s7904_s29, 32  ;;  %p12249_p7 = scmp.lt.s32.totalorder %s7904_s29, %s7904_s29 }
0x1a0c   :  { %v11743_v2 = vpack.c.bf16 %v7727_v38, %v7726_v41  ;;  %p12245_p6 = scmp.ne.s32.totalorder %s7904_s29, %s12244_s20  ;;  %p12250_p8 = scmp.lt.s32.totalorder %s12244_s20, %s12244_s20 }
0x1a0e   :  { %11744 = vmatpush3.bf16.msra.mxu1 %v11743_v2  ;;  %p12251_p9 = por %p12250_p8, %p12249_p7 }
0x1a0f   :  { %11745 = vmatprep.subr.bf16.mxu1 %v12336_v11 }
0x1a10   :  { %p12252_p10 = pnand %p12251_p9, %p12245_p6 }
0x1a11   :  { %10386 = vmatmul.mubr.msk.f32.vlgmr.msra.gmra.mrb[122].mxu1 %vm2909_vm4, %v7728_v1 }
0x1a12   :  { %11747 = vmatpush3.bf16.msra.mxu1 %v11746_v51  ;;  %10404 = vmatprep.mubr.msk.f32.mxu1 %vm12337_vm6, %v12335_v13 }
0x1a13   :  { %11748 = vmatprep.subr.bf16.mxu1 %v12336_v11 }
0x1a16   :  { %11750 = vmatpush3.bf16.msra.mxu1 %v11749_v46 }
0x1a17   :  { %11751 = vmatprep.subr.bf16.mxu1 %v12336_v11 }
0x1a1a   :  { %11753 = vmatpush3.bf16.msra.mxu1 %v11752_v16 }
0x1a1b   :  { %11754 = vmatprep.subr.bf16.mxu1 %v12336_v11 }
0x1a1e   :  { %11756 = vmatpush3.bf16.msra.mxu1 %v11755_v42 }
0x1ae4   :  { %v7798_v19 = vpop.f32.mrb[122].mxu1 }
0x1ae5   :  { %10405 = vmatmul.mubr.msk.f32.vlgmr.msra.gmra.mrb[124].mxu1 %vm349_vm0, %v7798_v19  ;;  %v10387_v55 = vpop.f32.mrb[123].mxu1 }
0x1bb8   :  { %v7879_v13 = vpop.f32.mrb[124].mxu1 }
0x1bb9   :  { %v7884_v30 = vsel %vm7883_vm8, %v7879_v13, -inf  ;;  %v10406_v6 = vpop.f32.mrb[125].mxu1 }
0x1bba   :  { %7885 = vmax.xlane.f32.xlu0 %v7884_v30 }
0x1c47   :  { %v7886_v50 = vpop.xlane.xlu0 %7885 }
0x1c48   :  { %v7887_v63 = vsub.f32 %v7879_v13, %v7886_v50 }
0x1c4a   :  { %v7888_v58 = vmul.f32 1.442695, %v7887_v63 }
0x1c4c   :  { %11954 = vpow2.f32 %v7888_v58 }
0x1c56   :  { %v11955_v18 = vpop.eup %11954 }
0x1c57   :  { %v7890_v29 = vsel %vm7883_vm8, %v11955_v18, 0.0 }
0x1c58   :  { %7891 = vadd.xlane.f32.xlu0 %v7890_v29 }
0x1ce5   :  { %v7892_v11 = vpop.xlane.xlu0 %7891 }
0x1ce6   :  { %11956 = vlog2.f32 %v7892_v11 }
0x1cf0   :  { %v11957_v35 = vpop.eup %11956 }
0x1cf1   :  { %v7894_v24 = vmul.f32 0.6931472, %v11957_v35 }
0x1cf3   :  { %v7895_v14 = vsub.f32 %v7887_v63, %v7894_v24 }
0x1cf5   :  { %7896 = vst.msk [vmem:[#allocation23] sm:$0x3] %vm7883_vm8, %v7895_v14 }
0x1cf6   :  { %12255 = shalt.err (!%p12252_p10)
}
0x1cf7   :  { %s12256_s12 = scalar_lea.hbm %s12537_s9, 32 }
0x1cf8   :  { %p12257_p11 = scmp.ne.s32.totalorder %s12537_s9, %s12256_s12  ;;  %p12260_p12 = scmp.lt.u32.totalorder %s12256_s12, %s12537_s9 }
0x1cfa   :  { %p12262_p13 = pnand %p12260_p12, %p12257_p11 }
0x1cfc   :  { %12265 = shalt.err (!%p12262_p13)
}
0x1cfd   :  { %7906 = dma.vmem_to_hbm [thread:$0]  %s7904_s29, 32, %s12537_s9, [#allocation4]  }
0x1cfe   :  { %12280 = dma.done.wait [#allocation4], 32  }
0x1cff   :  { %12281 = vsyncadd [#allocation4], 4294967264 }
0x1d00   :  { %7910 = vsyncpa [#allocation3], 1 }
0x1d01   :  { %7911 = vsyncpa [#allocation6], 1 }
0x1d02   :  { %7912 = vsyncpa [#allocation9], 1 }
0x1d03   :  { %7913 = vsyncpa [#allocation12], 1 }
0x1d04   :  { %7914 = vsyncpa [#allocation15], 1 }
0x1d05   :  { %7915 = vsyncpa [#allocation18], 1 }
0x1d06   :  { %7916 = vsyncpa [#allocation21], 1 }
0x1d07   :  { %7917 = vsyncpa [#allocation4], 1 }

</bundles_post_ra>
